<compile_context>
chip_gen: v5e
topology: v5e:2x2
jax: 0.10.0
libtpu: 0.0.40
codegen_flags: <defaults>
</compile_context>

<pallas_src>
import math

import jax
import jax.numpy as jnp
from jax.experimental import pallas as pl
from jax.experimental.pallas import tpu as pltpu

BN_EPS = 1e-5
BN_SCALE = 1.0 / math.sqrt(1.0 + BN_EPS)   # gamma / sqrt(var + eps) with init values

_VMEM = pl.BlockSpec(memory_space=pltpu.MemorySpace.VMEM)


# ----------------------------- Pallas kernels ------------------------------

def _conv_relu_kernel(p_ref, w_ref, o_ref):
    """out = relu(P @ W)   (BN folded into W; f32 accumulate, bf16 store)."""
    acc = jnp.dot(p_ref[...], w_ref[...], preferred_element_type=jnp.float32)
    o_ref[...] = jnp.maximum(acc, 0.0).astype(o_ref.dtype)


def _conv_relu_res_kernel(p_ref, w_ref, r_ref, o_ref):
    """out = relu(relu(P @ W) + residual)   -- BasicBlock tail (no pool)."""
    acc = jnp.dot(p_ref[...], w_ref[...], preferred_element_type=jnp.float32)
    z = jnp.maximum(acc, 0.0) + r_ref[...].astype(jnp.float32)
    o_ref[...] = jnp.maximum(z, 0.0).astype(o_ref.dtype)


def _conv_relu_pool_kernel(p_ref, w_ref, o_ref):
    """out = maxpool2x2(relu(conv)); P holds the 4 pool taps as leading blocks."""
    m = jnp.dot(p_ref[0], w_ref[...], preferred_element_type=jnp.float32)
    for t in range(1, 4):
        m = jnp.maximum(
            m, jnp.dot(p_ref[t], w_ref[...], preferred_element_type=jnp.float32))
    o_ref[...] = jnp.maximum(m, 0.0).astype(o_ref.dtype)


def _conv_relu_res_pool_kernel(p_ref, w_ref, r_ref, o_ref):
    """out = maxpool2x2(relu(relu(conv) + residual)) -- BasicBlock tail + pool."""
    def tap(t):
        acc = jnp.dot(p_ref[t], w_ref[...], preferred_element_type=jnp.float32)
        return jnp.maximum(acc, 0.0) + r_ref[t].astype(jnp.float32)

    m = tap(0)
    for t in range(1, 4):
        m = jnp.maximum(m, tap(t))
    o_ref[...] = jnp.maximum(m, 0.0).astype(o_ref.dtype)


def _head_kernel(x_ref, w_ref, b_ref, o_ref):
    """AvgPool over the full (2x3) spatial window + both Linear heads."""
    inv = 1.0 / x_ref.shape[1]
    pooled = jnp.sum(x_ref[...].astype(jnp.float32), axis=1) * inv       # (N, 512)
    o_ref[...] = (jnp.dot(pooled, w_ref[...],
                          preferred_element_type=jnp.float32) + b_ref[...])


# ------------------------------ JAX glue / wrappers -------------------------

def _im2col(x, kh, kw, stride, pad):
    """x: [N,H,W,C] -> patches [N*OH*OW, kh*kw*C] (tap-major, channel-minor)."""
    n, h, w, c = x.shape
    xp = jnp.pad(x, ((0, 0), (pad, pad), (pad, pad), (0, 0)))
    oh = (h + 2 * pad - kh) // stride + 1
    ow = (w + 2 * pad - kw) // stride + 1
    cols = [xp[:, ky:ky + stride * oh:stride, kx:kx + stride * ow:stride, :]
            for ky in range(kh) for kx in range(kw)]
    patches = jnp.concatenate(cols, axis=-1)               # [N, OH, OW, kh*kw*C]
    return patches.reshape(n * oh * ow, kh * kw * c), (n, oh, ow)


def _pool_major(a, n, h, w):
    """Rows ordered (n,y,x) -> (4, n*(h//2)*(w//2), C) grouped by 2x2 pool tap."""
    c = a.shape[-1]
    a = a.reshape(n, h // 2, 2, w // 2, 2, c).transpose(2, 4, 0, 1, 3, 5)
    return a.reshape(4, n * (h // 2) * (w // 2), c)


def conv_relu(x, w2d, *, kh, kw, stride, pad):
    """Conv2d(bias=False) + folded-BN + ReLU; dense NHWC bf16 in/out."""
    patches, (n, oh, ow) = _im2col(x, kh, kw, stride, pad)
    cout = w2d.shape[1]
    out = pl.pallas_call(
        _conv_relu_kernel,
        out_shape=jax.ShapeDtypeStruct((n * oh * ow, cout), jnp.bfloat16),
        in_specs=[_VMEM, _VMEM],
        out_specs=_VMEM,
    )(patches, w2d)
    return out.reshape(n, oh, ow, cout)


def conv_relu_pool(x, w2d, *, kh, kw, stride, pad):
    """Conv + folded-BN + ReLU + fused 2x2/stride-2 max-pool."""
    patches, (n, oh, ow) = _im2col(x, kh, kw, stride, pad)
    p4 = _pool_major(patches, n, oh, ow)
    cout = w2d.shape[1]
    mp = n * (oh // 2) * (ow // 2)
    out = pl.pallas_call(
        _conv_relu_pool_kernel,
        out_shape=jax.ShapeDtypeStruct((mp, cout), jnp.bfloat16),
        in_specs=[_VMEM, _VMEM],
        out_specs=_VMEM,
    )(p4, w2d)
    return out.reshape(n, oh // 2, ow // 2, cout)


def conv_relu_res(x, w2d, residual):
    """3x3/s1 conv + folded-BN + ReLU + residual-add + ReLU (BasicBlock tail)."""
    n, h, w, _ = x.shape
    patches, _ = _im2col(x, 3, 3, 1, 1)
    cout = w2d.shape[1]
    out = pl.pallas_call(
        _conv_relu_res_kernel,
        out_shape=jax.ShapeDtypeStruct((n * h * w, cout), jnp.bfloat16),
        in_specs=[_VMEM, _VMEM, _VMEM],
        out_specs=_VMEM,
    )(patches, w2d, residual.reshape(n * h * w, cout))
    return out.reshape(n, h, w, cout)


def conv_relu_res_pool(x, w2d, residual):
    """BasicBlock tail with the following 2x2 max-pool fused in."""
    n, h, w, _ = x.shape
    patches, _ = _im2col(x, 3, 3, 1, 1)
    cout = w2d.shape[1]
    p4 = _pool_major(patches, n, h, w)
    r4 = _pool_major(residual.reshape(n * h * w, cout), n, h, w)
    mp = n * (h // 2) * (w // 2)
    out = pl.pallas_call(
        _conv_relu_res_pool_kernel,
        out_shape=jax.ShapeDtypeStruct((mp, cout), jnp.bfloat16),
        in_specs=[_VMEM, _VMEM, _VMEM],
        out_specs=_VMEM,
    )(p4, w2d, r4)
    return out.reshape(n, h // 2, w // 2, cout)


def branch_convs(x, w2d):
    """Fused conv_gaze | conv_label (3x3/s2/p1, 256 -> 2x256 channels).

    The size-2 "parallel" grid splits the two independent branches across
    output-channel halves so v7x's two TensorCores each take one branch.
    """
    patches, (n, oh, ow) = _im2col(x, 3, 3, 2, 1)
    m, k = patches.shape
    cout = w2d.shape[1]
    half = cout // 2
    out = pl.pallas_call(
        _conv_relu_kernel,
        out_shape=jax.ShapeDtypeStruct((m, cout), jnp.bfloat16),
        grid=(2,),
        in_specs=[pl.BlockSpec((m, k), lambda i: (0, 0)),
                  pl.BlockSpec((k, half), lambda i: (0, i))],
        out_specs=pl.BlockSpec((m, half), lambda i: (0, i)),
        compiler_params=pltpu.CompilerParams(
            dimension_semantics=("parallel",)),
    )(patches, w2d)
    return out.reshape(n, oh, ow, cout)


def heads(x, w, b):
    """AvgPool2d((2,3)) + flatten + both Linear heads (block-diagonal weight)."""
    n, h, wd, c = x.shape
    xr = x.reshape(n, h * wd, c)                            # (N, 6, 512)
    return pl.pallas_call(
        _head_kernel,
        out_shape=jax.ShapeDtypeStruct((n, w.shape[1]), jnp.float32),
        in_specs=[_VMEM, _VMEM, _VMEM],
        out_specs=_VMEM,
    )(xr, w, b)


# ------------------------------ parameters ---------------------------------

def _conv_weight_2d(key, kh, kw, cin, cout, scale):
    """PyTorch init normal(0, sqrt(2/(kh*kw*cout))), folded BN scale, bf16,
    stored as (kh*kw*cin, cout) matching the im2col tap-major/channel-minor order."""
    fan = kh * kw * cout
    w = jax.random.normal(key, (kh, kw, cin, cout), jnp.float32) * math.sqrt(2.0 / fan)
    return (w * scale).reshape(kh * kw * cin, cout).astype(jnp.bfloat16)


def _fc_params(key, cin, cout):
    k1, k2 = jax.random.split(key)
    bound = 1.0 / math.sqrt(cin)
    w = jax.random.uniform(k1, (cin, cout), jnp.float32, -bound, bound)
    b = jax.random.uniform(k2, (cout,), jnp.float32, -bound, bound)
    return w, b


def init_params(key):
    ks = jax.random.split(key, 9)
    p = {}
    # bn0 and conv_base's own BN both fold to a BN_SCALE factor on the weight.
    p["conv_base_w"] = _conv_weight_2d(ks[0], 5, 5, 3, 64, BN_SCALE * BN_SCALE)
    p["b1_conv1_w"] = _conv_weight_2d(ks[1], 3, 3, 64, 128, BN_SCALE)
    p["b1_conv2_w"] = _conv_weight_2d(ks[2], 3, 3, 128, 128, BN_SCALE)
    p["b2_conv1_w"] = _conv_weight_2d(ks[3], 3, 3, 128, 256, BN_SCALE)
    p["b2_conv2_w"] = _conv_weight_2d(ks[4], 3, 3, 256, 256, BN_SCALE)

    w_gaze = _conv_weight_2d(ks[5], 3, 3, 256, 256, BN_SCALE)
    w_label = _conv_weight_2d(ks[6], 3, 3, 256, 256, BN_SCALE)
    p["branch_w"] = jnp.concatenate([w_gaze, w_label], axis=1)   # [gaze | label]

    fc_g_w, fc_g_b = _fc_params(ks[7], 256, 2)
    fc_l_w, fc_l_b = _fc_params(ks[8], 256, 3)
    head_w = jnp.zeros((512, 128), jnp.float32)
    head_w = head_w.at[0:256, 0:2].set(fc_g_w).at[256:512, 2:5].set(fc_l_w)
    head_b = jnp.zeros((1, 128), jnp.float32)
    head_b = head_b.at[0, 0:2].set(fc_g_b).at[0, 2:5].set(fc_l_b)
    p["head_w"] = head_w
    p["head_b"] = head_b
    return p


# ------------------------------ forward pass --------------------------------

def smallnet3_forward(x_nchw, params):
    # NCHW -> NHWC; bf16 activations feed the MXU (accumulation stays f32).
    x = jnp.transpose(x_nchw, (0, 2, 3, 1)).astype(jnp.bfloat16)

    # bn0 + conv_base(5x5/s2) + BN + ReLU + maxpool1, one fused kernel.
    x = conv_relu_pool(x, params["conv_base_w"], kh=5, kw=5, stride=2, pad=2)

    # block1: BasicBlock(64 -> 128); maxpool2 fused into its second conv.
    y = conv_relu(x, params["b1_conv1_w"], kh=3, kw=3, stride=1, pad=1)
    x = conv_relu_res_pool(y, params["b1_conv2_w"], y)

    # block2: BasicBlock(128 -> 256).
    y = conv_relu(x, params["b2_conv1_w"], kh=3, kw=3, stride=1, pad=1)
    x = conv_relu_res(y, params["b2_conv2_w"], y)

    # conv_gaze / conv_label fused along output channels, then both heads.
    f = branch_convs(x, params["branch_w"])                  # (N, 2, 3, 512)
    out = heads(f, params["head_w"], params["head_b"])       # (N, 128) f32
    gaze = out[:, 0:2]
    label = out[:, 2:5]
    return gaze, label


if __name__ == "__main__":
    key = jax.random.PRNGKey(0)
    k_x, k_p = jax.random.split(key)

    # Input 3x32x48 -> conv_base 16x24 -> pool 8x12 -> pool 4x6 -> heads 2x3,
    # which AvgPool2d((2,3)) reduces to exactly 1x1 (as the module requires).
    x = jax.random.normal(k_x, (2, 3, 32, 48), jnp.float32)
    params = init_params(k_p)

    fwd = jax.jit(lambda xx: smallnet3_forward(xx, params))
    gaze, label = fwd(x)
    jax.block_until_ready((gaze, label))

    assert gaze.shape == (2, 2), gaze.shape
    assert label.shape == (2, 3), label.shape
    assert jnp.all(jnp.isfinite(gaze)) and jnp.all(jnp.isfinite(label))
    print("KERNEL_OK")
</pallas_src>

<mosaic_0001>
module attributes {stable_mosaic.version = 11 : i64} {
  func.func @_conv_relu_pool_kernel(%arg0: memref<4x192x75xbf16, #tpu.memory_space<vmem>>, %arg1: memref<75x64xbf16, #tpu.memory_space<vmem>>, %arg2: memref<192x64xbf16, #tpu.memory_space<vmem>>) attributes {dimension_semantics = [], scalar_prefetch = 0 : i64, scratch_operands = 0 : i64, tpu.core_type = #tpu.core_type<tc>} {
    %c0 = arith.constant 0 : index
    %c0_0 = arith.constant 0 : index
    %c0_1 = arith.constant 0 : index
    %0 = vector.load %arg0[%c0, %c0_0, %c0_1] : memref<4x192x75xbf16, #tpu.memory_space<vmem>>, vector<1x192x75xbf16>
    %1 = vector.shape_cast %0 : vector<1x192x75xbf16> to vector<192x75xbf16>
    %c0_2 = arith.constant 0 : index
    %c0_3 = arith.constant 0 : index
    %2 = vector.load %arg1[%c0_2, %c0_3] : memref<75x64xbf16, #tpu.memory_space<vmem>>, vector<75x64xbf16>
    %cst = arith.constant dense<0.000000e+00> : vector<192x64xf32>
    %3 = tpu.matmul %1, %2, %cst {dimension_numbers = #tpu.dot_dimension_numbers<[1], [0], [0], [1], [0, 0, 1, 1], [], []>} : vector<192x75xbf16>, vector<75x64xbf16>, vector<192x64xf32> -> vector<192x64xf32>
    %c1 = arith.constant 1 : index
    %c0_4 = arith.constant 0 : index
    %c0_5 = arith.constant 0 : index
    %4 = vector.load %arg0[%c1, %c0_4, %c0_5] : memref<4x192x75xbf16, #tpu.memory_space<vmem>>, vector<1x192x75xbf16>
    %5 = vector.shape_cast %4 : vector<1x192x75xbf16> to vector<192x75xbf16>
    %c0_6 = arith.constant 0 : index
    %c0_7 = arith.constant 0 : index
    %6 = vector.load %arg1[%c0_6, %c0_7] : memref<75x64xbf16, #tpu.memory_space<vmem>>, vector<75x64xbf16>
    %cst_8 = arith.constant dense<0.000000e+00> : vector<192x64xf32>
    %7 = tpu.matmul %5, %6, %cst_8 {dimension_numbers = #tpu.dot_dimension_numbers<[1], [0], [0], [1], [0, 0, 1, 1], [], []>} : vector<192x75xbf16>, vector<75x64xbf16>, vector<192x64xf32> -> vector<192x64xf32>
    %8 = arith.maximumf %3, %7 : vector<192x64xf32>
    %c2 = arith.constant 2 : index
    %c0_9 = arith.constant 0 : index
    %c0_10 = arith.constant 0 : index
    %9 = vector.load %arg0[%c2, %c0_9, %c0_10] : memref<4x192x75xbf16, #tpu.memory_space<vmem>>, vector<1x192x75xbf16>
    %10 = vector.shape_cast %9 : vector<1x192x75xbf16> to vector<192x75xbf16>
    %c0_11 = arith.constant 0 : index
    %c0_12 = arith.constant 0 : index
    %11 = vector.load %arg1[%c0_11, %c0_12] : memref<75x64xbf16, #tpu.memory_space<vmem>>, vector<75x64xbf16>
    %cst_13 = arith.constant dense<0.000000e+00> : vector<192x64xf32>
    %12 = tpu.matmul %10, %11, %cst_13 {dimension_numbers = #tpu.dot_dimension_numbers<[1], [0], [0], [1], [0, 0, 1, 1], [], []>} : vector<192x75xbf16>, vector<75x64xbf16>, vector<192x64xf32> -> vector<192x64xf32>
    %13 = arith.maximumf %8, %12 : vector<192x64xf32>
    %c3 = arith.constant 3 : index
    %c0_14 = arith.constant 0 : index
    %c0_15 = arith.constant 0 : index
    %14 = vector.load %arg0[%c3, %c0_14, %c0_15] : memref<4x192x75xbf16, #tpu.memory_space<vmem>>, vector<1x192x75xbf16>
    %15 = vector.shape_cast %14 : vector<1x192x75xbf16> to vector<192x75xbf16>
    %c0_16 = arith.constant 0 : index
    %c0_17 = arith.constant 0 : index
    %16 = vector.load %arg1[%c0_16, %c0_17] : memref<75x64xbf16, #tpu.memory_space<vmem>>, vector<75x64xbf16>
    %cst_18 = arith.constant dense<0.000000e+00> : vector<192x64xf32>
    %17 = tpu.matmul %15, %16, %cst_18 {dimension_numbers = #tpu.dot_dimension_numbers<[1], [0], [0], [1], [0, 0, 1, 1], [], []>} : vector<192x75xbf16>, vector<75x64xbf16>, vector<192x64xf32> -> vector<192x64xf32>
    %18 = arith.maximumf %13, %17 : vector<192x64xf32>
    %cst_19 = arith.constant 0.000000e+00 : f32
    %19 = vector.broadcast %cst_19 : f32 to vector<192x64xf32>
    %20 = arith.maximumf %18, %19 : vector<192x64xf32>
    %21 = arith.truncf %20 : vector<192x64xf32> to vector<192x64xbf16>
    %c0_20 = arith.constant 0 : index
    %c0_21 = arith.constant 0 : index
    %22 = vector.load %arg2[%c0_20, %c0_21] : memref<192x64xbf16, #tpu.memory_space<vmem>>, vector<192x64xbf16>
    tpu.vector_store %arg2[%c0_20, %c0_21], %21 {strides = array<i32>} : memref<192x64xbf16, #tpu.memory_space<vmem>>, vector<192x64xbf16>,
    return
  }
}

module attributes {stable_mosaic.version = 11 : i64} {
  func.func @_conv_relu_kernel(%arg0: memref<192x576xbf16, #tpu.memory_space<vmem>>, %arg1: memref<576x128xbf16, #tpu.memory_space<vmem>>, %arg2: memref<192x128xbf16, #tpu.memory_space<vmem>>) attributes {dimension_semantics = [], scalar_prefetch = 0 : i64, scratch_operands = 0 : i64, tpu.core_type = #tpu.core_type<tc>} {
    %c0 = arith.constant 0 : index
    %c0_0 = arith.constant 0 : index
    %0 = vector.load %arg0[%c0, %c0_0] : memref<192x576xbf16, #tpu.memory_space<vmem>>, vector<192x576xbf16>
    %c0_1 = arith.constant 0 : index
    %c0_2 = arith.constant 0 : index
    %1 = vector.load %arg1[%c0_1, %c0_2] : memref<576x128xbf16, #tpu.memory_space<vmem>>, vector<576x128xbf16>
    %cst = arith.constant dense<0.000000e+00> : vector<192x128xf32>
    %2 = tpu.matmul %0, %1, %cst {dimension_numbers = #tpu.dot_dimension_numbers<[1], [0], [0], [1], [0, 0, 1, 1], [], []>} : vector<192x576xbf16>, vector<576x128xbf16>, vector<192x128xf32> -> vector<192x128xf32>
    %cst_3 = arith.constant 0.000000e+00 : f32
    %3 = vector.broadcast %cst_3 : f32 to vector<192x128xf32>
    %4 = arith.maximumf %2, %3 : vector<192x128xf32>
    %5 = arith.truncf %4 : vector<192x128xf32> to vector<192x128xbf16>
    %c0_4 = arith.constant 0 : index
    %c0_5 = arith.constant 0 : index
    %6 = vector.load %arg2[%c0_4, %c0_5] : memref<192x128xbf16, #tpu.memory_space<vmem>>, vector<192x128xbf16>
    tpu.vector_store %arg2[%c0_4, %c0_5], %5 {strides = array<i32>} : memref<192x128xbf16, #tpu.memory_space<vmem>>, vector<192x128xbf16>,
    return
  }
}

module attributes {stable_mosaic.version = 11 : i64} {
  func.func @_conv_relu_res_pool_kernel(%arg0: memref<4x48x1152xbf16, #tpu.memory_space<vmem>>, %arg1: memref<1152x128xbf16, #tpu.memory_space<vmem>>, %arg2: memref<4x48x128xbf16, #tpu.memory_space<vmem>>, %arg3: memref<48x128xbf16, #tpu.memory_space<vmem>>) attributes {dimension_semantics = [], scalar_prefetch = 0 : i64, scratch_operands = 0 : i64, tpu.core_type = #tpu.core_type<tc>} {
    %c0 = arith.constant 0 : index
    %c0_0 = arith.constant 0 : index
    %c0_1 = arith.constant 0 : index
    %0 = vector.load %arg0[%c0, %c0_0, %c0_1] : memref<4x48x1152xbf16, #tpu.memory_space<vmem>>, vector<1x48x1152xbf16>
    %1 = vector.shape_cast %0 : vector<1x48x1152xbf16> to vector<48x1152xbf16>
    %c0_2 = arith.constant 0 : index
    %c0_3 = arith.constant 0 : index
    %2 = vector.load %arg1[%c0_2, %c0_3] : memref<1152x128xbf16, #tpu.memory_space<vmem>>, vector<1152x128xbf16>
    %cst = arith.constant dense<0.000000e+00> : vector<48x128xf32>
    %3 = tpu.matmul %1, %2, %cst {dimension_numbers = #tpu.dot_dimension_numbers<[1], [0], [0], [1], [0, 0, 1, 1], [], []>} : vector<48x1152xbf16>, vector<1152x128xbf16>, vector<48x128xf32> -> vector<48x128xf32>
    %cst_4 = arith.constant 0.000000e+00 : f32
    %4 = vector.broadcast %cst_4 : f32 to vector<48x128xf32>
    %5 = arith.maximumf %3, %4 : vector<48x128xf32>
    %c0_5 = arith.constant 0 : index
    %c0_6 = arith.constant 0 : index
    %c0_7 = arith.constant 0 : index
    %6 = vector.load %arg2[%c0_5, %c0_6, %c0_7] : memref<4x48x128xbf16, #tpu.memory_space<vmem>>, vector<1x48x128xbf16>
    %7 = vector.shape_cast %6 : vector<1x48x128xbf16> to vector<48x128xbf16>
    %8 = arith.extf %7 : vector<48x128xbf16> to vector<48x128xf32>
    %9 = arith.addf %5, %8 : vector<48x128xf32>
    %c1 = arith.constant 1 : index
    %c0_8 = arith.constant 0 : index
    %c0_9 = arith.constant 0 : index
    %10 = vector.load %arg0[%c1, %c0_8, %c0_9] : memref<4x48x1152xbf16, #tpu.memory_space<vmem>>, vector<1x48x1152xbf16>
    %11 = vector.shape_cast %10 : vector<1x48x1152xbf16> to vector<48x1152xbf16>
    %c0_10 = arith.constant 0 : index
    %c0_11 = arith.constant 0 : index
    %12 = vector.load %arg1[%c0_10, %c0_11] : memref<1152x128xbf16, #tpu.memory_space<vmem>>, vector<1152x128xbf16>
    %cst_12 = arith.constant dense<0.000000e+00> : vector<48x128xf32>
    %13 = tpu.matmul %11, %12, %cst_12 {dimension_numbers = #tpu.dot_dimension_numbers<[1], [0], [0], [1], [0, 0, 1, 1], [], []>} : vector<48x1152xbf16>, vector<1152x128xbf16>, vector<48x128xf32> -> vector<48x128xf32>
    %cst_13 = arith.constant 0.000000e+00 : f32
    %14 = vector.broadcast %cst_13 : f32 to vector<48x128xf32>
    %15 = arith.maximumf %13, %14 : vector<48x128xf32>
    %c1_14 = arith.constant 1 : index
    %c0_15 = arith.constant 0 : index
    %c0_16 = arith.constant 0 : index
    %16 = vector.load %arg2[%c1_14, %c0_15, %c0_16] : memref<4x48x128xbf16, #tpu.memory_space<vmem>>, vector<1x48x128xbf16>
    %17 = vector.shape_cast %16 : vector<1x48x128xbf16> to vector<48x128xbf16>
    %18 = arith.extf %17 : vector<48x128xbf16> to vector<48x128xf32>
    %19 = arith.addf %15, %18 : vector<48x128xf32>
    %20 = arith.maximumf %9, %19 : vector<48x128xf32>
    %c2 = arith.constant 2 : index
    %c0_17 = arith.constant 0 : index
    %c0_18 = arith.constant 0 : index
    %21 = vector.load %arg0[%c2, %c0_17, %c0_18] : memref<4x48x1152xbf16, #tpu.memory_space<vmem>>, vector<1x48x1152xbf16>
    %22 = vector.shape_cast %21 : vector<1x48x1152xbf16> to vector<48x1152xbf16>
    %c0_19 = arith.constant 0 : index
    %c0_20 = arith.constant 0 : index
    %23 = vector.load %arg1[%c0_19, %c0_20] : memref<1152x128xbf16, #tpu.memory_space<vmem>>, vector<1152x128xbf16>
    %cst_21 = arith.constant dense<0.000000e+00> : vector<48x128xf32>
    %24 = tpu.matmul %22, %23, %cst_21 {dimension_numbers = #tpu.dot_dimension_numbers<[1], [0], [0], [1], [0, 0, 1, 1], [], []>} : vector<48x1152xbf16>, vector<1152x128xbf16>, vector<48x128xf32> -> vector<48x128xf32>
    %cst_22 = arith.constant 0.000000e+00 : f32
    %25 = vector.broadcast %cst_22 : f32 to vector<48x128xf32>
    %26 = arith.maximumf %24, %25 : vector<48x128xf32>
    %c2_23 = arith.constant 2 : index
    %c0_24 = arith.constant 0 : index
    %c0_25 = arith.constant 0 : index
    %27 = vector.load %arg2[%c2_23, %c0_24, %c0_25] : memref<4x48x128xbf16, #tpu.memory_space<vmem>>, vector<1x48x128xbf16>
    %28 = vector.shape_cast %27 : vector<1x48x128xbf16> to vector<48x128xbf16>
    %29 = arith.extf %28 : vector<48x128xbf16> to vector<48x128xf32>
    %30 = arith.addf %26, %29 : vector<48x128xf32>
    %31 = arith.maximumf %20, %30 : vector<48x128xf32>
    %c3 = arith.constant 3 : index
    %c0_26 = arith.constant 0 : index
    %c0_27 = arith.constant 0 : index
    %32 = vector.load %arg0[%c3, %c0_26, %c0_27] : memref<4x48x1152xbf16, #tpu.memory_space<vmem>>, vector<1x48x1152xbf16>
    %33 = vector.shape_cast %32 : vector<1x48x1152xbf16> to vector<48x1152xbf16>
    %c0_28 = arith.constant 0 : index
    %c0_29 = arith.constant 0 : index
    %34 = vector.load %arg1[%c0_28, %c0_29] : memref<1152x128xbf16, #tpu.memory_space<vmem>>, vector<1152x128xbf16>
    %cst_30 = arith.constant dense<0.000000e+00> : vector<48x128xf32>
    %35 = tpu.matmul %33, %34, %cst_30 {dimension_numbers = #tpu.dot_dimension_numbers<[1], [0], [0], [1], [0, 0, 1, 1], [], []>} : vector<48x1152xbf16>, vector<1152x128xbf16>, vector<48x128xf32> -> vector<48x128xf32>
    %cst_31 = arith.constant 0.000000e+00 : f32
    %36 = vector.broadcast %cst_31 : f32 to vector<48x128xf32>
    %37 = arith.maximumf %35, %36 : vector<48x128xf32>
    %c3_32 = arith.constant 3 : index
    %c0_33 = arith.constant 0 : index
    %c0_34 = arith.constant 0 : index
    %38 = vector.load %arg2[%c3_32, %c0_33, %c0_34] : memref<4x48x128xbf16, #tpu.memory_space<vmem>>, vector<1x48x128xbf16>
    %39 = vector.shape_cast %38 : vector<1x48x128xbf16> to vector<48x128xbf16>
    %40 = arith.extf %39 : vector<48x128xbf16> to vector<48x128xf32>
    %41 = arith.addf %37, %40 : vector<48x128xf32>
    %42 = arith.maximumf %31, %41 : vector<48x128xf32>
    %cst_35 = arith.constant 0.000000e+00 : f32
    %43 = vector.broadcast %cst_35 : f32 to vector<48x128xf32>
    %44 = arith.maximumf %42, %43 : vector<48x128xf32>
    %45 = arith.truncf %44 : vector<48x128xf32> to vector<48x128xbf16>
    %c0_36 = arith.constant 0 : index
    %c0_37 = arith.constant 0 : index
    %46 = vector.load %arg3[%c0_36, %c0_37] : memref<48x128xbf16, #tpu.memory_space<vmem>>, vector<48x128xbf16>
    tpu.vector_store %arg3[%c0_36, %c0_37], %45 {strides = array<i32>} : memref<48x128xbf16, #tpu.memory_space<vmem>>, vector<48x128xbf16>,
    return
  }
}

module attributes {stable_mosaic.version = 11 : i64} {
  func.func @_conv_relu_kernel(%arg0: memref<48x1152xbf16, #tpu.memory_space<vmem>>, %arg1: memref<1152x256xbf16, #tpu.memory_space<vmem>>, %arg2: memref<48x256xbf16, #tpu.memory_space<vmem>>) attributes {dimension_semantics = [], scalar_prefetch = 0 : i64, scratch_operands = 0 : i64, tpu.core_type = #tpu.core_type<tc>} {
    %c0 = arith.constant 0 : index
    %c0_0 = arith.constant 0 : index
    %0 = vector.load %arg0[%c0, %c0_0] : memref<48x1152xbf16, #tpu.memory_space<vmem>>, vector<48x1152xbf16>
    %c0_1 = arith.constant 0 : index
    %c0_2 = arith.constant 0 : index
    %1 = vector.load %arg1[%c0_1, %c0_2] : memref<1152x256xbf16, #tpu.memory_space<vmem>>, vector<1152x256xbf16>
    %cst = arith.constant dense<0.000000e+00> : vector<48x256xf32>
    %2 = tpu.matmul %0, %1, %cst {dimension_numbers = #tpu.dot_dimension_numbers<[1], [0], [0], [1], [0, 0, 1, 1], [], []>} : vector<48x1152xbf16>, vector<1152x256xbf16>, vector<48x256xf32> -> vector<48x256xf32>
    %cst_3 = arith.constant 0.000000e+00 : f32
    %3 = vector.broadcast %cst_3 : f32 to vector<48x256xf32>
    %4 = arith.maximumf %2, %3 : vector<48x256xf32>
    %5 = arith.truncf %4 : vector<48x256xf32> to vector<48x256xbf16>
    %c0_4 = arith.constant 0 : index
    %c0_5 = arith.constant 0 : index
    %6 = vector.load %arg2[%c0_4, %c0_5] : memref<48x256xbf16, #tpu.memory_space<vmem>>, vector<48x256xbf16>
    tpu.vector_store %arg2[%c0_4, %c0_5], %5 {strides = array<i32>} : memref<48x256xbf16, #tpu.memory_space<vmem>>, vector<48x256xbf16>,
    return
  }
}

module attributes {stable_mosaic.version = 11 : i64} {
  func.func @_conv_relu_res_kernel(%arg0: memref<48x2304xbf16, #tpu.memory_space<vmem>>, %arg1: memref<2304x256xbf16, #tpu.memory_space<vmem>>, %arg2: memref<48x256xbf16, #tpu.memory_space<vmem>>, %arg3: memref<48x256xbf16, #tpu.memory_space<vmem>>) attributes {dimension_semantics = [], scalar_prefetch = 0 : i64, scratch_operands = 0 : i64, tpu.core_type = #tpu.core_type<tc>} {
    %c0 = arith.constant 0 : index
    %c0_0 = arith.constant 0 : index
    %0 = vector.load %arg0[%c0, %c0_0] : memref<48x2304xbf16, #tpu.memory_space<vmem>>, vector<48x2304xbf16>
    %c0_1 = arith.constant 0 : index
    %c0_2 = arith.constant 0 : index
    %1 = vector.load %arg1[%c0_1, %c0_2] : memref<2304x256xbf16, #tpu.memory_space<vmem>>, vector<2304x256xbf16>
    %cst = arith.constant dense<0.000000e+00> : vector<48x256xf32>
    %2 = tpu.matmul %0, %1, %cst {dimension_numbers = #tpu.dot_dimension_numbers<[1], [0], [0], [1], [0, 0, 1, 1], [], []>} : vector<48x2304xbf16>, vector<2304x256xbf16>, vector<48x256xf32> -> vector<48x256xf32>
    %cst_3 = arith.constant 0.000000e+00 : f32
    %3 = vector.broadcast %cst_3 : f32 to vector<48x256xf32>
    %4 = arith.maximumf %2, %3 : vector<48x256xf32>
    %c0_4 = arith.constant 0 : index
    %c0_5 = arith.constant 0 : index
    %5 = vector.load %arg2[%c0_4, %c0_5] : memref<48x256xbf16, #tpu.memory_space<vmem>>, vector<48x256xbf16>
    %6 = arith.extf %5 : vector<48x256xbf16> to vector<48x256xf32>
    %7 = arith.addf %4, %6 : vector<48x256xf32>
    %cst_6 = arith.constant 0.000000e+00 : f32
    %8 = vector.broadcast %cst_6 : f32 to vector<48x256xf32>
    %9 = arith.maximumf %7, %8 : vector<48x256xf32>
    %10 = arith.truncf %9 : vector<48x256xf32> to vector<48x256xbf16>
    %c0_7 = arith.constant 0 : index
    %c0_8 = arith.constant 0 : index
    %11 = vector.load %arg3[%c0_7, %c0_8] : memref<48x256xbf16, #tpu.memory_space<vmem>>, vector<48x256xbf16>
    tpu.vector_store %arg3[%c0_7, %c0_8], %10 {strides = array<i32>} : memref<48x256xbf16, #tpu.memory_space<vmem>>, vector<48x256xbf16>,
    return
  }
}

module attributes {stable_mosaic.version = 11 : i64} {
  func.func @_conv_relu_kernel(%arg0: i32, %arg1: memref<12x2304xbf16, #tpu.memory_space<vmem>>, %arg2: memref<2304x256xbf16, #tpu.memory_space<vmem>>, %arg3: memref<12x256xbf16, #tpu.memory_space<vmem>>) attributes {dimension_semantics = [#tpu.dimension_semantics<parallel>], iteration_bounds = array<i64: 2>, scalar_prefetch = 0 : i64, scratch_operands = 0 : i64, tpu.core_type = #tpu.core_type<tc>, window_params = [{pipeline_mode = #tpu.pipeline_mode<synchronous>, transform_indices = @transform_0, window_bounds = array<i64: 12, 2304>}, {transform_indices = @transform_1, window_bounds = array<i64: 2304, 256>}, {transform_indices = @transform_2, window_bounds = array<i64: 12, 256>}]} {
    %c0 = arith.constant 0 : index
    %c0_0 = arith.constant 0 : index
    %0 = vector.load %arg1[%c0, %c0_0] : memref<12x2304xbf16, #tpu.memory_space<vmem>>, vector<12x2304xbf16>
    %c0_1 = arith.constant 0 : index
    %c0_2 = arith.constant 0 : index
    %1 = vector.load %arg2[%c0_1, %c0_2] : memref<2304x256xbf16, #tpu.memory_space<vmem>>, vector<2304x256xbf16>
    %cst = arith.constant dense<0.000000e+00> : vector<12x256xf32>
    %2 = tpu.matmul %0, %1, %cst {dimension_numbers = #tpu.dot_dimension_numbers<[1], [0], [0], [1], [0, 0, 1, 1], [], []>} : vector<12x2304xbf16>, vector<2304x256xbf16>, vector<12x256xf32> -> vector<12x256xf32>
    %cst_3 = arith.constant 0.000000e+00 : f32
    %3 = vector.broadcast %cst_3 : f32 to vector<12x256xf32>
    %4 = arith.maximumf %2, %3 : vector<12x256xf32>
    %5 = arith.truncf %4 : vector<12x256xf32> to vector<12x256xbf16>
    %c0_4 = arith.constant 0 : index
    %c0_5 = arith.constant 0 : index
    %6 = vector.load %arg3[%c0_4, %c0_5] : memref<12x256xbf16, #tpu.memory_space<vmem>>, vector<12x256xbf16>
    tpu.vector_store %arg3[%c0_4, %c0_5], %5 {strides = array<i32>} : memref<12x256xbf16, #tpu.memory_space<vmem>>, vector<12x256xbf16>,
    return
  }
  func.func @transform_0(%arg0: i32) -> (i32, i32) {
    %c0_i32 = arith.constant 0 : i32
    %c0_i32_0 = arith.constant 0 : i32
    %c0_i32_1 = arith.constant 0 : i32
    return %c0_i32, %c0_i32_0 : i32, i32
  }
  func.func @transform_1(%arg0: i32) -> (i32, i32) {
    %c0_i32 = arith.constant 0 : i32
    %c0_i32_0 = arith.constant 0 : i32
    return %c0_i32, %arg0 : i32, i32
  }
  func.func @transform_2(%arg0: i32) -> (i32, i32) {
    %c0_i32 = arith.constant 0 : i32
    %c0_i32_0 = arith.constant 0 : i32
    return %c0_i32, %arg0 : i32, i32
  }
}

module attributes {stable_mosaic.version = 11 : i64} {
  func.func @_head_kernel(%arg0: memref<2x6x512xbf16, #tpu.memory_space<vmem>>, %arg1: memref<512x128xf32, #tpu.memory_space<vmem>>, %arg2: memref<1x128xf32, #tpu.memory_space<vmem>>, %arg3: memref<2x128xf32, #tpu.memory_space<vmem>>) attributes {dimension_semantics = [], scalar_prefetch = 0 : i64, scratch_operands = 0 : i64, tpu.core_type = #tpu.core_type<tc>} {
    %c0 = arith.constant 0 : index
    %c0_0 = arith.constant 0 : index
    %c0_1 = arith.constant 0 : index
    %0 = vector.load %arg0[%c0, %c0_0, %c0_1] : memref<2x6x512xbf16, #tpu.memory_space<vmem>>, vector<2x6x512xbf16>
    %1 = arith.extf %0 : vector<2x6x512xbf16> to vector<2x6x512xf32>
    %cst = arith.constant dense<0.000000e+00> : vector<2x512xf32>
    %2 = vector.multi_reduction <add>, %1, %cst [1] : vector<2x6x512xf32> to vector<2x512xf32>
    %cst_2 = arith.constant 0.166666672 : f32
    %3 = vector.broadcast %cst_2 : f32 to vector<2x512xf32>
    %4 = arith.mulf %2, %3 : vector<2x512xf32>
    %c0_3 = arith.constant 0 : index
    %c0_4 = arith.constant 0 : index
    %5 = vector.load %arg1[%c0_3, %c0_4] : memref<512x128xf32, #tpu.memory_space<vmem>>, vector<512x128xf32>
    %cst_5 = arith.constant dense<0.000000e+00> : vector<2x128xf32>
    %6 = tpu.matmul %4, %5, %cst_5 {dimension_numbers = #tpu.dot_dimension_numbers<[1], [0], [0], [1], [0, 0, 1, 1], [], []>} : vector<2x512xf32>, vector<512x128xf32>, vector<2x128xf32> -> vector<2x128xf32>
    %c0_6 = arith.constant 0 : index
    %c0_7 = arith.constant 0 : index
    %7 = vector.load %arg2[%c0_6, %c0_7] : memref<1x128xf32, #tpu.memory_space<vmem>>, vector<1x128xf32>
    %8 = vector.broadcast %7 : vector<1x128xf32> to vector<2x128xf32>
    %9 = arith.addf %6, %8 : vector<2x128xf32>
    %c0_8 = arith.constant 0 : index
    %c0_9 = arith.constant 0 : index
    %10 = vector.load %arg3[%c0_8, %c0_9] : memref<2x128xf32, #tpu.memory_space<vmem>>, vector<2x128xf32>
    tpu.vector_store %arg3[%c0_8, %c0_9], %9 {strides = array<i32>} : memref<2x128xf32, #tpu.memory_space<vmem>>, vector<2x128xf32>,
    return
  }
}

</mosaic_0001>

<bundles_post_ra>
// kernel: _lambda_.7
= control target key start
LH: loop header
LB: loop body
LE: loop exit
PB: predicated region body
PF: predicated region fallthrough
CT: control target
= control target key end

     0   :  { %vm172_vm0 = vcmask 1044480   ;;  %vm173_vm1 = vcmask 1045504   ;;  %v1353_v2 = vmov 65535   ;;  %vm135_vm2 = vcmask 613376   ;;  %s1675_s1 = inlined_call_operand.vmem [shape: bf16[75,64], index: 1, kind: input, shape index: {}]   ;;  %s1676_s0 = inlined_call_operand.vmem [shape: bf16[4,192,75], index: 0, kind: input, shape index: {}]   ;;  %s1677_s2 = inlined_call_operand.vmem [shape: bf16[192,64], index: 2, kind: output, shape index: {}]  }
   0x1   :  { %v1033_v0 = vld [vmem:[%s1675_s1 + $0x20] sm:$0xf]  ;;  %v1315_v1 = vld [vmem:[%s1675_s1 + $0x20] sm:$0x30]  ;;  %v174_v3 = vsel %vm172_vm0, 4294967295, %v1353_v2  ;;  %v1314_v7 = vld [vmem:[%s1675_s1 + $0x18] sm:$0xff] }
   0x2   :  { %v1034_v4 = vor.u32 %v1315_v1, %v1033_v0  ;;  %v175_v5 = vsel %vm173_vm1, %v174_v3, 0  ;;  %v1313_v8 = vld [vmem:[%s1675_s1 + $0x10] sm:$0xff]  ;;  %v1312_v9 = vld [vmem:[%s1675_s1 + $0x8] sm:$0xff]  ;;  %v1311_v10 = vld [vmem:[%s1675_s1] sm:$0xff]  ;;  %vm938_vm3 = vcmask 519168  }
   0x3   :  { %v1299_v11 = vld [vmem:[%s1676_s0] sm:$0xff]  ;;  %v1300_v15 = vld [vmem:[%s1676_s0 + $0x8] sm:$0xff]  ;;  %v1301_v19 = vld [vmem:[%s1676_s0 + $0x10] sm:$0xff] }
   0x4   :  { %v177_v6 = vand.u32 %v1034_v4, %v175_v5  ;;  %v1316_v12 = vld [vmem:[%s1676_s0 + $0x60] sm:$0xff]  ;;  %v1317_v16 = vld [vmem:[%s1676_s0 + $0x68] sm:$0xff]  ;;  %v1318_v20 = vld [vmem:[%s1676_s0 + $0x70] sm:$0xff] }
   0x5   :  { %v1328_v13 = vld [vmem:[%s1676_s0 + $0xc0] sm:$0xff]  ;;  %v1329_v17 = vld [vmem:[%s1676_s0 + $0xc8] sm:$0xff]  ;;  %v1330_v21 = vld [vmem:[%s1676_s0 + $0xd0] sm:$0xff] }
   0x6   :  { %182 = vmatpush.bf16.msra.mxu0 %v177_v6  ;;  %372 = vmatpush.bf16.msra.mxu1 %v177_v6  ;;  %v1340_v14 = vld [vmem:[%s1676_s0 + $0x120] sm:$0xff]  ;;  %v1341_v18 = vld [vmem:[%s1676_s0 + $0x128] sm:$0xff]  ;;  %v1342_v22 = vld [vmem:[%s1676_s0 + $0x130] sm:$0xff] }
   0x7   :  { %586 = vmatpush.bf16.msra.mxu2 %v177_v6  ;;  %800 = vmatpush.bf16.msra.mxu3 %v177_v6  ;;  %v1302_v23 = vld [vmem:[%s1676_s0 + $0x18] sm:$0xff]  ;;  %v1303_v27 = vld [vmem:[%s1676_s0 + $0x20] sm:$0xff]  ;;  %v1304_v31 = vld [vmem:[%s1676_s0 + $0x28] sm:$0xff] }
   0x8   :  { %v1319_v24 = vld [vmem:[%s1676_s0 + $0x78] sm:$0xff]  ;;  %v1320_v28 = vld [vmem:[%s1676_s0 + $0x80] sm:$0xff]  ;;  %v1321_v32 = vld [vmem:[%s1676_s0 + $0x88] sm:$0xff] }
   0x9   :  { %v1331_v25 = vld [vmem:[%s1676_s0 + $0xd8] sm:$0xff]  ;;  %v1332_v29 = vld [vmem:[%s1676_s0 + $0xe0] sm:$0xff]  ;;  %v1333_v33 = vld [vmem:[%s1676_s0 + $0xe8] sm:$0xff] }
   0xa   :  { %183 = vmatpush.bf16.msra.mxu0 %v1314_v7  ;;  %373 = vmatpush.bf16.msra.mxu1 %v1314_v7  ;;  %v1343_v26 = vld [vmem:[%s1676_s0 + $0x138] sm:$0xff]  ;;  %v1344_v30 = vld [vmem:[%s1676_s0 + $0x140] sm:$0xff]  ;;  %v1345_v34 = vld [vmem:[%s1676_s0 + $0x148] sm:$0xff] }
   0xb   :  { %587 = vmatpush.bf16.msra.mxu2 %v1314_v7  ;;  %801 = vmatpush.bf16.msra.mxu3 %v1314_v7  ;;  %v1305_v35 = vld [vmem:[%s1676_s0 + $0x30] sm:$0xff]  ;;  %v1306_v39 = vld [vmem:[%s1676_s0 + $0x38] sm:$0xff]  ;;  %v1307_v43 = vld [vmem:[%s1676_s0 + $0x40] sm:$0xff] }
   0xc   :  { %v1322_v36 = vld [vmem:[%s1676_s0 + $0x90] sm:$0xff]  ;;  %v1323_v40 = vld [vmem:[%s1676_s0 + $0x98] sm:$0xff]  ;;  %v1324_v44 = vld [vmem:[%s1676_s0 + $0xa0] sm:$0xff] }
   0xd   :  { %v1334_v37 = vld [vmem:[%s1676_s0 + $0xf0] sm:$0xff]  ;;  %v1335_v41 = vld [vmem:[%s1676_s0 + $0xf8] sm:$0xff]  ;;  %v1336_v47 = vld [vmem:[%s1676_s0 + $0x100] sm:$0xff] }
   0xe   :  { %184 = vmatpush.bf16.msra.mxu0 %v1313_v8  ;;  %374 = vmatpush.bf16.msra.mxu1 %v1313_v8  ;;  %v1346_v38 = vld [vmem:[%s1676_s0 + $0x150] sm:$0xff]  ;;  %v1347_v42 = vld [vmem:[%s1676_s0 + $0x158] sm:$0xff]  ;;  %v1348_v48 = vld [vmem:[%s1676_s0 + $0x160] sm:$0xff] }
   0xf   :  { %588 = vmatpush.bf16.msra.mxu2 %v1313_v8  ;;  %802 = vmatpush.bf16.msra.mxu3 %v1313_v8  ;;  %v1308_v61 = vld [vmem:[%s1676_s0 + $0x48] sm:$0xff] }
  0x10   :  { %v1325_v62 = vld [vmem:[%s1676_s0 + $0xa8] sm:$0xff] }
  0x11   :  { %v1337_v2 = vld [vmem:[%s1676_s0 + $0x108] sm:$0xff] }
  0x12   :  { %185 = vmatpush.bf16.msra.mxu0 %v1312_v9  ;;  %375 = vmatpush.bf16.msra.mxu1 %v1312_v9  ;;  %v1349_v3 = vld [vmem:[%s1676_s0 + $0x168] sm:$0xff] }
  0x13   :  { %589 = vmatpush.bf16.msra.mxu2 %v1312_v9  ;;  %803 = vmatpush.bf16.msra.mxu3 %v1312_v9 }
  0x16   :  { %186 = vmatpush.bf16.msra.mxu0 %v1311_v10  ;;  %376 = vmatpush.bf16.msra.mxu1 %v1311_v10 }
  0x17   :  { %590 = vmatpush.bf16.msra.mxu2 %v1311_v10  ;;  %804 = vmatpush.bf16.msra.mxu3 %v1311_v10 }
  0x19   :  { %1035 = vmatmul.msk.bf16.vlgmr.msra.gmra.mxu0 %vm135_vm2, %v1299_v11  ;;  %1119 = vmatmul.msk.bf16.vlgmr.msra.gmra.mxu1 %vm135_vm2, %v1316_v12 }
  0x1a   :  { %1203 = vmatmul.msk.bf16.vlgmr.msra.gmra.mxu2 %vm135_vm2, %v1328_v13  ;;  %1287 = vmatmul.msk.bf16.vlgmr.msra.gmra.mxu3 %vm135_vm2, %v1340_v14 }
  0x29   :  { %1036 = vmatmul.msk.bf16.gmra.mxu0 %vm135_vm2, %v1300_v15  ;;  %1120 = vmatmul.msk.bf16.gmra.mxu1 %vm135_vm2, %v1317_v16 }
  0x2a   :  { %1204 = vmatmul.msk.bf16.gmra.mxu2 %vm135_vm2, %v1329_v17  ;;  %1288 = vmatmul.msk.bf16.gmra.mxu3 %vm135_vm2, %v1341_v18 }
  0x39   :  { %1037 = vmatmul.msk.bf16.gmra.mxu0 %vm135_vm2, %v1301_v19  ;;  %1121 = vmatmul.msk.bf16.gmra.mxu1 %vm135_vm2, %v1318_v20  ;;  %v1309_v19 = vld [vmem:[%s1676_s0 + $0x50] sm:$0xff] }
  0x3a   :  { %1205 = vmatmul.msk.bf16.gmra.mxu2 %vm135_vm2, %v1330_v21  ;;  %1289 = vmatmul.msk.bf16.gmra.mxu3 %vm135_vm2, %v1342_v22  ;;  %v1326_v20 = vld [vmem:[%s1676_s0 + $0xb0] sm:$0xff] }
  0x49   :  { %1038 = vmatmul.msk.bf16.gmra.mxu0 %vm135_vm2, %v1302_v23  ;;  %1122 = vmatmul.msk.bf16.gmra.mxu1 %vm135_vm2, %v1319_v24  ;;  %v1338_v24 = vld [vmem:[%s1676_s0 + $0x110] sm:$0xff] }
  0x4a   :  { %1206 = vmatmul.msk.bf16.gmra.mxu2 %vm135_vm2, %v1331_v25  ;;  %1290 = vmatmul.msk.bf16.gmra.mxu3 %vm135_vm2, %v1343_v26  ;;  %v1350_v25 = vld [vmem:[%s1676_s0 + $0x170] sm:$0xff] }
  0x59   :  { %1039 = vmatmul.msk.bf16.gmra.mxu0 %vm135_vm2, %v1303_v27  ;;  %1123 = vmatmul.msk.bf16.gmra.mxu1 %vm135_vm2, %v1320_v28 }
  0x5a   :  { %1207 = vmatmul.msk.bf16.gmra.mxu2 %vm135_vm2, %v1332_v29  ;;  %1291 = vmatmul.msk.bf16.gmra.mxu3 %vm135_vm2, %v1344_v30 }
  0x69   :  { %1040 = vmatmul.msk.bf16.gmra.mxu0 %vm135_vm2, %v1304_v31  ;;  %1124 = vmatmul.msk.bf16.gmra.mxu1 %vm135_vm2, %v1321_v32 }
  0x6a   :  { %1208 = vmatmul.msk.bf16.gmra.mxu2 %vm135_vm2, %v1333_v33  ;;  %1292 = vmatmul.msk.bf16.gmra.mxu3 %vm135_vm2, %v1345_v34 }
  0x79   :  { %1041 = vmatmul.msk.bf16.gmra.mxu0 %vm135_vm2, %v1305_v35  ;;  %1125 = vmatmul.msk.bf16.gmra.mxu1 %vm135_vm2, %v1322_v36 }
  0x7a   :  { %1209 = vmatmul.msk.bf16.gmra.mxu2 %vm135_vm2, %v1334_v37  ;;  %1293 = vmatmul.msk.bf16.gmra.mxu3 %vm135_vm2, %v1346_v38 }
  0x89   :  { %1042 = vmatmul.msk.bf16.gmra.mxu0 %vm135_vm2, %v1306_v39  ;;  %1126 = vmatmul.msk.bf16.gmra.mxu1 %vm135_vm2, %v1323_v40 }
  0x8a   :  { %1210 = vmatmul.msk.bf16.gmra.mxu2 %vm135_vm2, %v1335_v41  ;;  %1294 = vmatmul.msk.bf16.gmra.mxu3 %vm135_vm2, %v1347_v42  ;;  %v1310_v41 = vld [vmem:[%s1676_s0 + $0x58] sm:$0xff] }
  0x8b   :  { %v1327_v42 = vld [vmem:[%s1676_s0 + $0xb8] sm:$0xff] }
  0x96   :  { %v188_v45 = vpop.f32.mrf.mxu0  ;;  %v378_v46 = vpop.f32.mrf.mxu1 }
  0x97   :  { %v438_v49 = vmax.f32 %v188_v45, %v378_v46  ;;  %v1339_v46 = vld [vmem:[%s1676_s0 + $0x118] sm:$0xff] }
  0x99   :  { %1043 = vmatmul.msk.bf16.gmra.mxu0 %vm135_vm2, %v1307_v43  ;;  %1127 = vmatmul.msk.bf16.gmra.mxu1 %vm135_vm2, %v1324_v44 }
  0x9a   :  { %1211 = vmatmul.msk.bf16.gmra.mxu2 %vm135_vm2, %v1336_v47  ;;  %1295 = vmatmul.msk.bf16.gmra.mxu3 %vm135_vm2, %v1348_v48  ;;  %v1351_v47 = vld [vmem:[%s1676_s0 + $0x178] sm:$0xff] }
  0x9d   :  { %v592_v50 = vpop.f32.mrf.mxu2  ;;  %v806_v51 = vpop.f32.mrf.mxu3 }
  0x9e   :  { %v652_v52 = vmax.f32 %v438_v49, %v592_v50  ;;  %v190_v53 = vpop.f32.mrf.mxu0  ;;  %v380_v54 = vpop.f32.mrf.mxu1 }
  0x9f   :  { %v439_v58 = vmax.f32 %v190_v53, %v380_v54 }
  0xa0   :  { %v866_v55 = vmax.f32 %v652_v52, %v806_v51 }
  0xa2   :  { %v890_v56 = vmax.f32 %v866_v55, 0.0 }
  0xa4   :  { %v914_v57 = vpack.c.bf16 %v890_v56, %v890_v56 }
  0xa5   :  { %v594_v59 = vpop.f32.mrf.mxu2  ;;  %v808_v60 = vpop.f32.mrf.mxu3 }
  0xa6   :  { %939 = vst.msk [vmem:[%s1677_s2] sm:$0xf] %vm938_vm3, %v914_v57  ;;  %v653_v63 = vmax.f32 %v439_v58, %v594_v59  ;;  %v193_v0 = vpop.f32.mrf.mxu0  ;;  %v383_v1 = vpop.f32.mrf.mxu1 }
  0xa7   :  { %v440_v6 = vmax.f32 %v193_v0, %v383_v1 }
  0xa8   :  { %v867_v4 = vmax.f32 %v653_v63, %v808_v60 }
  0xa9   :  { %1044 = vmatmul.msk.bf16.gmra.mxu0 %vm135_vm2, %v1308_v61  ;;  %1128 = vmatmul.msk.bf16.gmra.mxu1 %vm135_vm2, %v1325_v62 }
  0xaa   :  { %v891_v5 = vmax.f32 %v867_v4, 0.0  ;;  %1212 = vmatmul.msk.bf16.gmra.mxu2 %vm135_vm2, %v1337_v2  ;;  %1296 = vmatmul.msk.bf16.gmra.mxu3 %vm135_vm2, %v1349_v3 }
  0xac   :  { %v915_v7 = vpack.c.bf16 %v891_v5, %v891_v5 }
  0xad   :  { %v597_v8 = vpop.f32.mrf.mxu2  ;;  %v811_v9 = vpop.f32.mrf.mxu3 }
  0xae   :  { %940 = vst.msk [vmem:[%s1677_s2 + $0x4] sm:$0xf] %vm938_vm3, %v915_v7  ;;  %v654_v10 = vmax.f32 %v440_v6, %v597_v8  ;;  %v195_v11 = vpop.f32.mrf.mxu0  ;;  %v385_v12 = vpop.f32.mrf.mxu1 }
  0xaf   :  { %v441_v16 = vmax.f32 %v195_v11, %v385_v12 }
  0xb0   :  { %v868_v13 = vmax.f32 %v654_v10, %v811_v9 }
  0xb2   :  { %v892_v14 = vmax.f32 %v868_v13, 0.0 }
  0xb4   :  { %v916_v15 = vpack.c.bf16 %v892_v14, %v892_v14 }
  0xb5   :  { %v599_v17 = vpop.f32.mrf.mxu2  ;;  %v813_v18 = vpop.f32.mrf.mxu3 }
  0xb6   :  { %941 = vst.msk [vmem:[%s1677_s2 + $0x8] sm:$0xf] %vm938_vm3, %v916_v15  ;;  %v655_v21 = vmax.f32 %v441_v16, %v599_v17  ;;  %v198_v22 = vpop.f32.mrf.mxu0  ;;  %v388_v23 = vpop.f32.mrf.mxu1 }
  0xb7   :  { %v442_v28 = vmax.f32 %v198_v22, %v388_v23 }
  0xb8   :  { %v869_v26 = vmax.f32 %v655_v21, %v813_v18 }
  0xb9   :  { %1045 = vmatmul.msk.bf16.gmra.mxu0 %vm135_vm2, %v1309_v19  ;;  %1129 = vmatmul.msk.bf16.gmra.mxu1 %vm135_vm2, %v1326_v20 }
  0xba   :  { %v893_v27 = vmax.f32 %v869_v26, 0.0  ;;  %1213 = vmatmul.msk.bf16.gmra.mxu2 %vm135_vm2, %v1338_v24  ;;  %1297 = vmatmul.msk.bf16.gmra.mxu3 %vm135_vm2, %v1350_v25 }
  0xbc   :  { %v917_v29 = vpack.c.bf16 %v893_v27, %v893_v27 }
  0xbd   :  { %v602_v30 = vpop.f32.mrf.mxu2  ;;  %v816_v31 = vpop.f32.mrf.mxu3 }
  0xbe   :  { %942 = vst.msk [vmem:[%s1677_s2 + $0xc] sm:$0xf] %vm938_vm3, %v917_v29  ;;  %v656_v32 = vmax.f32 %v442_v28, %v602_v30  ;;  %v200_v33 = vpop.f32.mrf.mxu0  ;;  %v390_v34 = vpop.f32.mrf.mxu1 }
  0xbf   :  { %v443_v38 = vmax.f32 %v200_v33, %v390_v34 }
  0xc0   :  { %v870_v35 = vmax.f32 %v656_v32, %v816_v31 }
  0xc2   :  { %v894_v36 = vmax.f32 %v870_v35, 0.0 }
  0xc4   :  { %v918_v37 = vpack.c.bf16 %v894_v36, %v894_v36 }
  0xc5   :  { %v604_v39 = vpop.f32.mrf.mxu2  ;;  %v818_v40 = vpop.f32.mrf.mxu3 }
  0xc6   :  { %943 = vst.msk [vmem:[%s1677_s2 + $0x10] sm:$0xf] %vm938_vm3, %v918_v37  ;;  %v657_v43 = vmax.f32 %v443_v38, %v604_v39  ;;  %v203_v44 = vpop.f32.mrf.mxu0  ;;  %v393_v45 = vpop.f32.mrf.mxu1 }
  0xc7   :  { %v444_v50 = vmax.f32 %v203_v44, %v393_v45 }
  0xc8   :  { %v871_v48 = vmax.f32 %v657_v43, %v818_v40 }
  0xc9   :  { %1046 = vmatmul.msk.bf16.gmra.mxu0 %vm135_vm2, %v1310_v41  ;;  %1130 = vmatmul.msk.bf16.gmra.mxu1 %vm135_vm2, %v1327_v42 }
  0xca   :  { %v895_v49 = vmax.f32 %v871_v48, 0.0  ;;  %1214 = vmatmul.msk.bf16.gmra.mxu2 %vm135_vm2, %v1339_v46  ;;  %1298 = vmatmul.msk.bf16.gmra.mxu3 %vm135_vm2, %v1351_v47 }
  0xcc   :  { %v919_v51 = vpack.c.bf16 %v895_v49, %v895_v49 }
  0xcd   :  { %v607_v52 = vpop.f32.mrf.mxu2  ;;  %v821_v53 = vpop.f32.mrf.mxu3 }
  0xce   :  { %944 = vst.msk [vmem:[%s1677_s2 + $0x14] sm:$0xf] %vm938_vm3, %v919_v51  ;;  %v658_v54 = vmax.f32 %v444_v50, %v607_v52  ;;  %v205_v55 = vpop.f32.mrf.mxu0  ;;  %v395_v56 = vpop.f32.mrf.mxu1 }
  0xcf   :  { %v445_v60 = vmax.f32 %v205_v55, %v395_v56 }
  0xd0   :  { %v872_v57 = vmax.f32 %v658_v54, %v821_v53 }
  0xd2   :  { %v896_v58 = vmax.f32 %v872_v57, 0.0 }
  0xd4   :  { %v920_v59 = vpack.c.bf16 %v896_v58, %v896_v58 }
  0xd5   :  { %v609_v61 = vpop.f32.mrf.mxu2  ;;  %v823_v62 = vpop.f32.mrf.mxu3 }
  0xd6   :  { %945 = vst.msk [vmem:[%s1677_s2 + $0x18] sm:$0xf] %vm938_vm3, %v920_v59  ;;  %v659_v63 = vmax.f32 %v445_v60, %v609_v61  ;;  %v208_v0 = vpop.f32.mrf.mxu0  ;;  %v398_v1 = vpop.f32.mrf.mxu1 }
  0xd7   :  { %v446_v4 = vmax.f32 %v208_v0, %v398_v1 }
  0xd8   :  { %v873_v2 = vmax.f32 %v659_v63, %v823_v62 }
  0xda   :  { %v897_v3 = vmax.f32 %v873_v2, 0.0 }
  0xdc   :  { %v921_v5 = vpack.c.bf16 %v897_v3, %v897_v3 }
  0xdd   :  { %v612_v6 = vpop.f32.mrf.mxu2  ;;  %v826_v7 = vpop.f32.mrf.mxu3 }
  0xde   :  { %946 = vst.msk [vmem:[%s1677_s2 + $0x1c] sm:$0xf] %vm938_vm3, %v921_v5  ;;  %v660_v8 = vmax.f32 %v446_v4, %v612_v6  ;;  %v210_v9 = vpop.f32.mrf.mxu0  ;;  %v400_v10 = vpop.f32.mrf.mxu1 }
  0xdf   :  { %v447_v14 = vmax.f32 %v210_v9, %v400_v10 }
  0xe0   :  { %v874_v11 = vmax.f32 %v660_v8, %v826_v7 }
  0xe2   :  { %v898_v12 = vmax.f32 %v874_v11, 0.0 }
  0xe4   :  { %v922_v13 = vpack.c.bf16 %v898_v12, %v898_v12 }
  0xe5   :  { %v614_v15 = vpop.f32.mrf.mxu2  ;;  %v828_v16 = vpop.f32.mrf.mxu3 }
  0xe6   :  { %947 = vst.msk [vmem:[%s1677_s2 + $0x20] sm:$0xf] %vm938_vm3, %v922_v13  ;;  %v661_v17 = vmax.f32 %v447_v14, %v614_v15  ;;  %v213_v18 = vpop.f32.mrf.mxu0  ;;  %v403_v19 = vpop.f32.mrf.mxu1 }
  0xe7   :  { %v448_v22 = vmax.f32 %v213_v18, %v403_v19 }
  0xe8   :  { %v875_v20 = vmax.f32 %v661_v17, %v828_v16 }
  0xea   :  { %v899_v21 = vmax.f32 %v875_v20, 0.0 }
  0xec   :  { %v923_v23 = vpack.c.bf16 %v899_v21, %v899_v21 }
  0xed   :  { %v617_v24 = vpop.f32.mrf.mxu2  ;;  %v831_v25 = vpop.f32.mrf.mxu3 }
  0xee   :  { %948 = vst.msk [vmem:[%s1677_s2 + $0x24] sm:$0xf] %vm938_vm3, %v923_v23  ;;  %v662_v26 = vmax.f32 %v448_v22, %v617_v24  ;;  %v215_v27 = vpop.f32.mrf.mxu0  ;;  %v405_v28 = vpop.f32.mrf.mxu1 }
  0xef   :  { %v449_v32 = vmax.f32 %v215_v27, %v405_v28 }
  0xf0   :  { %v876_v29 = vmax.f32 %v662_v26, %v831_v25 }
  0xf2   :  { %v900_v30 = vmax.f32 %v876_v29, 0.0 }
  0xf4   :  { %v924_v31 = vpack.c.bf16 %v900_v30, %v900_v30 }
  0xf5   :  { %v619_v33 = vpop.f32.mrf.mxu2  ;;  %v833_v34 = vpop.f32.mrf.mxu3 }
  0xf6   :  { %949 = vst.msk [vmem:[%s1677_s2 + $0x28] sm:$0xf] %vm938_vm3, %v924_v31  ;;  %v663_v35 = vmax.f32 %v449_v32, %v619_v33  ;;  %v218_v36 = vpop.f32.mrf.mxu0  ;;  %v408_v37 = vpop.f32.mrf.mxu1 }
  0xf7   :  { %v450_v40 = vmax.f32 %v218_v36, %v408_v37 }
  0xf8   :  { %v877_v38 = vmax.f32 %v663_v35, %v833_v34 }
  0xfa   :  { %v901_v39 = vmax.f32 %v877_v38, 0.0 }
  0xfc   :  { %v925_v41 = vpack.c.bf16 %v901_v39, %v901_v39 }
  0xfd   :  { %v622_v42 = vpop.f32.mrf.mxu2  ;;  %v836_v43 = vpop.f32.mrf.mxu3 }
  0xfe   :  { %950 = vst.msk [vmem:[%s1677_s2 + $0x2c] sm:$0xf] %vm938_vm3, %v925_v41  ;;  %v664_v44 = vmax.f32 %v450_v40, %v622_v42  ;;  %v220_v45 = vpop.f32.mrf.mxu0  ;;  %v410_v46 = vpop.f32.mrf.mxu1 }
  0xff   :  { %v451_v50 = vmax.f32 %v220_v45, %v410_v46 }
 0x100   :  { %v878_v47 = vmax.f32 %v664_v44, %v836_v43 }
 0x102   :  { %v902_v48 = vmax.f32 %v878_v47, 0.0 }
 0x104   :  { %v926_v49 = vpack.c.bf16 %v902_v48, %v902_v48 }
 0x105   :  { %v624_v51 = vpop.f32.mrf.mxu2  ;;  %v838_v52 = vpop.f32.mrf.mxu3 }
 0x106   :  { %951 = vst.msk [vmem:[%s1677_s2 + $0x30] sm:$0xf] %vm938_vm3, %v926_v49  ;;  %v665_v53 = vmax.f32 %v451_v50, %v624_v51  ;;  %v223_v54 = vpop.f32.mrf.mxu0  ;;  %v413_v55 = vpop.f32.mrf.mxu1 }
 0x107   :  { %v452_v58 = vmax.f32 %v223_v54, %v413_v55 }
 0x108   :  { %v879_v56 = vmax.f32 %v665_v53, %v838_v52 }
 0x10a   :  { %v903_v57 = vmax.f32 %v879_v56, 0.0 }
 0x10c   :  { %v927_v59 = vpack.c.bf16 %v903_v57, %v903_v57 }
 0x10d   :  { %v627_v60 = vpop.f32.mrf.mxu2  ;;  %v841_v61 = vpop.f32.mrf.mxu3 }
 0x10e   :  { %952 = vst.msk [vmem:[%s1677_s2 + $0x34] sm:$0xf] %vm938_vm3, %v927_v59  ;;  %v666_v62 = vmax.f32 %v452_v58, %v627_v60  ;;  %v225_v63 = vpop.f32.mrf.mxu0  ;;  %v415_v0 = vpop.f32.mrf.mxu1 }
 0x10f   :  { %v453_v4 = vmax.f32 %v225_v63, %v415_v0 }
 0x110   :  { %v880_v1 = vmax.f32 %v666_v62, %v841_v61 }
 0x112   :  { %v904_v2 = vmax.f32 %v880_v1, 0.0 }
 0x114   :  { %v928_v3 = vpack.c.bf16 %v904_v2, %v904_v2 }
 0x115   :  { %v629_v5 = vpop.f32.mrf.mxu2  ;;  %v843_v6 = vpop.f32.mrf.mxu3 }
 0x116   :  { %953 = vst.msk [vmem:[%s1677_s2 + $0x38] sm:$0xf] %vm938_vm3, %v928_v3  ;;  %v667_v7 = vmax.f32 %v453_v4, %v629_v5  ;;  %v228_v8 = vpop.f32.mrf.mxu0  ;;  %v418_v9 = vpop.f32.mrf.mxu1 }
 0x117   :  { %v454_v12 = vmax.f32 %v228_v8, %v418_v9 }
 0x118   :  { %v881_v10 = vmax.f32 %v667_v7, %v843_v6 }
 0x11a   :  { %v905_v11 = vmax.f32 %v881_v10, 0.0 }
 0x11c   :  { %v929_v13 = vpack.c.bf16 %v905_v11, %v905_v11 }
 0x11d   :  { %v632_v14 = vpop.f32.mrf.mxu2  ;;  %v846_v15 = vpop.f32.mrf.mxu3 }
 0x11e   :  { %954 = vst.msk [vmem:[%s1677_s2 + $0x3c] sm:$0xf] %vm938_vm3, %v929_v13  ;;  %v668_v16 = vmax.f32 %v454_v12, %v632_v14  ;;  %v230_v17 = vpop.f32.mrf.mxu0  ;;  %v420_v18 = vpop.f32.mrf.mxu1 }
 0x11f   :  { %v455_v22 = vmax.f32 %v230_v17, %v420_v18 }
 0x120   :  { %v882_v19 = vmax.f32 %v668_v16, %v846_v15 }
 0x122   :  { %v906_v20 = vmax.f32 %v882_v19, 0.0 }
 0x124   :  { %v930_v21 = vpack.c.bf16 %v906_v20, %v906_v20 }
 0x125   :  { %v634_v23 = vpop.f32.mrf.mxu2  ;;  %v848_v24 = vpop.f32.mrf.mxu3 }
 0x126   :  { %955 = vst.msk [vmem:[%s1677_s2 + $0x40] sm:$0xf] %vm938_vm3, %v930_v21  ;;  %v669_v25 = vmax.f32 %v455_v22, %v634_v23  ;;  %v233_v26 = vpop.f32.mrf.mxu0  ;;  %v423_v27 = vpop.f32.mrf.mxu1 }
 0x127   :  { %v456_v30 = vmax.f32 %v233_v26, %v423_v27 }
 0x128   :  { %v883_v28 = vmax.f32 %v669_v25, %v848_v24 }
 0x12a   :  { %v907_v29 = vmax.f32 %v883_v28, 0.0 }
 0x12c   :  { %v931_v31 = vpack.c.bf16 %v907_v29, %v907_v29 }
 0x12d   :  { %v637_v32 = vpop.f32.mrf.mxu2  ;;  %v851_v33 = vpop.f32.mrf.mxu3 }
 0x12e   :  { %956 = vst.msk [vmem:[%s1677_s2 + $0x44] sm:$0xf] %vm938_vm3, %v931_v31  ;;  %v670_v34 = vmax.f32 %v456_v30, %v637_v32  ;;  %v235_v35 = vpop.f32.mrf.mxu0  ;;  %v425_v36 = vpop.f32.mrf.mxu1 }
 0x12f   :  { %v457_v40 = vmax.f32 %v235_v35, %v425_v36 }
 0x130   :  { %v884_v37 = vmax.f32 %v670_v34, %v851_v33 }
 0x132   :  { %v908_v38 = vmax.f32 %v884_v37, 0.0 }
 0x134   :  { %v932_v39 = vpack.c.bf16 %v908_v38, %v908_v38 }
 0x135   :  { %v639_v41 = vpop.f32.mrf.mxu2  ;;  %v853_v42 = vpop.f32.mrf.mxu3 }
 0x136   :  { %957 = vst.msk [vmem:[%s1677_s2 + $0x48] sm:$0xf] %vm938_vm3, %v932_v39  ;;  %v671_v43 = vmax.f32 %v457_v40, %v639_v41  ;;  %v238_v44 = vpop.f32.mrf.mxu0  ;;  %v428_v45 = vpop.f32.mrf.mxu1 }
 0x137   :  { %v458_v48 = vmax.f32 %v238_v44, %v428_v45 }
 0x138   :  { %v885_v46 = vmax.f32 %v671_v43, %v853_v42 }
 0x13a   :  { %v909_v47 = vmax.f32 %v885_v46, 0.0 }
 0x13c   :  { %v933_v49 = vpack.c.bf16 %v909_v47, %v909_v47 }
 0x13d   :  { %v642_v50 = vpop.f32.mrf.mxu2  ;;  %v856_v51 = vpop.f32.mrf.mxu3 }
 0x13e   :  { %958 = vst.msk [vmem:[%s1677_s2 + $0x4c] sm:$0xf] %vm938_vm3, %v933_v49  ;;  %v672_v52 = vmax.f32 %v458_v48, %v642_v50  ;;  %v240_v53 = vpop.f32.mrf.mxu0  ;;  %v430_v54 = vpop.f32.mrf.mxu1 }
 0x13f   :  { %v459_v58 = vmax.f32 %v240_v53, %v430_v54 }
 0x140   :  { %v886_v55 = vmax.f32 %v672_v52, %v856_v51 }
 0x142   :  { %v910_v56 = vmax.f32 %v886_v55, 0.0 }
 0x144   :  { %v934_v57 = vpack.c.bf16 %v910_v56, %v910_v56 }
 0x145   :  { %v644_v59 = vpop.f32.mrf.mxu2  ;;  %v858_v60 = vpop.f32.mrf.mxu3 }
 0x146   :  { %959 = vst.msk [vmem:[%s1677_s2 + $0x50] sm:$0xf] %vm938_vm3, %v934_v57  ;;  %v673_v61 = vmax.f32 %v459_v58, %v644_v59  ;;  %v243_v62 = vpop.f32.mrf.mxu0  ;;  %v433_v63 = vpop.f32.mrf.mxu1 }
 0x147   :  { %v460_v2 = vmax.f32 %v243_v62, %v433_v63 }
 0x148   :  { %v887_v0 = vmax.f32 %v673_v61, %v858_v60 }
 0x14a   :  { %v911_v1 = vmax.f32 %v887_v0, 0.0 }
 0x14c   :  { %v935_v3 = vpack.c.bf16 %v911_v1, %v911_v1 }
 0x14d   :  { %v647_v4 = vpop.f32.mrf.mxu2  ;;  %v861_v5 = vpop.f32.mrf.mxu3 }
 0x14e   :  { %960 = vst.msk [vmem:[%s1677_s2 + $0x54] sm:$0xf] %vm938_vm3, %v935_v3  ;;  %v674_v6 = vmax.f32 %v460_v2, %v647_v4  ;;  %v245_v8 = vpop.f32.mrf.mxu0  ;;  %v435_v9 = vpop.f32.mrf.mxu1 }
 0x14f   :  { %v461_v12 = vmax.f32 %v245_v8, %v435_v9 }
 0x150   :  { %v888_v7 = vmax.f32 %v674_v6, %v861_v5 }
 0x152   :  { %v912_v10 = vmax.f32 %v888_v7, 0.0 }
 0x154   :  { %v936_v11 = vpack.c.bf16 %v912_v10, %v912_v10 }
 0x155   :  { %v649_v13 = vpop.f32.mrf.mxu2  ;;  %v863_v15 = vpop.f32.mrf.mxu3 }
 0x156   :  { %961 = vst.msk [vmem:[%s1677_s2 + $0x58] sm:$0xf] %vm938_vm3, %v936_v11  ;;  %v675_v14 = vmax.f32 %v461_v12, %v649_v13 }
 0x158   :  { %v889_v16 = vmax.f32 %v675_v14, %v863_v15 }
 0x15a   :  { %v913_v17 = vmax.f32 %v889_v16, 0.0 }
 0x15c   :  { %v937_v18 = vpack.c.bf16 %v913_v17, %v913_v17 }
 0x15e   :  { %962 = vst.msk [vmem:[%s1677_s2 + $0x5c] sm:$0xf] %vm938_vm3, %v937_v18 }

// kernel: _lambda_.8
= control target key start
LH: loop header
LB: loop body
LE: loop exit
PB: predicated region body
PF: predicated region fallthrough
CT: control target
= control target key end

     0   :  { %vm672_vm0 = vcmask 523264   ;;  %s2320_s1 = inlined_call_operand.vmem [shape: bf16[576,128], index: 1, kind: input, shape index: {}]   ;;  %s2321_s0 = inlined_call_operand.vmem [shape: bf16[192,576], index: 0, kind: input, shape index: {}]   ;;  %s2322_s2 = inlined_call_operand.vmem [shape: bf16[192,128], index: 2, kind: output, shape index: {}]  }
   0x1   :  { %v1593_v0 = vld [vmem:[%s2320_s1 + $0x38] sm:$0xff]  ;;  %v1592_v1 = vld [vmem:[%s2320_s1 + $0x30] sm:$0xff]  ;;  %v1591_v2 = vld [vmem:[%s2320_s1 + $0x28] sm:$0xff] }
   0x2   :  { %1693 = vmatpush.bf16.msra.mxu1 %v1593_v0  ;;  %1694 = vmatpush.bf16.msra.mxu2 %v1593_v0  ;;  %v1590_v3 = vld [vmem:[%s2320_s1 + $0x20] sm:$0xff]  ;;  %v1589_v4 = vld [vmem:[%s2320_s1 + $0x18] sm:$0xff]  ;;  %v1588_v5 = vld [vmem:[%s2320_s1 + $0x10] sm:$0xff] }
   0x3   :  { %1695 = vmatpush.bf16.msra.mxu3 %v1593_v0  ;;  %709 = vmatpush.bf16.msra.mxu0 %v1593_v0  ;;  %v1587_v6 = vld [vmem:[%s2320_s1 + $0x8] sm:$0xff]  ;;  %v1586_v7 = vld [vmem:[%s2320_s1] sm:$0xff]  ;;  %v1192_v8 = vld [vmem:[%s2321_s0 + $0x78] sm:$0xf] }
   0x4   :  { %v1543_v9 = vld [vmem:[%s2321_s0 + $0x88] sm:$0xf0]  ;;  %v1252_v10 = vld [vmem:[%s2321_s0 + $0xf0] sm:$0xf]  ;;  %v1558_v11 = vld [vmem:[%s2321_s0 + $0x100] sm:$0xf0] }
   0x5   :  { %v1312_v12 = vld [vmem:[%s2321_s0 + $0x168] sm:$0xf]  ;;  %v1573_v13 = vld [vmem:[%s2321_s0 + $0x178] sm:$0xf0]  ;;  %v1132_v14 = vld [vmem:[%s2321_s0] sm:$0xf]  ;;  %v1193_v18 = vor.u32 %v1543_v9, %v1192_v8  ;;  %v1253_v19 = vor.u32 %v1558_v11, %v1252_v10 }
   0x6   :  { %1696 = vmatpush.bf16.msra.mxu1 %v1592_v1  ;;  %1697 = vmatpush.bf16.msra.mxu2 %v1592_v1  ;;  %v1528_v15 = vld [vmem:[%s2321_s0 + $0x10] sm:$0xf0]  ;;  %v1609_v16 = vld [vmem:[%s2320_s1 + $0xb8] sm:$0xff]  ;;  %v1313_v20 = vor.u32 %v1573_v13, %v1312_v12  ;;  %v1607_v28 = vld [vmem:[%s2320_s1 + $0xa8] sm:$0xff] }
   0x7   :  { %1698 = vmatpush.bf16.msra.mxu3 %v1592_v1  ;;  %710 = vmatpush.bf16.msra.mxu0 %v1592_v1  ;;  %v1617_v17 = vld [vmem:[%s2320_s1 + $0xf8] sm:$0xff]  ;;  %v1133_v21 = vor.u32 %v1528_v15, %v1132_v14  ;;  %v1608_v24 = vld [vmem:[%s2320_s1 + $0xb0] sm:$0xff]  ;;  %v1615_v29 = vld [vmem:[%s2320_s1 + $0xe8] sm:$0xff] }
   0x8   :  { %v1601_v22 = vld [vmem:[%s2320_s1 + $0x78] sm:$0xff]  ;;  %v1616_v25 = vld [vmem:[%s2320_s1 + $0xf0] sm:$0xff]  ;;  %v1599_v30 = vld [vmem:[%s2320_s1 + $0x68] sm:$0xff] }
   0x9   :  { %v1621_v23 = vld [vmem:[%s2320_s1 + $0x118] sm:$0xff]  ;;  %v1600_v26 = vld [vmem:[%s2320_s1 + $0x70] sm:$0xff]  ;;  %v1619_v31 = vld [vmem:[%s2320_s1 + $0x108] sm:$0xff] }
   0xa   :  { %1699 = vmatpush.bf16.msra.mxu1 %v1591_v2  ;;  %1700 = vmatpush.bf16.msra.mxu2 %v1591_v2  ;;  %v1620_v27 = vld [vmem:[%s2320_s1 + $0x110] sm:$0xff]  ;;  %v1212_v32 = vld [vmem:[%s2321_s0 + $0xa0] sm:$0xf]  ;;  %v1272_v36 = vld [vmem:[%s2321_s0 + $0x118] sm:$0xf] }
   0xb   :  { %1701 = vmatpush.bf16.msra.mxu3 %v1591_v2  ;;  %711 = vmatpush.bf16.msra.mxu0 %v1591_v2  ;;  %v1606_v33 = vld [vmem:[%s2320_s1 + $0xa0] sm:$0xff]  ;;  %v1548_v35 = vld [vmem:[%s2321_s0 + $0xb0] sm:$0xf0]  ;;  %v1563_v37 = vld [vmem:[%s2321_s0 + $0x128] sm:$0xf0] }
   0xc   :  { %v1614_v34 = vld [vmem:[%s2320_s1 + $0xe0] sm:$0xff]  ;;  %v1332_v38 = vld [vmem:[%s2321_s0 + $0x190] sm:$0xf]  ;;  %v1152_v40 = vld [vmem:[%s2321_s0 + $0x28] sm:$0xf]  ;;  %v1213_v46 = vor.u32 %v1548_v35, %v1212_v32  ;;  %v1273_v47 = vor.u32 %v1563_v37, %v1272_v36 }
   0xd   :  { %v1578_v39 = vld [vmem:[%s2321_s0 + $0x1a0] sm:$0xf0]  ;;  %v1533_v41 = vld [vmem:[%s2321_s0 + $0x38] sm:$0xf0]  ;;  %v1604_v51 = vld [vmem:[%s2320_s1 + $0x90] sm:$0xff] }
   0xe   :  { %1702 = vmatpush.bf16.msra.mxu1 %v1590_v3  ;;  %1703 = vmatpush.bf16.msra.mxu2 %v1590_v3  ;;  %v1598_v42 = vld [vmem:[%s2320_s1 + $0x60] sm:$0xff]  ;;  %v1605_v44 = vld [vmem:[%s2320_s1 + $0x98] sm:$0xff]  ;;  %v1333_v48 = vor.u32 %v1578_v39, %v1332_v38  ;;  %v1153_v49 = vor.u32 %v1533_v41, %v1152_v40  ;;  %v1612_v52 = vld [vmem:[%s2320_s1 + $0xd0] sm:$0xff] }
   0xf   :  { %1704 = vmatpush.bf16.msra.mxu3 %v1590_v3  ;;  %712 = vmatpush.bf16.msra.mxu0 %v1590_v3  ;;  %v1618_v43 = vld [vmem:[%s2320_s1 + $0x100] sm:$0xff]  ;;  %v1613_v45 = vld [vmem:[%s2320_s1 + $0xd8] sm:$0xff]  ;;  %v1596_v53 = vld [vmem:[%s2320_s1 + $0x50] sm:$0xff] }
  0x10   :  { %v1597_v50 = vld [vmem:[%s2320_s1 + $0x58] sm:$0xff]  ;;  %v1603_v54 = vld [vmem:[%s2320_s1 + $0x88] sm:$0xff]  ;;  %v1602_v57 = vld [vmem:[%s2320_s1 + $0x80] sm:$0xff] }
  0x11   :  { %v1611_v55 = vld [vmem:[%s2320_s1 + $0xc8] sm:$0xff]  ;;  %v1610_v58 = vld [vmem:[%s2320_s1 + $0xc0] sm:$0xff]  ;;  %v1553_v60 = vld [vmem:[%s2321_s0 + $0xd8] sm:$0xf0] }
  0x12   :  { %1705 = vmatpush.bf16.msra.mxu1 %v1589_v4  ;;  %1706 = vmatpush.bf16.msra.mxu2 %v1589_v4  ;;  %v1595_v56 = vld [vmem:[%s2320_s1 + $0x48] sm:$0xff]  ;;  %v1292_v61 = vld [vmem:[%s2321_s0 + $0x140] sm:$0xf]  ;;  %v1568_v62 = vld [vmem:[%s2321_s0 + $0x150] sm:$0xf0] }
  0x13   :  { %1707 = vmatpush.bf16.msra.mxu3 %v1589_v4  ;;  %713 = vmatpush.bf16.msra.mxu0 %v1589_v4  ;;  %v1232_v59 = vld [vmem:[%s2321_s0 + $0xc8] sm:$0xf]  ;;  %v1352_v63 = vld [vmem:[%s2321_s0 + $0x1b8] sm:$0xf]  ;;  %v1583_v0 = vld [vmem:[%s2321_s0 + $0x1c8] sm:$0xf0] }
  0x14   :  { %v1172_v1 = vld [vmem:[%s2321_s0 + $0x50] sm:$0xf]  ;;  %v1538_v2 = vld [vmem:[%s2321_s0 + $0x60] sm:$0xf0]  ;;  %v1233_v4 = vor.u32 %v1553_v60, %v1232_v59  ;;  %v1134_v9 = vld [vmem:[%s2321_s0 + $0x14] sm:$0xf0] }
  0x15   :  { %v1594_v3 = vld [vmem:[%s2320_s1 + $0x40] sm:$0xff]  ;;  %v1140_v10 = vld [vmem:[%s2321_s0 + $0x8] sm:$0xf]  ;;  %v1529_v11 = vld [vmem:[%s2321_s0 + $0x18] sm:$0xf0] }
  0x16   :  { %1708 = vmatpush.bf16.msra.mxu1 %v1588_v5  ;;  %1709 = vmatpush.bf16.msra.mxu2 %v1588_v5  ;;  %v1526_v8 = vld [vmem:[%s2321_s0 + $0x4] sm:$0xf]  ;;  %v1527_v12 = vld [vmem:[%s2321_s0 + $0xc] sm:$0xf]  ;;  %v1142_v13 = vld [vmem:[%s2321_s0 + $0x1c] sm:$0xf0] }
  0x17   :  { %1710 = vmatpush.bf16.msra.mxu3 %v1588_v5  ;;  %714 = vmatpush.bf16.msra.mxu0 %v1588_v5  ;;  %v1293_v5 = vor.u32 %v1568_v62, %v1292_v61  ;;  %v1148_v14 = vld [vmem:[%s2321_s0 + $0x10] sm:$0xf]  ;;  %v1530_v15 = vld [vmem:[%s2321_s0 + $0x20] sm:$0xf0]  ;;  %v1536_v32 = vld [vmem:[%s2321_s0 + $0x54] sm:$0xf] }
  0x18   :  { %v1539_v35 = vld [vmem:[%s2321_s0 + $0x68] sm:$0xf0]  ;;  %v1537_v36 = vld [vmem:[%s2321_s0 + $0x5c] sm:$0xf]  ;;  %v1182_v37 = vld [vmem:[%s2321_s0 + $0x6c] sm:$0xf0] }
  0x19   :  { %v1188_v38 = vld [vmem:[%s2321_s0 + $0x60] sm:$0xf]  ;;  %v1540_v39 = vld [vmem:[%s2321_s0 + $0x70] sm:$0xf0]  ;;  %v1549_v59 = vld [vmem:[%s2321_s0 + $0xb8] sm:$0xf0] }
  0x1a   :  { %1711 = vmatpush.bf16.msra.mxu1 %v1587_v6  ;;  %1712 = vmatpush.bf16.msra.mxu2 %v1587_v6  ;;  %v1547_v60 = vld [vmem:[%s2321_s0 + $0xac] sm:$0xf]  ;;  %v1222_v61 = vld [vmem:[%s2321_s0 + $0xbc] sm:$0xf0]  ;;  %v1228_v62 = vld [vmem:[%s2321_s0 + $0xb0] sm:$0xf] }
  0x1b   :  { %1713 = vmatpush.bf16.msra.mxu3 %v1587_v6  ;;  %715 = vmatpush.bf16.msra.mxu0 %v1587_v6  ;;  %v1353_v6 = vor.u32 %v1583_v0, %v1352_v63  ;;  %v1550_v63 = vld [vmem:[%s2321_s0 + $0xc0] sm:$0xf0] }
  0x1e   :  { %1714 = vmatpush.bf16.msra.mxu1 %v1586_v7  ;;  %1715 = vmatpush.bf16.msra.mxu2 %v1586_v7 }
  0x1f   :  { %1716 = vmatpush.bf16.msra.mxu3 %v1586_v7  ;;  %716 = vmatpush.bf16.msra.mxu0 %v1586_v7  ;;  %v1173_v7 = vor.u32 %v1538_v2, %v1172_v1  ;;  %v1225_v2 = vor.u32 %v1547_v60, %v1222_v61 }
  0x21   :  { %732 = vmatmul.bf16.vlgmr.msra.gmra.mxu1 %v1193_v18  ;;  %747 = vmatmul.bf16.vlgmr.msra.gmra.mxu2 %v1253_v19  ;;  %v1145_v18 = vor.u32 %v1527_v12, %v1142_v13  ;;  %v1149_v19 = vor.u32 %v1530_v15, %v1148_v14 }
  0x22   :  { %847 = vmatpush.bf16.msrb.mxu2 %v1609_v16  ;;  %762 = vmatmul.bf16.vlgmr.msra.gmra.mxu3 %v1313_v20  ;;  %v1137_v16 = vor.u32 %v1526_v8, %v1134_v9  ;;  %v1531_v20 = vld [vmem:[%s2321_s0 + $0x2c] sm:$0xf]  ;;  %v1552_v8 = vld [vmem:[%s2321_s0 + $0xd4] sm:$0xf]  ;;  %v1242_v9 = vld [vmem:[%s2321_s0 + $0xe4] sm:$0xf0] }
  0x23   :  { %916 = vmatpush.bf16.msrb.mxu3 %v1617_v17  ;;  %717 = vmatmul.bf16.vlgmr.msra.gmra.mxu0 %v1133_v21  ;;  %v1141_v17 = vor.u32 %v1529_v11, %v1140_v10  ;;  %v1154_v21 = vld [vmem:[%s2321_s0 + $0x3c] sm:$0xf0]  ;;  %v1248_v10 = vld [vmem:[%s2321_s0 + $0xd8] sm:$0xf]  ;;  %v1555_v11 = vld [vmem:[%s2321_s0 + $0xe8] sm:$0xf0]  ;;  %v1245_v15 = vor.u32 %v1552_v8, %v1242_v9 }
  0x24   :  { %778 = vmatpush.bf16.msrb.mxu1 %v1601_v22  ;;  %989 = vmatpush.bf16.msrb.mxu0 %v1621_v23  ;;  %v1160_v22 = vld [vmem:[%s2321_s0 + $0x30] sm:$0xf]  ;;  %v1534_v23 = vld [vmem:[%s2321_s0 + $0x40] sm:$0xf0] }
  0x26   :  { %848 = vmatpush.bf16.msrb.mxu2 %v1608_v24  ;;  %v1532_v24 = vld [vmem:[%s2321_s0 + $0x34] sm:$0xf] }
  0x27   :  { %917 = vmatpush.bf16.msrb.mxu3 %v1616_v25  ;;  %v1162_v25 = vld [vmem:[%s2321_s0 + $0x44] sm:$0xf0] }
  0x28   :  { %779 = vmatpush.bf16.msrb.mxu1 %v1600_v26  ;;  %990 = vmatpush.bf16.msrb.mxu0 %v1620_v27  ;;  %v1168_v26 = vld [vmem:[%s2321_s0 + $0x38] sm:$0xf]  ;;  %v1535_v27 = vld [vmem:[%s2321_s0 + $0x48] sm:$0xf0] }
  0x2a   :  { %849 = vmatpush.bf16.msrb.mxu2 %v1607_v28  ;;  %v1157_v28 = vor.u32 %v1531_v20, %v1154_v21 }
  0x2b   :  { %918 = vmatpush.bf16.msrb.mxu3 %v1615_v29  ;;  %v1161_v29 = vor.u32 %v1534_v23, %v1160_v22  ;;  %v1556_v22 = vld [vmem:[%s2321_s0 + $0xf4] sm:$0xf]  ;;  %v1254_v23 = vld [vmem:[%s2321_s0 + $0x104] sm:$0xf0] }
  0x2c   :  { %780 = vmatpush.bf16.msrb.mxu1 %v1599_v30  ;;  %991 = vmatpush.bf16.msrb.mxu0 %v1619_v31  ;;  %v1165_v30 = vor.u32 %v1532_v24, %v1162_v25  ;;  %v1169_v31 = vor.u32 %v1535_v27, %v1168_v26  ;;  %v1260_v24 = vld [vmem:[%s2321_s0 + $0xf8] sm:$0xf]  ;;  %v1559_v25 = vld [vmem:[%s2321_s0 + $0x108] sm:$0xf0]  ;;  %v1557_v26 = vld [vmem:[%s2321_s0 + $0xfc] sm:$0xf] }
  0x2d   :  { %v1262_v27 = vld [vmem:[%s2321_s0 + $0x10c] sm:$0xf0] }
  0x2e   :  { %850 = vmatpush.bf16.msrb.mxu2 %v1606_v33  ;;  %v1174_v33 = vld [vmem:[%s2321_s0 + $0x64] sm:$0xf0] }
  0x2f   :  { %919 = vmatpush.bf16.msrb.mxu3 %v1614_v34  ;;  %v1180_v34 = vld [vmem:[%s2321_s0 + $0x58] sm:$0xf]  ;;  %v1177_v40 = vor.u32 %v1536_v32, %v1174_v33  ;;  %v1257_v32 = vor.u32 %v1556_v22, %v1254_v23  ;;  %v1261_v33 = vor.u32 %v1559_v25, %v1260_v24 }
  0x30   :  { %781 = vmatpush.bf16.msrb.mxu1 %v1598_v42  ;;  %992 = vmatpush.bf16.msrb.mxu0 %v1618_v43  ;;  %v1181_v41 = vor.u32 %v1539_v35, %v1180_v34  ;;  %v1185_v42 = vor.u32 %v1537_v36, %v1182_v37  ;;  %v1189_v43 = vor.u32 %v1540_v39, %v1188_v38 }
  0x31   :  { %737 = vmatmul.bf16.gmra.mxu1 %v1213_v46  ;;  %752 = vmatmul.bf16.gmra.mxu2 %v1273_v47  ;;  %v1200_v46 = vld [vmem:[%s2321_s0 + $0x80] sm:$0xf]  ;;  %v1544_v47 = vld [vmem:[%s2321_s0 + $0x90] sm:$0xf0]  ;;  %v1265_v35 = vor.u32 %v1557_v26, %v1262_v27  ;;  %v1571_v26 = vld [vmem:[%s2321_s0 + $0x16c] sm:$0xf] }
  0x32   :  { %851 = vmatpush.bf16.msrb.mxu2 %v1605_v44  ;;  %767 = vmatmul.bf16.gmra.mxu3 %v1333_v48  ;;  %v1541_v44 = vld [vmem:[%s2321_s0 + $0x7c] sm:$0xf]  ;;  %v1542_v48 = vld [vmem:[%s2321_s0 + $0x84] sm:$0xf]  ;;  %v1314_v27 = vld [vmem:[%s2321_s0 + $0x17c] sm:$0xf0] }
  0x33   :  { %920 = vmatpush.bf16.msrb.mxu3 %v1613_v45  ;;  %722 = vmatmul.bf16.gmra.mxu0 %v1153_v49  ;;  %v1194_v45 = vld [vmem:[%s2321_s0 + $0x8c] sm:$0xf0]  ;;  %v1202_v49 = vld [vmem:[%s2321_s0 + $0x94] sm:$0xf0] }
  0x34   :  { %782 = vmatpush.bf16.msrb.mxu1 %v1597_v50  ;;  %v1208_v50 = vld [vmem:[%s2321_s0 + $0x88] sm:$0xf] }
  0x36   :  { %852 = vmatpush.bf16.msrb.mxu2 %v1604_v51  ;;  %v1545_v51 = vld [vmem:[%s2321_s0 + $0x98] sm:$0xf0] }
  0x37   :  { %921 = vmatpush.bf16.msrb.mxu3 %v1612_v52  ;;  %v1197_v52 = vor.u32 %v1541_v44, %v1194_v45  ;;  %v1280_v44 = vld [vmem:[%s2321_s0 + $0x120] sm:$0xf]  ;;  %v1564_v45 = vld [vmem:[%s2321_s0 + $0x130] sm:$0xf0] }
  0x38   :  { %783 = vmatpush.bf16.msrb.mxu1 %v1596_v53  ;;  %v1201_v53 = vor.u32 %v1544_v47, %v1200_v46  ;;  %v1562_v46 = vld [vmem:[%s2321_s0 + $0x124] sm:$0xf]  ;;  %v1282_v47 = vld [vmem:[%s2321_s0 + $0x134] sm:$0xf0] }
  0x3a   :  { %853 = vmatpush.bf16.msrb.mxu2 %v1603_v54  ;;  %v1205_v54 = vor.u32 %v1542_v48, %v1202_v49  ;;  %v1288_v48 = vld [vmem:[%s2321_s0 + $0x128] sm:$0xf]  ;;  %v1565_v49 = vld [vmem:[%s2321_s0 + $0x138] sm:$0xf0] }
  0x3b   :  { %922 = vmatpush.bf16.msrb.mxu3 %v1611_v55  ;;  %v1209_v55 = vor.u32 %v1545_v51, %v1208_v50 }
  0x3c   :  { %784 = vmatpush.bf16.msrb.mxu1 %v1595_v56  ;;  %v1546_v56 = vld [vmem:[%s2321_s0 + $0xa4] sm:$0xf] }
  0x3e   :  { %854 = vmatpush.bf16.msrb.mxu2 %v1602_v57  ;;  %v1214_v57 = vld [vmem:[%s2321_s0 + $0xb4] sm:$0xf0] }
  0x3f   :  { %923 = vmatpush.bf16.msrb.mxu3 %v1610_v58  ;;  %v1220_v58 = vld [vmem:[%s2321_s0 + $0xa8] sm:$0xf]  ;;  %v1217_v0 = vor.u32 %v1546_v56, %v1214_v57  ;;  %v1289_v56 = vor.u32 %v1565_v49, %v1288_v48 }
  0x40   :  { %785 = vmatpush.bf16.msrb.mxu1 %v1594_v3  ;;  %v1221_v1 = vor.u32 %v1549_v59, %v1220_v58  ;;  %v1229_v3 = vor.u32 %v1550_v63, %v1228_v62  ;;  %v1566_v62 = vld [vmem:[%s2321_s0 + $0x144] sm:$0xf]  ;;  %v1294_v63 = vld [vmem:[%s2321_s0 + $0x154] sm:$0xf0] }
  0x41   :  { %742 = vmatmul.bf16.gmra.mxu1 %v1233_v4  ;;  %757 = vmatmul.bf16.gmra.mxu2 %v1293_v5  ;;  %v1551_v4 = vld [vmem:[%s2321_s0 + $0xcc] sm:$0xf]  ;;  %v1234_v5 = vld [vmem:[%s2321_s0 + $0xdc] sm:$0xf0]  ;;  %v1297_v8 = vor.u32 %v1566_v62, %v1294_v63 }
  0x42   :  { %772 = vmatmul.bf16.gmra.mxu3 %v1353_v6  ;;  %v1240_v6 = vld [vmem:[%s2321_s0 + $0xd0] sm:$0xf]  ;;  %v1237_v12 = vor.u32 %v1551_v4, %v1234_v5  ;;  %v1570_v5 = vld [vmem:[%s2321_s0 + $0x160] sm:$0xf0] }
  0x43   :  { %727 = vmatmul.bf16.gmra.mxu0 %v1173_v7  ;;  %v1554_v7 = vld [vmem:[%s2321_s0 + $0xe0] sm:$0xf0]  ;;  %v1308_v4 = vld [vmem:[%s2321_s0 + $0x150] sm:$0xf] }
  0x44   :  { %v1241_v13 = vor.u32 %v1554_v7, %v1240_v6 }
  0x51   :  { %786 = vmatmul.bf16.vlgmr.msrb.gmra.mxu1 %v1137_v16  ;;  %855 = vmatmul.bf16.vlgmr.msrb.gmra.mxu2 %v1141_v17  ;;  %v1249_v16 = vor.u32 %v1555_v11, %v1248_v10 }
  0x52   :  { %924 = vmatmul.bf16.vlgmr.msrb.gmra.mxu3 %v1145_v18 }
  0x53   :  { %1514 = vmatmul.msk.bf16.vlgmr.msrb.gmra.mxu0 %vm672_vm0, %v1149_v19 }
  0x61   :  { %791 = vmatmul.bf16.gmra.mxu1 %v1157_v28  ;;  %860 = vmatmul.bf16.gmra.mxu2 %v1161_v29  ;;  %v1268_v28 = vld [vmem:[%s2321_s0 + $0x100] sm:$0xf]  ;;  %v1560_v29 = vld [vmem:[%s2321_s0 + $0x110] sm:$0xf0] }
  0x62   :  { %929 = vmatmul.bf16.gmra.mxu3 %v1165_v30  ;;  %v1269_v36 = vor.u32 %v1560_v29, %v1268_v28  ;;  %v1320_v28 = vld [vmem:[%s2321_s0 + $0x170] sm:$0xf]  ;;  %v1572_v29 = vld [vmem:[%s2321_s0 + $0x174] sm:$0xf] }
  0x63   :  { %1515 = vmatmul.msk.bf16.gmra.mxu0 %vm672_vm0, %v1169_v31 }
  0x71   :  { %796 = vmatmul.bf16.gmra.mxu1 %v1177_v40  ;;  %865 = vmatmul.bf16.gmra.mxu2 %v1181_v41 }
  0x72   :  { %934 = vmatmul.bf16.gmra.mxu3 %v1185_v42  ;;  %v1561_v42 = vld [vmem:[%s2321_s0 + $0x11c] sm:$0xf] }
  0x73   :  { %1516 = vmatmul.msk.bf16.gmra.mxu0 %vm672_vm0, %v1189_v43  ;;  %v1274_v43 = vld [vmem:[%s2321_s0 + $0x12c] sm:$0xf0] }
  0x81   :  { %801 = vmatmul.bf16.gmra.mxu1 %v1197_v52  ;;  %870 = vmatmul.bf16.gmra.mxu2 %v1201_v53  ;;  %v1277_v52 = vor.u32 %v1561_v42, %v1274_v43  ;;  %v1281_v53 = vor.u32 %v1564_v45, %v1280_v44  ;;  %v1575_v42 = vld [vmem:[%s2321_s0 + $0x188] sm:$0xf0] }
  0x82   :  { %939 = vmatmul.bf16.gmra.mxu3 %v1205_v54 }
  0x83   :  { %1517 = vmatmul.msk.bf16.gmra.mxu0 %vm672_vm0, %v1209_v55  ;;  %v1285_v55 = vor.u32 %v1562_v46, %v1282_v47  ;;  %v1317_v46 = vor.u32 %v1571_v26, %v1314_v27 }
  0x91   :  { %806 = vmatmul.bf16.gmra.mxu1 %v1217_v0  ;;  %875 = vmatmul.bf16.gmra.mxu2 %v1221_v1  ;;  %v1300_v0 = vld [vmem:[%s2321_s0 + $0x148] sm:$0xf]  ;;  %v1569_v1 = vld [vmem:[%s2321_s0 + $0x158] sm:$0xf0] }
  0x92   :  { %944 = vmatmul.bf16.gmra.mxu3 %v1225_v2  ;;  %v1567_v2 = vld [vmem:[%s2321_s0 + $0x14c] sm:$0xf]  ;;  %v1301_v9 = vor.u32 %v1569_v1, %v1300_v0 }
  0x93   :  { %1518 = vmatmul.msk.bf16.gmra.mxu0 %vm672_vm0, %v1229_v3  ;;  %v1302_v3 = vld [vmem:[%s2321_s0 + $0x15c] sm:$0xf0] }
  0x94   :  { %v1305_v11 = vor.u32 %v1567_v2, %v1302_v3 }
  0x9e   :  { %v2061_v14 = vpop.f32.mrf.mxu1 }
  0xa0   :  { %v2063_v17 = vpop.f32.mrf.mxu0 }
  0xa1   :  { %811 = vmatmul.bf16.gmra.mxu1 %v1237_v12  ;;  %880 = vmatmul.bf16.gmra.mxu2 %v1241_v13  ;;  %v1309_v12 = vor.u32 %v1570_v5, %v1308_v4 }
  0xa2   :  { %949 = vmatmul.bf16.gmra.mxu3 %v1245_v15 }
  0xa3   :  { %1519 = vmatmul.msk.bf16.gmra.mxu0 %vm672_vm0, %v1249_v16 }
  0xa4   :  { %v2066_v18 = vpop.f32.mrf.mxu2 }
  0xa5   :  { %v2068_v19 = vpop.f32.mrf.mxu3 }
  0xa6   :  { %v2070_v20 = vpop.f32.mrf.mxu1 }
  0xa8   :  { %v2072_v21 = vpop.f32.mrf.mxu0 }
  0xac   :  { %v2098_v30 = vpop.f32.mrf.mxu2 }
  0xad   :  { %v2100_v31 = vpop.f32.mrf.mxu3 }
  0xae   :  { %v2102_v34 = vpop.f32.mrf.mxu1 }
  0xb0   :  { %v2104_v37 = vpop.f32.mrf.mxu0 }
  0xb1   :  { %816 = vmatmul.bf16.gmra.mxu1 %v1257_v32  ;;  %885 = vmatmul.bf16.gmra.mxu2 %v1261_v33 }
  0xb2   :  { %954 = vmatmul.bf16.gmra.mxu3 %v1265_v35  ;;  %v1322_v35 = vld [vmem:[%s2321_s0 + $0x184] sm:$0xf0] }
  0xb3   :  { %1520 = vmatmul.msk.bf16.gmra.mxu0 %vm672_vm0, %v1269_v36  ;;  %v1328_v36 = vld [vmem:[%s2321_s0 + $0x178] sm:$0xf]  ;;  %v1325_v49 = vor.u32 %v1572_v29, %v1322_v35 }
  0xb4   :  { %v2107_v38 = vpop.f32.mrf.mxu2 }
  0xb5   :  { %v2109_v39 = vpop.f32.mrf.mxu3 }
  0xb6   :  { %v2111_v40 = vpop.f32.mrf.mxu1 }
  0xb8   :  { %v2113_v41 = vpop.f32.mrf.mxu0 }
  0xbc   :  { %v2139_v50 = vpop.f32.mrf.mxu2 }
  0xbd   :  { %v2141_v51 = vpop.f32.mrf.mxu3 }
  0xbe   :  { %v2143_v54 = vpop.f32.mrf.mxu1 }
  0xc0   :  { %v2145_v57 = vpop.f32.mrf.mxu0 }
  0xc1   :  { %821 = vmatmul.bf16.gmra.mxu1 %v1277_v52  ;;  %890 = vmatmul.bf16.gmra.mxu2 %v1281_v53 }
  0xc2   :  { %959 = vmatmul.bf16.gmra.mxu3 %v1285_v55 }
  0xc3   :  { %1521 = vmatmul.msk.bf16.gmra.mxu0 %vm672_vm0, %v1289_v56 }
  0xc4   :  { %v2148_v58 = vpop.f32.mrf.mxu2 }
  0xc5   :  { %v2150_v59 = vpop.f32.mrf.mxu3 }
  0xc6   :  { %v2152_v60 = vpop.f32.mrf.mxu1 }
  0xc8   :  { %v2154_v61 = vpop.f32.mrf.mxu0 }
  0xcc   :  { %v2180_v6 = vpop.f32.mrf.mxu2 }
  0xcd   :  { %v2182_v7 = vpop.f32.mrf.mxu3 }
  0xce   :  { %v787_v10 = vpop.f32.mrf.mxu1 }
  0xcf   :  { %v788_v16 = vadd.f32 %v787_v10, %v2063_v17  ;;  %v1574_v17 = vld [vmem:[%s2321_s0 + $0x180] sm:$0xf0]  ;;  %v1334_v10 = vld [vmem:[%s2321_s0 + $0x1a4] sm:$0xf0] }
  0xd0   :  { %v994_v13 = vpop.f32.mrf.mxu0  ;;  %v1321_v47 = vor.u32 %v1574_v17, %v1320_v28 }
  0xd1   :  { %826 = vmatmul.bf16.gmra.mxu1 %v1297_v8  ;;  %895 = vmatmul.bf16.gmra.mxu2 %v1301_v9  ;;  %v1576_v9 = vld [vmem:[%s2321_s0 + $0x194] sm:$0xf] }
  0xd2   :  { %964 = vmatmul.bf16.gmra.mxu3 %v1305_v11  ;;  %v1579_v11 = vld [vmem:[%s2321_s0 + $0x1a8] sm:$0xf0]  ;;  %v1337_v27 = vor.u32 %v1576_v9, %v1334_v10 }
  0xd3   :  { %1522 = vmatmul.msk.bf16.gmra.mxu0 %vm672_vm0, %v1309_v12  ;;  %v1577_v12 = vld [vmem:[%s2321_s0 + $0x19c] sm:$0xf] }
  0xd4   :  { %v856_v15 = vpop.f32.mrf.mxu2 }
  0xd5   :  { %v925_v22 = vpop.f32.mrf.mxu3  ;;  %v857_v24 = vadd.f32 %v856_v15, %v788_v16  ;;  %v1342_v16 = vld [vmem:[%s2321_s0 + $0x1ac] sm:$0xf0] }
  0xd6   :  { %v789_v23 = vpop.f32.mrf.mxu1  ;;  %v1345_v29 = vor.u32 %v1577_v12, %v1342_v16 }
  0xd7   :  { %v926_v32 = vadd.f32 %v925_v22, %v857_v24  ;;  %v790_v33 = vadd.f32 %v789_v23, %v2072_v21  ;;  %v1329_v21 = vor.u32 %v1575_v42, %v1328_v36  ;;  %v1348_v22 = vld [vmem:[%s2321_s0 + $0x1a0] sm:$0xf]  ;;  %v1580_v23 = vld [vmem:[%s2321_s0 + $0x1b0] sm:$0xf0] }
  0xd8   :  { %v996_v25 = vpop.f32.mrf.mxu0 }
  0xd9   :  { %v995_v52 = vadd.f32 %v994_v13, %v926_v32 }
  0xdb   :  { %v1054_v62 = vmax.f32 %v995_v52, 0.0  ;;  %v1581_v52 = vld [vmem:[%s2321_s0 + $0x1bc] sm:$0xf] }
  0xdc   :  { %v858_v43 = vpop.f32.mrf.mxu2 }
  0xdd   :  { %v859_v44 = vadd.f32 %v858_v43, %v790_v33  ;;  %v927_v45 = vpop.f32.mrf.mxu3 }
  0xde   :  { %v792_v48 = vpop.f32.mrf.mxu1 }
  0xdf   :  { %v928_v53 = vadd.f32 %v927_v45, %v859_v44  ;;  %v793_v2 = vadd.f32 %v792_v48, %v2104_v37  ;;  %v1340_v37 = vld [vmem:[%s2321_s0 + $0x198] sm:$0xf] }
  0xe0   :  { %v999_v55 = vpop.f32.mrf.mxu0  ;;  %v1341_v28 = vor.u32 %v1579_v11, %v1340_v37 }
  0xe1   :  { %v997_v56 = vadd.f32 %v996_v25, %v928_v53  ;;  %831 = vmatmul.bf16.gmra.mxu1 %v1317_v46  ;;  %900 = vmatmul.bf16.gmra.mxu2 %v1321_v47  ;;  %v1354_v53 = vld [vmem:[%s2321_s0 + $0x1cc] sm:$0xf0] }
  0xe2   :  { %969 = vmatmul.bf16.gmra.mxu3 %v1325_v49 }
  0xe3   :  { %1523 = vmatmul.msk.bf16.gmra.mxu0 %vm672_vm0, %v1329_v21  ;;  %v1055_v63 = vmax.f32 %v997_v56, 0.0  ;;  %v1582_v56 = vld [vmem:[%s2321_s0 + $0x1c4] sm:$0xf] }
  0xe4   :  { %v861_v0 = vpop.f32.mrf.mxu2 }
  0xe5   :  { %v1625_v1 = vpack.c.bf16 %v1055_v63, %v1054_v62  ;;  %v930_v3 = vpop.f32.mrf.mxu3  ;;  %v862_v5 = vadd.f32 %v861_v0, %v793_v2  ;;  %v1362_v0 = vld [vmem:[%s2321_s0 + $0x1d4] sm:$0xf0]  ;;  %v1585_v2 = vld [vmem:[%s2321_s0 + $0x1d8] sm:$0xf0] }
  0xe6   :  { %v794_v4 = vpop.f32.mrf.mxu1  ;;  %v1365_v37 = vor.u32 %v1582_v56, %v1362_v0 }
  0xe7   :  { %1626 = vst [vmem:[%s2322_s2] sm:$0xff] %v1625_v1   ;;  %v931_v13 = vadd.f32 %v930_v3, %v862_v5  ;;  %v795_v15 = vadd.f32 %v794_v4, %v2113_v41  ;;  %v1349_v41 = vor.u32 %v1580_v23, %v1348_v22  ;;  %v1368_v1 = vld [vmem:[%s2321_s0 + $0x1c8] sm:$0xf] }
  0xe8   :  { %v1001_v8 = vpop.f32.mrf.mxu0 }
  0xe9   :  { %v1000_v32 = vadd.f32 %v999_v55, %v931_v13  ;;  %v1584_v55 = vld [vmem:[%s2321_s0 + $0x1d0] sm:$0xf0] }
  0xeb   :  { %v1056_v42 = vmax.f32 %v1000_v32, 0.0 }
  0xec   :  { %v863_v24 = vpop.f32.mrf.mxu2 }
  0xed   :  { %v864_v25 = vadd.f32 %v863_v24, %v795_v15  ;;  %v932_v26 = vpop.f32.mrf.mxu3 }
  0xee   :  { %v797_v17 = vpop.f32.mrf.mxu1 }
  0xef   :  { %v933_v33 = vadd.f32 %v932_v26, %v864_v25  ;;  %v798_v46 = vadd.f32 %v797_v17, %v2145_v57  ;;  %v1360_v57 = vld [vmem:[%s2321_s0 + $0x1c0] sm:$0xf] }
  0xf0   :  { %v1004_v35 = vpop.f32.mrf.mxu0  ;;  %v1361_v9 = vor.u32 %v1584_v55, %v1360_v57 }
  0xf1   :  { %v1002_v36 = vadd.f32 %v1001_v8, %v933_v33  ;;  %836 = vmatmul.bf16.gmra.mxu1 %v1337_v27  ;;  %905 = vmatmul.bf16.gmra.mxu2 %v1341_v28  ;;  %v1357_v8 = vor.u32 %v1581_v52, %v1354_v53 }
  0xf2   :  { %974 = vmatmul.bf16.gmra.mxu3 %v1345_v29 }
  0xf3   :  { %1524 = vmatmul.msk.bf16.gmra.mxu0 %vm672_vm0, %v1349_v41  ;;  %v1057_v43 = vmax.f32 %v1002_v36, 0.0 }
  0xf4   :  { %v866_v44 = vpop.f32.mrf.mxu2 }
  0xf5   :  { %v1630_v45 = vpack.c.bf16 %v1057_v43, %v1056_v42  ;;  %v935_v47 = vpop.f32.mrf.mxu3  ;;  %v867_v49 = vadd.f32 %v866_v44, %v798_v46 }
  0xf6   :  { %v799_v48 = vpop.f32.mrf.mxu1 }
  0xf7   :  { %1682 = vst [vmem:[%s2322_s2 + $0x8] sm:$0xff] %v1630_v45   ;;  %v936_v62 = vadd.f32 %v935_v47, %v867_v49  ;;  %v800_v63 = vadd.f32 %v799_v48, %v2154_v61  ;;  %v1369_v61 = vor.u32 %v1585_v2, %v1368_v1 }
  0xf8   :  { %v1006_v21 = vpop.f32.mrf.mxu0 }
  0xf9   :  { %v1005_v11 = vadd.f32 %v1004_v35, %v936_v62 }
  0xfb   :  { %v1058_v16 = vmax.f32 %v1005_v11, 0.0 }
  0xfc   :  { %v868_v3 = vpop.f32.mrf.mxu2 }
  0xfd   :  { %v869_v4 = vadd.f32 %v868_v3, %v800_v63  ;;  %v937_v5 = vpop.f32.mrf.mxu3 }
  0xfe   :  { %v802_v10 = vpop.f32.mrf.mxu1 }
  0xff   :  { %v938_v12 = vadd.f32 %v937_v5, %v869_v4  ;;  %v803_v25 = vadd.f32 %v802_v10, %v2061_v14 }
 0x100   :  { %v1009_v13 = vpop.f32.mrf.mxu0 }
 0x101   :  { %v1007_v15 = vadd.f32 %v1006_v21, %v938_v12  ;;  %841 = vmatmul.bf16.gmra.mxu1 %v1357_v8  ;;  %910 = vmatmul.bf16.gmra.mxu2 %v1361_v9 }
 0x102   :  { %979 = vmatmul.bf16.gmra.mxu3 %v1365_v37 }
 0x103   :  { %1525 = vmatmul.msk.bf16.gmra.mxu0 %vm672_vm0, %v1369_v61  ;;  %v1059_v22 = vmax.f32 %v1007_v15, 0.0 }
 0x104   :  { %v871_v23 = vpop.f32.mrf.mxu2 }
 0x105   :  { %v1635_v24 = vpack.c.bf16 %v1059_v22, %v1058_v16  ;;  %v940_v26 = vpop.f32.mrf.mxu3  ;;  %v872_v28 = vadd.f32 %v871_v23, %v803_v25 }
 0x106   :  { %v804_v27 = vpop.f32.mrf.mxu1 }
 0x107   :  { %1683 = vst [vmem:[%s2322_s2 + $0x10] sm:$0xff] %v1635_v24   ;;  %v941_v29 = vadd.f32 %v940_v26, %v872_v28  ;;  %v805_v41 = vadd.f32 %v804_v27, %v2070_v20 }
 0x108   :  { %v1011_v17 = vpop.f32.mrf.mxu0 }
 0x109   :  { %v1010_v42 = vadd.f32 %v1009_v13, %v941_v29 }
 0x10b   :  { %v1060_v14 = vmax.f32 %v1010_v42, 0.0 }
 0x10c   :  { %v873_v32 = vpop.f32.mrf.mxu2 }
 0x10d   :  { %v874_v33 = vadd.f32 %v873_v32, %v805_v41  ;;  %v942_v35 = vpop.f32.mrf.mxu3 }
 0x10e   :  { %v807_v36 = vpop.f32.mrf.mxu1 }
 0x10f   :  { %v943_v43 = vadd.f32 %v942_v35, %v874_v33  ;;  %v808_v49 = vadd.f32 %v807_v36, %v2102_v34 }
 0x110   :  { %v1014_v44 = vpop.f32.mrf.mxu0 }
 0x111   :  { %v1012_v45 = vadd.f32 %v1011_v17, %v943_v43 }
 0x113   :  { %v1061_v46 = vmax.f32 %v1012_v45, 0.0 }
 0x114   :  { %v876_v47 = vpop.f32.mrf.mxu2 }
 0x115   :  { %v1640_v48 = vpack.c.bf16 %v1061_v46, %v1060_v14  ;;  %v945_v21 = vpop.f32.mrf.mxu3  ;;  %v877_v20 = vadd.f32 %v876_v47, %v808_v49 }
 0x116   :  { %v809_v52 = vpop.f32.mrf.mxu1 }
 0x117   :  { %1684 = vst [vmem:[%s2322_s2 + $0x18] sm:$0xff] %v1640_v48   ;;  %v946_v57 = vadd.f32 %v945_v21, %v877_v20  ;;  %v810_v55 = vadd.f32 %v809_v52, %v2111_v40 }
 0x118   :  { %v1016_v53 = vpop.f32.mrf.mxu0 }
 0x119   :  { %v1015_v1 = vadd.f32 %v1014_v44, %v946_v57 }
 0x11b   :  { %v1062_v34 = vmax.f32 %v1015_v1, 0.0 }
 0x11c   :  { %v878_v56 = vpop.f32.mrf.mxu2 }
 0x11d   :  { %v879_v62 = vadd.f32 %v878_v56, %v810_v55  ;;  %v947_v63 = vpop.f32.mrf.mxu3 }
 0x11e   :  { %v812_v0 = vpop.f32.mrf.mxu1 }
 0x11f   :  { %v948_v2 = vadd.f32 %v947_v63, %v879_v62  ;;  %v813_v10 = vadd.f32 %v812_v0, %v2143_v54 }
 0x120   :  { %v1019_v3 = vpop.f32.mrf.mxu0 }
 0x121   :  { %v1017_v4 = vadd.f32 %v1016_v53, %v948_v2 }
 0x123   :  { %v1063_v5 = vmax.f32 %v1017_v4, 0.0 }
 0x124   :  { %v881_v8 = vpop.f32.mrf.mxu2 }
 0x125   :  { %v1645_v9 = vpack.c.bf16 %v1063_v5, %v1062_v34  ;;  %v950_v37 = vpop.f32.mrf.mxu3  ;;  %v882_v40 = vadd.f32 %v881_v8, %v813_v10 }
 0x126   :  { %v814_v61 = vpop.f32.mrf.mxu1 }
 0x127   :  { %1685 = vst [vmem:[%s2322_s2 + $0x20] sm:$0xff] %v1645_v9   ;;  %v951_v12 = vadd.f32 %v950_v37, %v882_v40  ;;  %v815_v13 = vadd.f32 %v814_v61, %v2152_v60 }
 0x128   :  { %v1021_v11 = vpop.f32.mrf.mxu0 }
 0x129   :  { %v1020_v24 = vadd.f32 %v1019_v3, %v951_v12 }
 0x12b   :  { %v1064_v54 = vmax.f32 %v1020_v24, 0.0 }
 0x12c   :  { %v883_v15 = vpop.f32.mrf.mxu2 }
 0x12d   :  { %v884_v16 = vadd.f32 %v883_v15, %v815_v13  ;;  %v952_v22 = vpop.f32.mrf.mxu3 }
 0x12e   :  { %v817_v23 = vpop.f32.mrf.mxu1 }
 0x12f   :  { %v953_v25 = vadd.f32 %v952_v22, %v884_v16  ;;  %v818_v41 = vadd.f32 %v817_v23, %v2066_v18 }
 0x130   :  { %v1024_v26 = vpop.f32.mrf.mxu0 }
 0x131   :  { %v1022_v27 = vadd.f32 %v1021_v11, %v953_v25 }
 0x133   :  { %v1065_v28 = vmax.f32 %v1022_v27, 0.0 }
 0x134   :  { %v886_v17 = vpop.f32.mrf.mxu2 }
 0x135   :  { %v1650_v29 = vpack.c.bf16 %v1065_v28, %v1064_v54  ;;  %v955_v32 = vpop.f32.mrf.mxu3  ;;  %v887_v60 = vadd.f32 %v886_v17, %v818_v41 }
 0x136   :  { %v819_v33 = vpop.f32.mrf.mxu1 }
 0x137   :  { %1686 = vst [vmem:[%s2322_s2 + $0x28] sm:$0xff] %v1650_v29   ;;  %v956_v36 = vadd.f32 %v955_v32, %v887_v60  ;;  %v820_v42 = vadd.f32 %v819_v33, %v2098_v30 }
 0x138   :  { %v1026_v35 = vpop.f32.mrf.mxu0 }
 0x139   :  { %v1025_v46 = vadd.f32 %v1024_v26, %v956_v36 }
 0x13b   :  { %v1066_v18 = vmax.f32 %v1025_v46, 0.0 }
 0x13c   :  { %v888_v43 = vpop.f32.mrf.mxu2 }
 0x13d   :  { %v889_v44 = vadd.f32 %v888_v43, %v820_v42  ;;  %v957_v45 = vpop.f32.mrf.mxu3 }
 0x13e   :  { %v822_v14 = vpop.f32.mrf.mxu1 }
 0x13f   :  { %v958_v47 = vadd.f32 %v957_v45, %v889_v44  ;;  %v823_v53 = vadd.f32 %v822_v14, %v2107_v38 }
 0x140   :  { %v1029_v48 = vpop.f32.mrf.mxu0 }
 0x141   :  { %v1027_v49 = vadd.f32 %v1026_v35, %v958_v47 }
 0x143   :  { %v1067_v21 = vmax.f32 %v1027_v49, 0.0 }
 0x144   :  { %v891_v52 = vpop.f32.mrf.mxu2 }
 0x145   :  { %v1655_v20 = vpack.c.bf16 %v1067_v21, %v1066_v18  ;;  %v960_v57 = vpop.f32.mrf.mxu3  ;;  %v892_v30 = vadd.f32 %v891_v52, %v823_v53 }
 0x146   :  { %v824_v55 = vpop.f32.mrf.mxu1 }
 0x147   :  { %1687 = vst [vmem:[%s2322_s2 + $0x30] sm:$0xff] %v1655_v20   ;;  %v961_v62 = vadd.f32 %v960_v57, %v892_v30  ;;  %v825_v63 = vadd.f32 %v824_v55, %v2139_v50 }
 0x148   :  { %v1031_v56 = vpop.f32.mrf.mxu0 }
 0x149   :  { %v1030_v4 = vadd.f32 %v1029_v48, %v961_v62 }
 0x14b   :  { %v1068_v38 = vmax.f32 %v1030_v4, 0.0 }
 0x14c   :  { %v893_v0 = vpop.f32.mrf.mxu2 }
 0x14d   :  { %v894_v1 = vadd.f32 %v893_v0, %v825_v63  ;;  %v962_v2 = vpop.f32.mrf.mxu3 }
 0x14e   :  { %v827_v3 = vpop.f32.mrf.mxu1 }
 0x14f   :  { %v963_v34 = vadd.f32 %v962_v2, %v894_v1  ;;  %v828_v61 = vadd.f32 %v827_v3, %v2148_v58 }
 0x150   :  { %v1034_v5 = vpop.f32.mrf.mxu0 }
 0x151   :  { %v1032_v8 = vadd.f32 %v1031_v56, %v963_v34 }
 0x153   :  { %v1069_v9 = vmax.f32 %v1032_v8, 0.0 }
 0x154   :  { %v896_v10 = vpop.f32.mrf.mxu2 }
 0x155   :  { %v1660_v37 = vpack.c.bf16 %v1069_v9, %v1068_v38  ;;  %v965_v40 = vpop.f32.mrf.mxu3  ;;  %v897_v50 = vadd.f32 %v896_v10, %v828_v61 }
 0x156   :  { %v829_v11 = vpop.f32.mrf.mxu1 }
 0x157   :  { %1688 = vst [vmem:[%s2322_s2 + $0x38] sm:$0xff] %v1660_v37   ;;  %v966_v13 = vadd.f32 %v965_v40, %v897_v50  ;;  %v830_v15 = vadd.f32 %v829_v11, %v2180_v6 }
 0x158   :  { %v1036_v12 = vpop.f32.mrf.mxu0 }
 0x159   :  { %v1035_v25 = vadd.f32 %v1034_v5, %v966_v13 }
 0x15b   :  { %v1070_v58 = vmax.f32 %v1035_v25, 0.0 }
 0x15c   :  { %v898_v16 = vpop.f32.mrf.mxu2 }
 0x15d   :  { %v899_v22 = vadd.f32 %v898_v16, %v830_v15  ;;  %v967_v23 = vpop.f32.mrf.mxu3 }
 0x15e   :  { %v832_v24 = vpop.f32.mrf.mxu1 }
 0x15f   :  { %v968_v26 = vadd.f32 %v967_v23, %v899_v22  ;;  %v833_v41 = vadd.f32 %v832_v24, %v2068_v19 }
 0x160   :  { %v1039_v27 = vpop.f32.mrf.mxu0 }
 0x161   :  { %v1037_v54 = vadd.f32 %v1036_v12, %v968_v26 }
 0x163   :  { %v1071_v28 = vmax.f32 %v1037_v54, 0.0 }
 0x164   :  { %v901_v17 = vpop.f32.mrf.mxu2 }
 0x165   :  { %v1665_v29 = vpack.c.bf16 %v1071_v28, %v1070_v58  ;;  %v970_v32 = vpop.f32.mrf.mxu3  ;;  %v902_v6 = vadd.f32 %v901_v17, %v833_v41 }
 0x166   :  { %v834_v33 = vpop.f32.mrf.mxu1 }
 0x167   :  { %1689 = vst [vmem:[%s2322_s2 + $0x40] sm:$0xff] %v1665_v29   ;;  %v971_v35 = vadd.f32 %v970_v32, %v902_v6  ;;  %v835_v36 = vadd.f32 %v834_v33, %v2100_v31 }
 0x168   :  { %v1041_v60 = vpop.f32.mrf.mxu0 }
 0x169   :  { %v1040_v14 = vadd.f32 %v1039_v27, %v971_v35 }
 0x16b   :  { %v1072_v19 = vmax.f32 %v1040_v14, 0.0 }
 0x16c   :  { %v903_v42 = vpop.f32.mrf.mxu2 }
 0x16d   :  { %v904_v43 = vadd.f32 %v903_v42, %v835_v36  ;;  %v972_v44 = vpop.f32.mrf.mxu3 }
 0x16e   :  { %v837_v45 = vpop.f32.mrf.mxu1 }
 0x16f   :  { %v973_v46 = vadd.f32 %v972_v44, %v904_v43  ;;  %v838_v52 = vadd.f32 %v837_v45, %v2109_v39 }
 0x170   :  { %v1044_v48 = vpop.f32.mrf.mxu0 }
 0x171   :  { %v1042_v47 = vadd.f32 %v1041_v60, %v973_v46 }
 0x173   :  { %v1073_v49 = vmax.f32 %v1042_v47, 0.0 }
 0x174   :  { %v906_v18 = vpop.f32.mrf.mxu2 }
 0x175   :  { %v1670_v21 = vpack.c.bf16 %v1073_v49, %v1072_v19  ;;  %v975_v20 = vpop.f32.mrf.mxu3  ;;  %v907_v31 = vadd.f32 %v906_v18, %v838_v52 }
 0x176   :  { %v839_v53 = vpop.f32.mrf.mxu1 }
 0x177   :  { %1690 = vst [vmem:[%s2322_s2 + $0x48] sm:$0xff] %v1670_v21   ;;  %v976_v57 = vadd.f32 %v975_v20, %v907_v31  ;;  %v840_v55 = vadd.f32 %v839_v53, %v2141_v51 }
 0x178   :  { %v1046_v30 = vpop.f32.mrf.mxu0 }
 0x179   :  { %v1045_v1 = vadd.f32 %v1044_v48, %v976_v57 }
 0x17b   :  { %v1074_v4 = vmax.f32 %v1045_v1, 0.0 }
 0x17c   :  { %v908_v56 = vpop.f32.mrf.mxu2 }
 0x17d   :  { %v909_v62 = vadd.f32 %v908_v56, %v840_v55  ;;  %v977_v63 = vpop.f32.mrf.mxu3 }
 0x17e   :  { %v842_v0 = vpop.f32.mrf.mxu1 }
 0x17f   :  { %v978_v2 = vadd.f32 %v977_v63, %v909_v62  ;;  %v843_v8 = vadd.f32 %v842_v0, %v2150_v59 }
 0x180   :  { %v1049_v9 = vpop.f32.mrf.mxu0 }
 0x181   :  { %v1047_v3 = vadd.f32 %v1046_v30, %v978_v2 }
 0x183   :  { %v1075_v39 = vmax.f32 %v1047_v3, 0.0 }
 0x184   :  { %v911_v34 = vpop.f32.mrf.mxu2 }
 0x185   :  { %v1675_v5 = vpack.c.bf16 %v1075_v39, %v1074_v4  ;;  %v980_v38 = vpop.f32.mrf.mxu3  ;;  %v912_v51 = vadd.f32 %v911_v34, %v843_v8 }
 0x186   :  { %v844_v10 = vpop.f32.mrf.mxu1 }
 0x187   :  { %1691 = vst [vmem:[%s2322_s2 + $0x50] sm:$0xff] %v1675_v5   ;;  %v981_v37 = vadd.f32 %v980_v38, %v912_v51  ;;  %v845_v61 = vadd.f32 %v844_v10, %v2182_v7 }
 0x188   :  { %v1051_v15 = vpop.f32.mrf.mxu0 }
 0x189   :  { %v1050_v12 = vadd.f32 %v1049_v9, %v981_v37 }
 0x18b   :  { %v1076_v22 = vmax.f32 %v1050_v12, 0.0 }
 0x18c   :  { %v913_v40 = vpop.f32.mrf.mxu2 }
 0x18d   :  { %v914_v11 = vadd.f32 %v913_v40, %v845_v61  ;;  %v982_v50 = vpop.f32.mrf.mxu3 }
 0x18f   :  { %v983_v13 = vadd.f32 %v982_v50, %v914_v11 }
 0x191   :  { %v1052_v16 = vadd.f32 %v1051_v15, %v983_v13 }
 0x193   :  { %v1077_v59 = vmax.f32 %v1052_v16, 0.0 }
 0x195   :  { %v1680_v23 = vpack.c.bf16 %v1077_v59, %v1076_v22 }
 0x197   :  { %1692 = vst [vmem:[%s2322_s2 + $0x58] sm:$0xff] %v1680_v23  }

// kernel: _lambda_.9
= control target key start
LH: loop header
LB: loop body
LE: loop exit
PB: predicated region body
PF: predicated region fallthrough
CT: control target
= control target key end

     0   :  { %s5160_s1 = inlined_call_operand.vmem [shape: bf16[1152,128], index: 1, kind: input, shape index: {}]   ;;  %s5161_s0 = inlined_call_operand.vmem [shape: bf16[4,48,1152], index: 0, kind: input, shape index: {}]   ;;  %s5162_s2 = inlined_call_operand.vmem [shape: bf16[4,48,128], index: 2, kind: input, shape index: {}]   ;;  %s5163_s3 = inlined_call_operand.vmem [shape: bf16[48,128], index: 3, kind: output, shape index: {}]  }
   0x1   :  { %v3447_v0 = vld [vmem:[%s5160_s1 + $0x38] sm:$0xff]  ;;  %v3469_v4 = vld [vmem:[%s5160_s1 + $0x30] sm:$0xff]  ;;  %v3493_v8 = vld [vmem:[%s5160_s1 + $0x28] sm:$0xff] }
   0x2   :  { %v3452_v1 = vld [vmem:[%s5160_s1 + $0x78] sm:$0xff]  ;;  %758 = vmatpush.bf16.msra.mxu0 %v3447_v0  ;;  %v3474_v5 = vld [vmem:[%s5160_s1 + $0x70] sm:$0xff]  ;;  %v3498_v9 = vld [vmem:[%s5160_s1 + $0x68] sm:$0xff] }
   0x3   :  { %v3457_v2 = vld [vmem:[%s5160_s1 + $0xb8] sm:$0xff]  ;;  %782 = vmatpush.bf16.msra.mxu1 %v3452_v1  ;;  %v3481_v6 = vld [vmem:[%s5160_s1 + $0xb0] sm:$0xff]  ;;  %v3505_v10 = vld [vmem:[%s5160_s1 + $0xa8] sm:$0xff] }
   0x4   :  { %5205 = vst [vmem:[#allocation2_spill] sm:$0xff] %v3457_v2  ;;  %v3462_v3 = vld [vmem:[%s5160_s1 + $0xf8] sm:$0xff]  ;;  %806 = vmatpush.bf16.msra.mxu2 %v3457_v2  ;;  %v3486_v7 = vld [vmem:[%s5160_s1 + $0xf0] sm:$0xff]  ;;  %v3510_v11 = vld [vmem:[%s5160_s1 + $0xe8] sm:$0xff] }
   0x5   :  { %830 = vmatpush.bf16.msra.mxu3 %v3462_v3  ;;  %5206 = vst [vmem:[#allocation3_spill] sm:$0xff] %v3481_v6  ;;  %v3517_v12 = vld [vmem:[%s5160_s1 + $0x20] sm:$0xff]  ;;  %v3541_v16 = vld [vmem:[%s5160_s1 + $0x18] sm:$0xff]  ;;  %v3565_v20 = vld [vmem:[%s5160_s1 + $0x10] sm:$0xff] }
   0x6   :  { %759 = vmatpush.bf16.msra.mxu0 %v3469_v4  ;;  %5207 = vst [vmem:[#allocation4_spill] sm:$0xff] %v3505_v10  ;;  %v3522_v13 = vld [vmem:[%s5160_s1 + $0x60] sm:$0xff]  ;;  %v3546_v17 = vld [vmem:[%s5160_s1 + $0x58] sm:$0xff]  ;;  %v3570_v21 = vld [vmem:[%s5160_s1 + $0x50] sm:$0xff] }
   0x7   :  { %783 = vmatpush.bf16.msra.mxu1 %v3474_v5  ;;  %v3529_v14 = vld [vmem:[%s5160_s1 + $0xa0] sm:$0xff]  ;;  %v3553_v18 = vld [vmem:[%s5160_s1 + $0x98] sm:$0xff]  ;;  %v3577_v22 = vld [vmem:[%s5160_s1 + $0x90] sm:$0xff] }
   0x8   :  { %807 = vmatpush.bf16.msra.mxu2 %v3481_v6  ;;  %5208 = vst [vmem:[#allocation5_spill] sm:$0xff] %v3529_v14  ;;  %v3534_v15 = vld [vmem:[%s5160_s1 + $0xe0] sm:$0xff]  ;;  %v3558_v19 = vld [vmem:[%s5160_s1 + $0xd8] sm:$0xff]  ;;  %v3582_v23 = vld [vmem:[%s5160_s1 + $0xd0] sm:$0xff] }
   0x9   :  { %831 = vmatpush.bf16.msra.mxu3 %v3486_v7  ;;  %5209 = vst [vmem:[#allocation6_spill] sm:$0xff] %v3577_v22  ;;  %v3589_v24 = vld [vmem:[%s5160_s1 + $0x8] sm:$0xff]  ;;  %v3611_v28 = vld [vmem:[%s5160_s1] sm:$0xff]  ;;  %v2280_v39 = vld [vmem:[%s5161_s0 + $0x2c] sm:$0xf0] }
   0xa   :  { %760 = vmatpush.bf16.msra.mxu0 %v3493_v8  ;;  %v3594_v25 = vld [vmem:[%s5160_s1 + $0x48] sm:$0xff]  ;;  %v3616_v29 = vld [vmem:[%s5160_s1 + $0x40] sm:$0xff]  ;;  %v3659_v40 = vld [vmem:[%s5160_s1 + $0x1b8] sm:$0xff] }
   0xb   :  { %784 = vmatpush.bf16.msra.mxu1 %v3498_v9  ;;  %v3601_v26 = vld [vmem:[%s5160_s1 + $0x88] sm:$0xff]  ;;  %v3621_v30 = vld [vmem:[%s5160_s1 + $0x80] sm:$0xff]  ;;  %5214 = vst [vmem:[#allocation11_spill] sm:$0xff] %v3659_v40  ;;  %v3664_v41 = vld [vmem:[%s5160_s1 + $0x138] sm:$0xff] }
   0xc   :  { %808 = vmatpush.bf16.msra.mxu2 %v3505_v10  ;;  %5210 = vst [vmem:[#allocation7_spill] sm:$0xff] %v3601_v26  ;;  %v3606_v27 = vld [vmem:[%s5160_s1 + $0xc8] sm:$0xff]  ;;  %v3626_v31 = vld [vmem:[%s5160_s1 + $0xc0] sm:$0xff]  ;;  %v3673_v46 = vld [vmem:[%s5160_s1 + $0x1f8] sm:$0xff] }
   0xd   :  { %832 = vmatpush.bf16.msra.mxu3 %v3510_v11  ;;  %5211 = vst [vmem:[#allocation8_spill] sm:$0xff] %v3606_v27  ;;  %v2270_v32 = vld [vmem:[%s5161_s0] sm:$0xf]  ;;  %v3100_v33 = vld [vmem:[%s5161_s0 + $0x20] sm:$0xf0]  ;;  %v3678_v47 = vld [vmem:[%s5160_s1 + $0x178] sm:$0xff] }
   0xe   :  { %761 = vmatpush.bf16.msra.mxu0 %v3517_v12  ;;  %5212 = vst [vmem:[#allocation9_spill] sm:$0xff] %v3621_v30  ;;  %v3096_v34 = vld [vmem:[%s5161_s0 + $0x4] sm:$0xf]  ;;  %v2272_v35 = vld [vmem:[%s5161_s0 + $0x24] sm:$0xf0]  ;;  %v2271_v42 = vor.u32 %v3100_v33, %v2270_v32  ;;  %v3685_v48 = vld [vmem:[%s5160_s1 + $0x1b0] sm:$0xff] }
   0xf   :  { %785 = vmatpush.bf16.msra.mxu1 %v3522_v13  ;;  %5213 = vst [vmem:[#allocation10_spill] sm:$0xff] %v3626_v31  ;;  %v2278_v36 = vld [vmem:[%s5161_s0 + $0x8] sm:$0xf]  ;;  %v3101_v37 = vld [vmem:[%s5161_s0 + $0x28] sm:$0xf0]  ;;  %v2275_v43 = vor.u32 %v3096_v34, %v2272_v35  ;;  %v3690_v49 = vld [vmem:[%s5160_s1 + $0x130] sm:$0xff] }
  0x10   :  { %809 = vmatpush.bf16.msra.mxu2 %v3529_v14  ;;  %v3097_v38 = vld [vmem:[%s5161_s0 + $0xc] sm:$0xf]  ;;  %v2279_v44 = vor.u32 %v3101_v37, %v2278_v36  ;;  %5215 = vst [vmem:[#allocation12_spill] sm:$0xff] %v3673_v46  ;;  %v3697_v50 = vld [vmem:[%s5160_s1 + $0x1f0] sm:$0xff]  ;;  %v2306_v56 = vld [vmem:[%s5161_s0 + $0x48] sm:$0xf] }
  0x11   :  { %833 = vmatpush.bf16.msra.mxu3 %v3534_v15  ;;  %v2283_v45 = vor.u32 %v3097_v38, %v2280_v39  ;;  %5216 = vst [vmem:[#allocation13_spill] sm:$0xff] %v3685_v48  ;;  %v3702_v51 = vld [vmem:[%s5160_s1 + $0x170] sm:$0xff]  ;;  %v3709_v52 = vld [vmem:[%s5160_s1 + $0x1a8] sm:$0xff]  ;;  %v3736_v57 = vld [vmem:[%s5160_s1 + $0x1a0] sm:$0xff] }
  0x12   :  { %762 = vmatpush.bf16.msra.mxu0 %v3541_v16  ;;  %5217 = vst [vmem:[#allocation14_spill] sm:$0xff] %v3697_v50  ;;  %v3714_v53 = vld [vmem:[%s5160_s1 + $0x128] sm:$0xff]  ;;  %v3741_v58 = vld [vmem:[%s5160_s1 + $0x120] sm:$0xff]  ;;  %v2308_v61 = vld [vmem:[%s5161_s0 + $0x6c] sm:$0xf0] }
  0x13   :  { %786 = vmatpush.bf16.msra.mxu1 %v3546_v17  ;;  %5218 = vst [vmem:[#allocation15_spill] sm:$0xff] %v3709_v52  ;;  %v3721_v54 = vld [vmem:[%s5160_s1 + $0x1e8] sm:$0xff]  ;;  %v2314_v62 = vld [vmem:[%s5161_s0 + $0x50] sm:$0xf]  ;;  %v3110_v63 = vld [vmem:[%s5161_s0 + $0x70] sm:$0xf0] }
  0x14   :  { %810 = vmatpush.bf16.msra.mxu2 %v3553_v18  ;;  %5219 = vst [vmem:[#allocation16_spill] sm:$0xff] %v3721_v54  ;;  %v3726_v55 = vld [vmem:[%s5160_s1 + $0x168] sm:$0xff]  ;;  %v3106_v32 = vld [vmem:[%s5161_s0 + $0x54] sm:$0xf]  ;;  %v2316_v33 = vld [vmem:[%s5161_s0 + $0x74] sm:$0xf0] }
  0x15   :  { %834 = vmatpush.bf16.msra.mxu3 %v3558_v19  ;;  %5220 = vst [vmem:[#allocation17_spill] sm:$0xff] %v3736_v57  ;;  %v3109_v59 = vld [vmem:[%s5161_s0 + $0x68] sm:$0xf0]  ;;  %v3769_v34 = vld [vmem:[%s5160_s1 + $0x1e0] sm:$0xff]  ;;  %v3781_v36 = vld [vmem:[%s5160_s1 + $0x198] sm:$0xff] }
  0x16   :  { %763 = vmatpush.bf16.msra.mxu0 %v3565_v20  ;;  %v3105_v60 = vld [vmem:[%s5161_s0 + $0x4c] sm:$0xf]  ;;  %5221 = vst [vmem:[#allocation18_spill] sm:$0xff] %v3769_v34  ;;  %v3774_v35 = vld [vmem:[%s5160_s1 + $0x160] sm:$0xff]  ;;  %v3786_v37 = vld [vmem:[%s5160_s1 + $0x118] sm:$0xff]  ;;  %v2307_v38 = vor.u32 %v3109_v59, %v2306_v56 }
  0x17   :  { %787 = vmatpush.bf16.msra.mxu1 %v3570_v21  ;;  %5222 = vst [vmem:[#allocation19_spill] sm:$0xff] %v3781_v36  ;;  %v2311_v39 = vor.u32 %v3105_v60, %v2308_v61  ;;  %v3805_v56 = vld [vmem:[%s5160_s1 + $0x190] sm:$0xff] }
  0x18   :  { %811 = vmatpush.bf16.msra.mxu2 %v3577_v22  ;;  %5224 = vst [vmem:[#allocation21_spill] sm:$0xff] %v3805_v56  ;;  %v3810_v59 = vld [vmem:[%s5160_s1 + $0x110] sm:$0xff] }
  0x19   :  { %835 = vmatpush.bf16.msra.mxu3 %v3582_v23  ;;  %5225 = vst [vmem:[#allocation22_spill] sm:$0xff] %v3810_v59  ;;  %v3817_v60 = vld [vmem:[%s5160_s1 + $0x1d0] sm:$0xff] }
  0x1a   :  { %764 = vmatpush.bf16.msra.mxu0 %v3589_v24  ;;  %5226 = vst [vmem:[#allocation23_spill] sm:$0xff] %v3817_v60  ;;  %v3822_v61 = vld [vmem:[%s5160_s1 + $0x150] sm:$0xff] }
  0x1b   :  { %788 = vmatpush.bf16.msra.mxu1 %v3594_v25 }
  0x1c   :  { %812 = vmatpush.bf16.msra.mxu2 %v3601_v26 }
  0x1d   :  { %836 = vmatpush.bf16.msra.mxu3 %v3606_v27 }
  0x1e   :  { %765 = vmatpush.bf16.msra.mxu0 %v3611_v28 }
  0x1f   :  { %789 = vmatpush.bf16.msra.mxu1 %v3616_v29 }
  0x20   :  { %813 = vmatpush.bf16.msra.mxu2 %v3621_v30 }
  0x21   :  { %837 = vmatpush.bf16.msra.mxu3 %v3626_v31  ;;  %766 = vmatmul.bf16.vlgmr.msra.gmra.mxu0 %v2271_v42  ;;  %v2315_v42 = vor.u32 %v3110_v63, %v2314_v62  ;;  %v3829_v62 = vld [vmem:[%s5160_s1 + $0x188] sm:$0xff]  ;;  %v2352_v31 = vld [vmem:[%s5161_s0 + $0xbc] sm:$0xf0] }
  0x22   :  { %854 = vmatpush.bf16.msrb.mxu0 %v3664_v41  ;;  %790 = vmatmul.bf16.vlgmr.msra.gmra.mxu1 %v2275_v43  ;;  %v2319_v43 = vor.u32 %v3106_v32, %v2316_v33  ;;  %5227 = vst [vmem:[#allocation24_spill] sm:$0xff] %v3829_v62  ;;  %v3834_v63 = vld [vmem:[%s5160_s1 + $0x108] sm:$0xff] }
  0x23   :  { %814 = vmatmul.bf16.vlgmr.msra.gmra.mxu2 %v2279_v44  ;;  %878 = vmatpush.bf16.msrb.mxu1 %v3678_v47  ;;  %v3793_v44 = vld [vmem:[%s5160_s1 + $0x1d8] sm:$0xff]  ;;  %5228 = vst [vmem:[#allocation25_spill] sm:$0xff] %v3834_v63  ;;  %v3841_v32 = vld [vmem:[%s5160_s1 + $0x1c8] sm:$0xff] }
  0x24   :  { %902 = vmatpush.bf16.msrb.mxu2 %v3659_v40  ;;  %838 = vmatmul.bf16.vlgmr.msra.gmra.mxu3 %v2283_v45  ;;  %5223 = vst [vmem:[#allocation20_spill] sm:$0xff] %v3793_v44  ;;  %v3798_v45 = vld [vmem:[%s5160_s1 + $0x158] sm:$0xff]  ;;  %v3846_v33 = vld [vmem:[%s5160_s1 + $0x148] sm:$0xff] }
  0x25   :  { %926 = vmatpush.bf16.msrb.mxu3 %v3673_v46  ;;  %5229 = vst [vmem:[#allocation26_spill] sm:$0xff] %v3841_v32  ;;  %v3115_v46 = vld [vmem:[%s5161_s0 + $0x9c] sm:$0xf] }
  0x26   :  { %855 = vmatpush.bf16.msrb.mxu0 %v3690_v49  ;;  %5230 = vst [vmem:[#allocation27_spill] sm:$0xff] %v3846_v33 }
  0x27   :  { %879 = vmatpush.bf16.msrb.mxu1 %v3702_v51 }
  0x28   :  { %903 = vmatpush.bf16.msrb.mxu2 %v3685_v48 }
  0x29   :  { %927 = vmatpush.bf16.msrb.mxu3 %v3697_v50  ;;  %v3119_v50 = vld [vmem:[%s5161_s0 + $0xb8] sm:$0xf0] }
  0x2a   :  { %856 = vmatpush.bf16.msrb.mxu0 %v3714_v53 }
  0x2b   :  { %880 = vmatpush.bf16.msrb.mxu1 %v3726_v55 }
  0x2c   :  { %904 = vmatpush.bf16.msrb.mxu2 %v3709_v52 }
  0x2d   :  { %928 = vmatpush.bf16.msrb.mxu3 %v3721_v54  ;;  %v2350_v54 = vld [vmem:[%s5161_s0 + $0x98] sm:$0xf] }
  0x2e   :  { %857 = vmatpush.bf16.msrb.mxu0 %v3741_v58 }
  0x2f   :  { %881 = vmatpush.bf16.msrb.mxu1 %v3774_v35 }
  0x30   :  { %905 = vmatpush.bf16.msrb.mxu2 %v3736_v57 }
  0x31   :  { %929 = vmatpush.bf16.msrb.mxu3 %v3769_v34  ;;  %771 = vmatmul.bf16.gmra.mxu0 %v2307_v38  ;;  %v2342_v38 = vld [vmem:[%s5161_s0 + $0x90] sm:$0xf]  ;;  %v3875_v34 = vld [vmem:[%s5160_s1 + $0x238] sm:$0xff] }
  0x32   :  { %858 = vmatpush.bf16.msrb.mxu0 %v3786_v37  ;;  %795 = vmatmul.bf16.gmra.mxu1 %v2311_v39  ;;  %v3118_v39 = vld [vmem:[%s5161_s0 + $0xb0] sm:$0xf0] }
  0x33   :  { %819 = vmatmul.bf16.gmra.mxu2 %v2315_v42  ;;  %882 = vmatpush.bf16.msrb.mxu1 %v3798_v45  ;;  %v3859_v42 = vld [vmem:[%s5160_s1 + $0x180] sm:$0xff]  ;;  %v2343_v27 = vor.u32 %v3118_v39, %v2342_v38  ;;  %v3961_v38 = vld [vmem:[%s5160_s1 + $0x218] sm:$0xff] }
  0x34   :  { %906 = vmatpush.bf16.msrb.mxu2 %v3781_v36  ;;  %843 = vmatmul.bf16.gmra.mxu3 %v2319_v43  ;;  %5231 = vst [vmem:[#allocation28_spill] sm:$0xff] %v3859_v42  ;;  %v3864_v43 = vld [vmem:[%s5160_s1 + $0x100] sm:$0xff] }
  0x35   :  { %930 = vmatpush.bf16.msrb.mxu3 %v3793_v44  ;;  %v2344_v44 = vld [vmem:[%s5161_s0 + $0xb4] sm:$0xf0] }
  0x36   :  { %859 = vmatpush.bf16.msrb.mxu0 %v3810_v59 }
  0x37   :  { %883 = vmatpush.bf16.msrb.mxu1 %v3822_v61 }
  0x38   :  { %907 = vmatpush.bf16.msrb.mxu2 %v3805_v56  ;;  %v3910_v56 = vld [vmem:[%s5160_s1 + $0x230] sm:$0xff] }
  0x39   :  { %931 = vmatpush.bf16.msrb.mxu3 %v3817_v60  ;;  %v3114_v60 = vld [vmem:[%s5161_s0 + $0x94] sm:$0xf] }
  0x3a   :  { %860 = vmatpush.bf16.msrb.mxu0 %v3834_v63  ;;  %v3894_v63 = vld [vmem:[%s5160_s1 + $0x1c0] sm:$0xff]  ;;  %v2347_v59 = vor.u32 %v3114_v60, %v2344_v44  ;;  %v2288_v44 = vld [vmem:[%s5161_s0 + $0x34] sm:$0xf0]  ;;  %v3103_v60 = vld [vmem:[%s5161_s0 + $0x38] sm:$0xf0] }
  0x3b   :  { %884 = vmatpush.bf16.msrb.mxu1 %v3846_v33  ;;  %v2355_v33 = vor.u32 %v3115_v46, %v2352_v31  ;;  %v3919_v31 = vld [vmem:[%s5160_s1 + $0x228] sm:$0xff]  ;;  %v2286_v46 = vld [vmem:[%s5161_s0 + $0x10] sm:$0xf] }
  0x3c   :  { %908 = vmatpush.bf16.msrb.mxu2 %v3829_v62  ;;  %v3899_v62 = vld [vmem:[%s5160_s1 + $0x140] sm:$0xff] }
  0x3d   :  { %932 = vmatpush.bf16.msrb.mxu3 %v3841_v32  ;;  %v2351_v32 = vor.u32 %v3119_v50, %v2350_v54  ;;  %v3102_v50 = vld [vmem:[%s5161_s0 + $0x30] sm:$0xf0] }
  0x3e   :  { %861 = vmatpush.bf16.msrb.mxu0 %v3864_v43  ;;  %v3098_v54 = vld [vmem:[%s5161_s0 + $0x14] sm:$0xf]  ;;  %v2287_v39 = vor.u32 %v3102_v50, %v2286_v46  ;;  %v3980_v46 = vld [vmem:[%s5160_s1 + $0x208] sm:$0xff]  ;;  %v3107_v50 = vld [vmem:[%s5161_s0 + $0x5c] sm:$0xf] }
  0x3f   :  { %885 = vmatpush.bf16.msrb.mxu1 %v3899_v62 }
  0x40   :  { %909 = vmatpush.bf16.msrb.mxu2 %v3859_v42 }
  0x41   :  { %933 = vmatpush.bf16.msrb.mxu3 %v3894_v63  ;;  %776 = vmatmul.bf16.gmra.mxu0 %v2343_v27  ;;  %v3928_v27 = vld [vmem:[%s5160_s1 + $0x220] sm:$0xff] }
  0x42   :  { %950 = vmatpush.bf16.msra.mxu0 %v3875_v34  ;;  %800 = vmatmul.bf16.gmra.mxu1 %v2347_v59  ;;  %v2294_v59 = vld [vmem:[%s5161_s0 + $0x18] sm:$0xf] }
  0x43   :  { %1167 = vmatpush.bf16.msra.mxu1 %v3447_v0  ;;  %824 = vmatmul.bf16.gmra.mxu2 %v2351_v32  ;;  %v3099_v32 = vld [vmem:[%s5161_s0 + $0x1c] sm:$0xf] }
  0x44   :  { %1191 = vmatpush.bf16.msra.mxu2 %v3452_v1  ;;  %848 = vmatmul.bf16.gmra.mxu3 %v2355_v33  ;;  %v2296_v33 = vld [vmem:[%s5161_s0 + $0x3c] sm:$0xf0] }
  0x45   :  { %1215 = vmatpush.bf16.msra.mxu3 %v3457_v2  ;;  %v2299_v2 = vor.u32 %v3099_v32, %v2296_v33  ;;  %v2332_v32 = vld [vmem:[%s5161_s0 + $0x84] sm:$0xf0] }
  0x46   :  { %951 = vmatpush.bf16.msra.mxu0 %v3910_v56 }
  0x47   :  { %1168 = vmatpush.bf16.msra.mxu1 %v3469_v4 }
  0x48   :  { %1192 = vmatpush.bf16.msra.mxu2 %v3474_v5 }
  0x49   :  { %1216 = vmatpush.bf16.msra.mxu3 %v3481_v6  ;;  %v2295_v6 = vor.u32 %v3103_v60, %v2294_v59  ;;  %v3112_v59 = vld [vmem:[%s5161_s0 + $0x80] sm:$0xf0] }
  0x4a   :  { %952 = vmatpush.bf16.msra.mxu0 %v3919_v31  ;;  %v3108_v60 = vld [vmem:[%s5161_s0 + $0x64] sm:$0xf] }
  0x4b   :  { %1169 = vmatpush.bf16.msra.mxu1 %v3493_v8 }
  0x4c   :  { %1193 = vmatpush.bf16.msra.mxu2 %v3498_v9 }
  0x4d   :  { %1217 = vmatpush.bf16.msra.mxu3 %v3505_v10  ;;  %v2291_v10 = vor.u32 %v3098_v54, %v2288_v44  ;;  %v2324_v54 = vld [vmem:[%s5161_s0 + $0x7c] sm:$0xf0] }
  0x4e   :  { %953 = vmatpush.bf16.msra.mxu0 %v3928_v27  ;;  %v2330_v44 = vld [vmem:[%s5161_s0 + $0x60] sm:$0xf] }
  0x4f   :  { %1170 = vmatpush.bf16.msra.mxu1 %v3517_v12 }
  0x50   :  { %1194 = vmatpush.bf16.msra.mxu2 %v3522_v13 }
  0x51   :  { %1218 = vmatpush.bf16.msra.mxu3 %v3529_v14  ;;  %862 = vmatmul.bf16.vlgmr.msrb.gmra.mxu0 %v2287_v39  ;;  %v3972_v14 = vld [vmem:[%s5160_s1 + $0x210] sm:$0xff]  ;;  %v2327_v39 = vor.u32 %v3107_v50, %v2324_v54  ;;  %v2366_v50 = vld [vmem:[%s5161_s0 + $0xa8] sm:$0xf]  ;;  %v3121_v54 = vld [vmem:[%s5161_s0 + $0xc8] sm:$0xf0] }
  0x52   :  { %954 = vmatpush.bf16.msra.mxu0 %v3961_v38  ;;  %886 = vmatmul.bf16.vlgmr.msrb.gmra.mxu1 %v2291_v10  ;;  %v3111_v10 = vld [vmem:[%s5161_s0 + $0x78] sm:$0xf0] }
  0x53   :  { %1171 = vmatpush.bf16.msra.mxu1 %v3541_v16  ;;  %910 = vmatmul.bf16.vlgmr.msrb.gmra.mxu2 %v2295_v6  ;;  %v2322_v6 = vld [vmem:[%s5161_s0 + $0x58] sm:$0xf] }
  0x54   :  { %1195 = vmatpush.bf16.msra.mxu2 %v3546_v17  ;;  %934 = vmatmul.bf16.vlgmr.msrb.gmra.mxu3 %v2299_v2  ;;  %v3989_v2 = vld [vmem:[%s5160_s1 + $0x200] sm:$0xff]  ;;  %v2323_v33 = vor.u32 %v3111_v10, %v2322_v6  ;;  %v2360_v10 = vld [vmem:[%s5161_s0 + $0xc4] sm:$0xf0] }
  0x55   :  { %1219 = vmatpush.bf16.msra.mxu3 %v3553_v18  ;;  %v3116_v6 = vld [vmem:[%s5161_s0 + $0xa4] sm:$0xf] }
  0x56   :  { %955 = vmatpush.bf16.msra.mxu0 %v3972_v14 }
  0x57   :  { %1172 = vmatpush.bf16.msra.mxu1 %v3565_v20 }
  0x58   :  { %1196 = vmatpush.bf16.msra.mxu2 %v3570_v21 }
  0x59   :  { %1220 = vmatpush.bf16.msra.mxu3 %v3577_v22  ;;  %v2335_v22 = vor.u32 %v3108_v60, %v2332_v32  ;;  %v2363_v32 = vor.u32 %v3116_v6, %v2360_v10  ;;  %v5234_v6 = vld [vmem:[#allocation27_spill] sm:$0xff]  ;;  %v5235_v10 = vld [vmem:[#allocation8_spill] sm:$0xff] }
  0x5a   :  { %956 = vmatpush.bf16.msra.mxu0 %v3980_v46 }
  0x5b   :  { %1173 = vmatpush.bf16.msra.mxu1 %v3589_v24 }
  0x5c   :  { %1197 = vmatpush.bf16.msra.mxu2 %v3594_v25 }
  0x5d   :  { %1221 = vmatpush.bf16.msra.mxu3 %v3601_v26  ;;  %v2331_v26 = vor.u32 %v3112_v59, %v2330_v44  ;;  %v3117_v44 = vld [vmem:[%s5161_s0 + $0xac] sm:$0xf]  ;;  %v2368_v59 = vld [vmem:[%s5161_s0 + $0xcc] sm:$0xf0] }
  0x5e   :  { %957 = vmatpush.bf16.msra.mxu0 %v3989_v2 }
  0x5f   :  { %1174 = vmatpush.bf16.msra.mxu1 %v3611_v28 }
  0x60   :  { %1198 = vmatpush.bf16.msra.mxu2 %v3616_v29 }
  0x61   :  { %1222 = vmatpush.bf16.msra.mxu3 %v3621_v30  ;;  %867 = vmatmul.bf16.gmra.mxu0 %v2323_v33  ;;  %v2367_v33 = vor.u32 %v3121_v54, %v2366_v50  ;;  %v5236_v50 = vld [vmem:[#allocation24_spill] sm:$0xff]  ;;  %v5237_v54 = vld [vmem:[#allocation25_spill] sm:$0xff] }
  0x62   :  { %1239 = vmatpush.bf16.msrb.mxu0 %v3462_v3  ;;  %891 = vmatmul.bf16.gmra.mxu1 %v2327_v39  ;;  %v2371_v39 = vor.u32 %v3117_v44, %v2368_v59  ;;  %v2302_v44 = vld [vmem:[%s5161_s0 + $0x20] sm:$0xf]  ;;  %v3104_v59 = vld [vmem:[%s5161_s0 + $0x40] sm:$0xf0]  ;;  %v5239_v30 = vld [vmem:[#allocation12_spill] sm:$0xff] }
  0x63   :  { %1263 = vmatpush.bf16.msrb.mxu1 %v3664_v41  ;;  %915 = vmatmul.bf16.gmra.mxu2 %v2331_v26  ;;  %v3120_v26 = vld [vmem:[%s5161_s0 + $0xc0] sm:$0xf0] }
  0x64   :  { %1287 = vmatpush.bf16.msrb.mxu2 %v3678_v47  ;;  %939 = vmatmul.bf16.gmra.mxu3 %v2335_v22  ;;  %v2358_v22 = vld [vmem:[%s5161_s0 + $0xa0] sm:$0xf] }
  0x65   :  { %1311 = vmatpush.bf16.msrb.mxu3 %v3659_v40  ;;  %v2359_v60 = vor.u32 %v3120_v26, %v2358_v22  ;;  %v5232_v22 = vld [vmem:[#allocation21_spill] sm:$0xff]  ;;  %v5233_v26 = vld [vmem:[#allocation22_spill] sm:$0xff] }
  0x66   :  { %1240 = vmatpush.bf16.msrb.mxu0 %v3486_v7 }
  0x67   :  { %1264 = vmatpush.bf16.msrb.mxu1 %v3690_v49 }
  0x68   :  { %1288 = vmatpush.bf16.msrb.mxu2 %v3702_v51 }
  0x69   :  { %1312 = vmatpush.bf16.msrb.mxu3 %v3685_v48 }
  0x6a   :  { %1241 = vmatpush.bf16.msrb.mxu0 %v3510_v11 }
  0x6b   :  { %1265 = vmatpush.bf16.msrb.mxu1 %v3714_v53 }
  0x6c   :  { %1289 = vmatpush.bf16.msrb.mxu2 %v3726_v55 }
  0x6d   :  { %1313 = vmatpush.bf16.msrb.mxu3 %v3709_v52 }
  0x6e   :  { %1242 = vmatpush.bf16.msrb.mxu0 %v3534_v15 }
  0x6f   :  { %1266 = vmatpush.bf16.msrb.mxu1 %v3741_v58 }
  0x70   :  { %1290 = vmatpush.bf16.msrb.mxu2 %v3774_v35 }
  0x71   :  { %1314 = vmatpush.bf16.msrb.mxu3 %v3736_v57  ;;  %872 = vmatmul.bf16.gmra.mxu0 %v2359_v60  ;;  %v2696_v60 = vld [vmem:[%s5161_s0 + $0xd8] sm:$0xf]  ;;  %v2303_v57 = vor.u32 %v3104_v59, %v2302_v44 }
  0x72   :  { %1243 = vmatpush.bf16.msrb.mxu0 %v3558_v19  ;;  %896 = vmatmul.bf16.gmra.mxu1 %v2363_v32  ;;  %v3199_v32 = vld [vmem:[%s5161_s0 + $0xf8] sm:$0xf0] }
  0x73   :  { %1267 = vmatpush.bf16.msrb.mxu1 %v3786_v37  ;;  %920 = vmatmul.bf16.gmra.mxu2 %v2367_v33  ;;  %v3195_v33 = vld [vmem:[%s5161_s0 + $0xdc] sm:$0xf]  ;;  %v2697_v52 = vor.u32 %v3199_v32, %v2696_v60  ;;  %v5242_v32 = vld [vmem:[#allocation18_spill] sm:$0xff] }
  0x74   :  { %1291 = vmatpush.bf16.msrb.mxu2 %v3798_v45  ;;  %944 = vmatmul.bf16.gmra.mxu3 %v2371_v39  ;;  %v2698_v39 = vld [vmem:[%s5161_s0 + $0xfc] sm:$0xf0] }
  0x75   :  { %1315 = vmatpush.bf16.msrb.mxu3 %v3781_v36  ;;  %v5238_v36 = vld [vmem:[#allocation10_spill] sm:$0xff]  ;;  %v2701_v48 = vor.u32 %v3195_v33, %v2698_v39  ;;  %v2776_v33 = vld [vmem:[%s5161_s0 + $0x170] sm:$0xf]  ;;  %v3218_v39 = vld [vmem:[%s5161_s0 + $0x190] sm:$0xf0] }
  0x76   :  { %1244 = vmatpush.bf16.msrb.mxu0 %v3582_v23 }
  0x77   :  { %1268 = vmatpush.bf16.msrb.mxu1 %v5233_v26 }
  0x78   :  { %1292 = vmatpush.bf16.msrb.mxu2 %v3822_v61 }
  0x79   :  { %1316 = vmatpush.bf16.msrb.mxu3 %v5232_v22  ;;  %v3200_v22 = vld [vmem:[%s5161_s0 + $0x100] sm:$0xf0] }
  0x7a   :  { %1245 = vmatpush.bf16.msrb.mxu0 %v5235_v10 }
  0x7b   :  { %1269 = vmatpush.bf16.msrb.mxu1 %v5237_v54 }
  0x7c   :  { %1293 = vmatpush.bf16.msrb.mxu2 %v5234_v6 }
  0x7d   :  { %1317 = vmatpush.bf16.msrb.mxu3 %v5236_v50  ;;  %v2704_v50 = vld [vmem:[%s5161_s0 + $0xe0] sm:$0xf] }
  0x7e   :  { %1246 = vmatpush.bf16.msrb.mxu0 %v5238_v36  ;;  %v2705_v40 = vor.u32 %v3200_v22, %v2704_v50  ;;  %v5241_v22 = vld [vmem:[#allocation16_spill] sm:$0xff] }
  0x7f   :  { %1270 = vmatpush.bf16.msrb.mxu1 %v3864_v43 }
  0x80   :  { %1294 = vmatpush.bf16.msrb.mxu2 %v3899_v62 }
  0x81   :  { %1318 = vmatpush.bf16.msrb.mxu3 %v3859_v42  ;;  %958 = vmatmul.bf16.vlgmr.msra.gmra.mxu0 %v2303_v57  ;;  %v5240_v42 = vld [vmem:[#allocation14_spill] sm:$0xff]  ;;  %v3209_v57 = vld [vmem:[%s5161_s0 + $0x148] sm:$0xf0] }
  0x82   :  { %1175 = vmatmul.bf16.vlgmr.msra.gmra.mxu1 %v2697_v52  ;;  %1335 = vmatpush.bf16.msra.mxu0 %v5239_v30  ;;  %v2740_v52 = vld [vmem:[%s5161_s0 + $0x128] sm:$0xf] }
  0x83   :  { %1199 = vmatmul.bf16.vlgmr.msra.gmra.mxu2 %v2701_v48  ;;  %1359 = vmatpush.bf16.msra.mxu1 %v3875_v34  ;;  %v2734_v48 = vld [vmem:[%s5161_s0 + $0x144] sm:$0xf0]  ;;  %v2741_v60 = vor.u32 %v3209_v57, %v2740_v52  ;;  %v2777_v52 = vor.u32 %v3218_v39, %v2776_v33  ;;  %v3202_v33 = vld [vmem:[%s5161_s0 + $0x110] sm:$0xf0] }
  0x84   :  { %1223 = vmatmul.bf16.vlgmr.msra.gmra.mxu3 %v2705_v40  ;;  %1583 = vmatpush.bf16.msra.mxu2 %v3447_v0  ;;  %v2338_v40 = vld [vmem:[%s5161_s0 + $0x68] sm:$0xf]  ;;  %v3113_v0 = vld [vmem:[%s5161_s0 + $0x88] sm:$0xf0] }
  0x85   :  { %1607 = vmatpush.bf16.msra.mxu3 %v3452_v1  ;;  %v2732_v1 = vld [vmem:[%s5161_s0 + $0x120] sm:$0xf]  ;;  %v2339_v50 = vor.u32 %v3113_v0, %v2338_v40 }
  0x86   :  { %1336 = vmatpush.bf16.msra.mxu0 %v5240_v42  ;;  %v5245_v40 = vld [vmem:[#allocation26_spill] sm:$0xff] }
  0x87   :  { %1360 = vmatpush.bf16.msra.mxu1 %v3910_v56 }
  0x88   :  { %1584 = vmatpush.bf16.msra.mxu2 %v3469_v4  ;;  %v3208_v4 = vld [vmem:[%s5161_s0 + $0x140] sm:$0xf0] }
  0x89   :  { %1608 = vmatpush.bf16.msra.mxu3 %v3474_v5  ;;  %v3204_v5 = vld [vmem:[%s5161_s0 + $0x124] sm:$0xf]  ;;  %v2733_v44 = vor.u32 %v3208_v4, %v2732_v1 }
  0x8a   :  { %1337 = vmatpush.bf16.msra.mxu0 %v5241_v22  ;;  %v2737_v59 = vor.u32 %v3204_v5, %v2734_v48 }
  0x8b   :  { %1361 = vmatpush.bf16.msra.mxu1 %v3919_v31 }
  0x8c   :  { %1585 = vmatpush.bf16.msra.mxu2 %v3493_v8  ;;  %v5243_v8 = vld [vmem:[#allocation20_spill] sm:$0xff] }
  0x8d   :  { %1609 = vmatpush.bf16.msra.mxu3 %v3498_v9  ;;  %v5244_v9 = vld [vmem:[#allocation23_spill] sm:$0xff] }
  0x8e   :  { %1338 = vmatpush.bf16.msra.mxu0 %v5242_v32 }
  0x8f   :  { %1362 = vmatpush.bf16.msra.mxu1 %v3928_v27 }
  0x90   :  { %1586 = vmatpush.bf16.msra.mxu2 %v3517_v12  ;;  %v2374_v12 = vld [vmem:[%s5161_s0 + $0xb0] sm:$0xf] }
  0x91   :  { %1610 = vmatpush.bf16.msra.mxu3 %v3522_v13  ;;  %963 = vmatmul.bf16.gmra.mxu0 %v2339_v50  ;;  %v3122_v13 = vld [vmem:[%s5161_s0 + $0xd0] sm:$0xf0] }
  0x92   :  { %1180 = vmatmul.bf16.gmra.mxu1 %v2733_v44  ;;  %1339 = vmatpush.bf16.msra.mxu0 %v5243_v8  ;;  %v2375_v0 = vor.u32 %v3122_v13, %v2374_v12  ;;  %v2712_v13 = vld [vmem:[%s5161_s0 + $0xe8] sm:$0xf] }
  0x93   :  { %1204 = vmatmul.bf16.gmra.mxu2 %v2737_v59  ;;  %1363 = vmatpush.bf16.msra.mxu1 %v3961_v38 }
  0x94   :  { %1228 = vmatmul.bf16.gmra.mxu3 %v2741_v60  ;;  %1587 = vmatpush.bf16.msra.mxu2 %v3541_v16  ;;  %v2768_v16 = vld [vmem:[%s5161_s0 + $0x168] sm:$0xf] }
  0x95   :  { %1611 = vmatpush.bf16.msra.mxu3 %v3546_v17  ;;  %v3217_v17 = vld [vmem:[%s5161_s0 + $0x188] sm:$0xf0] }
  0x96   :  { %1340 = vmatpush.bf16.msra.mxu0 %v5244_v9  ;;  %v2769_v1 = vor.u32 %v3217_v17, %v2768_v16  ;;  %v3201_v16 = vld [vmem:[%s5161_s0 + $0x108] sm:$0xf0] }
  0x97   :  { %1364 = vmatpush.bf16.msra.mxu1 %v3972_v14  ;;  %v3197_v17 = vld [vmem:[%s5161_s0 + $0xec] sm:$0xf] }
  0x98   :  { %1588 = vmatpush.bf16.msra.mxu2 %v3565_v20  ;;  %v3213_v20 = vld [vmem:[%s5161_s0 + $0x16c] sm:$0xf] }
  0x99   :  { %1612 = vmatpush.bf16.msra.mxu3 %v3570_v21  ;;  %v2770_v21 = vld [vmem:[%s5161_s0 + $0x18c] sm:$0xf0] }
  0x9a   :  { %1341 = vmatpush.bf16.msra.mxu0 %v5245_v40  ;;  %v2773_v48 = vor.u32 %v3213_v20, %v2770_v21  ;;  %v2714_v20 = vld [vmem:[%s5161_s0 + $0x10c] sm:$0xf0] }
  0x9b   :  { %1365 = vmatpush.bf16.msra.mxu1 %v3980_v46  ;;  %v2720_v21 = vld [vmem:[%s5161_s0 + $0xf0] sm:$0xf] }
  0x9c   :  { %1589 = vmatpush.bf16.msra.mxu2 %v3589_v24 }
  0x9d   :  { %1613 = vmatpush.bf16.msra.mxu3 %v3594_v25 }
  0x9e   :  { %v767_v4 = vpop.f32.mrf.mxu0  ;;  %1342 = vmatpush.bf16.msra.mxu0 %v3894_v63 }
  0x9f   :  { %v791_v5 = vpop.f32.mrf.mxu1  ;;  %1366 = vmatpush.bf16.msra.mxu1 %v3989_v2 }
  0xa0   :  { %v792_v57 = vadd.f32 %v791_v5, %v767_v4  ;;  %1590 = vmatpush.bf16.msra.mxu2 %v3611_v28  ;;  %v3196_v28 = vld [vmem:[%s5161_s0 + $0xe4] sm:$0xf]  ;;  %v2713_v4 = vor.u32 %v3201_v16, %v2712_v13 }
  0xa1   :  { %1614 = vmatpush.bf16.msra.mxu3 %v3616_v29  ;;  %968 = vmatmul.bf16.gmra.mxu0 %v2375_v0  ;;  %v2706_v29 = vld [vmem:[%s5161_s0 + $0x104] sm:$0xf0] }
  0xa2   :  { %1185 = vmatmul.bf16.gmra.mxu1 %v2769_v1  ;;  %v2709_v1 = vor.u32 %v3196_v28, %v2706_v29 }
  0xa3   :  { %1209 = vmatmul.bf16.gmra.mxu2 %v2773_v48 }
  0xa4   :  { %1233 = vmatmul.bf16.gmra.mxu3 %v2777_v52 }
  0xa6   :  { %v815_v24 = vpop.f32.mrf.mxu2  ;;  %v769_v44 = vpop.f32.mrf.mxu0 }
  0xa7   :  { %v839_v25 = vpop.f32.mrf.mxu3  ;;  %v816_v50 = vadd.f32 %v815_v24, %v792_v57  ;;  %v793_v59 = vpop.f32.mrf.mxu1  ;;  %v2717_v57 = vor.u32 %v3197_v17, %v2714_v20  ;;  %v2721_v24 = vor.u32 %v3202_v33, %v2720_v21  ;;  %v5247_v17 = vld [vmem:[#allocation3_spill] sm:$0xff]  ;;  %v2756_v21 = vld [vmem:[%s5161_s0 + $0x138] sm:$0xf]  ;;  %v3211_v33 = vld [vmem:[%s5161_s0 + $0x158] sm:$0xf0] }
  0xa8   :  { %v794_v60 = vadd.f32 %v793_v59, %v769_v44  ;;  %v5246_v44 = vld [vmem:[#allocation2_spill] sm:$0xff] }
  0xa9   :  { %v4180_v12 = vadd.f32 %v839_v25, %v816_v50 }
  0xae   :  { %v817_v39 = vpop.f32.mrf.mxu2  ;;  %v772_v48 = vpop.f32.mrf.mxu0 }
  0xaf   :  { %v841_v0 = vpop.f32.mrf.mxu3  ;;  %v818_v5 = vadd.f32 %v817_v39, %v794_v60  ;;  %v796_v52 = vpop.f32.mrf.mxu1  ;;  %v5248_v39 = vld [vmem:[#allocation4_spill] sm:$0xff] }
  0xb0   :  { %v797_v25 = vadd.f32 %v796_v52, %v772_v48 }
  0xb1   :  { %v4206_v50 = vadd.f32 %v841_v0, %v818_v5  ;;  %1247 = vmatmul.bf16.vlgmr.msrb.gmra.mxu0 %v2709_v1 }
  0xb2   :  { %1271 = vmatmul.bf16.vlgmr.msrb.gmra.mxu1 %v2713_v4  ;;  %1631 = vmatpush.bf16.msrb.mxu0 %v5246_v44 }
  0xb3   :  { %1295 = vmatmul.bf16.vlgmr.msrb.gmra.mxu2 %v2717_v57  ;;  %1655 = vmatpush.bf16.msrb.mxu1 %v3462_v3  ;;  %v3205_v3 = vld [vmem:[%s5161_s0 + $0x12c] sm:$0xf] }
  0xb4   :  { %1319 = vmatmul.bf16.vlgmr.msrb.gmra.mxu3 %v2721_v24  ;;  %1679 = vmatpush.bf16.msrb.mxu2 %v3664_v41  ;;  %v2742_v41 = vld [vmem:[%s5161_s0 + $0x14c] sm:$0xf0] }
  0xb5   :  { %1703 = vmatpush.bf16.msrb.mxu3 %v3678_v47  ;;  %v2748_v47 = vld [vmem:[%s5161_s0 + $0x130] sm:$0xf]  ;;  %v2745_v4 = vor.u32 %v3205_v3, %v2742_v41 }
  0xb6   :  { %v820_v59 = vpop.f32.mrf.mxu2  ;;  %v774_v29 = vpop.f32.mrf.mxu0  ;;  %1632 = vmatpush.bf16.msrb.mxu0 %v5247_v17 }
  0xb7   :  { %v844_v60 = vpop.f32.mrf.mxu3  ;;  %v821_v28 = vadd.f32 %v820_v59, %v797_v25  ;;  %v798_v13 = vpop.f32.mrf.mxu1  ;;  %1656 = vmatpush.bf16.msrb.mxu1 %v3486_v7  ;;  %v3206_v7 = vld [vmem:[%s5161_s0 + $0x134] sm:$0xf]  ;;  %v2757_v25 = vor.u32 %v3211_v33, %v2756_v21  ;;  %v5249_v59 = vld [vmem:[#allocation5_spill] sm:$0xff] }
  0xb8   :  { %v799_v16 = vadd.f32 %v798_v13, %v774_v29  ;;  %1680 = vmatpush.bf16.msrb.mxu2 %v3690_v49  ;;  %v3210_v49 = vld [vmem:[%s5161_s0 + $0x150] sm:$0xf0]  ;;  %v3220_v13 = vld [vmem:[%s5161_s0 + $0x1a0] sm:$0xf0] }
  0xb9   :  { %v4214_v20 = vadd.f32 %v844_v60, %v821_v28  ;;  %1704 = vmatpush.bf16.msrb.mxu3 %v3702_v51  ;;  %v2750_v51 = vld [vmem:[%s5161_s0 + $0x154] sm:$0xf0]  ;;  %v2749_v5 = vor.u32 %v3210_v49, %v2748_v47 }
  0xba   :  { %1633 = vmatpush.bf16.msrb.mxu0 %v5248_v39  ;;  %v2753_v24 = vor.u32 %v3206_v7, %v2750_v51 }
  0xbb   :  { %1657 = vmatpush.bf16.msrb.mxu1 %v3510_v11 }
  0xbc   :  { %1681 = vmatpush.bf16.msrb.mxu2 %v3714_v53 }
  0xbd   :  { %1705 = vmatpush.bf16.msrb.mxu3 %v3726_v55 }
  0xbe   :  { %v822_v0 = vpop.f32.mrf.mxu2  ;;  %v777_v52 = vpop.f32.mrf.mxu0  ;;  %1634 = vmatpush.bf16.msrb.mxu0 %v5249_v59  ;;  %v2842_v59 = vld [vmem:[%s5161_s0 + $0x1d4] sm:$0xf0] }
  0xbf   :  { %v846_v1 = vpop.f32.mrf.mxu3  ;;  %v823_v48 = vadd.f32 %v822_v0, %v799_v16  ;;  %v801_v57 = vpop.f32.mrf.mxu1  ;;  %1658 = vmatpush.bf16.msrb.mxu1 %v3534_v15  ;;  %v5250_v15 = vld [vmem:[#allocation6_spill] sm:$0xff]  ;;  %v5251_v16 = vld [vmem:[#allocation7_spill] sm:$0xff] }
  0xc0   :  { %v802_v44 = vadd.f32 %v801_v57, %v777_v52  ;;  %1682 = vmatpush.bf16.msrb.mxu2 %v3741_v58  ;;  %v2728_v57 = vld [vmem:[%s5161_s0 + $0xf8] sm:$0xf] }
  0xc1   :  { %v4248_v53 = vadd.f32 %v846_v1, %v823_v48  ;;  %1706 = vmatpush.bf16.msrb.mxu3 %v3774_v35  ;;  %1252 = vmatmul.bf16.gmra.mxu0 %v2745_v4 }
  0xc2   :  { %1276 = vmatmul.bf16.gmra.mxu1 %v2749_v5  ;;  %1635 = vmatpush.bf16.msrb.mxu0 %v3553_v18  ;;  %v3214_v18 = vld [vmem:[%s5161_s0 + $0x174] sm:$0xf] }
  0xc3   :  { %1300 = vmatmul.bf16.gmra.mxu2 %v2753_v24  ;;  %1659 = vmatpush.bf16.msrb.mxu1 %v3558_v19  ;;  %v2778_v19 = vld [vmem:[%s5161_s0 + $0x194] sm:$0xf0]  ;;  %v3203_v24 = vld [vmem:[%s5161_s0 + $0x118] sm:$0xf0] }
  0xc4   :  { %1324 = vmatmul.bf16.gmra.mxu3 %v2757_v25  ;;  %1683 = vmatpush.bf16.msrb.mxu2 %v3786_v37  ;;  %v2784_v37 = vld [vmem:[%s5161_s0 + $0x178] sm:$0xf]  ;;  %v2781_v41 = vor.u32 %v3214_v18, %v2778_v19  ;;  %v3226_v25 = vld [vmem:[%s5161_s0 + $0x1d0] sm:$0xf0] }
  0xc5   :  { %1707 = vmatpush.bf16.msrb.mxu3 %v3798_v45  ;;  %v3219_v45 = vld [vmem:[%s5161_s0 + $0x198] sm:$0xf0] }
  0xc6   :  { %v825_v11 = vpop.f32.mrf.mxu2  ;;  %v779_v60 = vpop.f32.mrf.mxu0  ;;  %1636 = vmatpush.bf16.msrb.mxu0 %v5250_v15  ;;  %v2785_v47 = vor.u32 %v3219_v45, %v2784_v37 }
  0xc7   :  { %v849_v55 = vpop.f32.mrf.mxu3  ;;  %v826_v58 = vadd.f32 %v825_v11, %v802_v44  ;;  %v803_v28 = vpop.f32.mrf.mxu1  ;;  %1660 = vmatpush.bf16.msrb.mxu1 %v3582_v23  ;;  %v3215_v23 = vld [vmem:[%s5161_s0 + $0x17c] sm:$0xf]  ;;  %v3222_v44 = vld [vmem:[%s5161_s0 + $0x1b4] sm:$0xf] }
  0xc8   :  { %v804_v35 = vadd.f32 %v803_v28, %v779_v60  ;;  %1684 = vmatpush.bf16.msrb.mxu2 %v5233_v26  ;;  %v2792_v26 = vld [vmem:[%s5161_s0 + $0x180] sm:$0xf]  ;;  %v2729_v60 = vor.u32 %v3203_v24, %v2728_v57  ;;  %v2845_v19 = vor.u32 %v3222_v44, %v2842_v59  ;;  %v5256_v57 = vld [vmem:[#allocation17_spill] sm:$0xff] }
  0xc9   :  { %v4258_v29 = vadd.f32 %v849_v55, %v826_v58  ;;  %1708 = vmatpush.bf16.msrb.mxu3 %v3822_v61  ;;  %v2786_v61 = vld [vmem:[%s5161_s0 + $0x19c] sm:$0xf0]  ;;  %v2793_v33 = vor.u32 %v3220_v13, %v2792_v26  ;;  %v3352_v26 = vld [vmem:[%s5160_s1 + $0x38] sm:$0xff] }
  0xca   :  { %1637 = vmatpush.bf16.msrb.mxu0 %v5251_v16  ;;  %v2789_v21 = vor.u32 %v3215_v23, %v2786_v61  ;;  %v5253_v61 = vld [vmem:[#allocation11_spill] sm:$0xff] }
  0xcb   :  { %1661 = vmatpush.bf16.msrb.mxu1 %v5235_v10 }
  0xcc   :  { %1685 = vmatpush.bf16.msrb.mxu2 %v5237_v54  ;;  %v5252_v54 = vld [vmem:[#allocation9_spill] sm:$0xff] }
  0xcd   :  { %1709 = vmatpush.bf16.msrb.mxu3 %v5234_v6 }
  0xce   :  { %v827_v17 = vpop.f32.mrf.mxu2  ;;  %v863_v7 = vpop.f32.mrf.mxu0  ;;  %1638 = vmatpush.bf16.msrb.mxu0 %v5252_v54  ;;  %v5255_v54 = vld [vmem:[#allocation15_spill] sm:$0xff] }
  0xcf   :  { %v851_v3 = vpop.f32.mrf.mxu3  ;;  %v828_v49 = vadd.f32 %v827_v17, %v804_v35  ;;  %v887_v51 = vpop.f32.mrf.mxu1  ;;  %v864_v39 = vadd.f32 %v863_v7, %v4180_v12  ;;  %1662 = vmatpush.bf16.msrb.mxu1 %v5238_v36  ;;  %v2722_v36 = vld [vmem:[%s5161_s0 + $0x114] sm:$0xf0]  ;;  %v3207_v7 = vld [vmem:[%s5161_s0 + $0x13c] sm:$0xf] }
  0xd0   :  { %1686 = vmatpush.bf16.msrb.mxu2 %v3864_v43 }
  0xd1   :  { %v4293_v0 = vadd.f32 %v851_v3, %v828_v49  ;;  %1710 = vmatpush.bf16.msrb.mxu3 %v3899_v62  ;;  %v888_v6 = vadd.f32 %v887_v51, %v864_v39  ;;  %1257 = vmatmul.bf16.gmra.mxu0 %v2781_v41  ;;  %v3198_v62 = vld [vmem:[%s5161_s0 + $0xf4] sm:$0xf]  ;;  %v3212_v51 = vld [vmem:[%s5161_s0 + $0x160] sm:$0xf0]  ;;  %v2878_v39 = vld [vmem:[%s5161_s0 + $0x21c] sm:$0xf0] }
  0xd2   :  { %1281 = vmatmul.bf16.gmra.mxu1 %v2785_v47  ;;  %v2725_v58 = vor.u32 %v3198_v62, %v2722_v36  ;;  %v5254_v47 = vld [vmem:[#allocation13_spill] sm:$0xff]  ;;  %v3353_v49 = vld [vmem:[%s5160_s1 + $0x30] sm:$0xff] }
  0xd3   :  { %1305 = vmatmul.bf16.gmra.mxu2 %v2789_v21  ;;  %v3235_v21 = vld [vmem:[%s5161_s0 + $0x218] sm:$0xf0] }
  0xd4   :  { %1329 = vmatmul.bf16.gmra.mxu3 %v2793_v33  ;;  %v3231_v33 = vld [vmem:[%s5161_s0 + $0x1fc] sm:$0xf] }
  0xd5   :  { %v2881_v36 = vor.u32 %v3231_v33, %v2878_v39  ;;  %v3223_v33 = vld [vmem:[%s5161_s0 + $0x1bc] sm:$0xf]  ;;  %v2850_v39 = vld [vmem:[%s5161_s0 + $0x1dc] sm:$0xf0] }
  0xd6   :  { %v911_v10 = vpop.f32.mrf.mxu2  ;;  %v865_v5 = vpop.f32.mrf.mxu0 }
  0xd7   :  { %v935_v1 = vpop.f32.mrf.mxu3  ;;  %v912_v4 = vadd.f32 %v911_v10, %v888_v6  ;;  %v889_v12 = vpop.f32.mrf.mxu1  ;;  %v866_v43 = vadd.f32 %v865_v5, %v4206_v50  ;;  %v2840_v50 = vld [vmem:[%s5161_s0 + $0x1b0] sm:$0xf]  ;;  %v3354_v6 = vld [vmem:[%s5160_s1 + $0x28] sm:$0xff] }
  0xd8   :  { %v2841_v18 = vor.u32 %v3226_v25, %v2840_v50 }
  0xd9   :  { %v4298_v48 = vadd.f32 %v935_v1, %v912_v4  ;;  %v890_v52 = vadd.f32 %v889_v12, %v866_v43 }
  0xde   :  { %v913_v11 = vpop.f32.mrf.mxu2  ;;  %v868_v35 = vpop.f32.mrf.mxu0 }
  0xdf   :  { %v937_v55 = vpop.f32.mrf.mxu3  ;;  %v914_v28 = vadd.f32 %v913_v11, %v890_v52  ;;  %v892_v15 = vpop.f32.mrf.mxu1  ;;  %v869_v37 = vadd.f32 %v868_v35, %v4214_v20  ;;  %v3221_v35 = vld [vmem:[%s5161_s0 + $0x1a8] sm:$0xf0] }
  0xe1   :  { %v4325_v45 = vadd.f32 %v937_v55, %v914_v28  ;;  %v893_v23 = vadd.f32 %v892_v15, %v869_v37  ;;  %1343 = vmatmul.bf16.vlgmr.msra.gmra.mxu0 %v2725_v58  ;;  %v5258_v58 = vld [vmem:[#allocation21_spill] sm:$0xff]  ;;  %v3216_v28 = vld [vmem:[%s5161_s0 + $0x184] sm:$0xf]  ;;  %v5259_v37 = vld [vmem:[#allocation24_spill] sm:$0xff] }
  0xe2   :  { %1367 = vmatmul.bf16.vlgmr.msra.gmra.mxu1 %v2729_v60  ;;  %1727 = vmatpush.bf16.msra.mxu0 %v5253_v61  ;;  %v3357_v60 = vld [vmem:[%s5160_s1 + $0x10] sm:$0xff]  ;;  %v3244_v15 = vld [vmem:[%s5161_s0 + $0x260] sm:$0xf0] }
  0xe3   :  { %1591 = vmatmul.bf16.vlgmr.msra.gmra.mxu2 %v2841_v18  ;;  %1751 = vmatpush.bf16.msra.mxu1 %v5239_v30  ;;  %v3240_v18 = vld [vmem:[%s5161_s0 + $0x244] sm:$0xf] }
  0xe4   :  { %1615 = vmatmul.bf16.vlgmr.msra.gmra.mxu3 %v2845_v19  ;;  %1775 = vmatpush.bf16.msra.mxu2 %v3875_v34  ;;  %v2914_v19 = vld [vmem:[%s5161_s0 + $0x264] sm:$0xf0] }
  0xe5   :  { %1999 = vmatpush.bf16.msra.mxu3 %v3352_v26 }
  0xe6   :  { %v916_v13 = vpop.f32.mrf.mxu2  ;;  %v870_v17 = vpop.f32.mrf.mxu0  ;;  %1728 = vmatpush.bf16.msra.mxu0 %v5254_v47  ;;  %v2917_v47 = vor.u32 %v3240_v18, %v2914_v19  ;;  %v3237_v18 = vld [vmem:[%s5161_s0 + $0x228] sm:$0xf0] }
  0xe7   :  { %v940_v20 = vpop.f32.mrf.mxu3  ;;  %v917_v16 = vadd.f32 %v916_v13, %v893_v23  ;;  %v894_v3 = vpop.f32.mrf.mxu1  ;;  %v871_v41 = vadd.f32 %v870_v17, %v4248_v53  ;;  %1752 = vmatpush.bf16.msra.mxu1 %v5240_v42  ;;  %v2764_v53 = vld [vmem:[%s5161_s0 + $0x140] sm:$0xf]  ;;  %v2876_v42 = vld [vmem:[%s5161_s0 + $0x1f8] sm:$0xf]  ;;  %v3358_v23 = vld [vmem:[%s5160_s1 + $0x8] sm:$0xff] }
  0xe8   :  { %1776 = vmatpush.bf16.msra.mxu2 %v3910_v56  ;;  %v2758_v56 = vld [vmem:[%s5161_s0 + $0x15c] sm:$0xf0]  ;;  %v2765_v5 = vor.u32 %v3212_v51, %v2764_v53  ;;  %v2877_v62 = vor.u32 %v3235_v21, %v2876_v42  ;;  %v2848_v21 = vld [vmem:[%s5161_s0 + $0x1b8] sm:$0xf]  ;;  %v3233_v19 = vld [vmem:[%s5161_s0 + $0x20c] sm:$0xf] }
  0xe9   :  { %v4336_v34 = vadd.f32 %v940_v20, %v917_v16  ;;  %2000 = vmatpush.bf16.msra.mxu3 %v3353_v49  ;;  %v895_v30 = vadd.f32 %v894_v3, %v871_v41  ;;  %v2761_v4 = vor.u32 %v3207_v7, %v2758_v56  ;;  %v5260_v49 = vld [vmem:[#allocation28_spill] sm:$0xff] }
  0xea   :  { %1729 = vmatpush.bf16.msra.mxu0 %v5255_v54  ;;  %v3228_v54 = vld [vmem:[%s5161_s0 + $0x1e0] sm:$0xf0] }
  0xeb   :  { %1753 = vmatpush.bf16.msra.mxu1 %v5241_v22  ;;  %v3355_v22 = vld [vmem:[%s5160_s1 + $0x20] sm:$0xff] }
  0xec   :  { %1777 = vmatpush.bf16.msra.mxu2 %v3919_v31 }
  0xed   :  { %2001 = vmatpush.bf16.msra.mxu3 %v3354_v6  ;;  %v3224_v6 = vld [vmem:[%s5161_s0 + $0x1c4] sm:$0xf] }
  0xee   :  { %v918_v10 = vpop.f32.mrf.mxu2  ;;  %v873_v43 = vpop.f32.mrf.mxu0  ;;  %1730 = vmatpush.bf16.msra.mxu0 %v5256_v57 }
  0xef   :  { %v942_v1 = vpop.f32.mrf.mxu3  ;;  %v919_v12 = vadd.f32 %v918_v10, %v895_v30  ;;  %v897_v52 = vpop.f32.mrf.mxu1  ;;  %v874_v31 = vadd.f32 %v873_v43, %v4258_v29  ;;  %1754 = vmatpush.bf16.msra.mxu1 %v5242_v32  ;;  %v5257_v29 = vld [vmem:[#allocation19_spill] sm:$0xff] }
  0xf0   :  { %1778 = vmatpush.bf16.msra.mxu2 %v3928_v27  ;;  %v3356_v27 = vld [vmem:[%s5160_s1 + $0x18] sm:$0xff]  ;;  %v2858_v10 = vld [vmem:[%s5161_s0 + $0x1e4] sm:$0xf0] }
  0xf1   :  { %v4375_v24 = vadd.f32 %v942_v1, %v919_v12  ;;  %2002 = vmatpush.bf16.msra.mxu3 %v3355_v22  ;;  %v898_v50 = vadd.f32 %v897_v52, %v874_v31  ;;  %1348 = vmatmul.bf16.gmra.mxu0 %v2761_v4  ;;  %v2853_v12 = vor.u32 %v3223_v33, %v2850_v39  ;;  %v3377_v33 = vld [vmem:[%s5160_s1 + $0x58] sm:$0xff] }
  0xf2   :  { %1372 = vmatmul.bf16.gmra.mxu1 %v2765_v5  ;;  %1731 = vmatpush.bf16.msra.mxu0 %v5257_v29  ;;  %v2861_v31 = vor.u32 %v3224_v6, %v2858_v10  ;;  %v3361_v29 = vld [vmem:[%s5160_s1 + $0x78] sm:$0xff] }
  0xf3   :  { %1596 = vmatmul.bf16.gmra.mxu2 %v2877_v62  ;;  %1755 = vmatpush.bf16.msra.mxu1 %v5243_v8  ;;  %v3378_v39 = vld [vmem:[%s5160_s1 + $0x118] sm:$0xff] }
  0xf4   :  { %1620 = vmatmul.bf16.gmra.mxu3 %v2881_v36  ;;  %1779 = vmatpush.bf16.msra.mxu2 %v3961_v38 }
  0xf5   :  { %2003 = vmatpush.bf16.msra.mxu3 %v3356_v27  ;;  %v3363_v27 = vld [vmem:[%s5160_s1 + $0xb8] sm:$0xff] }
  0xf6   :  { %v921_v25 = vpop.f32.mrf.mxu2  ;;  %v875_v32 = vpop.f32.mrf.mxu0  ;;  %1732 = vmatpush.bf16.msra.mxu0 %v5258_v58  ;;  %v3364_v58 = vld [vmem:[%s5160_s1 + $0xf0] sm:$0xff] }
  0xf7   :  { %v945_v44 = vpop.f32.mrf.mxu3  ;;  %v922_v59 = vadd.f32 %v921_v25, %v898_v50  ;;  %v899_v11 = vpop.f32.mrf.mxu1  ;;  %v876_v55 = vadd.f32 %v875_v32, %v4293_v0  ;;  %1756 = vmatpush.bf16.msra.mxu1 %v5244_v9  ;;  %v2800_v0 = vld [vmem:[%s5161_s0 + $0x188] sm:$0xf]  ;;  %v2912_v9 = vld [vmem:[%s5161_s0 + $0x240] sm:$0xf]  ;;  %v3360_v50 = vld [vmem:[%s5160_s1 + $0xf8] sm:$0xff] }
  0xf8   :  { %1780 = vmatpush.bf16.msra.mxu2 %v3972_v14  ;;  %v2794_v14 = vld [vmem:[%s5161_s0 + $0x1a4] sm:$0xf0]  ;;  %v2801_v20 = vor.u32 %v3221_v35, %v2800_v0  ;;  %v2913_v41 = vor.u32 %v3244_v15, %v2912_v9  ;;  %v3236_v0 = vld [vmem:[%s5161_s0 + $0x220] sm:$0xf0] }
  0xf9   :  { %v4390_v38 = vadd.f32 %v945_v44, %v922_v59  ;;  %2004 = vmatpush.bf16.msra.mxu3 %v3357_v60  ;;  %v900_v8 = vadd.f32 %v899_v11, %v876_v55  ;;  %v2797_v13 = vor.u32 %v3216_v28, %v2794_v14  ;;  %v3365_v60 = vld [vmem:[%s5160_s1 + $0x70] sm:$0xff]  ;;  %v2884_v14 = vld [vmem:[%s5161_s0 + $0x200] sm:$0xf]  ;;  %v3232_v35 = vld [vmem:[%s5161_s0 + $0x204] sm:$0xf] }
  0xfa   :  { %1733 = vmatpush.bf16.msra.mxu0 %v5259_v37  ;;  %v3366_v28 = vld [vmem:[%s5160_s1 + $0x130] sm:$0xff]  ;;  %v2886_v9 = vld [vmem:[%s5161_s0 + $0x224] sm:$0xf0] }
  0xfb   :  { %1757 = vmatpush.bf16.msra.mxu1 %v5245_v40  ;;  %v3359_v40 = vld [vmem:[%s5160_s1] sm:$0xff]  ;;  %v2892_v15 = vld [vmem:[%s5161_s0 + $0x208] sm:$0xf]  ;;  %v2894_v37 = vld [vmem:[%s5161_s0 + $0x22c] sm:$0xf0] }
  0xfc   :  { %1781 = vmatpush.bf16.msra.mxu2 %v3980_v46 }
  0xfd   :  { %2005 = vmatpush.bf16.msra.mxu3 %v3358_v23  ;;  %v3368_v23 = vld [vmem:[%s5160_s1 + $0xe8] sm:$0xff] }
  0xfe   :  { %v923_v61 = vpop.f32.mrf.mxu2  ;;  %v959_v17 = vpop.f32.mrf.mxu0  ;;  %1734 = vmatpush.bf16.msra.mxu0 %v5260_v49 }
  0xff   :  { %v947_v26 = vpop.f32.mrf.mxu3  ;;  %v924_v16 = vadd.f32 %v923_v61, %v900_v8  ;;  %v1176_v3 = vpop.f32.mrf.mxu1  ;;  %v4427_v46 = vadd.f32 %v959_v17, %v4298_v48  ;;  %1758 = vmatpush.bf16.msra.mxu1 %v3894_v63  ;;  %v3227_v63 = vld [vmem:[%s5161_s0 + $0x1d8] sm:$0xf0]  ;;  %v3369_v61 = vld [vmem:[%s5160_s1 + $0x68] sm:$0xff]  ;;  %v2885_v17 = vor.u32 %v3236_v0, %v2884_v14 }
 0x100   :  { %1782 = vmatpush.bf16.msra.mxu2 %v3989_v2  ;;  %v2849_v5 = vor.u32 %v3227_v63, %v2848_v21  ;;  %v3374_v21 = vld [vmem:[%s5160_s1 + $0x120] sm:$0xff]  ;;  %v3376_v63 = vld [vmem:[%s5160_s1 + $0xd8] sm:$0xff] }
 0x101   :  { %v4431_v30 = vadd.f32 %v947_v26, %v924_v16  ;;  %2006 = vmatpush.bf16.msra.mxu3 %v3359_v40  ;;  %1353 = vmatmul.bf16.gmra.mxu0 %v2797_v13  ;;  %v3370_v26 = vld [vmem:[%s5160_s1 + $0x128] sm:$0xff]  ;;  %v2893_v40 = vor.u32 %v3237_v18, %v2892_v15 }
 0x102   :  { %1377 = vmatmul.bf16.gmra.mxu1 %v2801_v20  ;;  %v3371_v13 = vld [vmem:[%s5160_s1 + $0xa8] sm:$0xff] }
 0x103   :  { %1601 = vmatmul.bf16.gmra.mxu2 %v2913_v41 }
 0x104   :  { %1625 = vmatmul.bf16.gmra.mxu3 %v2917_v47 }
 0x106   :  { %v1200_v7 = vpop.f32.mrf.mxu2  ;;  %v961_v53 = vpop.f32.mrf.mxu0 }
 0x107   :  { %v1224_v48 = vpop.f32.mrf.mxu3  ;;  %v1201_v56 = vadd.f32 %v1200_v7, %v1176_v3  ;;  %v1178_v2 = vpop.f32.mrf.mxu1  ;;  %v4438_v51 = vadd.f32 %v961_v53, %v4325_v45  ;;  %v2856_v45 = vld [vmem:[%s5161_s0 + $0x1c0] sm:$0xf]  ;;  %v2889_v3 = vor.u32 %v3232_v35, %v2886_v9  ;;  %v2897_v7 = vor.u32 %v3233_v19, %v2894_v37 }
 0x108   :  { %v2857_v36 = vor.u32 %v3228_v54, %v2856_v45  ;;  %v3373_v53 = vld [vmem:[%s5160_s1 + $0x60] sm:$0xff]  ;;  %v3379_v45 = vld [vmem:[%s5160_s1 + $0x98] sm:$0xff] }
 0x109   :  { %v4440_v42 = vadd.f32 %v1224_v48, %v1201_v56  ;;  %v3372_v56 = vld [vmem:[%s5160_s1 + $0xe0] sm:$0xff] }
 0x10a   :  { %v3388_v37 = vld [vmem:[%s5160_s1 + $0xc0] sm:$0xff] }
 0x10e   :  { %v1202_v1 = vpop.f32.mrf.mxu2  ;;  %v964_v52 = vpop.f32.mrf.mxu0 }
 0x10f   :  { %v1226_v4 = vpop.f32.mrf.mxu3  ;;  %v1203_v43 = vadd.f32 %v1202_v1, %v1178_v2  ;;  %v1181_v62 = vpop.f32.mrf.mxu1  ;;  %v4467_v57 = vadd.f32 %v964_v52, %v4336_v34  ;;  %v3362_v34 = vld [vmem:[%s5160_s1 + $0x138] sm:$0xff] }
 0x111   :  { %v4469_v22 = vadd.f32 %v1226_v4, %v1203_v43  ;;  %1639 = vmatmul.bf16.vlgmr.msrb.gmra.mxu0 %v2849_v5  ;;  %v3381_v43 = vld [vmem:[%s5160_s1 + $0x50] sm:$0xff] }
 0x112   :  { %1663 = vmatmul.bf16.vlgmr.msrb.gmra.mxu1 %v2853_v12  ;;  %2023 = vmatpush.bf16.msrb.mxu0 %v3361_v29  ;;  %v3380_v12 = vld [vmem:[%s5160_s1 + $0xd0] sm:$0xff] }
 0x113   :  { %1687 = vmatmul.bf16.vlgmr.msrb.gmra.mxu2 %v2857_v36  ;;  %2047 = vmatpush.bf16.msrb.mxu1 %v3363_v27  ;;  %v2920_v36 = vld [vmem:[%s5161_s0 + $0x248] sm:$0xf]  ;;  %v2922_v29 = vld [vmem:[%s5161_s0 + $0x26c] sm:$0xf0]  ;;  %v3246_v27 = vld [vmem:[%s5161_s0 + $0x270] sm:$0xf0] }
 0x114   :  { %1711 = vmatmul.bf16.vlgmr.msrb.gmra.mxu3 %v2861_v31  ;;  %2071 = vmatpush.bf16.msrb.mxu2 %v3360_v50  ;;  %v3245_v31 = vld [vmem:[%s5161_s0 + $0x268] sm:$0xf0] }
 0x115   :  { %2095 = vmatpush.bf16.msrb.mxu3 %v3362_v34  ;;  %v3241_v50 = vld [vmem:[%s5161_s0 + $0x24c] sm:$0xf]  ;;  %v2928_v34 = vld [vmem:[%s5161_s0 + $0x250] sm:$0xf] }
 0x116   :  { %v1205_v25 = vpop.f32.mrf.mxu2  ;;  %v966_v32 = vpop.f32.mrf.mxu0  ;;  %2024 = vmatpush.bf16.msrb.mxu0 %v3365_v60  ;;  %v2925_v14 = vor.u32 %v3241_v50, %v2922_v29  ;;  %v2929_v15 = vor.u32 %v3246_v27, %v2928_v34  ;;  %v3393_v50 = vld [vmem:[%s5160_s1 + $0x178] sm:$0xff] }
 0x117   :  { %v1229_v44 = vpop.f32.mrf.mxu3  ;;  %v1206_v59 = vadd.f32 %v1205_v25, %v1181_v62  ;;  %v1183_v11 = vpop.f32.mrf.mxu1  ;;  %v4484_v55 = vadd.f32 %v966_v32, %v4375_v24  ;;  %v3367_v24 = vld [vmem:[%s5160_s1 + $0xb0] sm:$0xff]  ;;  %v3385_v32 = vld [vmem:[%s5160_s1 + $0x48] sm:$0xff]  ;;  %v3395_v29 = vld [vmem:[%s5160_s1 + $0x1b8] sm:$0xff] }
 0x118   :  { %2072 = vmatpush.bf16.msrb.mxu2 %v3364_v58  ;;  %2048 = vmatpush.bf16.msrb.mxu1 %v3367_v24  ;;  %v3382_v62 = vld [vmem:[%s5160_s1 + $0x110] sm:$0xff]  ;;  %v3387_v58 = vld [vmem:[%s5160_s1 + $0x88] sm:$0xff]  ;;  %v2921_v24 = vor.u32 %v3245_v31, %v2920_v36  ;;  %v3392_v31 = vld [vmem:[%s5160_s1 + $0x1f8] sm:$0xff] }
 0x119   :  { %v4492_v8 = vadd.f32 %v1229_v44, %v1206_v59  ;;  %2096 = vmatpush.bf16.msrb.mxu3 %v3366_v28  ;;  %v3242_v25 = vld [vmem:[%s5161_s0 + $0x254] sm:$0xf]  ;;  %v2930_v44 = vld [vmem:[%s5161_s0 + $0x274] sm:$0xf0]  ;;  %v3384_v59 = vld [vmem:[%s5160_s1 + $0xc8] sm:$0xff] }
 0x11a   :  { %2025 = vmatpush.bf16.msrb.mxu0 %v3369_v61  ;;  %v2933_v18 = vor.u32 %v3242_v25, %v2930_v44 }
 0x11c   :  { %2073 = vmatpush.bf16.msrb.mxu2 %v3368_v23  ;;  %2049 = vmatpush.bf16.msrb.mxu1 %v3371_v13  ;;  %v3389_v23 = vld [vmem:[%s5160_s1 + $0x40] sm:$0xff] }
 0x11d   :  { %2097 = vmatpush.bf16.msrb.mxu3 %v3370_v26  ;;  %v3390_v26 = vld [vmem:[%s5160_s1 + $0x100] sm:$0xff] }
 0x11e   :  { %v1207_v20 = vpop.f32.mrf.mxu2  ;;  %v969_v47 = vpop.f32.mrf.mxu0  ;;  %2026 = vmatpush.bf16.msrb.mxu0 %v3373_v53  ;;  %v3225_v53 = vld [vmem:[%s5161_s0 + $0x1cc] sm:$0xf] }
 0x11f   :  { %v1231_v16 = vpop.f32.mrf.mxu3  ;;  %v1208_v41 = vadd.f32 %v1207_v20, %v1183_v11  ;;  %v1186_v49 = vpop.f32.mrf.mxu1  ;;  %v4537_v48 = vadd.f32 %v969_v47, %v4390_v38  ;;  %v3375_v38 = vld [vmem:[%s5160_s1 + $0xa0] sm:$0xff]  ;;  %v3386_v11 = vld [vmem:[%s5160_s1 + $0x108] sm:$0xff] }
 0x120   :  { %2074 = vmatpush.bf16.msrb.mxu2 %v3372_v56  ;;  %2050 = vmatpush.bf16.msrb.mxu1 %v3375_v38  ;;  %v3229_v56 = vld [vmem:[%s5161_s0 + $0x1e8] sm:$0xf0]  ;;  %v3230_v38 = vld [vmem:[%s5161_s0 + $0x1f0] sm:$0xf0] }
 0x121   :  { %v4545_v2 = vadd.f32 %v1231_v16, %v1208_v41  ;;  %2098 = vmatpush.bf16.msrb.mxu3 %v3374_v21  ;;  %1644 = vmatmul.bf16.gmra.mxu0 %v2885_v17  ;;  %v2866_v21 = vld [vmem:[%s5161_s0 + $0x1ec] sm:$0xf0] }
 0x122   :  { %1668 = vmatmul.bf16.gmra.mxu1 %v2889_v3  ;;  %2027 = vmatpush.bf16.msrb.mxu0 %v3377_v33  ;;  %v3253_v33 = vld [vmem:[%s5161_s0 + $0x2a8] sm:$0xf0] }
 0x123   :  { %1692 = vmatmul.bf16.gmra.mxu2 %v2893_v40 }
 0x124   :  { %1716 = vmatmul.bf16.gmra.mxu3 %v2897_v7  ;;  %2075 = vmatpush.bf16.msrb.mxu2 %v3376_v63  ;;  %v2864_v7 = vld [vmem:[%s5161_s0 + $0x1c8] sm:$0xf] }
 0x125   :  { %2099 = vmatpush.bf16.msrb.mxu3 %v3378_v39  ;;  %2051 = vmatpush.bf16.msrb.mxu1 %v3379_v45  ;;  %v2984_v63 = vld [vmem:[%s5161_s0 + $0x288] sm:$0xf] }
 0x126   :  { %v1210_v54 = vpop.f32.mrf.mxu2  ;;  %v971_v1 = vpop.f32.mrf.mxu0  ;;  %2028 = vmatpush.bf16.msrb.mxu0 %v3381_v43  ;;  %v2985_v43 = vor.u32 %v3253_v33, %v2984_v63  ;;  %v3406_v63 = vld [vmem:[%s5160_s1 + $0x220] sm:$0xff] }
 0x127   :  { %v1234_v6 = vpop.f32.mrf.mxu3  ;;  %v1211_v10 = vadd.f32 %v1210_v54, %v1186_v49  ;;  %v1188_v4 = vpop.f32.mrf.mxu1  ;;  %v4566_v5 = vadd.f32 %v971_v1, %v4431_v30  ;;  %v3383_v30 = vld [vmem:[%s5160_s1 + $0x90] sm:$0xff]  ;;  %v2865_v54 = vor.u32 %v3229_v56, %v2864_v7 }
 0x128   :  { %2076 = vmatpush.bf16.msrb.mxu2 %v3380_v12 }
 0x129   :  { %v4574_v52 = vadd.f32 %v1234_v6, %v1211_v10  ;;  %2100 = vmatpush.bf16.msrb.mxu3 %v3382_v62  ;;  %2052 = vmatpush.bf16.msrb.mxu1 %v3383_v30  ;;  %v2869_v6 = vor.u32 %v3225_v53, %v2866_v21  ;;  %v3404_v21 = vld [vmem:[%s5160_s1 + $0x1e0] sm:$0xff] }
 0x12a   :  { %2029 = vmatpush.bf16.msrb.mxu0 %v3385_v32 }
 0x12c   :  { %2077 = vmatpush.bf16.msrb.mxu2 %v3384_v59 }
 0x12d   :  { %2101 = vmatpush.bf16.msrb.mxu3 %v3386_v11  ;;  %2053 = vmatpush.bf16.msrb.mxu1 %v3387_v58  ;;  %v3396_v11 = vld [vmem:[%s5160_s1 + $0x1f0] sm:$0xff] }
 0x12e   :  { %v1212_v60 = vpop.f32.mrf.mxu2  ;;  %v1248_v35 = vpop.f32.mrf.mxu0  ;;  %2030 = vmatpush.bf16.msrb.mxu0 %v3389_v23  ;;  %v3397_v58 = vld [vmem:[%s5160_s1 + $0x170] sm:$0xff]  ;;  %v3400_v23 = vld [vmem:[%s5160_s1 + $0x1e8] sm:$0xff] }
 0x12f   :  { %v1236_v28 = vpop.f32.mrf.mxu3  ;;  %v1213_v0 = vadd.f32 %v1212_v60, %v1188_v4  ;;  %v1272_v9 = vpop.f32.mrf.mxu1  ;;  %v1249_v19 = vadd.f32 %v1248_v35, %v4440_v42  ;;  %v3391_v42 = vld [vmem:[%s5160_s1 + $0x80] sm:$0xff]  ;;  %v3234_v35 = vld [vmem:[%s5161_s0 + $0x214] sm:$0xf] }
 0x130   :  { %2078 = vmatpush.bf16.msrb.mxu2 %v3388_v37  ;;  %v3262_v37 = vld [vmem:[%s5161_s0 + $0x2f0] sm:$0xf0] }
 0x131   :  { %v4625_v61 = vadd.f32 %v1236_v28, %v1213_v0  ;;  %2102 = vmatpush.bf16.msrb.mxu3 %v3390_v26  ;;  %2054 = vmatpush.bf16.msrb.mxu1 %v3391_v42  ;;  %v1273_v13 = vadd.f32 %v1272_v9, %v1249_v19  ;;  %v3398_v28 = vld [vmem:[%s5160_s1 + $0x230] sm:$0xff]  ;;  %v2902_v9 = vld [vmem:[%s5161_s0 + $0x234] sm:$0xf0]  ;;  %v3401_v26 = vld [vmem:[%s5160_s1 + $0x168] sm:$0xff] }
 0x132   :  { %1649 = vmatmul.bf16.gmra.mxu0 %v2921_v24  ;;  %1673 = vmatmul.bf16.gmra.mxu1 %v2925_v14  ;;  %v2900_v14 = vld [vmem:[%s5161_s0 + $0x210] sm:$0xf]  ;;  %v3238_v0 = vld [vmem:[%s5161_s0 + $0x230] sm:$0xf0]  ;;  %v3402_v42 = vld [vmem:[%s5160_s1 + $0x228] sm:$0xff] }
 0x133   :  { %1697 = vmatmul.bf16.gmra.mxu2 %v2929_v15  ;;  %v2908_v15 = vld [vmem:[%s5161_s0 + $0x218] sm:$0xf]  ;;  %v3020_v19 = vld [vmem:[%s5161_s0 + $0x2d0] sm:$0xf] }
 0x134   :  { %1721 = vmatmul.bf16.gmra.mxu3 %v2933_v18  ;;  %v3239_v18 = vld [vmem:[%s5161_s0 + $0x238] sm:$0xf0]  ;;  %v3021_v56 = vor.u32 %v3262_v37, %v3020_v19 }
 0x135   :  { %v2909_v7 = vor.u32 %v3239_v18, %v2908_v15  ;;  %v3277_v18 = vld [vmem:[%s5162_s2] sm:$0xff]  }
 0x136   :  { %v1296_v20 = vpop.f32.mrf.mxu2  ;;  %v1250_v3 = vpop.f32.mrf.mxu0 }
 0x137   :  { %v1320_v16 = vpop.f32.mrf.mxu3  ;;  %v1297_v17 = vadd.f32 %v1296_v20, %v1273_v13  ;;  %v1274_v41 = vpop.f32.mrf.mxu1  ;;  %v1251_v47 = vadd.f32 %v1250_v3, %v4469_v22  ;;  %v2872_v22 = vld [vmem:[%s5161_s0 + $0x1d0] sm:$0xf]  ;;  %v3403_v13 = vld [vmem:[%s5160_s1 + $0x1a8] sm:$0xff]  ;;  %v2905_v3 = vor.u32 %v3234_v35, %v2902_v9 }
 0x138   :  { %v2873_v12 = vor.u32 %v3230_v38, %v2872_v22  ;;  %v3405_v22 = vld [vmem:[%s5160_s1 + $0x160] sm:$0xff] }
 0x139   :  { %v4634_v49 = vadd.f32 %v1320_v16, %v1297_v17  ;;  %v1275_v40 = vadd.f32 %v1274_v41, %v1251_v47  ;;  %v2901_v17 = vor.u32 %v3238_v0, %v2900_v14  ;;  %v3419_v14 = vld [vmem:[%s5160_s1 + $0x188] sm:$0xff] }
 0x13e   :  { %v1298_v39 = vpop.f32.mrf.mxu2  ;;  %v1253_v1 = vpop.f32.mrf.mxu0 }
 0x13f   :  { %v1322_v45 = vpop.f32.mrf.mxu3  ;;  %v1299_v10 = vadd.f32 %v1298_v39, %v1275_v40  ;;  %v1277_v4 = vpop.f32.mrf.mxu1  ;;  %v1254_v62 = vadd.f32 %v1253_v1, %v4492_v8  ;;  %v3394_v8 = vld [vmem:[%s5160_s1 + $0x238] sm:$0xff] }
 0x140   :  { %v3408_v39 = vld [vmem:[%s5160_s1 + $0x1d8] sm:$0xff] }
 0x141   :  { %v4661_v30 = vadd.f32 %v1322_v45, %v1299_v10  ;;  %v1278_v36 = vadd.f32 %v1277_v4, %v1254_v62  ;;  %v3409_v45 = vld [vmem:[%s5160_s1 + $0x158] sm:$0xff] }
 0x142   :  { %1735 = vmatmul.bf16.vlgmr.msra.gmra.mxu0 %v2865_v54  ;;  %1759 = vmatmul.bf16.vlgmr.msra.gmra.mxu1 %v2869_v6  ;;  %v3410_v54 = vld [vmem:[%s5160_s1 + $0x218] sm:$0xff] }
 0x143   :  { %1783 = vmatmul.bf16.vlgmr.msra.gmra.mxu2 %v2873_v12  ;;  %2119 = vmatpush.bf16.msra.mxu0 %v3393_v50  ;;  %v3411_v6 = vld [vmem:[%s5160_s1 + $0x198] sm:$0xff] }
 0x144   :  { %2007 = vmatmul.bf16.vlgmr.msra.gmra.mxu3 %v2985_v43  ;;  %2167 = vmatpush.bf16.msra.mxu2 %v3392_v31  ;;  %v3413_v31 = vld [vmem:[%s5160_s1 + $0x150] sm:$0xff] }
 0x145   :  { %2191 = vmatpush.bf16.msra.mxu3 %v3394_v8  ;;  %2143 = vmatpush.bf16.msra.mxu1 %v3395_v29  ;;  %v3414_v8 = vld [vmem:[%s5160_s1 + $0x210] sm:$0xff] }
 0x146   :  { %v1301_v34 = vpop.f32.mrf.mxu2  ;;  %v1255_v44 = vpop.f32.mrf.mxu0 }
 0x147   :  { %v1325_v27 = vpop.f32.mrf.mxu3  ;;  %v1302_v25 = vadd.f32 %v1301_v34, %v1278_v36  ;;  %v1279_v59 = vpop.f32.mrf.mxu1  ;;  %v1256_v32 = vadd.f32 %v1255_v44, %v4545_v2  ;;  %2120 = vmatpush.bf16.msra.mxu0 %v3397_v58  ;;  %v3399_v2 = vld [vmem:[%s5160_s1 + $0x1b0] sm:$0xff]  ;;  %v2936_v34 = vld [vmem:[%s5161_s0 + $0x258] sm:$0xf]  ;;  %v2938_v44 = vld [vmem:[%s5161_s0 + $0x27c] sm:$0xf0] }
 0x148   :  { %2168 = vmatpush.bf16.msra.mxu2 %v3396_v11  ;;  %v3412_v36 = vld [vmem:[%s5160_s1 + $0x1d0] sm:$0xff]  ;;  %v3056_v11 = vld [vmem:[%s5161_s0 + $0x318] sm:$0xf]  ;;  %v3271_v58 = vld [vmem:[%s5161_s0 + $0x338] sm:$0xf0] }
 0x149   :  { %v4682_v60 = vadd.f32 %v1325_v27, %v1302_v25  ;;  %2192 = vmatpush.bf16.msra.mxu3 %v3398_v28  ;;  %2144 = vmatpush.bf16.msra.mxu1 %v3399_v2  ;;  %v1280_v24 = vadd.f32 %v1279_v59, %v1256_v32  ;;  %v3247_v27 = vld [vmem:[%s5161_s0 + $0x278] sm:$0xf0]  ;;  %v2944_v59 = vld [vmem:[%s5161_s0 + $0x260] sm:$0xf]  ;;  %v3248_v32 = vld [vmem:[%s5161_s0 + $0x280] sm:$0xf0] }
 0x14a   :  { %v3243_v25 = vld [vmem:[%s5161_s0 + $0x25c] sm:$0xf]  ;;  %v3416_v28 = vld [vmem:[%s5160_s1 + $0x1c8] sm:$0xff]  ;;  %v2937_v9 = vor.u32 %v3247_v27, %v2936_v34 }
 0x14b   :  { %2121 = vmatpush.bf16.msra.mxu0 %v3401_v26  ;;  %v3417_v2 = vld [vmem:[%s5160_s1 + $0x148] sm:$0xff]  ;;  %v2941_v15 = vor.u32 %v3243_v25, %v2938_v44  ;;  %v3341_v26 = vld [vmem:[%s5162_s2 + $0x18] sm:$0xff]  }
 0x14c   :  { %2169 = vmatpush.bf16.msra.mxu2 %v3400_v23 }
 0x14d   :  { %2193 = vmatpush.bf16.msra.mxu3 %v3402_v42  ;;  %2145 = vmatpush.bf16.msra.mxu1 %v3403_v13  ;;  %v2945_v42 = vor.u32 %v3248_v32, %v2944_v59  ;;  %v3057_v13 = vor.u32 %v3271_v58, %v3056_v11  ;;  %v3339_v32 = vld [vmem:[%s5162_s2 + $0x8] sm:$0xff]  }
 0x14e   :  { %v1303_v20 = vpop.f32.mrf.mxu2  ;;  %v1258_v47 = vpop.f32.mrf.mxu0 }
 0x14f   :  { %v1327_v16 = vpop.f32.mrf.mxu3  ;;  %v1304_v41 = vadd.f32 %v1303_v20, %v1280_v24  ;;  %v1282_v40 = vpop.f32.mrf.mxu1  ;;  %v1259_v53 = vadd.f32 %v1258_v47, %v4574_v52  ;;  %2122 = vmatpush.bf16.msra.mxu0 %v3405_v22  ;;  %v3407_v52 = vld [vmem:[%s5160_s1 + $0x1a0] sm:$0xff]  ;;  %v3418_v24 = vld [vmem:[%s5160_s1 + $0x208] sm:$0xff]  ;;  %v974_v47 = vmax.f32 %v4427_v46, 0.0 }
 0x150   :  { %2170 = vmatpush.bf16.msra.mxu2 %v3404_v21 }
 0x151   :  { %v4733_v38 = vadd.f32 %v1327_v16, %v1304_v41  ;;  %2194 = vmatpush.bf16.msra.mxu3 %v3406_v63  ;;  %2146 = vmatpush.bf16.msra.mxu1 %v3407_v52  ;;  %v1283_v33 = vadd.f32 %v1282_v40, %v1259_v53  ;;  %v3420_v16 = vld [vmem:[%s5160_s1 + $0x1c0] sm:$0xff]  ;;  %v3278_v40 = vunpack.c.l.bf16 %v3277_v18 }
 0x152   :  { %1740 = vmatmul.bf16.gmra.mxu0 %v2901_v17  ;;  %1764 = vmatmul.bf16.gmra.mxu1 %v2905_v3  ;;  %v3421_v17 = vld [vmem:[%s5160_s1 + $0x140] sm:$0xff] }
 0x153   :  { %1788 = vmatmul.bf16.gmra.mxu2 %v2909_v7  ;;  %2123 = vmatpush.bf16.msra.mxu0 %v3409_v45  ;;  %v3422_v41 = vld [vmem:[%s5160_s1 + $0x200] sm:$0xff]  ;;  %v4826_v21 = vadd.f32 %v3278_v40, %v974_v47 }
 0x154   :  { %2012 = vmatmul.bf16.gmra.mxu3 %v3021_v56  ;;  %2171 = vmatpush.bf16.msra.mxu2 %v3408_v39  ;;  %v3290_v56 = vunpack.c.l.bf16 %v3341_v26 }
 0x155   :  { %2195 = vmatpush.bf16.msra.mxu3 %v3410_v54  ;;  %2147 = vmatpush.bf16.msra.mxu1 %v3411_v6  ;;  %v975_v6 = vmax.f32 %v4438_v51, 0.0  ;;  %v3250_v51 = vld [vmem:[%s5161_s0 + $0x294] sm:$0xf] }
 0x156   :  { %v1306_v10 = vpop.f32.mrf.mxu2  ;;  %v1260_v12 = vpop.f32.mrf.mxu0 }
 0x157   :  { %v1330_v1 = vpop.f32.mrf.mxu3  ;;  %v1307_v4 = vadd.f32 %v1306_v10, %v1283_v33  ;;  %v1284_v43 = vpop.f32.mrf.mxu1  ;;  %v1261_v62 = vadd.f32 %v1260_v12, %v4625_v61  ;;  %2124 = vmatpush.bf16.msra.mxu0 %v3413_v31  ;;  %v3415_v61 = vld [vmem:[%s5160_s1 + $0x190] sm:$0xff]  ;;  %v3279_v10 = vunpack.c.h.bf16 %v3277_v18  ;;  %v3249_v12 = vld [vmem:[%s5161_s0 + $0x28c] sm:$0xf] }
 0x158   :  { %2172 = vmatpush.bf16.msra.mxu2 %v3412_v36  ;;  %v2994_v36 = vld [vmem:[%s5161_s0 + $0x2b4] sm:$0xf0] }
 0x159   :  { %v4760_v50 = vadd.f32 %v1330_v1, %v1307_v4  ;;  %2196 = vmatpush.bf16.msra.mxu3 %v3414_v8  ;;  %2148 = vmatpush.bf16.msra.mxu1 %v3415_v61  ;;  %v1285_v29 = vadd.f32 %v1284_v43, %v1261_v62  ;;  %v3291_v4 = vunpack.c.h.bf16 %v3341_v26  ;;  %v2986_v43 = vld [vmem:[%s5161_s0 + $0x2ac] sm:$0xf0]  ;;  %v3000_v8 = vld [vmem:[%s5161_s0 + $0x298] sm:$0xf]  ;;  %v3255_v61 = vld [vmem:[%s5161_s0 + $0x2b8] sm:$0xf0] }
 0x15a   :  { %v2992_v62 = vld [vmem:[%s5161_s0 + $0x290] sm:$0xf]  ;;  %v2989_v44 = vor.u32 %v3249_v12, %v2986_v43 }
 0x15b   :  { %2125 = vmatpush.bf16.msra.mxu0 %v3417_v2  ;;  %v3342_v2 = vld [vmem:[%s5162_s2 + $0x20] sm:$0xff]   ;;  %v3340_v43 = vld [vmem:[%s5162_s2 + $0x10] sm:$0xff]  }
 0x15c   :  { %2173 = vmatpush.bf16.msra.mxu2 %v3416_v28  ;;  %v3295_v40 = vunpack.c.h.bf16 %v3342_v2 }
 0x15d   :  { %2197 = vmatpush.bf16.msra.mxu3 %v3418_v24  ;;  %2149 = vmatpush.bf16.msra.mxu1 %v3419_v14  ;;  %v2997_v24 = vor.u32 %v3250_v51, %v2994_v36  ;;  %v3001_v14 = vor.u32 %v3255_v61, %v3000_v8  ;;  %v3343_v36 = vld [vmem:[%s5162_s2 + $0x28] sm:$0xff]  }
 0x15e   :  { %v1308_v0 = vpop.f32.mrf.mxu2  ;;  %v1344_v37 = vpop.f32.mrf.mxu0 }
 0x15f   :  { %v1332_v35 = vpop.f32.mrf.mxu3  ;;  %v1309_v19 = vadd.f32 %v1308_v0, %v1285_v29  ;;  %v1368_v23 = vpop.f32.mrf.mxu1  ;;  %v1345_v20 = vadd.f32 %v1344_v37, %v4634_v49  ;;  %2126 = vmatpush.bf16.msra.mxu0 %v3421_v17  ;;  %v3423_v49 = vld [vmem:[%s5160_s1 + $0x180] sm:$0xff]  ;;  %v4860_v29 = vadd.f32 %v3279_v10, %v975_v6 }
 0x160   :  { %2174 = vmatpush.bf16.msra.mxu2 %v3420_v16 }
 0x161   :  { %v4817_v3 = vadd.f32 %v1332_v35, %v1309_v19  ;;  %2198 = vmatpush.bf16.msra.mxu3 %v3422_v41  ;;  %2150 = vmatpush.bf16.msra.mxu1 %v3423_v49  ;;  %v1369_v7 = vadd.f32 %v1368_v23, %v1345_v20  ;;  %v3294_v19 = vunpack.c.l.bf16 %v3342_v2  ;;  %v977_v41 = vmax.f32 %v4484_v55, 0.0  ;;  %v3259_v55 = vld [vmem:[%s5161_s0 + $0x2dc] sm:$0xf] }
 0x162   :  { %1745 = vmatmul.bf16.gmra.mxu0 %v2937_v9  ;;  %1769 = vmatmul.bf16.gmra.mxu1 %v2941_v15  ;;  %v976_v9 = vmax.f32 %v4467_v57, 0.0  ;;  %v3282_v15 = vunpack.c.l.bf16 %v3339_v32  ;;  %v3283_v49 = vunpack.c.h.bf16 %v3339_v32  ;;  %v3298_v32 = vunpack.c.l.bf16 %v3343_v36 }
 0x163   :  { %1793 = vmatmul.bf16.gmra.mxu2 %v2945_v42  ;;  %v1383_v53 = vmax.f32 %v1369_v7, 0.0  ;;  %v3258_v7 = vld [vmem:[%s5161_s0 + $0x2d4] sm:$0xf] }
 0x164   :  { %2017 = vmatmul.bf16.gmra.mxu3 %v3057_v13  ;;  %v4876_v23 = vadd.f32 %v3282_v15, %v976_v9 }
 0x165   :  { %v4828_v22 = vadd.f32 %v3290_v56, %v1383_v53  ;;  %v3022_v56 = vld [vmem:[%s5161_s0 + $0x2f4] sm:$0xf0] }
 0x166   :  { %v1592_v63 = vpop.f32.mrf.mxu2  ;;  %v1346_v39 = vpop.f32.mrf.mxu0  ;;  %v3028_v53 = vld [vmem:[%s5161_s0 + $0x2d8] sm:$0xf] }
 0x167   :  { %v1616_v52 = vpop.f32.mrf.mxu3  ;;  %v1370_v45 = vpop.f32.mrf.mxu1  ;;  %v1408_v46 = vmax.f32 %v4826_v21, %v4828_v22  ;;  %v1347_v54 = vadd.f32 %v1346_v39, %v4661_v30  ;;  %v3254_v30 = vld [vmem:[%s5161_s0 + $0x2b0] sm:$0xf0]  ;;  %v3036_v39 = vld [vmem:[%s5161_s0 + $0x2e0] sm:$0xf] }
 0x168   :  { %v4830_v33 = vadd.f32 %v1616_v52, %v1592_v63  ;;  %v2993_v59 = vor.u32 %v3254_v30, %v2992_v62  ;;  %v3030_v63 = vld [vmem:[%s5161_s0 + $0x2fc] sm:$0xf0] }
 0x169   :  { %v1371_v1 = vadd.f32 %v1370_v45, %v1347_v54  ;;  %v3264_v45 = vld [vmem:[%s5161_s0 + $0x300] sm:$0xf0]  ;;  %v4910_v54 = vadd.f32 %v3283_v49, %v977_v41  ;;  %v3072_v49 = vld [vmem:[%s5161_s0 + $0x328] sm:$0xf] }
 0x16a   :  { %v3037_v8 = vor.u32 %v3264_v45, %v3036_v39 }
 0x16b   :  { %v1384_v31 = vmax.f32 %v1371_v1, 0.0 }
 0x16d   :  { %v4862_v34 = vadd.f32 %v3291_v4, %v1384_v31  ;;  %v3025_v4 = vor.u32 %v3258_v7, %v3022_v56  ;;  %v3033_v31 = vor.u32 %v3259_v55, %v3030_v63 }
 0x16e   :  { %v1594_v27 = vpop.f32.mrf.mxu2  ;;  %v1349_v58 = vpop.f32.mrf.mxu0 }
 0x16f   :  { %v1618_v25 = vpop.f32.mrf.mxu3  ;;  %v1373_v28 = vpop.f32.mrf.mxu1  ;;  %v1409_v0 = vmax.f32 %v4860_v29, %v4862_v34  ;;  %v1350_v35 = vadd.f32 %v1349_v58, %v4682_v60 }
 0x170   :  { %v4867_v11 = vadd.f32 %v1618_v25, %v1594_v27  ;;  %v978_v25 = vmax.f32 %v4537_v48, 0.0 }
 0x171   :  { %v1374_v18 = vadd.f32 %v1373_v28, %v1350_v35 }
 0x172   :  { %2031 = vmatmul.bf16.vlgmr.msrb.gmra.mxu0 %v2989_v44  ;;  %2055 = vmatmul.bf16.vlgmr.msrb.gmra.mxu1 %v2993_v59  ;;  %v3286_v44 = vunpack.c.l.bf16 %v3340_v43 }
 0x173   :  { %2079 = vmatmul.bf16.vlgmr.msrb.gmra.mxu2 %v2997_v24  ;;  %v1385_v37 = vmax.f32 %v1374_v18, 0.0  ;;  %v979_v18 = vmax.f32 %v4566_v5, 0.0  ;;  %v3268_v5 = vld [vmem:[%s5161_s0 + $0x324] sm:$0xf] }
 0x174   :  { %2103 = vmatmul.bf16.vlgmr.msrb.gmra.mxu3 %v3001_v14  ;;  %v4926_v28 = vadd.f32 %v3286_v44, %v978_v25  ;;  %v3251_v44 = vld [vmem:[%s5161_s0 + $0x29c] sm:$0xf] }
 0x175   :  { %v4878_v26 = vadd.f32 %v3294_v19, %v1385_v37  ;;  %v3287_v19 = vunpack.c.h.bf16 %v3340_v43 }
 0x176   :  { %v1597_v42 = vpop.f32.mrf.mxu2  ;;  %v1351_v16 = vpop.f32.mrf.mxu0 }
 0x177   :  { %v1621_v13 = vpop.f32.mrf.mxu3  ;;  %v1375_v60 = vpop.f32.mrf.mxu1  ;;  %v1410_v57 = vmax.f32 %v4876_v23, %v4878_v26  ;;  %v1352_v17 = vadd.f32 %v1351_v16, %v4733_v38  ;;  %v3263_v38 = vld [vmem:[%s5161_s0 + $0x2f8] sm:$0xf0]  ;;  %v3058_v16 = vld [vmem:[%s5161_s0 + $0x33c] sm:$0xf0] }
 0x178   :  { %v4880_v20 = vadd.f32 %v1621_v13, %v1597_v42  ;;  %v3029_v12 = vor.u32 %v3263_v38, %v3028_v53  ;;  %v3299_v42 = vunpack.c.h.bf16 %v3343_v36  ;;  %v3267_v13 = vld [vmem:[%s5161_s0 + $0x31c] sm:$0xf] }
 0x179   :  { %v1376_v47 = vadd.f32 %v1375_v60, %v1352_v17  ;;  %v3064_v60 = vld [vmem:[%s5161_s0 + $0x320] sm:$0xf]  ;;  %v3066_v17 = vld [vmem:[%s5161_s0 + $0x344] sm:$0xf0]  ;;  %v3061_v38 = vor.u32 %v3267_v13, %v3058_v16 }
 0x17a   :  { %v3069_v45 = vor.u32 %v3268_v5, %v3066_v17 }
 0x17b   :  { %v1386_v52 = vmax.f32 %v1376_v47, 0.0  ;;  %v3273_v47 = vld [vmem:[%s5161_s0 + $0x348] sm:$0xf0] }
 0x17d   :  { %v4912_v6 = vadd.f32 %v3295_v40, %v1386_v52  ;;  %v4960_v40 = vadd.f32 %v3287_v19, %v979_v18 }
 0x17e   :  { %v1599_v10 = vpop.f32.mrf.mxu2  ;;  %v1354_v30 = vpop.f32.mrf.mxu0 }
 0x17f   :  { %v1623_v1 = vpop.f32.mrf.mxu3  ;;  %v1378_v51 = vpop.f32.mrf.mxu1  ;;  %v1411_v61 = vmax.f32 %v4910_v54, %v4912_v6  ;;  %v1355_v27 = vadd.f32 %v1354_v30, %v4760_v50 }
 0x180   :  { %v4917_v62 = vadd.f32 %v1623_v1, %v1599_v10  ;;  %v3073_v10 = vor.u32 %v3273_v47, %v3072_v49 }
 0x181   :  { %v1379_v59 = vadd.f32 %v1378_v51, %v1355_v27 }
 0x182   :  { %2036 = vmatmul.bf16.gmra.mxu0 %v3025_v4  ;;  %2060 = vmatmul.bf16.gmra.mxu1 %v3029_v12 }
 0x183   :  { %2084 = vmatmul.bf16.gmra.mxu2 %v3033_v31  ;;  %v1387_v58 = vmax.f32 %v1379_v59, 0.0  ;;  %v3008_v59 = vld [vmem:[%s5161_s0 + $0x2a0] sm:$0xf] }
 0x184   :  { %2108 = vmatmul.bf16.gmra.mxu3 %v3037_v8 }
 0x185   :  { %v4928_v2 = vadd.f32 %v3298_v32, %v1387_v58  ;;  %v3256_v32 = vld [vmem:[%s5161_s0 + $0x2c0] sm:$0xf0]  ;;  %v3010_v58 = vld [vmem:[%s5161_s0 + $0x2c4] sm:$0xf0] }
 0x186   :  { %v1602_v24 = vpop.f32.mrf.mxu2  ;;  %v1356_v9 = vpop.f32.mrf.mxu0  ;;  %v3009_v18 = vor.u32 %v3256_v32, %v3008_v59 }
 0x187   :  { %v1626_v14 = vpop.f32.mrf.mxu3  ;;  %v1380_v50 = vpop.f32.mrf.mxu1  ;;  %v1412_v48 = vmax.f32 %v4926_v28, %v4928_v2  ;;  %v1357_v15 = vadd.f32 %v1356_v9, %v4817_v3  ;;  %v3272_v3 = vld [vmem:[%s5161_s0 + $0x340] sm:$0xf0] }
 0x188   :  { %v4930_v35 = vadd.f32 %v1626_v14, %v1602_v24  ;;  %v3065_v55 = vor.u32 %v3272_v3, %v3064_v60  ;;  %v3016_v24 = vld [vmem:[%s5161_s0 + $0x2a8] sm:$0xf]  ;;  %v3257_v14 = vld [vmem:[%s5161_s0 + $0x2c8] sm:$0xf0] }
 0x189   :  { %v1381_v37 = vadd.f32 %v1380_v50, %v1357_v15  ;;  %v3017_v16 = vor.u32 %v3257_v14, %v3016_v24 }
 0x18b   :  { %v1388_v41 = vmax.f32 %v1381_v37, 0.0 }
 0x18d   :  { %v4962_v7 = vadd.f32 %v3299_v42, %v1388_v41 }
 0x18e   :  { %v1604_v56 = vpop.f32.mrf.mxu2  ;;  %v1640_v52 = vpop.f32.mrf.mxu0 }
 0x18f   :  { %v1628_v53 = vpop.f32.mrf.mxu3  ;;  %v1664_v39 = vpop.f32.mrf.mxu1  ;;  %v1413_v1 = vmax.f32 %v4960_v40, %v4962_v7  ;;  %v1641_v4 = vadd.f32 %v1640_v52, %v4830_v33  ;;  %v3002_v33 = vld [vmem:[%s5161_s0 + $0x2bc] sm:$0xf0]  ;;  %v3038_v52 = vld [vmem:[%s5161_s0 + $0x304] sm:$0xf0] }
 0x190   :  { %v4964_v63 = vadd.f32 %v1628_v53, %v1604_v56  ;;  %v3005_v15 = vor.u32 %v3251_v44, %v3002_v33 }
 0x191   :  { %v1665_v12 = vadd.f32 %v1664_v39, %v1641_v4  ;;  %v3044_v39 = vld [vmem:[%s5161_s0 + $0x2e8] sm:$0xf]  ;;  %v3052_v4 = vld [vmem:[%s5161_s0 + $0x2f0] sm:$0xf] }
 0x192   :  { %2041 = vmatmul.bf16.gmra.mxu0 %v3061_v38  ;;  %2065 = vmatmul.bf16.gmra.mxu1 %v3065_v55 }
 0x193   :  { %2089 = vmatmul.bf16.gmra.mxu2 %v3069_v45  ;;  %v3265_v45 = vld [vmem:[%s5161_s0 + $0x308] sm:$0xf0] }
 0x194   :  { %2113 = vmatmul.bf16.gmra.mxu3 %v3073_v10  ;;  %v3046_v10 = vld [vmem:[%s5161_s0 + $0x30c] sm:$0xf0] }
 0x196   :  { %v1688_v43 = vpop.f32.mrf.mxu2  ;;  %v1642_v36 = vpop.f32.mrf.mxu0 }
 0x197   :  { %v1712_v30 = vpop.f32.mrf.mxu3  ;;  %v1689_v51 = vadd.f32 %v1688_v43, %v1665_v12  ;;  %v1666_v31 = vpop.f32.mrf.mxu1  ;;  %v1643_v8 = vadd.f32 %v1642_v36, %v4867_v11  ;;  %v3252_v11 = vld [vmem:[%s5161_s0 + $0x2a4] sm:$0xf]  ;;  %v3266_v12 = vld [vmem:[%s5161_s0 + $0x310] sm:$0xf0]  ;;  %v3045_v36 = vor.u32 %v3265_v45, %v3044_v39 }
 0x198   :  { %v3013_v13 = vor.u32 %v3252_v11, %v3010_v58  ;;  %v3053_v33 = vor.u32 %v3266_v12, %v3052_v4 }
 0x199   :  { %v4970_v27 = vadd.f32 %v1712_v30, %v1689_v51  ;;  %v1667_v25 = vadd.f32 %v1666_v31, %v1643_v8 }
 0x19e   :  { %v1690_v9 = vpop.f32.mrf.mxu2  ;;  %v1645_v37 = vpop.f32.mrf.mxu0 }
 0x19f   :  { %v1714_v50 = vpop.f32.mrf.mxu3  ;;  %v1691_v19 = vadd.f32 %v1690_v9, %v1667_v25  ;;  %v1669_v42 = vpop.f32.mrf.mxu1  ;;  %v1646_v60 = vadd.f32 %v1645_v37, %v4880_v20  ;;  %v3260_v20 = vld [vmem:[%s5161_s0 + $0x2e4] sm:$0xf]  ;;  %v3074_v37 = vld [vmem:[%s5161_s0 + $0x34c] sm:$0xf0] }
 0x1a0   :  { %v3041_v51 = vor.u32 %v3260_v20, %v3038_v52 }
 0x1a1   :  { %v4997_v3 = vadd.f32 %v1714_v50, %v1691_v19  ;;  %v1670_v5 = vadd.f32 %v1669_v42, %v1646_v60  ;;  %v3080_v42 = vld [vmem:[%s5161_s0 + $0x330] sm:$0xf]  ;;  %v3088_v60 = vld [vmem:[%s5161_s0 + $0x338] sm:$0xf] }
 0x1a2   :  { %2127 = vmatmul.bf16.vlgmr.msra.gmra.mxu0 %v3005_v15  ;;  %2151 = vmatmul.bf16.vlgmr.msra.gmra.mxu1 %v3009_v18 }
 0x1a3   :  { %2175 = vmatmul.bf16.vlgmr.msra.gmra.mxu2 %v3013_v13  ;;  %v3274_v13 = vld [vmem:[%s5161_s0 + $0x350] sm:$0xf0] }
 0x1a4   :  { %2199 = vmatmul.bf16.vlgmr.msra.gmra.mxu3 %v3017_v16  ;;  %v3082_v16 = vld [vmem:[%s5161_s0 + $0x354] sm:$0xf0] }
 0x1a6   :  { %v1693_v17 = vpop.f32.mrf.mxu2  ;;  %v1647_v47 = vpop.f32.mrf.mxu0 }
 0x1a7   :  { %v1717_v41 = vpop.f32.mrf.mxu3  ;;  %v1694_v49 = vadd.f32 %v1693_v17, %v1670_v5  ;;  %v1671_v56 = vpop.f32.mrf.mxu1  ;;  %v1648_v53 = vadd.f32 %v1647_v47, %v4917_v62  ;;  %v3261_v62 = vld [vmem:[%s5161_s0 + $0x2ec] sm:$0xf]  ;;  %v3275_v5 = vld [vmem:[%s5161_s0 + $0x358] sm:$0xf0]  ;;  %v3081_v47 = vor.u32 %v3274_v13, %v3080_v42 }
 0x1a8   :  { %v3049_v44 = vor.u32 %v3261_v62, %v3046_v10  ;;  %v3089_v52 = vor.u32 %v3275_v5, %v3088_v60  ;;  %v3344_v10 = vld [vmem:[%s5162_s2 + $0x30] sm:$0xff]  }
 0x1a9   :  { %v5000_v38 = vadd.f32 %v1717_v41, %v1694_v49  ;;  %v1672_v55 = vadd.f32 %v1671_v56, %v1648_v53 }
 0x1ae   :  { %v1695_v43 = vpop.f32.mrf.mxu2 }
 0x1af   :  { %v1719_v30 = vpop.f32.mrf.mxu3  ;;  %v1696_v31 = vadd.f32 %v1695_v43, %v1672_v55  ;;  %v1650_v8 = vpop.f32.mrf.mxu0 }
 0x1b0   :  { %v1674_v25 = vpop.f32.mrf.mxu1  ;;  %v1651_v59 = vadd.f32 %v1650_v8, %v4930_v35  ;;  %v3269_v35 = vld [vmem:[%s5161_s0 + $0x32c] sm:$0xf] }
 0x1b1   :  { %v5027_v32 = vadd.f32 %v1719_v30, %v1696_v31  ;;  %v3077_v49 = vor.u32 %v3269_v35, %v3074_v37  ;;  %v3302_v30 = vunpack.c.l.bf16 %v3344_v10 }
 0x1b2   :  { %v1675_v11 = vadd.f32 %v1674_v25, %v1651_v59  ;;  %2132 = vmatmul.bf16.gmra.mxu0 %v3041_v51  ;;  %2156 = vmatmul.bf16.gmra.mxu1 %v3045_v36 }
 0x1b3   :  { %2180 = vmatmul.bf16.gmra.mxu2 %v3049_v44 }
 0x1b4   :  { %2204 = vmatmul.bf16.gmra.mxu3 %v3053_v33 }
 0x1b6   :  { %v1698_v58 = vpop.f32.mrf.mxu2 }
 0x1b7   :  { %v1722_v24 = vpop.f32.mrf.mxu3  ;;  %v1699_v14 = vadd.f32 %v1698_v58, %v1675_v11  ;;  %v1652_v9 = vpop.f32.mrf.mxu0  ;;  %v3303_v58 = vunpack.c.h.bf16 %v3344_v10 }
 0x1b8   :  { %v1676_v50 = vpop.f32.mrf.mxu1  ;;  %v1653_v15 = vadd.f32 %v1652_v9, %v4964_v63  ;;  %v3270_v63 = vld [vmem:[%s5161_s0 + $0x334] sm:$0xf] }
 0x1b9   :  { %v5030_v18 = vadd.f32 %v1722_v24, %v1699_v14  ;;  %v3085_v20 = vor.u32 %v3270_v63, %v3082_v16 }
 0x1ba   :  { %v1677_v19 = vadd.f32 %v1676_v50, %v1653_v15 }
 0x1be   :  { %v1700_v17 = vpop.f32.mrf.mxu2 }
 0x1bf   :  { %v1724_v41 = vpop.f32.mrf.mxu3  ;;  %v1701_v56 = vadd.f32 %v1700_v17, %v1677_v19  ;;  %v1736_v53 = vpop.f32.mrf.mxu0  ;;  %v3345_v19 = vld [vmem:[%s5162_s2 + $0x38] sm:$0xff]  }
 0x1c0   :  { %v1760_v55 = vpop.f32.mrf.mxu1  ;;  %v1737_v39 = vadd.f32 %v1736_v53, %v4970_v27  ;;  %v3306_v37 = vunpack.c.l.bf16 %v3345_v19  ;;  %v3307_v17 = vunpack.c.h.bf16 %v3345_v19 }
 0x1c1   :  { %v1725_v45 = vadd.f32 %v1724_v41, %v1701_v56 }
 0x1c2   :  { %v1761_v62 = vadd.f32 %v1760_v55, %v1737_v39  ;;  %2137 = vmatmul.bf16.gmra.mxu0 %v3077_v49  ;;  %2161 = vmatmul.bf16.gmra.mxu1 %v3081_v47  ;;  %v3346_v55 = vld [vmem:[%s5162_s2 + $0x40] sm:$0xff]  }
 0x1c3   :  { %2185 = vmatmul.bf16.gmra.mxu2 %v3085_v20 }
 0x1c4   :  { %2209 = vmatmul.bf16.gmra.mxu3 %v3089_v52  ;;  %v3310_v52 = vunpack.c.l.bf16 %v3346_v55 }
 0x1c6   :  { %v1784_v4 = vpop.f32.mrf.mxu2 }
 0x1c7   :  { %v5060_v12 = vpop.f32.mrf.mxu3  ;;  %v1785_v43 = vadd.f32 %v1784_v4, %v1761_v62  ;;  %v1738_v51 = vpop.f32.mrf.mxu0 }
 0x1c8   :  { %v1762_v36 = vpop.f32.mrf.mxu1  ;;  %v1739_v31 = vadd.f32 %v1738_v51, %v4997_v3 }
 0x1c9   :  { %v1799_v27 = vmax.f32 %v1785_v43, 0.0 }
 0x1ca   :  { %v1763_v8 = vadd.f32 %v1762_v36, %v1739_v31 }
 0x1cb   :  { %v1818_v25 = vadd.f32 %v3302_v30, %v1799_v27 }
 0x1cd   :  { %v5066_v44 = vmax.f32 %v1408_v46, %v1818_v25 }
 0x1ce   :  { %v1786_v33 = vpop.f32.mrf.mxu2 }
 0x1cf   :  { %v5068_v59 = vpop.f32.mrf.mxu3  ;;  %v1787_v11 = vadd.f32 %v1786_v33, %v1763_v8  ;;  %v1741_v24 = vpop.f32.mrf.mxu0 }
 0x1d0   :  { %v1765_v14 = vpop.f32.mrf.mxu1  ;;  %v1742_v9 = vadd.f32 %v1741_v24, %v5000_v38 }
 0x1d1   :  { %v1800_v50 = vmax.f32 %v1787_v11, 0.0 }
 0x1d2   :  { %v1766_v15 = vadd.f32 %v1765_v14, %v1742_v9 }
 0x1d3   :  { %v1819_v3 = vadd.f32 %v3303_v58, %v1800_v50 }
 0x1d5   :  { %v5077_v21 = vmax.f32 %v1409_v0, %v1819_v3 }
 0x1d6   :  { %v1789_v22 = vpop.f32.mrf.mxu2 }
 0x1d7   :  { %v5079_v46 = vpop.f32.mrf.mxu3  ;;  %v1790_v35 = vadd.f32 %v1789_v22, %v1766_v15  ;;  %v1743_v42 = vpop.f32.mrf.mxu0 }
 0x1d8   :  { %v1767_v13 = vpop.f32.mrf.mxu1  ;;  %v1744_v38 = vadd.f32 %v1743_v42, %v5027_v32 }
 0x1d9   :  { %v1801_v63 = vmax.f32 %v1790_v35, 0.0 }
 0x1da   :  { %v1768_v16 = vadd.f32 %v1767_v13, %v1744_v38 }
 0x1db   :  { %v1820_v60 = vadd.f32 %v3306_v37, %v1801_v63 }
 0x1dd   :  { %v5085_v5 = vmax.f32 %v1410_v57, %v1820_v60 }
 0x1de   :  { %v1791_v29 = vpop.f32.mrf.mxu2 }
 0x1df   :  { %v5087_v34 = vpop.f32.mrf.mxu3  ;;  %v1792_v0 = vadd.f32 %v1791_v29, %v1768_v16  ;;  %v1746_v41 = vpop.f32.mrf.mxu0 }
 0x1e0   :  { %v1770_v49 = vpop.f32.mrf.mxu1  ;;  %v1747_v47 = vadd.f32 %v1746_v41, %v5030_v18 }
 0x1e1   :  { %v1802_v56 = vmax.f32 %v1792_v0, 0.0 }
 0x1e2   :  { %v1771_v53 = vadd.f32 %v1770_v49, %v1747_v47 }
 0x1e3   :  { %v1821_v32 = vadd.f32 %v3307_v17, %v1802_v56 }
 0x1e5   :  { %v5096_v23 = vmax.f32 %v1411_v61, %v1821_v32  ;;  %v3311_v61 = vunpack.c.h.bf16 %v3346_v55  ;;  %v3347_v55 = vld [vmem:[%s5162_s2 + $0x48] sm:$0xff]  }
 0x1e6   :  { %v1794_v26 = vpop.f32.mrf.mxu2 }
 0x1e7   :  { %v5098_v57 = vpop.f32.mrf.mxu3  ;;  %v1795_v20 = vadd.f32 %v1794_v26, %v1771_v53  ;;  %v1748_v39 = vpop.f32.mrf.mxu0 }
 0x1e8   :  { %v1772_v62 = vpop.f32.mrf.mxu1  ;;  %v1749_v18 = vadd.f32 %v1748_v39, %v1725_v45 }
 0x1e9   :  { %v1803_v10 = vmax.f32 %v1795_v20, 0.0 }
 0x1ea   :  { %v1773_v4 = vadd.f32 %v1772_v62, %v1749_v18  ;;  %v3314_v18 = vunpack.c.l.bf16 %v3347_v55 }
 0x1eb   :  { %v1822_v43 = vadd.f32 %v3310_v52, %v1803_v10 }
 0x1ed   :  { %v5103_v30 = vmax.f32 %v1412_v48, %v1822_v43 }
 0x1ee   :  { %v1796_v51 = vpop.f32.mrf.mxu2 }
 0x1ef   :  { %v5105_v54 = vpop.f32.mrf.mxu3  ;;  %v1797_v6 = vadd.f32 %v1796_v51, %v1773_v4  ;;  %v2032_v36 = vpop.f32.mrf.mxu0 }
 0x1f0   :  { %v2056_v31 = vpop.f32.mrf.mxu1  ;;  %v2033_v40 = vadd.f32 %v2032_v36, %v5060_v12 }
 0x1f1   :  { %v1804_v27 = vmax.f32 %v1797_v6, 0.0 }
 0x1f2   :  { %v2057_v13 = vadd.f32 %v2056_v31, %v2033_v40 }
 0x1f3   :  { %v1823_v8 = vadd.f32 %v3311_v61, %v1804_v27 }
 0x1f5   :  { %v5110_v45 = vmax.f32 %v1413_v1, %v1823_v8 }
 0x1f6   :  { %v2080_v25 = vpop.f32.mrf.mxu2 }
 0x1f7   :  { %v2104_v33 = vpop.f32.mrf.mxu3  ;;  %v2034_v11 = vpop.f32.mrf.mxu0  ;;  %v2081_v38 = vadd.f32 %v2080_v25, %v2057_v13 }
 0x1f8   :  { %v2058_v28 = vpop.f32.mrf.mxu1  ;;  %v2035_v63 = vadd.f32 %v2034_v11, %v5068_v59 }
 0x1f9   :  { %v2105_v29 = vadd.f32 %v2104_v33, %v2081_v38 }
 0x1fa   :  { %v2059_v12 = vadd.f32 %v2058_v28, %v2035_v63 }
 0x1fe   :  { %v2082_v2 = vpop.f32.mrf.mxu2 }
 0x1ff   :  { %v2106_v48 = vpop.f32.mrf.mxu3  ;;  %v2037_v58 = vpop.f32.mrf.mxu0  ;;  %v2083_v49 = vadd.f32 %v2082_v2, %v2059_v12  ;;  %v3315_v2 = vunpack.c.h.bf16 %v3347_v55 }
 0x200   :  { %v2061_v24 = vpop.f32.mrf.mxu1  ;;  %v2038_v47 = vadd.f32 %v2037_v58, %v5079_v46 }
 0x201   :  { %v2107_v59 = vadd.f32 %v2106_v48, %v2083_v49 }
 0x202   :  { %v2062_v39 = vadd.f32 %v2061_v24, %v2038_v47 }
 0x206   :  { %v2085_v14 = vpop.f32.mrf.mxu2 }
 0x207   :  { %v2109_v9 = vpop.f32.mrf.mxu3  ;;  %v2039_v50 = vpop.f32.mrf.mxu0  ;;  %v2086_v4 = vadd.f32 %v2085_v14, %v2062_v39 }
 0x208   :  { %v2063_v15 = vpop.f32.mrf.mxu1  ;;  %v2040_v51 = vadd.f32 %v2039_v50, %v5087_v34  ;;  %v3348_v50 = vld [vmem:[%s5162_s2 + $0x50] sm:$0xff]  }
 0x209   :  { %v2110_v31 = vadd.f32 %v2109_v9, %v2086_v4  ;;  %v3349_v4 = vld [vmem:[%s5162_s2 + $0x58] sm:$0xff]  }
 0x20a   :  { %v2064_v11 = vadd.f32 %v2063_v15, %v2040_v51 }
 0x20e   :  { %v2087_v3 = vpop.f32.mrf.mxu2 }
 0x20f   :  { %v2111_v19 = vpop.f32.mrf.mxu3  ;;  %v2042_v22 = vpop.f32.mrf.mxu0  ;;  %v2088_v58 = vadd.f32 %v2087_v3, %v2064_v11 }
 0x210   :  { %v2066_v35 = vpop.f32.mrf.mxu1  ;;  %v2043_v14 = vadd.f32 %v2042_v22, %v5098_v57 }
 0x216   :  { %v5113_v7 = vpop.f32.mrf.mxu2 }
 0x217   :  { %v5115_v1 = vpop.f32.mrf.mxu3  ;;  %v5117_v37 = vpop.f32.mrf.mxu0 }
 0x218   :  { %v5119_v42 = vpop.f32.mrf.mxu1 }
 0x21e   :  { %v5122_v16 = vpop.f32.mrf.mxu2 }
 0x21f   :  { %v5124_v60 = vpop.f32.mrf.mxu3  ;;  %v2128_v0 = vpop.f32.mrf.mxu0 }
 0x220   :  { %v2152_v17 = vpop.f32.mrf.mxu1  ;;  %v2129_v41 = vadd.f32 %v2128_v0, %v2105_v29  ;;  %v2067_v29 = vadd.f32 %v2066_v35, %v2043_v14  ;;  %v3318_v0 = vunpack.c.l.bf16 %v3348_v50 }
 0x222   :  { %v2153_v56 = vadd.f32 %v2152_v17, %v2129_v41  ;;  %v2091_v22 = vadd.f32 %v5113_v7, %v2067_v29 }
 0x226   :  { %v2176_v53 = vpop.f32.mrf.mxu2 }
 0x227   :  { %v2200_v32 = vpop.f32.mrf.mxu3  ;;  %v2177_v26 = vadd.f32 %v2176_v53, %v2153_v56  ;;  %v2130_v20 = vpop.f32.mrf.mxu0  ;;  %v2045_v56 = vadd.f32 %v5117_v37, %v5105_v54 }
 0x228   :  { %v2154_v52 = vpop.f32.mrf.mxu1  ;;  %v2131_v10 = vadd.f32 %v2130_v20, %v2107_v59 }
 0x229   :  { %v2201_v62 = vadd.f32 %v2200_v32, %v2177_v26  ;;  %v2115_v32 = vadd.f32 %v5115_v1, %v2091_v22  ;;  %v2069_v7 = vadd.f32 %v5119_v42, %v2045_v56 }
 0x22a   :  { %v2155_v6 = vadd.f32 %v2154_v52, %v2131_v10  ;;  %v3319_v52 = vunpack.c.h.bf16 %v3348_v50 }
 0x22b   :  { %v2215_v43 = vmax.f32 %v2201_v62, 0.0  ;;  %v2093_v37 = vadd.f32 %v5122_v16, %v2069_v7 }
 0x22d   :  { %v2234_v46 = vadd.f32 %v3314_v18, %v2215_v43 }
 0x22e   :  { %v2178_v61 = vpop.f32.mrf.mxu2 }
 0x22f   :  { %v2202_v36 = vpop.f32.mrf.mxu3  ;;  %v2240_v27 = vmax.f32 %v5066_v44, %v2234_v46  ;;  %v2179_v8 = vadd.f32 %v2178_v61, %v2155_v6  ;;  %v2133_v25 = vpop.f32.mrf.mxu0  ;;  %v2112_v44 = vadd.f32 %v2111_v19, %v2088_v58  ;;  %v3322_v6 = vunpack.c.l.bf16 %v3349_v4 }
 0x230   :  { %v2157_v33 = vpop.f32.mrf.mxu1  ;;  %v2134_v48 = vadd.f32 %v2133_v25, %v2110_v31  ;;  %v3323_v58 = vunpack.c.h.bf16 %v3349_v4 }
 0x231   :  { %v2203_v28 = vadd.f32 %v2202_v36, %v2179_v8  ;;  %v2246_v3 = vmax.f32 %v2240_v27, 0.0 }
 0x232   :  { %v2158_v34 = vadd.f32 %v2157_v33, %v2134_v48 }
 0x233   :  { %v2216_v24 = vmax.f32 %v2203_v28, 0.0 }
 0x235   :  { %v2235_v40 = vadd.f32 %v3315_v2, %v2216_v24 }
 0x236   :  { %v2181_v9 = vpop.f32.mrf.mxu2 }
 0x237   :  { %v2205_v13 = vpop.f32.mrf.mxu3  ;;  %v2241_v38 = vmax.f32 %v5077_v21, %v2235_v40  ;;  %v2182_v63 = vadd.f32 %v2181_v9, %v2158_v34  ;;  %v2135_v15 = vpop.f32.mrf.mxu0 }
 0x238   :  { %v2159_v17 = vpop.f32.mrf.mxu1  ;;  %v2136_v57 = vadd.f32 %v2135_v15, %v2112_v44 }
 0x239   :  { %v2247_v12 = vmax.f32 %v2241_v38, 0.0  ;;  %v2206_v41 = vadd.f32 %v2205_v13, %v2182_v63 }
 0x23a   :  { %v2160_v19 = vadd.f32 %v2159_v17, %v2136_v57 }
 0x23b   :  { %v3327_v49 = vpack.c.bf16 %v2247_v12, %v2246_v3  ;;  %v2217_v47 = vmax.f32 %v2206_v41, 0.0 }
 0x23d   :  { %3328 = vst [vmem:[%s5163_s3] sm:$0xff] %v3327_v49   ;;  %v2236_v21 = vadd.f32 %v3318_v0, %v2217_v47 }
 0x23e   :  { %v2183_v35 = vpop.f32.mrf.mxu2 }
 0x23f   :  { %v2207_v53 = vpop.f32.mrf.mxu3  ;;  %v2242_v55 = vmax.f32 %v5085_v5, %v2236_v21  ;;  %v2184_v59 = vadd.f32 %v2183_v35, %v2160_v19  ;;  %v2138_v26 = vpop.f32.mrf.mxu0  ;;  %v2117_v5 = vadd.f32 %v5124_v60, %v2093_v37 }
 0x240   :  { %v2139_v39 = vadd.f32 %v2138_v26, %v2115_v32  ;;  %v2162_v54 = vpop.f32.mrf.mxu1 }
 0x241   :  { %v2208_v20 = vadd.f32 %v2207_v53, %v2184_v59  ;;  %v2248_v61 = vmax.f32 %v2242_v55, 0.0 }
 0x242   :  { %v2163_v10 = vadd.f32 %v2162_v54, %v2139_v39 }
 0x243   :  { %v2218_v62 = vmax.f32 %v2208_v20, 0.0 }
 0x245   :  { %v2237_v18 = vadd.f32 %v3319_v52, %v2218_v62 }
 0x246   :  { %v2186_v1 = vpop.f32.mrf.mxu2 }
 0x247   :  { %v2210_v43 = vpop.f32.mrf.mxu3  ;;  %v2243_v51 = vmax.f32 %v5096_v23, %v2237_v18  ;;  %v2187_v42 = vadd.f32 %v2186_v1, %v2163_v10  ;;  %v2140_v46 = vpop.f32.mrf.mxu0 }
 0x248   :  { %v2141_v16 = vadd.f32 %v2140_v46, %v2117_v5  ;;  %v2164_v25 = vpop.f32.mrf.mxu1 }
 0x249   :  { %v2249_v36 = vmax.f32 %v2243_v51, 0.0  ;;  %v2211_v31 = vadd.f32 %v2210_v43, %v2187_v42 }
 0x24a   :  { %v2165_v11 = vadd.f32 %v2164_v25, %v2141_v16 }
 0x24b   :  { %v3332_v27 = vpack.c.bf16 %v2249_v36, %v2248_v61  ;;  %v2219_v8 = vmax.f32 %v2211_v31, 0.0 }
 0x24d   :  { %3350 = vst [vmem:[%s5163_s3 + $0x8] sm:$0xff] %v3332_v27   ;;  %v2238_v33 = vadd.f32 %v3322_v6, %v2219_v8 }
 0x24e   :  { %v2188_v28 = vpop.f32.mrf.mxu2 }
 0x24f   :  { %v2244_v60 = vmax.f32 %v5103_v30, %v2238_v33  ;;  %v2189_v23 = vadd.f32 %v2188_v28, %v2165_v11  ;;  %v2212_v2 = vpop.f32.mrf.mxu3 }
 0x251   :  { %v2213_v48 = vadd.f32 %v2212_v2, %v2189_v23  ;;  %v2250_v34 = vmax.f32 %v2244_v60, 0.0 }
 0x253   :  { %v2220_v24 = vmax.f32 %v2213_v48, 0.0 }
 0x255   :  { %v2239_v14 = vadd.f32 %v3323_v58, %v2220_v24 }
 0x257   :  { %v2245_v40 = vmax.f32 %v5110_v45, %v2239_v14 }
 0x259   :  { %v2251_v50 = vmax.f32 %v2245_v40, 0.0 }
 0x25b   :  { %v3337_v9 = vpack.c.bf16 %v2251_v50, %v2250_v34 }
 0x25d   :  { %3351 = vst [vmem:[%s5163_s3 + $0x10] sm:$0xff] %v3337_v9  }

// kernel: _lambda_.10
= control target key start
LH: loop header
LB: loop body
LE: loop exit
PB: predicated region body
PF: predicated region fallthrough
CT: control target
= control target key end

     0   :  { %s3598_s1 = inlined_call_operand.vmem [shape: bf16[1152,256], index: 1, kind: input, shape index: {}]   ;;  %s3599_s0 = inlined_call_operand.vmem [shape: bf16[48,1152], index: 0, kind: input, shape index: {}]   ;;  %s3600_s2 = inlined_call_operand.vmem [shape: bf16[48,256], index: 2, kind: output, shape index: {}]  }
   0x1   :  { %v1669_v0 = vld [vmem:[%s3598_s1 + $0x70] sm:$0xf]  ;;  %v2229_v1 = vld [vmem:[%s3598_s1 + $0x74] sm:$0xf0]  ;;  %v1661_v5 = vld [vmem:[%s3598_s1 + $0x60] sm:$0xf] }
   0x2   :  { %v1733_v2 = vld [vmem:[%s3598_s1 + $0xf0] sm:$0xf]  ;;  %v1670_v3 = vor.u32 %v2229_v1, %v1669_v0  ;;  %v2245_v4 = vld [vmem:[%s3598_s1 + $0xf4] sm:$0xf0]  ;;  %v2227_v6 = vld [vmem:[%s3598_s1 + $0x64] sm:$0xf0] }
   0x3   :  { %v1734_v7 = vor.u32 %v2245_v4, %v1733_v2  ;;  %v1725_v8 = vld [vmem:[%s3598_s1 + $0xe0] sm:$0xf]  ;;  %v2243_v9 = vld [vmem:[%s3598_s1 + $0xe4] sm:$0xf0]  ;;  %v1662_v10 = vor.u32 %v2227_v6, %v1661_v5  ;;  %v1653_v12 = vld [vmem:[%s3598_s1 + $0x50] sm:$0xf] }
   0x4   :  { %1043 = vmatpush.bf16.msra.mxu0 %v1670_v3  ;;  %2358 = vmatpush.bf16.msra.mxu2 %v1670_v3  ;;  %v1726_v11 = vor.u32 %v2243_v9, %v1725_v8  ;;  %v2225_v13 = vld [vmem:[%s3598_s1 + $0x54] sm:$0xf0]  ;;  %v1717_v14 = vld [vmem:[%s3598_s1 + $0xd0] sm:$0xf]  ;;  %v1645_v18 = vld [vmem:[%s3598_s1 + $0x40] sm:$0xf] }
   0x5   :  { %1067 = vmatpush.bf16.msra.mxu1 %v1734_v7  ;;  %2366 = vmatpush.bf16.msra.mxu3 %v1734_v7  ;;  %v2241_v15 = vld [vmem:[%s3598_s1 + $0xd4] sm:$0xf0]  ;;  %v1654_v16 = vor.u32 %v2225_v13, %v1653_v12  ;;  %v2223_v19 = vld [vmem:[%s3598_s1 + $0x44] sm:$0xf0]  ;;  %v1709_v20 = vld [vmem:[%s3598_s1 + $0xc0] sm:$0xf] }
   0x6   :  { %v1718_v17 = vor.u32 %v2241_v15, %v1717_v14  ;;  %v2239_v21 = vld [vmem:[%s3598_s1 + $0xc4] sm:$0xf0]  ;;  %v1646_v22 = vor.u32 %v2223_v19, %v1645_v18  ;;  %v1637_v24 = vld [vmem:[%s3598_s1 + $0x30] sm:$0xf]  ;;  %v2221_v25 = vld [vmem:[%s3598_s1 + $0x34] sm:$0xf0] }
   0x7   :  { %v1710_v23 = vor.u32 %v2239_v21, %v1709_v20  ;;  %v1701_v26 = vld [vmem:[%s3598_s1 + $0xb0] sm:$0xf]  ;;  %v2237_v27 = vld [vmem:[%s3598_s1 + $0xb4] sm:$0xf0]  ;;  %v1638_v28 = vor.u32 %v2221_v25, %v1637_v24  ;;  %v1629_v30 = vld [vmem:[%s3598_s1 + $0x20] sm:$0xf] }
   0x8   :  { %1044 = vmatpush.bf16.msra.mxu0 %v1662_v10  ;;  %2359 = vmatpush.bf16.msra.mxu2 %v1662_v10  ;;  %v1702_v29 = vor.u32 %v2237_v27, %v1701_v26  ;;  %v2219_v31 = vld [vmem:[%s3598_s1 + $0x24] sm:$0xf0]  ;;  %v1693_v32 = vld [vmem:[%s3598_s1 + $0xa0] sm:$0xf]  ;;  %v1621_v36 = vld [vmem:[%s3598_s1 + $0x10] sm:$0xf] }
   0x9   :  { %1068 = vmatpush.bf16.msra.mxu1 %v1726_v11  ;;  %2367 = vmatpush.bf16.msra.mxu3 %v1726_v11  ;;  %v2235_v33 = vld [vmem:[%s3598_s1 + $0xa4] sm:$0xf0]  ;;  %v1630_v34 = vor.u32 %v2219_v31, %v1629_v30  ;;  %v2217_v37 = vld [vmem:[%s3598_s1 + $0x14] sm:$0xf0]  ;;  %v1685_v38 = vld [vmem:[%s3598_s1 + $0x90] sm:$0xf] }
   0xa   :  { %v1694_v35 = vor.u32 %v2235_v33, %v1693_v32  ;;  %v2233_v39 = vld [vmem:[%s3598_s1 + $0x94] sm:$0xf0]  ;;  %v1622_v40 = vor.u32 %v2217_v37, %v1621_v36  ;;  %v1613_v41 = vld [vmem:[%s3598_s1] sm:$0xf]  ;;  %v2215_v42 = vld [vmem:[%s3598_s1 + $0x4] sm:$0xf0] }
   0xb   :  { %v1677_v43 = vld [vmem:[%s3598_s1 + $0x80] sm:$0xf]  ;;  %v1686_v44 = vor.u32 %v2233_v39, %v1685_v38  ;;  %v2231_v45 = vld [vmem:[%s3598_s1 + $0x84] sm:$0xf0]  ;;  %v1797_v46 = vld [vmem:[%s3598_s1 + $0x170] sm:$0xf]  ;;  %v1614_v54 = vor.u32 %v2215_v42, %v1613_v41 }
   0xc   :  { %1045 = vmatpush.bf16.msra.mxu0 %v1654_v16  ;;  %2360 = vmatpush.bf16.msra.mxu2 %v1654_v16  ;;  %v2261_v47 = vld [vmem:[%s3598_s1 + $0x174] sm:$0xf0]  ;;  %v1861_v48 = vld [vmem:[%s3598_s1 + $0x1f0] sm:$0xf]  ;;  %v1505_v50 = vld [vmem:[%s3599_s0] sm:$0xf]  ;;  %v1678_v58 = vor.u32 %v2231_v45, %v1677_v43 }
   0xd   :  { %1069 = vmatpush.bf16.msra.mxu1 %v1718_v17  ;;  %2368 = vmatpush.bf16.msra.mxu3 %v1718_v17  ;;  %v2277_v49 = vld [vmem:[%s3598_s1 + $0x1f4] sm:$0xf0]  ;;  %v2191_v51 = vld [vmem:[%s3599_s0 + $0x20] sm:$0xf0]  ;;  %v1507_v53 = vld [vmem:[%s3599_s0 + $0x24] sm:$0xf0]  ;;  %v1798_v62 = vor.u32 %v2261_v47, %v1797_v46 }
   0xe   :  { %v2187_v52 = vld [vmem:[%s3599_s0 + $0x4] sm:$0xf]  ;;  %v1925_v55 = vld [vmem:[%s3598_s1 + $0x270] sm:$0xf]  ;;  %v2309_v57 = vld [vmem:[%s3598_s1 + $0x2f4] sm:$0xf0]  ;;  %v1862_v63 = vor.u32 %v2277_v49, %v1861_v48  ;;  %v2536_v3 = vor.u32 %v2191_v51, %v1505_v50 }
   0xf   :  { %v1989_v56 = vld [vmem:[%s3598_s1 + $0x2f0] sm:$0xf]  ;;  %v2293_v59 = vld [vmem:[%s3598_s1 + $0x274] sm:$0xf0]  ;;  %v1789_v60 = vld [vmem:[%s3598_s1 + $0x160] sm:$0xf]  ;;  %v2547_v8 = vor.u32 %v2187_v52, %v1507_v53 }
  0x10   :  { %1046 = vmatpush.bf16.msra.mxu0 %v1646_v22  ;;  %2361 = vmatpush.bf16.msra.mxu2 %v1646_v22  ;;  %v1577_v61 = vld [vmem:[%s3599_s0 + $0x90] sm:$0xf]  ;;  %v2209_v0 = vld [vmem:[%s3599_s0 + $0xb0] sm:$0xf0]  ;;  %v1579_v2 = vld [vmem:[%s3599_s0 + $0xb4] sm:$0xf0]  ;;  %v1990_v7 = vor.u32 %v2309_v57, %v1989_v56  ;;  %v1926_v9 = vor.u32 %v2293_v59, %v1925_v55 }
  0x11   :  { %1070 = vmatpush.bf16.msra.mxu1 %v1710_v23  ;;  %2369 = vmatpush.bf16.msra.mxu3 %v1710_v23  ;;  %v2205_v1 = vld [vmem:[%s3599_s0 + $0x94] sm:$0xf]  ;;  %v2259_v4 = vld [vmem:[%s3598_s1 + $0x164] sm:$0xf0]  ;;  %v1853_v5 = vld [vmem:[%s3598_s1 + $0x1e0] sm:$0xf]  ;;  %v2555_v12 = vor.u32 %v2209_v0, %v1577_v61 }
  0x12   :  { %v2275_v6 = vld [vmem:[%s3598_s1 + $0x1e4] sm:$0xf0]  ;;  %v1981_v10 = vld [vmem:[%s3598_s1 + $0x2e0] sm:$0xf]  ;;  %v2557_v13 = vor.u32 %v2205_v1, %v1579_v2  ;;  %v1790_v16 = vor.u32 %v2259_v4, %v1789_v60  ;;  %v1781_v18 = vld [vmem:[%s3598_s1 + $0x150] sm:$0xf] }
  0x13   :  { %v2307_v11 = vld [vmem:[%s3598_s1 + $0x2e4] sm:$0xf0]  ;;  %v1917_v14 = vld [vmem:[%s3598_s1 + $0x260] sm:$0xf]  ;;  %v1854_v17 = vor.u32 %v2275_v6, %v1853_v5  ;;  %v2257_v19 = vld [vmem:[%s3598_s1 + $0x154] sm:$0xf0] }
  0x14   :  { %1047 = vmatpush.bf16.msra.mxu0 %v1638_v28  ;;  %2362 = vmatpush.bf16.msra.mxu2 %v1638_v28  ;;  %v2291_v15 = vld [vmem:[%s3598_s1 + $0x264] sm:$0xf0]  ;;  %v1845_v20 = vld [vmem:[%s3598_s1 + $0x1d0] sm:$0xf]  ;;  %v2273_v21 = vld [vmem:[%s3598_s1 + $0x1d4] sm:$0xf0]  ;;  %v1982_v22 = vor.u32 %v2307_v11, %v1981_v10  ;;  %v1782_v28 = vor.u32 %v2257_v19, %v1781_v18 }
  0x15   :  { %1071 = vmatpush.bf16.msra.mxu1 %v1702_v29  ;;  %2370 = vmatpush.bf16.msra.mxu3 %v1702_v29  ;;  %v1918_v23 = vor.u32 %v2291_v15, %v1917_v14  ;;  %v1973_v24 = vld [vmem:[%s3598_s1 + $0x2d0] sm:$0xf]  ;;  %v2305_v25 = vld [vmem:[%s3598_s1 + $0x2d4] sm:$0xf0]  ;;  %v1846_v29 = vor.u32 %v2273_v21, %v1845_v20  ;;  %v1773_v30 = vld [vmem:[%s3598_s1 + $0x140] sm:$0xf] }
  0x16   :  { %v1909_v26 = vld [vmem:[%s3598_s1 + $0x250] sm:$0xf]  ;;  %v2289_v27 = vld [vmem:[%s3598_s1 + $0x254] sm:$0xf0]  ;;  %v2255_v31 = vld [vmem:[%s3598_s1 + $0x144] sm:$0xf0] }
  0x17   :  { %v1837_v32 = vld [vmem:[%s3598_s1 + $0x1c0] sm:$0xf]  ;;  %v2271_v33 = vld [vmem:[%s3598_s1 + $0x1c4] sm:$0xf0]  ;;  %v1765_v42 = vld [vmem:[%s3598_s1 + $0x130] sm:$0xf] }
  0x18   :  { %1048 = vmatpush.bf16.msra.mxu0 %v1630_v34  ;;  %2363 = vmatpush.bf16.msra.mxu2 %v1630_v34  ;;  %v1974_v34 = vor.u32 %v2305_v25, %v1973_v24  ;;  %v1965_v36 = vld [vmem:[%s3598_s1 + $0x2c0] sm:$0xf]  ;;  %v2303_v37 = vld [vmem:[%s3598_s1 + $0x2c4] sm:$0xf0]  ;;  %v1838_v41 = vor.u32 %v2271_v33, %v1837_v32  ;;  %v2253_v43 = vld [vmem:[%s3598_s1 + $0x134] sm:$0xf0] }
  0x19   :  { %1072 = vmatpush.bf16.msra.mxu1 %v1694_v35  ;;  %2371 = vmatpush.bf16.msra.mxu3 %v1694_v35  ;;  %v1910_v35 = vor.u32 %v2289_v27, %v1909_v26  ;;  %v1901_v38 = vld [vmem:[%s3598_s1 + $0x240] sm:$0xf]  ;;  %v2287_v39 = vld [vmem:[%s3598_s1 + $0x244] sm:$0xf0]  ;;  %v2269_v45 = vld [vmem:[%s3598_s1 + $0x1b4] sm:$0xf0]  ;;  %v1966_v46 = vor.u32 %v2303_v37, %v1965_v36  ;;  %v1766_v56 = vor.u32 %v2253_v43, %v1765_v42 }
  0x1a   :  { %v1541_v47 = vld [vmem:[%s3599_s0 + $0x48] sm:$0xf]  ;;  %v2200_v48 = vld [vmem:[%s3599_s0 + $0x68] sm:$0xf0]  ;;  %v1902_v49 = vor.u32 %v2287_v39, %v1901_v38  ;;  %v1957_v51 = vld [vmem:[%s3598_s1 + $0x2b0] sm:$0xf] }
  0x1b   :  { %v2196_v50 = vld [vmem:[%s3599_s0 + $0x4c] sm:$0xf]  ;;  %v2301_v52 = vld [vmem:[%s3598_s1 + $0x2b4] sm:$0xf0]  ;;  %v1543_v53 = vld [vmem:[%s3599_s0 + $0x6c] sm:$0xf0]  ;;  %v2656_v59 = vor.u32 %v2200_v48, %v1541_v47 }
  0x1c   :  { %1049 = vmatpush.bf16.msra.mxu0 %v1622_v40  ;;  %2364 = vmatpush.bf16.msra.mxu2 %v1622_v40  ;;  %v1774_v40 = vor.u32 %v2255_v31, %v1773_v30  ;;  %v2285_v55 = vld [vmem:[%s3598_s1 + $0x234] sm:$0xf0]  ;;  %v2251_v60 = vld [vmem:[%s3598_s1 + $0x124] sm:$0xf0]  ;;  %v1821_v61 = vld [vmem:[%s3598_s1 + $0x1a0] sm:$0xf]  ;;  %v2667_v0 = vor.u32 %v2196_v50, %v1543_v53 }
  0x1d   :  { %1073 = vmatpush.bf16.msra.mxu1 %v1686_v44  ;;  %2372 = vmatpush.bf16.msra.mxu3 %v1686_v44  ;;  %v1829_v44 = vld [vmem:[%s3598_s1 + $0x1b0] sm:$0xf]  ;;  %v1949_v2 = vld [vmem:[%s3598_s1 + $0x2a0] sm:$0xf]  ;;  %v2299_v4 = vld [vmem:[%s3598_s1 + $0x2a4] sm:$0xf0] }
  0x1e   :  { %v1830_v57 = vor.u32 %v2269_v45, %v1829_v44  ;;  %v1885_v5 = vld [vmem:[%s3598_s1 + $0x220] sm:$0xf]  ;;  %v2283_v6 = vld [vmem:[%s3598_s1 + $0x224] sm:$0xf0]  ;;  %v1749_v10 = vld [vmem:[%s3598_s1 + $0x110] sm:$0xf] }
  0x1f   :  { %v2249_v11 = vld [vmem:[%s3598_s1 + $0x114] sm:$0xf0]  ;;  %v1813_v14 = vld [vmem:[%s3598_s1 + $0x190] sm:$0xf]  ;;  %v1741_v24 = vld [vmem:[%s3598_s1 + $0x100] sm:$0xf] }
  0x20   :  { %1050 = vmatpush.bf16.msra.mxu0 %v1614_v54  ;;  %2365 = vmatpush.bf16.msra.mxu2 %v1614_v54  ;;  %v1893_v54 = vld [vmem:[%s3598_s1 + $0x230] sm:$0xf]  ;;  %v2265_v15 = vld [vmem:[%s3598_s1 + $0x194] sm:$0xf0]  ;;  %v2247_v25 = vld [vmem:[%s3598_s1 + $0x104] sm:$0xf0] }
  0x21   :  { %1074 = vmatpush.bf16.msra.mxu1 %v1678_v58  ;;  %2373 = vmatpush.bf16.msra.mxu3 %v1678_v58  ;;  %v1757_v58 = vld [vmem:[%s3598_s1 + $0x120] sm:$0xf]  ;;  %v1894_v1 = vor.u32 %v2285_v55, %v1893_v54  ;;  %v1941_v18 = vld [vmem:[%s3598_s1 + $0x290] sm:$0xf]  ;;  %v2297_v19 = vld [vmem:[%s3598_s1 + $0x294] sm:$0xf0]  ;;  %v1742_v42 = vor.u32 %v2247_v25, %v1741_v24 }
  0x22   :  { %v1877_v20 = vld [vmem:[%s3598_s1 + $0x210] sm:$0xf]  ;;  %v2281_v21 = vld [vmem:[%s3598_s1 + $0x214] sm:$0xf0]  ;;  %v1805_v26 = vld [vmem:[%s3598_s1 + $0x180] sm:$0xf] }
  0x23   :  { %1051 = vmatmul.bf16.vlgmr.msra.gmra.mxu0 %v2536_v3  ;;  %1061 = vmatmul.bf16.vlgmr.msra.gmra.mxu2 %v2555_v12  ;;  %v2263_v27 = vld [vmem:[%s3598_s1 + $0x184] sm:$0xf0]  ;;  %v2053_v30 = vld [vmem:[%s3598_s1 + $0x370] sm:$0xf]  ;;  %v1878_v31 = vor.u32 %v2281_v21, %v1877_v20  ;;  %v2192_v33 = vld [vmem:[%s3599_s0 + $0x28] sm:$0xf0] }
  0x24   :  { %1091 = vmatpush.bf16.msrb.mxu2 %v1798_v62  ;;  %1075 = vmatmul.bf16.vlgmr.msra.gmra.mxu1 %v2547_v8  ;;  %v2267_v62 = vld [vmem:[%s3598_s1 + $0x1a4] sm:$0xf0]  ;;  %v2325_v36 = vld [vmem:[%s3598_s1 + $0x374] sm:$0xf0]  ;;  %v1933_v37 = vld [vmem:[%s3598_s1 + $0x280] sm:$0xf]  ;;  %v1806_v43 = vor.u32 %v2263_v27, %v1805_v26 }
  0x25   :  { %1115 = vmatpush.bf16.msrb.mxu3 %v1862_v63  ;;  %1163 = vmatpush.bf16.msrb.mxu1 %v1990_v7  ;;  %v1958_v63 = vor.u32 %v2301_v52, %v1957_v51  ;;  %v1758_v7 = vor.u32 %v2251_v60, %v1757_v58  ;;  %v1513_v32 = vld [vmem:[%s3599_s0 + $0x8] sm:$0xf]  ;;  %v1521_v44 = vld [vmem:[%s3599_s0 + $0x10] sm:$0xf]  ;;  %v2193_v45 = vld [vmem:[%s3599_s0 + $0x30] sm:$0xf0]  ;;  %v2054_v47 = vor.u32 %v2325_v36, %v2053_v30 }
  0x26   :  { %1139 = vmatpush.bf16.msrb.mxu0 %v1926_v9  ;;  %1085 = vmatmul.bf16.vlgmr.msra.gmra.mxu3 %v2557_v13  ;;  %v1822_v9 = vor.u32 %v2267_v62, %v1821_v61  ;;  %v2295_v38 = vld [vmem:[%s3598_s1 + $0x284] sm:$0xf0]  ;;  %v2228_v50 = vld [vmem:[%s3598_s1 + $0x74] sm:$0xf]  ;;  %v1671_v51 = vld [vmem:[%s3598_s1 + $0x78] sm:$0xf0] }
  0x27   :  { %v2279_v39 = vld [vmem:[%s3598_s1 + $0x204] sm:$0xf0]  ;;  %v1934_v48 = vor.u32 %v2295_v38, %v1933_v37  ;;  %v2189_v54 = vld [vmem:[%s3599_s0 + $0x14] sm:$0xf]  ;;  %v2045_v55 = vld [vmem:[%s3598_s1 + $0x360] sm:$0xf] }
  0x28   :  { %1092 = vmatpush.bf16.msrb.mxu2 %v1790_v16  ;;  %v1950_v16 = vor.u32 %v2299_v4, %v1949_v2  ;;  %v1523_v60 = vld [vmem:[%s3599_s0 + $0x34] sm:$0xf0]  ;;  %v2109_v61 = vld [vmem:[%s3598_s1 + $0x3e0] sm:$0xf]  ;;  %v2339_v62 = vld [vmem:[%s3598_s1 + $0x3e4] sm:$0xf0]  ;;  %v2798_v4 = vor.u32 %v2193_v45, %v1521_v44 }
  0x29   :  { %1116 = vmatpush.bf16.msrb.mxu3 %v1854_v17  ;;  %1164 = vmatpush.bf16.msrb.mxu1 %v1982_v22  ;;  %v1886_v17 = vor.u32 %v2283_v6, %v1885_v5  ;;  %v1750_v22 = vor.u32 %v2249_v11, %v1749_v10  ;;  %v2173_v2 = vld [vmem:[%s3598_s1 + $0x460] sm:$0xf]  ;;  %v2355_v6 = vld [vmem:[%s3598_s1 + $0x464] sm:$0xf0]  ;;  %v2809_v10 = vor.u32 %v2189_v54, %v1523_v60  ;;  %v2165_v20 = vld [vmem:[%s3598_s1 + $0x450] sm:$0xf] }
  0x2a   :  { %1140 = vmatpush.bf16.msrb.mxu0 %v1918_v23  ;;  %v1814_v23 = vor.u32 %v2265_v15, %v1813_v14  ;;  %v2110_v11 = vor.u32 %v2339_v62, %v2109_v61  ;;  %v2037_v14 = vld [vmem:[%s3598_s1 + $0x350] sm:$0xf]  ;;  %v2321_v15 = vld [vmem:[%s3598_s1 + $0x354] sm:$0xf0]  ;;  %v1655_v24 = vld [vmem:[%s3598_s1 + $0x58] sm:$0xf0] }
  0x2b   :  { %v2038_v21 = vor.u32 %v2321_v15, %v2037_v14  ;;  %v2029_v26 = vld [vmem:[%s3598_s1 + $0x340] sm:$0xf]  ;;  %v2319_v27 = vld [vmem:[%s3598_s1 + $0x344] sm:$0xf0]  ;;  %v1647_v36 = vld [vmem:[%s3598_s1 + $0x48] sm:$0xf0] }
  0x2c   :  { %1093 = vmatpush.bf16.msrb.mxu2 %v1782_v28  ;;  %v1942_v28 = vor.u32 %v2297_v19, %v1941_v18  ;;  %v2174_v18 = vor.u32 %v2355_v6, %v2173_v2  ;;  %v1549_v37 = vld [vmem:[%s3599_s0 + $0x50] sm:$0xf]  ;;  %v2201_v38 = vld [vmem:[%s3599_s0 + $0x70] sm:$0xf0]  ;;  %v2333_v45 = vld [vmem:[%s3598_s1 + $0x3b4] sm:$0xf0] }
  0x2d   :  { %1117 = vmatpush.bf16.msrb.mxu3 %v1846_v29  ;;  %1165 = vmatpush.bf16.msrb.mxu1 %v1974_v34  ;;  %v1869_v29 = vld [vmem:[%s3598_s1 + $0x200] sm:$0xf]  ;;  %v2188_v34 = vld [vmem:[%s3599_s0 + $0xc] sm:$0xf]  ;;  %v2085_v44 = vld [vmem:[%s3598_s1 + $0x3b0] sm:$0xf]  ;;  %v2914_v62 = vor.u32 %v2201_v38, %v1549_v37 }
  0x2e   :  { %1141 = vmatpush.bf16.msrb.mxu0 %v1910_v35  ;;  %v1515_v35 = vld [vmem:[%s3599_s0 + $0x2c] sm:$0xf0]  ;;  %v1870_v52 = vor.u32 %v2279_v39, %v1869_v29  ;;  %v2335_v29 = vld [vmem:[%s3598_s1 + $0x3c4] sm:$0xf0]  ;;  %v2197_v39 = vld [vmem:[%s3599_s0 + $0x54] sm:$0xf] }
  0x2f   :  { %v2784_v58 = vor.u32 %v2188_v34, %v1515_v35  ;;  %v2351_v34 = vld [vmem:[%s3598_s1 + $0x444] sm:$0xf0]  ;;  %v2222_v35 = vld [vmem:[%s3598_s1 + $0x44] sm:$0xf]  ;;  %v1639_v54 = vld [vmem:[%s3598_s1 + $0x38] sm:$0xf0] }
  0x30   :  { %1094 = vmatpush.bf16.msrb.mxu2 %v1774_v40  ;;  %v2117_v40 = vld [vmem:[%s3598_s1 + $0x3f0] sm:$0xf]  ;;  %v2013_v60 = vld [vmem:[%s3598_s1 + $0x320] sm:$0xf]  ;;  %v2315_v61 = vld [vmem:[%s3598_s1 + $0x324] sm:$0xf0] }
  0x31   :  { %1118 = vmatpush.bf16.msrb.mxu3 %v1838_v41  ;;  %1166 = vmatpush.bf16.msrb.mxu1 %v1966_v46  ;;  %v2341_v41 = vld [vmem:[%s3598_s1 + $0x3f4] sm:$0xf0]  ;;  %v2181_v46 = vld [vmem:[%s3598_s1 + $0x470] sm:$0xf]  ;;  %v2077_v2 = vld [vmem:[%s3598_s1 + $0x3a0] sm:$0xf]  ;;  %v2014_v14 = vor.u32 %v2315_v61, %v2013_v60 }
  0x32   :  { %1142 = vmatpush.bf16.msrb.mxu0 %v1902_v49  ;;  %v2357_v49 = vld [vmem:[%s3598_s1 + $0x474] sm:$0xf0]  ;;  %v2118_v53 = vor.u32 %v2341_v41, %v2117_v40  ;;  %v2021_v41 = vld [vmem:[%s3598_s1 + $0x330] sm:$0xf]  ;;  %v2347_v15 = vld [vmem:[%s3598_s1 + $0x424] sm:$0xf0] }
  0x33   :  { %1056 = vmatmul.bf16.gmra.mxu0 %v2656_v59  ;;  %v2244_v37 = vld [vmem:[%s3598_s1 + $0xf4] sm:$0xf]  ;;  %v1735_v38 = vld [vmem:[%s3598_s1 + $0xf8] sm:$0xf0] }
  0x34   :  { %1095 = vmatpush.bf16.msrb.mxu2 %v1766_v56  ;;  %1080 = vmatmul.bf16.gmra.mxu1 %v2667_v0  ;;  %v2323_v56 = vld [vmem:[%s3598_s1 + $0x364] sm:$0xf0]  ;;  %v2210_v60 = vld [vmem:[%s3599_s0 + $0xb8] sm:$0xf0] }
  0x35   :  { %1119 = vmatpush.bf16.msrb.mxu3 %v1830_v57  ;;  %1167 = vmatpush.bf16.msrb.mxu1 %v1958_v63  ;;  %v2782_v57 = vor.u32 %v2192_v33, %v1513_v32  ;;  %v2182_v63 = vor.u32 %v2357_v49, %v2181_v46  ;;  %v2046_v5 = vor.u32 %v2323_v56, %v2045_v55  ;;  %v2157_v32 = vld [vmem:[%s3598_s1 + $0x440] sm:$0xf]  ;;  %v1557_v46 = vld [vmem:[%s3599_s0 + $0x58] sm:$0xf]  ;;  %v2198_v55 = vld [vmem:[%s3599_s0 + $0x5c] sm:$0xf] }
  0x36   :  { %1143 = vmatpush.bf16.msrb.mxu0 %v1894_v1  ;;  %v1674_v1 = vor.u32 %v2228_v50, %v1671_v51  ;;  %v2030_v33 = vor.u32 %v2319_v27, %v2029_v26  ;;  %v1650_v49 = vor.u32 %v2222_v35, %v1647_v36  ;;  %v2149_v50 = vld [vmem:[%s3598_s1 + $0x430] sm:$0xf]  ;;  %v2086_v56 = vor.u32 %v2333_v45, %v2085_v44  ;;  %v1997_v26 = vld [vmem:[%s3598_s1 + $0x300] sm:$0xf]  ;;  %v2327_v35 = vld [vmem:[%s3598_s1 + $0x384] sm:$0xf0] }
  0x37   :  { %v2133_v27 = vld [vmem:[%s3598_s1 + $0x410] sm:$0xf]  ;;  %v2125_v36 = vld [vmem:[%s3598_s1 + $0x400] sm:$0xf]  ;;  %v2214_v45 = vld [vmem:[%s3598_s1 + $0x4] sm:$0xf] }
  0x38   :  { %1096 = vmatpush.bf16.msrb.mxu2 %v1758_v7  ;;  %v2226_v7 = vld [vmem:[%s3598_s1 + $0x64] sm:$0xf]  ;;  %v2206_v61 = vld [vmem:[%s3599_s0 + $0x9c] sm:$0xf] }
  0x39   :  { %1120 = vmatpush.bf16.msrb.mxu3 %v1822_v9  ;;  %1168 = vmatpush.bf16.msrb.mxu1 %v1950_v16  ;;  %v1663_v9 = vld [vmem:[%s3598_s1 + $0x68] sm:$0xf0]  ;;  %v2101_v16 = vld [vmem:[%s3598_s1 + $0x3d0] sm:$0xf] }
  0x3a   :  { %1144 = vmatpush.bf16.msrb.mxu0 %v1886_v17  ;;  %v2337_v17 = vld [vmem:[%s3598_s1 + $0x3d4] sm:$0xf0]  ;;  %v1666_v19 = vor.u32 %v2226_v7, %v1663_v9  ;;  %v2141_v9 = vld [vmem:[%s3598_s1 + $0x420] sm:$0xf] }
  0x3b   :  { %v2102_v25 = vor.u32 %v2337_v17, %v2101_v16  ;;  %v2218_v16 = vld [vmem:[%s3598_s1 + $0x24] sm:$0xf]  ;;  %v1631_v17 = vld [vmem:[%s3598_s1 + $0x28] sm:$0xf0] }
  0x3c   :  { %1097 = vmatpush.bf16.msrb.mxu2 %v1750_v22  ;;  %v2353_v22 = vld [vmem:[%s3598_s1 + $0x454] sm:$0xf0] }
  0x3d   :  { %1121 = vmatpush.bf16.msrb.mxu3 %v1814_v23  ;;  %1169 = vmatpush.bf16.msrb.mxu1 %v1942_v28  ;;  %v2224_v23 = vld [vmem:[%s3598_s1 + $0x54] sm:$0xf]  ;;  %v2093_v28 = vld [vmem:[%s3598_s1 + $0x3c0] sm:$0xf]  ;;  %v2166_v30 = vor.u32 %v2353_v22, %v2165_v20  ;;  %v2005_v20 = vld [vmem:[%s3598_s1 + $0x310] sm:$0xf] }
  0x3e   :  { %1145 = vmatpush.bf16.msrb.mxu0 %v1878_v31  ;;  %v1658_v31 = vor.u32 %v2224_v23, %v1655_v24  ;;  %v2094_v40 = vor.u32 %v2335_v29, %v2093_v28  ;;  %v2069_v22 = vld [vmem:[%s3598_s1 + $0x390] sm:$0xf]  ;;  %v2329_v23 = vld [vmem:[%s3598_s1 + $0x394] sm:$0xf0]  ;;  %v2142_v24 = vor.u32 %v2347_v15, %v2141_v9  ;;  %v1593_v15 = vld [vmem:[%s3599_s0 + $0xa0] sm:$0xf] }
  0x3f   :  { %v2345_v29 = vld [vmem:[%s3598_s1 + $0x414] sm:$0xf0] }
  0x40   :  { %1098 = vmatpush.bf16.msrb.mxu2 %v1742_v42  ;;  %v2317_v42 = vld [vmem:[%s3598_s1 + $0x334] sm:$0xf0] }
  0x41   :  { %1122 = vmatpush.bf16.msrb.mxu3 %v1806_v43  ;;  %1170 = vmatpush.bf16.msrb.mxu1 %v1934_v48  ;;  %v1551_v43 = vld [vmem:[%s3599_s0 + $0x74] sm:$0xf0]  ;;  %v2158_v48 = vor.u32 %v2351_v34, %v2157_v32  ;;  %v2022_v51 = vor.u32 %v2317_v42, %v2021_v41  ;;  %v2070_v32 = vor.u32 %v2329_v23, %v2069_v22  ;;  %v2061_v34 = vld [vmem:[%s3598_s1 + $0x380] sm:$0xf]  ;;  %v2343_v41 = vld [vmem:[%s3598_s1 + $0x404] sm:$0xf0] }
  0x42   :  { %1146 = vmatpush.bf16.msrb.mxu0 %v1870_v52  ;;  %v2349_v52 = vld [vmem:[%s3598_s1 + $0x434] sm:$0xf0]  ;;  %v2260_v42 = vld [vmem:[%s3598_s1 + $0x174] sm:$0xf]  ;;  %v1595_v22 = vld [vmem:[%s3599_s0 + $0xc4] sm:$0xf0] }
  0x43   :  { %1099 = vmatmul.bf16.vlgmr.msrb.gmra.mxu2 %v2782_v57  ;;  %v2150_v6 = vor.u32 %v2349_v52, %v2149_v50  ;;  %v1863_v50 = vld [vmem:[%s3598_s1 + $0x1f8] sm:$0xf0]  ;;  %v2240_v23 = vld [vmem:[%s3598_s1 + $0xd4] sm:$0xf] }
  0x44   :  { %1187 = vmatpush.bf16.msra.mxu2 %v2054_v47  ;;  %1123 = vmatmul.bf16.vlgmr.msrb.gmra.mxu3 %v2784_v58  ;;  %v2202_v47 = vld [vmem:[%s3599_s0 + $0x78] sm:$0xf0] }
  0x45   :  { %1211 = vmatpush.bf16.msra.mxu3 %v2118_v53  ;;  %1259 = vmatpush.bf16.msra.mxu1 %v1674_v1  ;;  %v2220_v53 = vld [vmem:[%s3598_s1 + $0x34] sm:$0xf]  ;;  %v1559_v1 = vld [vmem:[%s3599_s0 + $0x7c] sm:$0xf0]  ;;  %v1927_v52 = vld [vmem:[%s3598_s1 + $0x278] sm:$0xf0] }
  0x46   :  { %1235 = vmatpush.bf16.msra.mxu0 %v2182_v63  ;;  %1171 = vmatmul.bf16.vlgmr.msrb.gmra.mxu1 %v2809_v10  ;;  %v2916_v63 = vor.u32 %v2197_v39, %v1551_v43  ;;  %v1642_v7 = vor.u32 %v2220_v53, %v1639_v54  ;;  %v2134_v39 = vor.u32 %v2345_v29, %v2133_v27  ;;  %v1799_v43 = vld [vmem:[%s3598_s1 + $0x178] sm:$0xf0]  ;;  %v1585_v53 = vld [vmem:[%s3599_s0 + $0x98] sm:$0xf]  ;;  %v2256_v27 = vld [vmem:[%s3598_s1 + $0x154] sm:$0xf] }
  0x47   :  { %1147 = vmatmul.bf16.vlgmr.msrb.gmra.mxu0 %v2798_v4  ;;  %v1802_v54 = vor.u32 %v2260_v42, %v1799_v43  ;;  %v1775_v42 = vld [vmem:[%s3598_s1 + $0x148] sm:$0xf0]  ;;  %v2272_v43 = vld [vmem:[%s3598_s1 + $0x1d4] sm:$0xf] }
  0x48   :  { %1188 = vmatpush.bf16.msra.mxu2 %v2046_v5  ;;  %v2331_v5 = vld [vmem:[%s3598_s1 + $0x3a4] sm:$0xf0] }
  0x49   :  { %1212 = vmatpush.bf16.msra.mxu3 %v2110_v11  ;;  %1260 = vmatpush.bf16.msra.mxu1 %v1666_v19  ;;  %v2930_v11 = vor.u32 %v2202_v47, %v1557_v46  ;;  %v2078_v19 = vor.u32 %v2331_v5, %v2077_v2  ;;  %v1615_v46 = vld [vmem:[%s3598_s1 + $0x8] sm:$0xf0]  ;;  %v2276_v47 = vld [vmem:[%s3598_s1 + $0x1f4] sm:$0xf]  ;;  %v2126_v2 = vor.u32 %v2343_v41, %v2125_v36  ;;  %v2254_v41 = vld [vmem:[%s3598_s1 + $0x144] sm:$0xf] }
  0x4a   :  { %1236 = vmatpush.bf16.msra.mxu0 %v2174_v18  ;;  %v2941_v18 = vor.u32 %v2198_v55, %v1559_v1  ;;  %v2242_v55 = vld [vmem:[%s3598_s1 + $0xe4] sm:$0xf]  ;;  %v1587_v1 = vld [vmem:[%s3599_s0 + $0xbc] sm:$0xf0]  ;;  %v1618_v5 = vor.u32 %v2214_v45, %v1615_v46  ;;  %v1866_v9 = vor.u32 %v2276_v47, %v1863_v50  ;;  %v1711_v36 = vld [vmem:[%s3598_s1 + $0xc8] sm:$0xf0]  ;;  %v1778_v47 = vor.u32 %v2254_v41, %v1775_v42 }
  0x4b   :  { %v2236_v45 = vld [vmem:[%s3598_s1 + $0xb4] sm:$0xf]  ;;  %v1703_v46 = vld [vmem:[%s3598_s1 + $0xb8] sm:$0xf0]  ;;  %v2266_v41 = vld [vmem:[%s3598_s1 + $0x1a4] sm:$0xf] }
  0x4c   :  { %1189 = vmatpush.bf16.msra.mxu2 %v2038_v21  ;;  %v2313_v21 = vld [vmem:[%s3598_s1 + $0x314] sm:$0xf0]  ;;  %v1911_v50 = vld [vmem:[%s3598_s1 + $0x258] sm:$0xf0]  ;;  %v1823_v42 = vld [vmem:[%s3598_s1 + $0x1a8] sm:$0xf0] }
  0x4d   :  { %1213 = vmatpush.bf16.msra.mxu3 %v2102_v25  ;;  %1261 = vmatpush.bf16.msra.mxu1 %v1658_v31  ;;  %v1634_v25 = vor.u32 %v2218_v16, %v1631_v17  ;;  %v2006_v28 = vor.u32 %v2313_v21, %v2005_v20  ;;  %v1623_v31 = vld [vmem:[%s3598_s1 + $0x18] sm:$0xf0]  ;;  %v2211_v16 = vld [vmem:[%s3599_s0 + $0xc0] sm:$0xf0]  ;;  %v3052_v20 = vor.u32 %v2210_v60, %v1585_v53 }
  0x4e   :  { %1237 = vmatpush.bf16.msra.mxu0 %v2166_v30  ;;  %v2216_v30 = vld [vmem:[%s3598_s1 + $0x14] sm:$0xf]  ;;  %v2207_v17 = vld [vmem:[%s3599_s0 + $0xa4] sm:$0xf]  ;;  %v3054_v21 = vor.u32 %v2206_v61, %v1587_v1  ;;  %v1767_v53 = vld [vmem:[%s3598_s1 + $0x138] sm:$0xf0]  ;;  %v1706_v60 = vor.u32 %v2236_v45, %v1703_v46 }
  0x4f   :  { %v3073_v29 = vor.u32 %v2207_v17, %v1595_v22  ;;  %v2286_v61 = vld [vmem:[%s3598_s1 + $0x244] sm:$0xf]  ;;  %v1537_v17 = vld [vmem:[%s3599_s0 + $0x20] sm:$0xf]  ;;  %v1887_v46 = vld [vmem:[%s3598_s1 + $0x228] sm:$0xf0] }
  0x50   :  { %1190 = vmatpush.bf16.msra.mxu2 %v2030_v33  ;;  %v2311_v33 = vld [vmem:[%s3598_s1 + $0x304] sm:$0xf0]  ;;  %v2282_v45 = vld [vmem:[%s3598_s1 + $0x224] sm:$0xf] }
  0x51   :  { %1214 = vmatpush.bf16.msra.mxu3 %v2094_v40  ;;  %1262 = vmatpush.bf16.msra.mxu1 %v1650_v49  ;;  %v1626_v40 = vor.u32 %v2216_v30, %v1623_v31  ;;  %v1998_v44 = vor.u32 %v2311_v33, %v1997_v26  ;;  %v1738_v49 = vor.u32 %v2244_v37, %v1735_v38  ;;  %v2274_v31 = vld [vmem:[%s3598_s1 + $0x1e4] sm:$0xf]  ;;  %v1919_v38 = vld [vmem:[%s3598_s1 + $0x268] sm:$0xf0] }
  0x52   :  { %1238 = vmatpush.bf16.msra.mxu0 %v2158_v48  ;;  %v2062_v48 = vor.u32 %v2327_v35, %v2061_v34  ;;  %v3065_v26 = vor.u32 %v2211_v16, %v1593_v15  ;;  %v2238_v33 = vld [vmem:[%s3598_s1 + $0xc4] sm:$0xf] }
  0x53   :  { %1104 = vmatmul.bf16.gmra.mxu2 %v2914_v62  ;;  %v2290_v37 = vld [vmem:[%s3598_s1 + $0x264] sm:$0xf] }
  0x54   :  { %1191 = vmatpush.bf16.msra.mxu2 %v2022_v51  ;;  %1128 = vmatmul.bf16.gmra.mxu3 %v2916_v63  ;;  %v2292_v51 = vld [vmem:[%s3598_s1 + $0x274] sm:$0xf] }
  0x55   :  { %1215 = vmatpush.bf16.msra.mxu3 %v2086_v56  ;;  %1263 = vmatpush.bf16.msra.mxu1 %v1642_v7  ;;  %v1727_v56 = vld [vmem:[%s3598_s1 + $0xe8] sm:$0xf0] }
  0x56   :  { %1239 = vmatpush.bf16.msra.mxu0 %v2150_v6  ;;  %1176 = vmatmul.bf16.gmra.mxu1 %v2941_v18  ;;  %v2258_v6 = vld [vmem:[%s3598_s1 + $0x164] sm:$0xf]  ;;  %v1791_v7 = vld [vmem:[%s3598_s1 + $0x168] sm:$0xf0] }
  0x57   :  { %1152 = vmatmul.bf16.gmra.mxu0 %v2930_v11 }
  0x58   :  { %1192 = vmatpush.bf16.msra.mxu2 %v2014_v14  ;;  %v1930_v14 = vor.u32 %v2292_v51, %v1927_v52  ;;  %v2252_v51 = vld [vmem:[%s3598_s1 + $0x134] sm:$0xf] }
  0x59   :  { %1216 = vmatpush.bf16.msra.mxu3 %v2078_v19  ;;  %1264 = vmatpush.bf16.msra.mxu1 %v1634_v25  ;;  %v1730_v19 = vor.u32 %v2242_v55, %v1727_v56  ;;  %v1794_v25 = vor.u32 %v2258_v6, %v1791_v7  ;;  %v1839_v55 = vld [vmem:[%s3598_s1 + $0x1c8] sm:$0xf0]  ;;  %v1529_v56 = vld [vmem:[%s3599_s0 + $0x18] sm:$0xf]  ;;  %v2194_v7 = vld [vmem:[%s3599_s0 + $0x38] sm:$0xf0]  ;;  %v1770_v15 = vor.u32 %v2252_v51, %v1767_v53 }
  0x5a   :  { %1240 = vmatpush.bf16.msra.mxu0 %v2142_v24  ;;  %v1719_v24 = vld [vmem:[%s3598_s1 + $0xd8] sm:$0xf0]  ;;  %v1903_v6 = vld [vmem:[%s3598_s1 + $0x248] sm:$0xf0] }
  0x5b   :  { %v1722_v30 = vor.u32 %v2240_v23, %v1719_v24  ;;  %v1906_v16 = vor.u32 %v2286_v61, %v1903_v6  ;;  %v3163_v23 = vor.u32 %v2194_v7, %v1529_v56  ;;  %v1743_v51 = vld [vmem:[%s3598_s1 + $0x108] sm:$0xf0]  ;;  %v2280_v56 = vld [vmem:[%s3598_s1 + $0x214] sm:$0xf]  ;;  %v1567_v6 = vld [vmem:[%s3599_s0 + $0x84] sm:$0xf0] }
  0x5c   :  { %1193 = vmatpush.bf16.msra.mxu2 %v2006_v28  ;;  %v1783_v28 = vld [vmem:[%s3598_s1 + $0x158] sm:$0xf0] }
  0x5d   :  { %1217 = vmatpush.bf16.msra.mxu3 %v2070_v32  ;;  %1265 = vmatpush.bf16.msra.mxu1 %v1626_v40  ;;  %v1855_v32 = vld [vmem:[%s3598_s1 + $0x1e8] sm:$0xf0]  ;;  %v1786_v34 = vor.u32 %v2256_v27, %v1783_v28  ;;  %v1714_v40 = vor.u32 %v2238_v33, %v1711_v36  ;;  %v2250_v27 = vld [vmem:[%s3598_s1 + $0x124] sm:$0xf]  ;;  %v2232_v36 = vld [vmem:[%s3598_s1 + $0x94] sm:$0xf] }
  0x5e   :  { %1241 = vmatpush.bf16.msra.mxu0 %v2134_v39  ;;  %v1858_v35 = vor.u32 %v2274_v31, %v1855_v32  ;;  %v1922_v39 = vor.u32 %v2290_v37, %v1919_v38  ;;  %v1759_v28 = vld [vmem:[%s3598_s1 + $0x128] sm:$0xf0]  ;;  %v1831_v32 = vld [vmem:[%s3598_s1 + $0x1b8] sm:$0xf0] }
  0x5f   :  { %v1762_v31 = vor.u32 %v2250_v27, %v1759_v28  ;;  %v1687_v37 = vld [vmem:[%s3598_s1 + $0x98] sm:$0xf0]  ;;  %v2278_v28 = vld [vmem:[%s3598_s1 + $0x204] sm:$0xf] }
  0x60   :  { %1194 = vmatpush.bf16.msra.mxu2 %v1998_v44  ;;  %v1847_v44 = vld [vmem:[%s3598_s1 + $0x1d8] sm:$0xf0] }
  0x61   :  { %1218 = vmatpush.bf16.msra.mxu3 %v2062_v48  ;;  %1266 = vmatpush.bf16.msra.mxu1 %v1618_v5  ;;  %v1850_v48 = vor.u32 %v2272_v43, %v1847_v44  ;;  %v1695_v5 = vld [vmem:[%s3598_s1 + $0xa8] sm:$0xf0]  ;;  %v1826_v44 = vor.u32 %v2266_v41, %v1823_v42  ;;  %v1603_v42 = vld [vmem:[%s3599_s0 + $0xcc] sm:$0xf0] }
  0x62   :  { %1242 = vmatpush.bf16.msra.mxu0 %v2126_v2  ;;  %v2234_v2 = vld [vmem:[%s3598_s1 + $0xa4] sm:$0xf]  ;;  %v2208_v41 = vld [vmem:[%s3599_s0 + $0xac] sm:$0xf] }
  0x63   :  { %1109 = vmatmul.bf16.gmra.mxu2 %v3052_v20  ;;  %v1698_v22 = vor.u32 %v2234_v2, %v1695_v5  ;;  %v2203_v2 = vld [vmem:[%s3599_s0 + $0x80] sm:$0xf0] }
  0x64   :  { %1283 = vmatpush.bf16.msrb.mxu2 %v1738_v49  ;;  %1133 = vmatmul.bf16.gmra.mxu3 %v3054_v21  ;;  %v2288_v49 = vld [vmem:[%s3598_s1 + $0x254] sm:$0xf]  ;;  %v2199_v5 = vld [vmem:[%s3599_s0 + $0x64] sm:$0xf] }
  0x65   :  { %1307 = vmatpush.bf16.msrb.mxu3 %v1802_v54  ;;  %1355 = vmatpush.bf16.msrb.mxu1 %v1930_v14  ;;  %v1914_v52 = vor.u32 %v2288_v49, %v1911_v50  ;;  %v2270_v54 = vld [vmem:[%s3598_s1 + $0x1c4] sm:$0xf]  ;;  %v1531_v14 = vld [vmem:[%s3599_s0 + $0x3c] sm:$0xf0]  ;;  %v1679_v49 = vld [vmem:[%s3598_s1 + $0x88] sm:$0xf0] }
  0x66   :  { %1331 = vmatpush.bf16.msrb.mxu0 %v1866_v9  ;;  %1181 = vmatmul.bf16.gmra.mxu1 %v3073_v29  ;;  %v1842_v1 = vor.u32 %v2270_v54, %v1839_v55  ;;  %v2190_v9 = vld [vmem:[%s3599_s0 + $0x1c] sm:$0xf]  ;;  %v2246_v50 = vld [vmem:[%s3598_s1 + $0x104] sm:$0xf]  ;;  %v2264_v54 = vld [vmem:[%s3598_s1 + $0x194] sm:$0xf] }
  0x67   :  { %1157 = vmatmul.bf16.gmra.mxu0 %v3065_v26  ;;  %v3165_v24 = vor.u32 %v2190_v9, %v1531_v14  ;;  %v1746_v53 = vor.u32 %v2246_v50, %v1743_v51  ;;  %v1815_v55 = vld [vmem:[%s3598_s1 + $0x198] sm:$0xf0]  ;;  %v1573_v9 = vld [vmem:[%s3599_s0 + $0x68] sm:$0xf]  ;;  %v2204_v14 = vld [vmem:[%s3599_s0 + $0x88] sm:$0xf0] }
  0x68   :  { %1284 = vmatpush.bf16.msrb.mxu2 %v1730_v19  ;;  %v2195_v19 = vld [vmem:[%s3599_s0 + $0x40] sm:$0xf0]  ;;  %v1818_v61 = vor.u32 %v2264_v54, %v1815_v55  ;;  %v2304_v50 = vld [vmem:[%s3598_s1 + $0x2d4] sm:$0xf]  ;;  %v1975_v51 = vld [vmem:[%s3598_s1 + $0x2d8] sm:$0xf0] }
  0x69   :  { %1308 = vmatpush.bf16.msrb.mxu3 %v1794_v25  ;;  %1356 = vmatpush.bf16.msrb.mxu1 %v1922_v39  ;;  %v3167_v25 = vor.u32 %v2195_v19, %v1537_v17  ;;  %v2248_v39 = vld [vmem:[%s3598_s1 + $0x114] sm:$0xf]  ;;  %v2262_v17 = vld [vmem:[%s3598_s1 + $0x184] sm:$0xf]  ;;  %v1807_v19 = vld [vmem:[%s3598_s1 + $0x188] sm:$0xf0] }
  0x6a   :  { %1332 = vmatpush.bf16.msrb.mxu0 %v1858_v35  ;;  %v1895_v35 = vld [vmem:[%s3598_s1 + $0x238] sm:$0xf0]  ;;  %v1810_v27 = vor.u32 %v2262_v17, %v1807_v19  ;;  %v2356_v54 = vld [vmem:[%s3598_s1 + $0x474] sm:$0xf]  ;;  %v1967_v19 = vld [vmem:[%s3598_s1 + $0x2c8] sm:$0xf0] }
  0x6b   :  { %v2183_v55 = vld [vmem:[%s3598_s1 + $0x478] sm:$0xf0] }
  0x6c   :  { %1285 = vmatpush.bf16.msrb.mxu2 %v1722_v30  ;;  %v2268_v30 = vld [vmem:[%s3598_s1 + $0x1b4] sm:$0xf] }
  0x6d   :  { %1309 = vmatpush.bf16.msrb.mxu3 %v1786_v34  ;;  %1357 = vmatpush.bf16.msrb.mxu1 %v1914_v52  ;;  %v1834_v33 = vor.u32 %v2268_v30, %v1831_v32  ;;  %v2284_v34 = vld [vmem:[%s3598_s1 + $0x234] sm:$0xf]  ;;  %v1871_v30 = vld [vmem:[%s3598_s1 + $0x208] sm:$0xf0] }
  0x6e   :  { %1333 = vmatpush.bf16.msrb.mxu0 %v1850_v48  ;;  %v1898_v38 = vor.u32 %v2284_v34, %v1895_v35  ;;  %v1890_v48 = vor.u32 %v2282_v45, %v1887_v46  ;;  %v2308_v32 = vld [vmem:[%s3598_s1 + $0x2f4] sm:$0xf]  ;;  %v2322_v45 = vld [vmem:[%s3598_s1 + $0x364] sm:$0xf]  ;;  %v2047_v46 = vld [vmem:[%s3598_s1 + $0x368] sm:$0xf0] }
  0x6f   :  { %v2324_v34 = vld [vmem:[%s3598_s1 + $0x374] sm:$0xf] }
  0x70   :  { %1286 = vmatpush.bf16.msrb.mxu2 %v1714_v40  ;;  %v1690_v40 = vor.u32 %v2232_v36, %v1687_v37  ;;  %v2055_v36 = vld [vmem:[%s3598_s1 + $0x378] sm:$0xf0] }
  0x71   :  { %1310 = vmatpush.bf16.msrb.mxu3 %v1778_v47  ;;  %1358 = vmatpush.bf16.msrb.mxu1 %v1906_v16  ;;  %v2230_v47 = vld [vmem:[%s3598_s1 + $0x84] sm:$0xf]  ;;  %v3259_v16 = vor.u32 %v2199_v5, %v1567_v6  ;;  %v2058_v37 = vor.u32 %v2324_v34, %v2055_v36  ;;  %v2336_v34 = vld [vmem:[%s3598_s1 + $0x3d4] sm:$0xf] }
  0x72   :  { %1334 = vmatpush.bf16.msrb.mxu0 %v1842_v1  ;;  %v1682_v52 = vor.u32 %v2230_v47, %v1679_v49  ;;  %v1879_v1 = vld [vmem:[%s3598_s1 + $0x218] sm:$0xf0]  ;;  %v2340_v47 = vld [vmem:[%s3598_s1 + $0x3f4] sm:$0xf] }
  0x73   :  { %1195 = vmatmul.bf16.vlgmr.msra.gmra.mxu2 %v3163_v23  ;;  %v1882_v7 = vor.u32 %v2280_v56, %v1879_v1  ;;  %v2119_v49 = vld [vmem:[%s3598_s1 + $0x3f8] sm:$0xf0]  ;;  %v2320_v56 = vld [vmem:[%s3598_s1 + $0x354] sm:$0xf]  ;;  %v2186_v1 = vor.u32 %v2356_v54, %v2183_v55  ;;  %v2314_v55 = vld [vmem:[%s3598_s1 + $0x324] sm:$0xf] }
  0x74   :  { %1287 = vmatpush.bf16.msrb.mxu2 %v1706_v60  ;;  %1219 = vmatmul.bf16.vlgmr.msra.gmra.mxu3 %v3165_v24  ;;  %v1565_v60 = vld [vmem:[%s3599_s0 + $0x60] sm:$0xf] }
  0x75   :  { %1311 = vmatpush.bf16.msrb.mxu3 %v1770_v15  ;;  %1359 = vmatpush.bf16.msrb.mxu1 %v1898_v38  ;;  %v3257_v15 = vor.u32 %v2203_v2, %v1565_v60  ;;  %v2306_v38 = vld [vmem:[%s3598_s1 + $0x2e4] sm:$0xf]  ;;  %v2039_v2 = vld [vmem:[%s3598_s1 + $0x358] sm:$0xf0] }
  0x76   :  { %1267 = vmatmul.bf16.vlgmr.msra.gmra.mxu1 %v2536_v3  ;;  %1335 = vmatpush.bf16.msrb.mxu0 %v1834_v33  ;;  %v1751_v3 = vld [vmem:[%s3598_s1 + $0x118] sm:$0xf0]  ;;  %v2042_v5 = vor.u32 %v2320_v56, %v2039_v2  ;;  %v2015_v56 = vld [vmem:[%s3598_s1 + $0x328] sm:$0xf0] }
  0x77   :  { %1243 = vmatmul.bf16.vlgmr.msra.gmra.mxu0 %v3167_v25  ;;  %v1754_v43 = vor.u32 %v2248_v39, %v1751_v3  ;;  %v1991_v33 = vld [vmem:[%s3598_s1 + $0x2f8] sm:$0xf0]  ;;  %v1983_v39 = vld [vmem:[%s3598_s1 + $0x2e8] sm:$0xf0]  ;;  %v1601_v3 = vld [vmem:[%s3599_s0 + $0xa8] sm:$0xf] }
  0x78   :  { %1288 = vmatpush.bf16.msrb.mxu2 %v1698_v22  ;;  %v3267_v22 = vor.u32 %v2204_v14, %v1573_v9  ;;  %v1994_v35 = vor.u32 %v2308_v32, %v1991_v33  ;;  %v2111_v9 = vld [vmem:[%s3598_s1 + $0x3e8] sm:$0xf0]  ;;  %v2302_v14 = vld [vmem:[%s3598_s1 + $0x2c4] sm:$0xf] }
  0x79   :  { %1312 = vmatpush.bf16.msrb.mxu3 %v1762_v31  ;;  %1360 = vmatpush.bf16.msrb.mxu1 %v1890_v48  ;;  %v1874_v31 = vor.u32 %v2278_v28, %v1871_v30  ;;  %v2050_v48 = vor.u32 %v2322_v45, %v2047_v46  ;;  %v2175_v28 = vld [vmem:[%s3598_s1 + $0x468] sm:$0xf0]  ;;  %v1970_v30 = vor.u32 %v2302_v14, %v1967_v19  ;;  %v2318_v32 = vld [vmem:[%s3598_s1 + $0x344] sm:$0xf]  ;;  %v2296_v19 = vld [vmem:[%s3598_s1 + $0x294] sm:$0xf] }
  0x7a   :  { %1336 = vmatpush.bf16.msrb.mxu0 %v1826_v44  ;;  %v2213_v44 = vld [vmem:[%s3599_s0 + $0xd0] sm:$0xf0]  ;;  %v2031_v33 = vld [vmem:[%s3598_s1 + $0x348] sm:$0xf0]  ;;  %v2298_v46 = vld [vmem:[%s3598_s1 + $0x2a4] sm:$0xf] }
  0x7b   :  { %v2095_v45 = vld [vmem:[%s3598_s1 + $0x3c8] sm:$0xf0] }
  0x7c   :  { %1289 = vmatpush.bf16.msrb.mxu2 %v1690_v40  ;;  %v1986_v40 = vor.u32 %v2306_v38, %v1983_v39  ;;  %v1959_v38 = vld [vmem:[%s3598_s1 + $0x2b8] sm:$0xf0]  ;;  %v2352_v39 = vld [vmem:[%s3598_s1 + $0x454] sm:$0xf] }
  0x7d   :  { %1313 = vmatpush.bf16.msrb.mxu3 %v1754_v43  ;;  %1361 = vmatpush.bf16.msrb.mxu1 %v1882_v7  ;;  %v1609_v43 = vld [vmem:[%s3599_s0 + $0xb0] sm:$0xf]  ;;  %v2338_v7 = vld [vmem:[%s3598_s1 + $0x3e4] sm:$0xf] }
  0x7e   :  { %1337 = vmatpush.bf16.msrb.mxu0 %v1818_v61  ;;  %v3344_v61 = vor.u32 %v2208_v41, %v1603_v42  ;;  %v3349_v6 = vor.u32 %v2213_v44, %v1609_v43  ;;  %v2114_v17 = vor.u32 %v2338_v7, %v2111_v9  ;;  %v2023_v41 = vld [vmem:[%s3598_s1 + $0x338] sm:$0xf0]  ;;  %v2334_v44 = vld [vmem:[%s3598_s1 + $0x3c4] sm:$0xf]  ;;  %v2348_v7 = vld [vmem:[%s3598_s1 + $0x434] sm:$0xf] }
  0x7f   :  { %v2151_v9 = vld [vmem:[%s3598_s1 + $0x438] sm:$0xf0] }
  0x80   :  { %1290 = vmatpush.bf16.msrb.mxu2 %v1682_v52  ;;  %v2122_v52 = vor.u32 %v2340_v47, %v2119_v49  ;;  %v2098_v47 = vor.u32 %v2334_v44, %v2095_v45  ;;  %v2350_v49 = vld [vmem:[%s3598_s1 + $0x444] sm:$0xf]  ;;  %v2154_v14 = vor.u32 %v2348_v7, %v2151_v9  ;;  %v1999_v45 = vld [vmem:[%s3598_s1 + $0x308] sm:$0xf0] }
  0x81   :  { %1314 = vmatpush.bf16.msrb.mxu3 %v1746_v53  ;;  %1362 = vmatpush.bf16.msrb.mxu1 %v1874_v31  ;;  %v1978_v53 = vor.u32 %v2304_v50, %v1975_v51  ;;  %v2159_v50 = vld [vmem:[%s3598_s1 + $0x448] sm:$0xf0]  ;;  %v2310_v44 = vld [vmem:[%s3598_s1 + $0x304] sm:$0xf] }
  0x82   :  { %1338 = vmatpush.bf16.msrb.mxu0 %v1810_v27  ;;  %v2354_v27 = vld [vmem:[%s3598_s1 + $0x464] sm:$0xf] }
  0x83   :  { %1200 = vmatmul.bf16.gmra.mxu2 %v3257_v15  ;;  %v2178_v31 = vor.u32 %v2354_v27, %v2175_v28  ;;  %v2312_v27 = vld [vmem:[%s3598_s1 + $0x314] sm:$0xf] }
  0x84   :  { %1224 = vmatmul.bf16.gmra.mxu3 %v3259_v16  ;;  %1379 = vmatpush.bf16.msra.mxu2 %v1994_v35  ;;  %v2034_v35 = vor.u32 %v2318_v32, %v2031_v33  ;;  %v2007_v33 = vld [vmem:[%s3598_s1 + $0x318] sm:$0xf0] }
  0x85   :  { %1403 = vmatpush.bf16.msra.mxu3 %v2058_v37  ;;  %1451 = vmatpush.bf16.msra.mxu1 %v2186_v1  ;;  %v2300_v37 = vld [vmem:[%s3598_s1 + $0x2b4] sm:$0xf] }
  0x86   :  { %1272 = vmatmul.bf16.gmra.mxu1 %v2656_v59  ;;  %v2212_v59 = vld [vmem:[%s3599_s0 + $0xc8] sm:$0xf0]  ;;  %1427 = vmatpush.bf16.msra.mxu0 %v2122_v52  ;;  %v2162_v52 = vor.u32 %v2350_v49, %v2159_v50  ;;  %v2332_v1 = vld [vmem:[%s3598_s1 + $0x3b4] sm:$0xf]  ;;  %v2135_v49 = vld [vmem:[%s3598_s1 + $0x418] sm:$0xf0] }
  0x87   :  { %1248 = vmatmul.bf16.gmra.mxu0 %v3267_v22  ;;  %v3342_v60 = vor.u32 %v2212_v59, %v1601_v3  ;;  %v2167_v3 = vld [vmem:[%s3598_s1 + $0x458] sm:$0xf0]  ;;  %v2316_v59 = vld [vmem:[%s3598_s1 + $0x334] sm:$0xf] }
  0x88   :  { %1380 = vmatpush.bf16.msra.mxu2 %v1986_v40  ;;  %v1962_v40 = vor.u32 %v2300_v37, %v1959_v38  ;;  %v2170_v42 = vor.u32 %v2352_v39, %v2167_v3  ;;  %v2026_v43 = vor.u32 %v2316_v59, %v2023_v41  ;;  %v2010_v37 = vor.u32 %v2312_v27, %v2007_v33  ;;  %v2294_v39 = vld [vmem:[%s3598_s1 + $0x284] sm:$0xf] }
  0x89   :  { %1404 = vmatpush.bf16.msra.mxu3 %v2050_v48  ;;  %1452 = vmatpush.bf16.msra.mxu1 %v2178_v31  ;;  %v1951_v48 = vld [vmem:[%s3598_s1 + $0x2a8] sm:$0xf0] }
  0x8a   :  { %1428 = vmatpush.bf16.msra.mxu0 %v2114_v17  ;;  %v1954_v51 = vor.u32 %v2298_v46, %v1951_v48  ;;  %v2330_v17 = vld [vmem:[%s3598_s1 + $0x3a4] sm:$0xf]  ;;  %v2002_v48 = vor.u32 %v2310_v44, %v1999_v45 }
  0x8c   :  { %1381 = vmatpush.bf16.msra.mxu2 %v1978_v53 }
  0x8d   :  { %1405 = vmatpush.bf16.msra.mxu3 %v2042_v5  ;;  %1453 = vmatpush.bf16.msra.mxu1 %v2170_v42  ;;  %v2018_v5 = vor.u32 %v2314_v55, %v2015_v56  ;;  %v2328_v42 = vld [vmem:[%s3598_s1 + $0x394] sm:$0xf]  ;;  %v2127_v55 = vld [vmem:[%s3598_s1 + $0x408] sm:$0xf0] }
  0x90   :  { %1382 = vmatpush.bf16.msra.mxu2 %v1970_v30 }
  0x91   :  { %1406 = vmatpush.bf16.msra.mxu3 %v2034_v35  ;;  %1454 = vmatpush.bf16.msra.mxu1 %v2162_v52  ;;  %v2143_v35 = vld [vmem:[%s3598_s1 + $0x428] sm:$0xf0] }
  0x92   :  { %v2063_v52 = vld [vmem:[%s3598_s1 + $0x388] sm:$0xf0] }
  0x93   :  { %1205 = vmatmul.bf16.gmra.mxu2 %v3342_v60 }
  0x94   :  { %1229 = vmatmul.bf16.gmra.mxu3 %v3344_v61  ;;  %1383 = vmatpush.bf16.msra.mxu2 %v1962_v40  ;;  %v1935_v40 = vld [vmem:[%s3598_s1 + $0x288] sm:$0xf0] }
  0x95   :  { %1407 = vmatpush.bf16.msra.mxu3 %v2026_v43  ;;  %1455 = vmatpush.bf16.msra.mxu1 %v2154_v14  ;;  %v1938_v41 = vor.u32 %v2294_v39, %v1935_v40  ;;  %v2071_v43 = vld [vmem:[%s3598_s1 + $0x398] sm:$0xf0] }
  0x96   :  { %1277 = vmatmul.bf16.gmra.mxu1 %v2555_v12  ;;  %v2103_v12 = vld [vmem:[%s3598_s1 + $0x3d8] sm:$0xf0]  ;;  %v2074_v46 = vor.u32 %v2328_v42, %v2071_v43 }
  0x97   :  { %1253 = vmatmul.bf16.gmra.mxu0 %v3349_v6  ;;  %v2106_v36 = vor.u32 %v2336_v34, %v2103_v12  ;;  %v2346_v34 = vld [vmem:[%s3598_s1 + $0x424] sm:$0xf] }
  0x98   :  { %1384 = vmatpush.bf16.msra.mxu2 %v1954_v51  ;;  %v2146_v38 = vor.u32 %v2346_v34, %v2143_v35  ;;  %v2326_v51 = vld [vmem:[%s3598_s1 + $0x384] sm:$0xf] }
  0x99   :  { %1429 = vmatpush.bf16.msra.mxu0 %v2106_v36  ;;  %1408 = vmatpush.bf16.msra.mxu3 %v2018_v5 }
  0x9a   :  { %1456 = vmatpush.bf16.msra.mxu1 %v2146_v38 }
  0x9d   :  { %1430 = vmatpush.bf16.msra.mxu0 %v2098_v47  ;;  %1409 = vmatpush.bf16.msra.mxu3 %v2010_v37  ;;  %v2344_v47 = vld [vmem:[%s3598_s1 + $0x414] sm:$0xf] }
  0x9e   :  { %v2138_v50 = vor.u32 %v2344_v47, %v2135_v49 }
  0xa0   :  { %v1052_v53 = vpop.f32.mrf.mxu0  ;;  %1457 = vmatpush.bf16.msra.mxu1 %v2138_v50 }
  0xa1   :  { %v1076_v54 = vpop.f32.mrf.mxu1  ;;  %1410 = vmatpush.bf16.msra.mxu3 %v2002_v48 }
  0xa2   :  { %v3432_v2 = vadd.f32 %v1076_v54, %v1052_v53  ;;  %v2066_v53 = vor.u32 %v2326_v51, %v2063_v52  ;;  %v2342_v54 = vld [vmem:[%s3598_s1 + $0x404] sm:$0xf] }
  0xa3   :  { %1291 = vmatmul.bf16.vlgmr.msrb.gmra.mxu2 %v2547_v8  ;;  %v2087_v8 = vld [vmem:[%s3598_s1 + $0x3b8] sm:$0xf0]  ;;  %v2130_v5 = vor.u32 %v2342_v54, %v2127_v55 }
  0xa4   :  { %1315 = vmatmul.bf16.vlgmr.msrb.gmra.mxu3 %v2782_v57  ;;  %v2090_v57 = vor.u32 %v2332_v1, %v2087_v8 }
  0xa5   :  { %1458 = vmatpush.bf16.msra.mxu1 %v2130_v5 }
  0xa6   :  { %1363 = vmatmul.bf16.vlgmr.msrb.gmra.mxu1 %v2798_v4  ;;  %1431 = vmatpush.bf16.msra.mxu0 %v2090_v57  ;;  %v1943_v4 = vld [vmem:[%s3598_s1 + $0x298] sm:$0xf0]  ;;  %v1062_v31 = vpop.f32.mrf.mxu2 }
  0xa7   :  { %1339 = vmatmul.bf16.vlgmr.msrb.gmra.mxu0 %v2784_v58  ;;  %v2079_v58 = vld [vmem:[%s3598_s1 + $0x3a8] sm:$0xf0]  ;;  %v1946_v32 = vor.u32 %v2296_v19, %v1943_v4 }
  0xa8   :  { %v2082_v28 = vor.u32 %v2330_v17, %v2079_v58  ;;  %v1054_v30 = vpop.f32.mrf.mxu0 }
  0xa9   :  { %v1078_v12 = vpop.f32.mrf.mxu1  ;;  %v1086_v36 = vpop.f32.mrf.mxu3  ;;  %1385 = vmatpush.bf16.msra.mxu2 %v1946_v32 }
  0xaa   :  { %1432 = vmatpush.bf16.msra.mxu0 %v2082_v28  ;;  %v1079_v3 = vadd.f32 %v1078_v12, %v1054_v30  ;;  %v3475_v59 = vadd.f32 %v1086_v36, %v1062_v31 }
  0xad   :  { %1386 = vmatpush.bf16.msra.mxu2 %v1938_v41 }
  0xae   :  { %1433 = vmatpush.bf16.msra.mxu0 %v2074_v46  ;;  %v1064_v1 = vpop.f32.mrf.mxu2 }
  0xb0   :  { %v1057_v56 = vpop.f32.mrf.mxu0 }
  0xb1   :  { %v1081_v8 = vpop.f32.mrf.mxu1  ;;  %v1088_v57 = vpop.f32.mrf.mxu3 }
  0xb2   :  { %v1082_v7 = vadd.f32 %v1081_v8, %v1057_v56  ;;  %v3509_v9 = vadd.f32 %v1088_v57, %v1064_v1  ;;  %1434 = vmatpush.bf16.msra.mxu0 %v2066_v53 }
  0xb3   :  { %1296 = vmatmul.bf16.gmra.mxu2 %v2667_v0 }
  0xb4   :  { %1320 = vmatmul.bf16.gmra.mxu3 %v2914_v62 }
  0xb6   :  { %1368 = vmatmul.bf16.gmra.mxu1 %v2930_v11 }
  0xb7   :  { %1344 = vmatmul.bf16.gmra.mxu0 %v2916_v63 }
  0xb8   :  { %v1059_v14 = vpop.f32.mrf.mxu0 }
  0xb9   :  { %v1083_v17 = vpop.f32.mrf.mxu1 }
  0xba   :  { %v1084_v58 = vadd.f32 %v1083_v17, %v1059_v14 }
  0xc3   :  { %1301 = vmatmul.bf16.gmra.mxu2 %v2557_v13  ;;  %v1172_v0 = vpop.f32.mrf.mxu1 }
  0xc4   :  { %v1148_v19 = vpop.f32.mrf.mxu0  ;;  %1325 = vmatmul.bf16.gmra.mxu3 %v3052_v20 }
  0xc6   :  { %v1100_v62 = vpop.f32.mrf.mxu2  ;;  %1373 = vmatmul.bf16.gmra.mxu1 %v3065_v26 }
  0xc7   :  { %1349 = vmatmul.bf16.gmra.mxu0 %v3054_v21  ;;  %v1124_v4 = vpop.f32.mrf.mxu3  ;;  %v1101_v63 = vadd.f32 %v1100_v62, %v3432_v2 }
  0xc9   :  { %v1125_v27 = vadd.f32 %v1124_v4, %v1101_v63 }
  0xcb   :  { %v1149_v11 = vadd.f32 %v1148_v19, %v1125_v27  ;;  %v1174_v30 = vpop.f32.mrf.mxu1 }
  0xcc   :  { %v1150_v28 = vpop.f32.mrf.mxu0 }
  0xcd   :  { %v1173_v31 = vadd.f32 %v1172_v0, %v1149_v11 }
  0xce   :  { %v1102_v32 = vpop.f32.mrf.mxu2 }
  0xcf   :  { %v1126_v33 = vpop.f32.mrf.mxu3  ;;  %v1103_v34 = vadd.f32 %v1102_v32, %v1079_v3 }
  0xd1   :  { %v1127_v13 = vadd.f32 %v1126_v33, %v1103_v34 }
  0xd3   :  { %v1151_v20 = vadd.f32 %v1150_v28, %v1127_v13  ;;  %1387 = vmatmul.bf16.vlgmr.msra.gmra.mxu2 %v2809_v10  ;;  %v1177_v21 = vpop.f32.mrf.mxu1 }
  0xd4   :  { %v1153_v35 = vpop.f32.mrf.mxu0  ;;  %1411 = vmatmul.bf16.vlgmr.msra.gmra.mxu3 %v3163_v23 }
  0xd5   :  { %v1175_v26 = vadd.f32 %v1174_v30, %v1151_v20 }
  0xd6   :  { %v1105_v2 = vpop.f32.mrf.mxu2  ;;  %1459 = vmatmul.bf16.vlgmr.msra.gmra.mxu1 %v3167_v25 }
  0xd7   :  { %1435 = vmatmul.bf16.vlgmr.msra.gmra.mxu0 %v3165_v24  ;;  %v1129_v12 = vpop.f32.mrf.mxu3  ;;  %v1106_v36 = vadd.f32 %v1105_v2, %v1082_v7 }
  0xd9   :  { %v1130_v37 = vadd.f32 %v1129_v12, %v1106_v36 }
  0xdb   :  { %v1154_v39 = vadd.f32 %v1153_v35, %v1130_v37  ;;  %v1179_v40 = vpop.f32.mrf.mxu1 }
  0xdc   :  { %v1155_v38 = vpop.f32.mrf.mxu0 }
  0xdd   :  { %v1178_v3 = vadd.f32 %v1177_v21, %v1154_v39 }
  0xde   :  { %v1107_v41 = vpop.f32.mrf.mxu2 }
  0xdf   :  { %v1131_v42 = vpop.f32.mrf.mxu3  ;;  %v1108_v43 = vadd.f32 %v1107_v41, %v1084_v58 }
  0xe1   :  { %v1132_v10 = vadd.f32 %v1131_v42, %v1108_v43 }
  0xe3   :  { %v1156_v23 = vadd.f32 %v1155_v38, %v1132_v10  ;;  %1392 = vmatmul.bf16.gmra.mxu2 %v2941_v18  ;;  %v1182_v24 = vpop.f32.mrf.mxu1 }
  0xe4   :  { %v1158_v44 = vpop.f32.mrf.mxu0  ;;  %1416 = vmatmul.bf16.gmra.mxu3 %v3257_v15 }
  0xe5   :  { %v1180_v25 = vadd.f32 %v1179_v40, %v1156_v23 }
  0xe6   :  { %v1110_v45 = vpop.f32.mrf.mxu2  ;;  %1464 = vmatmul.bf16.gmra.mxu1 %v3267_v22 }
  0xe7   :  { %1440 = vmatmul.bf16.gmra.mxu0 %v3259_v16  ;;  %v1134_v46 = vpop.f32.mrf.mxu3  ;;  %v1111_v47 = vadd.f32 %v1110_v45, %v3475_v59 }
  0xe9   :  { %v1135_v48 = vadd.f32 %v1134_v46, %v1111_v47 }
  0xeb   :  { %v1159_v50 = vadd.f32 %v1158_v44, %v1135_v48  ;;  %v1184_v51 = vpop.f32.mrf.mxu1 }
  0xec   :  { %v1160_v49 = vpop.f32.mrf.mxu0 }
  0xed   :  { %v1183_v52 = vadd.f32 %v1182_v24, %v1159_v50 }
  0xee   :  { %v1112_v53 = vpop.f32.mrf.mxu2 }
  0xef   :  { %v1136_v54 = vpop.f32.mrf.mxu3  ;;  %v1113_v18 = vadd.f32 %v1112_v53, %v3509_v9 }
  0xf1   :  { %v1137_v15 = vadd.f32 %v1136_v54, %v1113_v18 }
  0xf3   :  { %v1161_v56 = vadd.f32 %v1160_v49, %v1137_v15  ;;  %1397 = vmatmul.bf16.gmra.mxu2 %v3073_v29  ;;  %v3530_v16 = vpop.f32.mrf.mxu1 }
  0xf4   :  { %v1244_v55 = vpop.f32.mrf.mxu0  ;;  %1421 = vmatmul.bf16.gmra.mxu3 %v3342_v60 }
  0xf5   :  { %v1185_v22 = vadd.f32 %v1184_v51, %v1161_v56 }
  0xf6   :  { %v1196_v59 = vpop.f32.mrf.mxu2  ;;  %1469 = vmatmul.bf16.gmra.mxu1 %v3349_v6 }
  0xf7   :  { %1445 = vmatmul.bf16.gmra.mxu0 %v3344_v61  ;;  %v1220_v1 = vpop.f32.mrf.mxu3  ;;  %v1197_v5 = vadd.f32 %v1196_v59, %v1173_v31 }
  0xf9   :  { %v1221_v8 = vadd.f32 %v1220_v1, %v1197_v5 }
  0xfb   :  { %v3534_v7 = vadd.f32 %v1244_v55, %v1221_v8  ;;  %v1270_v9 = vpop.f32.mrf.mxu1 }
  0xfc   :  { %v1246_v57 = vpop.f32.mrf.mxu0 }
  0xfe   :  { %v1198_v14 = vpop.f32.mrf.mxu2 }
  0xff   :  { %v1222_v17 = vpop.f32.mrf.mxu3  ;;  %v1199_v29 = vadd.f32 %v1198_v14, %v1175_v26 }
 0x101   :  { %v1223_v58 = vadd.f32 %v1222_v17, %v1199_v29 }
 0x103   :  { %v3536_v19 = vadd.f32 %v1246_v57, %v1223_v58  ;;  %v3538_v0 = vpop.f32.mrf.mxu1 }
 0x104   :  { %v1249_v60 = vpop.f32.mrf.mxu0 }
 0x106   :  { %v1201_v61 = vpop.f32.mrf.mxu2 }
 0x107   :  { %v1225_v62 = vpop.f32.mrf.mxu3  ;;  %v1202_v4 = vadd.f32 %v1201_v61, %v1178_v3 }
 0x109   :  { %v1226_v63 = vadd.f32 %v1225_v62, %v1202_v4 }
 0x10b   :  { %v3540_v27 = vadd.f32 %v1249_v60, %v1226_v63  ;;  %v3542_v28 = vpop.f32.mrf.mxu1 }
 0x10c   :  { %v1251_v6 = vpop.f32.mrf.mxu0 }
 0x10e   :  { %v1203_v11 = vpop.f32.mrf.mxu2 }
 0x10f   :  { %v1227_v30 = vpop.f32.mrf.mxu3  ;;  %v1204_v31 = vadd.f32 %v1203_v11, %v1180_v25 }
 0x111   :  { %v1228_v32 = vadd.f32 %v1227_v30, %v1204_v31 }
 0x113   :  { %v3544_v34 = vadd.f32 %v1251_v6, %v1228_v32  ;;  %v3546_v13 = vpop.f32.mrf.mxu1 }
 0x114   :  { %v1254_v33 = vpop.f32.mrf.mxu0 }
 0x116   :  { %v1206_v35 = vpop.f32.mrf.mxu2 }
 0x117   :  { %v1230_v20 = vpop.f32.mrf.mxu3  ;;  %v1207_v21 = vadd.f32 %v1206_v35, %v1183_v52 }
 0x119   :  { %v1231_v26 = vadd.f32 %v1230_v20, %v1207_v21 }
 0x11b   :  { %v3548_v12 = vadd.f32 %v1254_v33, %v1231_v26  ;;  %v3550_v36 = vpop.f32.mrf.mxu1 }
 0x11c   :  { %v1256_v2 = vpop.f32.mrf.mxu0 }
 0x11e   :  { %v1208_v37 = vpop.f32.mrf.mxu2 }
 0x11f   :  { %v1232_v38 = vpop.f32.mrf.mxu3  ;;  %v1209_v39 = vadd.f32 %v1208_v37, %v1185_v22 }
 0x121   :  { %v1233_v40 = vadd.f32 %v1232_v38, %v1209_v39 }
 0x123   :  { %v3552_v41 = vadd.f32 %v1256_v2, %v1233_v40  ;;  %v1364_v42 = vpop.f32.mrf.mxu1 }
 0x124   :  { %v1340_v3 = vpop.f32.mrf.mxu0 }
 0x126   :  { %v1292_v43 = vpop.f32.mrf.mxu2 }
 0x127   :  { %v1316_v10 = vpop.f32.mrf.mxu3  ;;  %v1293_v55 = vadd.f32 %v1292_v43, %v3530_v16 }
 0x129   :  { %v1317_v59 = vadd.f32 %v1316_v10, %v1293_v55 }
 0x12b   :  { %v1366_v23 = vpop.f32.mrf.mxu1  ;;  %v1341_v8 = vadd.f32 %v1340_v3, %v1317_v59 }
 0x12c   :  { %v1342_v44 = vpop.f32.mrf.mxu0 }
 0x12d   :  { %v1365_v58 = vadd.f32 %v1364_v42, %v1341_v8 }
 0x12e   :  { %v1294_v24 = vpop.f32.mrf.mxu2 }
 0x12f   :  { %v1318_v25 = vpop.f32.mrf.mxu3  ;;  %v1295_v57 = vadd.f32 %v1294_v24, %v1270_v9  ;;  %v1475_v9 = vmax.f32 %v3534_v7, 0.0  ;;  %v1477_v7 = vmax.f32 %v3536_v19, 0.0  ;;  %v1479_v19 = vmax.f32 %v3540_v27, 0.0 }
 0x131   :  { %v1319_v29 = vadd.f32 %v1318_v25, %v1295_v57 }
 0x133   :  { %v1369_v46 = vpop.f32.mrf.mxu1  ;;  %v1343_v4 = vadd.f32 %v1342_v44, %v1319_v29 }
 0x134   :  { %v1345_v45 = vpop.f32.mrf.mxu0 }
 0x135   :  { %v1367_v33 = vadd.f32 %v1366_v23, %v1343_v4  ;;  %v1481_v4 = vmax.f32 %v3544_v34, 0.0 }
 0x136   :  { %v1297_v47 = vpop.f32.mrf.mxu2 }
 0x137   :  { %v1321_v48 = vpop.f32.mrf.mxu3  ;;  %v1298_v16 = vadd.f32 %v1297_v47, %v3538_v0 }
 0x139   :  { %v1322_v31 = vadd.f32 %v1321_v48, %v1298_v16 }
 0x13b   :  { %v1371_v50 = vpop.f32.mrf.mxu1  ;;  %v1346_v2 = vadd.f32 %v1345_v45, %v1322_v31 }
 0x13c   :  { %v1347_v49 = vpop.f32.mrf.mxu0 }
 0x13d   :  { %v1370_v10 = vadd.f32 %v1369_v46, %v1346_v2 }
 0x13e   :  { %v1299_v51 = vpop.f32.mrf.mxu2 }
 0x13f   :  { %v1323_v52 = vpop.f32.mrf.mxu3  ;;  %v1300_v37 = vadd.f32 %v1299_v51, %v3542_v28 }
 0x141   :  { %v1324_v3 = vadd.f32 %v1323_v52, %v1300_v37  ;;  %v1485_v37 = vmax.f32 %v3552_v41, 0.0 }
 0x143   :  { %v3556_v54 = vpop.f32.mrf.mxu1  ;;  %v1348_v45 = vadd.f32 %v1347_v49, %v1324_v3 }
 0x144   :  { %v3554_v53 = vpop.f32.mrf.mxu0 }
 0x145   :  { %v1372_v46 = vadd.f32 %v1371_v50, %v1348_v45 }
 0x146   :  { %v1302_v18 = vpop.f32.mrf.mxu2 }
 0x147   :  { %v1326_v15 = vpop.f32.mrf.mxu3  ;;  %v1303_v28 = vadd.f32 %v1302_v18, %v3546_v13 }
 0x149   :  { %v1327_v52 = vadd.f32 %v1326_v15, %v1303_v28 }
 0x14b   :  { %v3561_v22 = vpop.f32.mrf.mxu1  ;;  %v1351_v13 = vadd.f32 %v3554_v53, %v1327_v52 }
 0x14c   :  { %v3559_v56 = vpop.f32.mrf.mxu0 }
 0x14e   :  { %v1304_v1 = vpop.f32.mrf.mxu2 }
 0x14f   :  { %v3563_v5 = vpop.f32.mrf.mxu3  ;;  %v1305_v18 = vadd.f32 %v1304_v1, %v3550_v36 }
 0x151   :  { %v1329_v50 = vadd.f32 %v3563_v5, %v1305_v18 }
 0x153   :  { %v1460_v17 = vpop.f32.mrf.mxu1  ;;  %v1353_v36 = vadd.f32 %v3559_v56, %v1329_v50 }
 0x154   :  { %v1436_v14 = vpop.f32.mrf.mxu0 }
 0x156   :  { %v1388_v60 = vpop.f32.mrf.mxu2 }
 0x157   :  { %v1412_v61 = vpop.f32.mrf.mxu3  ;;  %v1389_v62 = vadd.f32 %v1388_v60, %v1365_v58 }
 0x159   :  { %v1413_v63 = vadd.f32 %v1412_v61, %v1389_v62  ;;  %v1375_v61 = vadd.f32 %v3556_v54, %v1351_v13  ;;  %v1377_v54 = vadd.f32 %v3561_v22, %v1353_v36 }
 0x15b   :  { %v1437_v11 = vadd.f32 %v1436_v14, %v1413_v63  ;;  %v1462_v30 = vpop.f32.mrf.mxu1 }
 0x15c   :  { %v1438_v6 = vpop.f32.mrf.mxu0 }
 0x15d   :  { %v1461_v32 = vadd.f32 %v1460_v17, %v1437_v11 }
 0x15e   :  { %v1390_v35 = vpop.f32.mrf.mxu2 }
 0x15f   :  { %v1414_v20 = vpop.f32.mrf.mxu3  ;;  %v1476_v21 = vmax.f32 %v1461_v32, 0.0  ;;  %v1391_v26 = vadd.f32 %v1390_v35, %v1367_v33  ;;  %v1483_v32 = vmax.f32 %v3548_v12, 0.0 }
 0x161   :  { %v1487_v38 = vpack.c.bf16 %v1476_v21, %v1475_v9  ;;  %v1415_v39 = vadd.f32 %v1414_v20, %v1391_v26 }
 0x163   :  { %1493 = vst [vmem:[%s3600_s2] sm:$0xff] %v1487_v38  ;;  %v1439_v0 = vadd.f32 %v1438_v6, %v1415_v39  ;;  %v1465_v43 = vpop.f32.mrf.mxu1 }
 0x164   :  { %v1441_v40 = vpop.f32.mrf.mxu0 }
 0x165   :  { %v1463_v42 = vadd.f32 %v1462_v30, %v1439_v0 }
 0x166   :  { %v1393_v44 = vpop.f32.mrf.mxu2 }
 0x167   :  { %v1417_v23 = vpop.f32.mrf.mxu3  ;;  %v1478_v24 = vmax.f32 %v1463_v42, 0.0  ;;  %v1394_v25 = vadd.f32 %v1393_v44, %v1370_v10 }
 0x169   :  { %v1488_v47 = vpack.c.bf16 %v1478_v24, %v1477_v7  ;;  %v1418_v48 = vadd.f32 %v1417_v23, %v1394_v25 }
 0x16b   :  { %1494 = vst [vmem:[%s3600_s2 + $0x8] sm:$0xff] %v1488_v47  ;;  %v1442_v51 = vadd.f32 %v1441_v40, %v1418_v48  ;;  %v1467_v49 = vpop.f32.mrf.mxu1 }
 0x16c   :  { %v1443_v59 = vpop.f32.mrf.mxu0 }
 0x16d   :  { %v1466_v55 = vadd.f32 %v1465_v43, %v1442_v51 }
 0x16e   :  { %v1395_v8 = vpop.f32.mrf.mxu2 }
 0x16f   :  { %v1419_v57 = vpop.f32.mrf.mxu3  ;;  %v1480_v14 = vmax.f32 %v1466_v55, 0.0  ;;  %v1396_v17 = vadd.f32 %v1395_v8, %v1372_v46 }
 0x171   :  { %v1489_v29 = vpack.c.bf16 %v1480_v14, %v1479_v19  ;;  %v1420_v58 = vadd.f32 %v1419_v57, %v1396_v17 }
 0x173   :  { %1495 = vst [vmem:[%s3600_s2 + $0x10] sm:$0xff] %v1489_v29  ;;  %v1444_v15 = vadd.f32 %v1443_v59, %v1420_v58  ;;  %v1470_v11 = vpop.f32.mrf.mxu1 }
 0x174   :  { %v1446_v63 = vpop.f32.mrf.mxu0 }
 0x175   :  { %v1468_v60 = vadd.f32 %v1467_v49, %v1444_v15 }
 0x176   :  { %v1398_v27 = vpop.f32.mrf.mxu2 }
 0x177   :  { %v1422_v62 = vpop.f32.mrf.mxu3  ;;  %v1482_v16 = vmax.f32 %v1468_v60, 0.0  ;;  %v1399_v53 = vadd.f32 %v1398_v27, %v1375_v61 }
 0x179   :  { %v1490_v1 = vpack.c.bf16 %v1482_v16, %v1481_v4  ;;  %v1423_v6 = vadd.f32 %v1422_v62, %v1399_v53 }
 0x17b   :  { %1496 = vst [vmem:[%s3600_s2 + $0x18] sm:$0xff] %v1490_v1  ;;  %v1447_v5 = vadd.f32 %v1446_v63, %v1423_v6  ;;  %v1472_v26 = vpop.f32.mrf.mxu1 }
 0x17c   :  { %v1448_v56 = vpop.f32.mrf.mxu0 }
 0x17d   :  { %v1471_v30 = vadd.f32 %v1470_v11, %v1447_v5 }
 0x17e   :  { %v1400_v31 = vpop.f32.mrf.mxu2 }
 0x17f   :  { %v1484_v34 = vmax.f32 %v1471_v30, 0.0  ;;  %v1401_v33 = vadd.f32 %v1400_v31, %v1377_v54  ;;  %v1424_v35 = vpop.f32.mrf.mxu3 }
 0x181   :  { %v1491_v20 = vpack.c.bf16 %v1484_v34, %v1483_v32  ;;  %v1425_v9 = vadd.f32 %v1424_v35, %v1401_v33 }
 0x183   :  { %1497 = vst [vmem:[%s3600_s2 + $0x20] sm:$0xff] %v1491_v20  ;;  %v1449_v21 = vadd.f32 %v1448_v56, %v1425_v9 }
 0x185   :  { %v1473_v2 = vadd.f32 %v1472_v26, %v1449_v21 }
 0x187   :  { %v1486_v38 = vmax.f32 %v1473_v2, 0.0 }
 0x189   :  { %v1492_v22 = vpack.c.bf16 %v1486_v38, %v1485_v37 }
 0x18b   :  { %1498 = vst [vmem:[%s3600_s2 + $0x28] sm:$0xff] %v1492_v22 }

// kernel: _lambda_.13
= control target key start
LH: loop header
LB: loop body
LE: loop exit
PB: predicated region body
PF: predicated region fallthrough
CT: control target
= control target key end

     0   :  { %vm26_vm0 = vcmask 1045504   ;;  %vm167_vm1 = vcmask 1041409   ;;  %s504_s1 = inlined_call_operand.vmem [shape: f32[512,128], index: 1, kind: input, shape index: {}]   ;;  %s505_s0 = inlined_call_operand.vmem [shape: bf16[2,6,512], index: 0, kind: input, shape index: {}]   ;;  %s506_s2 = inlined_call_operand.vmem [shape: f32[1,128], index: 2, kind: input, shape index: {}]   ;;  %s507_s3 = inlined_call_operand.vmem [shape: f32[2,128], index: 3, kind: output, shape index: {}]  }
   0x1   :  { %v138_v0 = vld [vmem:[%s504_s1 + $0x178] sm:$0xff]  ;;  %v137_v2 = vld [vmem:[%s504_s1 + $0x170] sm:$0xff]  ;;  %v136_v6 = vld [vmem:[%s504_s1 + $0x168] sm:$0xff] }
   0x2   :  { %v106_v1 = vld [vmem:[%s504_s1 + $0x78] sm:$0xff]  ;;  %216 = vmatpush.msra.mxu2 %v138_v0  ;;  %v105_v4 = vld [vmem:[%s504_s1 + $0x70] sm:$0xff]  ;;  %v104_v8 = vld [vmem:[%s504_s1 + $0x68] sm:$0xff] }
   0x3   :  { %176 = vmatpush.msra.mxu0 %v106_v1  ;;  %v154_v3 = vld [vmem:[%s504_s1 + $0x1f8] sm:$0xff]  ;;  %v153_v7 = vld [vmem:[%s504_s1 + $0x1f0] sm:$0xff]  ;;  %v152_v10 = vld [vmem:[%s504_s1 + $0x1e8] sm:$0xff] }
   0x4   :  { %v122_v5 = vld [vmem:[%s504_s1 + $0xf8] sm:$0xff]  ;;  %236 = vmatpush.msra.mxu3 %v154_v3  ;;  %217 = vmatpush.msra.mxu2 %v137_v2  ;;  %v121_v9 = vld [vmem:[%s504_s1 + $0xf0] sm:$0xff]  ;;  %v135_v11 = vld [vmem:[%s504_s1 + $0x160] sm:$0xff] }
   0x5   :  { %196 = vmatpush.msra.mxu1 %v122_v5  ;;  %177 = vmatpush.msra.mxu0 %v105_v4  ;;  %v103_v12 = vld [vmem:[%s504_s1 + $0x60] sm:$0xff]  ;;  %v120_v13 = vld [vmem:[%s504_s1 + $0xe8] sm:$0xff]  ;;  %v134_v16 = vld [vmem:[%s504_s1 + $0x158] sm:$0xff] }
   0x6   :  { %237 = vmatpush.msra.mxu3 %v153_v7  ;;  %218 = vmatpush.msra.mxu2 %v136_v6  ;;  %v151_v14 = vld [vmem:[%s504_s1 + $0x1e0] sm:$0xff]  ;;  %v102_v17 = vld [vmem:[%s504_s1 + $0x58] sm:$0xff]  ;;  %v133_v20 = vld [vmem:[%s504_s1 + $0x150] sm:$0xff] }
   0x7   :  { %197 = vmatpush.msra.mxu1 %v121_v9  ;;  %178 = vmatpush.msra.mxu0 %v104_v8  ;;  %v119_v15 = vld [vmem:[%s504_s1 + $0xe0] sm:$0xff]  ;;  %v150_v18 = vld [vmem:[%s504_s1 + $0x1d8] sm:$0xff]  ;;  %v101_v21 = vld [vmem:[%s504_s1 + $0x50] sm:$0xff] }
   0x8   :  { %238 = vmatpush.msra.mxu3 %v152_v10  ;;  %219 = vmatpush.msra.mxu2 %v135_v11  ;;  %v118_v19 = vld [vmem:[%s504_s1 + $0xd8] sm:$0xff]  ;;  %v149_v22 = vld [vmem:[%s504_s1 + $0x1d0] sm:$0xff]  ;;  %v132_v24 = vld [vmem:[%s504_s1 + $0x148] sm:$0xff] }
   0x9   :  { %198 = vmatpush.msra.mxu1 %v120_v13  ;;  %179 = vmatpush.msra.mxu0 %v103_v12  ;;  %v117_v23 = vld [vmem:[%s504_s1 + $0xd0] sm:$0xff]  ;;  %v100_v25 = vld [vmem:[%s504_s1 + $0x48] sm:$0xff]  ;;  %v131_v28 = vld [vmem:[%s504_s1 + $0x140] sm:$0xff] }
   0xa   :  { %239 = vmatpush.msra.mxu3 %v151_v14  ;;  %220 = vmatpush.msra.mxu2 %v134_v16  ;;  %v148_v26 = vld [vmem:[%s504_s1 + $0x1c8] sm:$0xff]  ;;  %v99_v29 = vld [vmem:[%s504_s1 + $0x40] sm:$0xff]  ;;  %v130_v32 = vld [vmem:[%s504_s1 + $0x138] sm:$0xff] }
   0xb   :  { %199 = vmatpush.msra.mxu1 %v119_v15  ;;  %180 = vmatpush.msra.mxu0 %v102_v17  ;;  %v116_v27 = vld [vmem:[%s504_s1 + $0xc8] sm:$0xff]  ;;  %v147_v30 = vld [vmem:[%s504_s1 + $0x1c0] sm:$0xff]  ;;  %v98_v33 = vld [vmem:[%s504_s1 + $0x38] sm:$0xff] }
   0xc   :  { %240 = vmatpush.msra.mxu3 %v150_v18  ;;  %221 = vmatpush.msra.mxu2 %v133_v20  ;;  %v115_v31 = vld [vmem:[%s504_s1 + $0xc0] sm:$0xff]  ;;  %v146_v34 = vld [vmem:[%s504_s1 + $0x1b8] sm:$0xff]  ;;  %v129_v36 = vld [vmem:[%s504_s1 + $0x130] sm:$0xff] }
   0xd   :  { %200 = vmatpush.msra.mxu1 %v118_v19  ;;  %181 = vmatpush.msra.mxu0 %v101_v21  ;;  %v114_v35 = vld [vmem:[%s504_s1 + $0xb8] sm:$0xff]  ;;  %v97_v37 = vld [vmem:[%s504_s1 + $0x30] sm:$0xff]  ;;  %v128_v40 = vld [vmem:[%s504_s1 + $0x128] sm:$0xff] }
   0xe   :  { %241 = vmatpush.msra.mxu3 %v149_v22  ;;  %222 = vmatpush.msra.mxu2 %v132_v24  ;;  %v145_v38 = vld [vmem:[%s504_s1 + $0x1b0] sm:$0xff]  ;;  %v96_v41 = vld [vmem:[%s504_s1 + $0x28] sm:$0xff]  ;;  %v127_v42 = vld [vmem:[%s504_s1 + $0x120] sm:$0xff] }
   0xf   :  { %201 = vmatpush.msra.mxu1 %v117_v23  ;;  %182 = vmatpush.msra.mxu0 %v100_v25  ;;  %v113_v39 = vld [vmem:[%s504_s1 + $0xb0] sm:$0xff]  ;;  %v144_v43 = vld [vmem:[%s504_s1 + $0x1a8] sm:$0xff]  ;;  %v95_v44 = vld [vmem:[%s504_s1 + $0x20] sm:$0xff] }
  0x10   :  { %242 = vmatpush.msra.mxu3 %v148_v26  ;;  %223 = vmatpush.msra.mxu2 %v131_v28  ;;  %v112_v45 = vld [vmem:[%s504_s1 + $0xa8] sm:$0xff]  ;;  %v126_v46 = vld [vmem:[%s504_s1 + $0x118] sm:$0xff]  ;;  %v143_v49 = vld [vmem:[%s504_s1 + $0x1a0] sm:$0xff] }
  0x11   :  { %202 = vmatpush.msra.mxu1 %v116_v27  ;;  %183 = vmatpush.msra.mxu0 %v99_v29  ;;  %v15_v47 = vld [vmem:[%s505_s0 + $0x8] sm:$0x77]  ;;  %v17_v48 = vld [vmem:[%s505_s0 + $0x18] sm:$0x77]  ;;  %v111_v50 = vld [vmem:[%s504_s1 + $0xa0] sm:$0xff] }
  0x12   :  { %243 = vmatpush.msra.mxu3 %v147_v30  ;;  %224 = vmatpush.msra.mxu2 %v130_v32  ;;  %v20_v51 = vunpack.c.l.bf16 %v15_v47  ;;  %v24_v52 = vunpack.c.l.bf16 %v17_v48  ;;  %v14_v53 = vld [vmem:[%s505_s0] sm:$0x77]  ;;  %v21_v54 = vunpack.c.h.bf16 %v15_v47  ;;  %v25_v55 = vunpack.c.h.bf16 %v17_v48  ;;  %v94_v56 = vld [vmem:[%s504_s1 + $0x18] sm:$0xff]  ;;  %v16_v57 = vld [vmem:[%s505_s0 + $0x10] sm:$0x77] }
  0x13   :  { %203 = vmatpush.msra.mxu1 %v115_v31  ;;  %184 = vmatpush.msra.mxu0 %v98_v33  ;;  %v18_v58 = vunpack.c.l.bf16 %v14_v53  ;;  %v19_v59 = vunpack.c.h.bf16 %v14_v53  ;;  %v142_v60 = vld [vmem:[%s504_s1 + $0x198] sm:$0xff]  ;;  %v22_v0 = vunpack.c.l.bf16 %v16_v57  ;;  %v125_v2 = vld [vmem:[%s504_s1 + $0x110] sm:$0xff]  ;;  %v23_v13 = vunpack.c.h.bf16 %v16_v57  ;;  %v124_v14 = vld [vmem:[%s504_s1 + $0x108] sm:$0xff] }
  0x14   :  { %244 = vmatpush.msra.mxu3 %v146_v34  ;;  %225 = vmatpush.msra.mxu2 %v129_v36  ;;  %v110_v61 = vld [vmem:[%s504_s1 + $0x98] sm:$0xff]  ;;  %v41_v62 = vsel %vm26_vm0, %v20_v51, 0.0  ;;  %v69_v63 = vsel %vm26_vm0, %v24_v52, 0.0  ;;  %v48_v1 = vsel %vm26_vm0, %v21_v54, 0.0  ;;  %v93_v3 = vld [vmem:[%s504_s1 + $0x10] sm:$0xff]  ;;  %v76_v12 = vsel %vm26_vm0, %v25_v55, 0.0 }
  0x15   :  { %204 = vmatpush.msra.mxu1 %v114_v35  ;;  %185 = vmatpush.msra.mxu0 %v97_v37  ;;  %v42_v4 = vrot.slane %v41_v62, 4  ;;  %v70_v5 = vrot.slane %v69_v63, 4  ;;  %v27_v6 = vsel %vm26_vm0, %v18_v58, 0.0  ;;  %v49_v7 = vrot.slane %v48_v1, 4  ;;  %v141_v8 = vld [vmem:[%s504_s1 + $0x190] sm:$0xff]  ;;  %v92_v15 = vld [vmem:[%s504_s1 + $0x8] sm:$0xff] }
  0x16   :  { %245 = vmatpush.msra.mxu3 %v145_v38  ;;  %226 = vmatpush.msra.mxu2 %v128_v40  ;;  %v109_v9 = vld [vmem:[%s504_s1 + $0x90] sm:$0xff]  ;;  %v28_v10 = vrot.slane %v27_v6, 4  ;;  %v55_v11 = vsel %vm26_vm0, %v22_v0, 0.0  ;;  %v140_v20 = vld [vmem:[%s504_s1 + $0x188] sm:$0xff]  ;;  %v77_v23 = vrot.slane %v76_v12, 4  ;;  %v34_v24 = vsel %vm26_vm0, %v19_v59, 0.0 }
  0x17   :  { %205 = vmatpush.msra.mxu1 %v113_v39  ;;  %186 = vmatpush.msra.mxu0 %v96_v41  ;;  %v43_v16 = vadd.f32 %v42_v4, %v41_v62  ;;  %v71_v17 = vadd.f32 %v70_v5, %v69_v63  ;;  %v56_v18 = vrot.slane %v55_v11, 4  ;;  %v50_v19 = vadd.f32 %v49_v7, %v48_v1  ;;  %v108_v21 = vld [vmem:[%s504_s1 + $0x88] sm:$0xff]  ;;  %v123_v26 = vld [vmem:[%s504_s1 + $0x100] sm:$0xff] }
  0x18   :  { %246 = vmatpush.msra.mxu3 %v144_v43  ;;  %227 = vmatpush.msra.mxu2 %v127_v42  ;;  %v29_v22 = vadd.f32 %v28_v10, %v27_v6  ;;  %v62_v25 = vsel %vm26_vm0, %v23_v13, 0.0  ;;  %v91_v29 = vld [vmem:[%s504_s1] sm:$0xff]  ;;  %v78_v34 = vadd.f32 %v77_v23, %v76_v12  ;;  %v35_v36 = vrot.slane %v34_v24, 4 }
  0x19   :  { %206 = vmatpush.msra.mxu1 %v112_v45  ;;  %187 = vmatpush.msra.mxu0 %v95_v44  ;;  %v44_v27 = vrot.slane %v43_v16, 2  ;;  %v72_v28 = vrot.slane %v71_v17, 2  ;;  %v57_v30 = vadd.f32 %v56_v18, %v55_v11  ;;  %v51_v31 = vrot.slane %v50_v19, 2  ;;  %v139_v32 = vld [vmem:[%s504_s1 + $0x180] sm:$0xff] }
  0x1a   :  { %247 = vmatpush.msra.mxu3 %v143_v49  ;;  %228 = vmatpush.msra.mxu2 %v126_v46  ;;  %v30_v33 = vrot.slane %v29_v22, 2  ;;  %v107_v35 = vld [vmem:[%s504_s1 + $0x80] sm:$0xff]  ;;  %v63_v37 = vrot.slane %v62_v25, 4  ;;  %v79_v43 = vrot.slane %v78_v34, 2  ;;  %v36_v44 = vadd.f32 %v35_v36, %v34_v24 }
  0x1b   :  { %207 = vmatpush.msra.mxu1 %v111_v50  ;;  %188 = vmatpush.msra.mxu0 %v94_v56  ;;  %v45_v38 = vadd.f32 %v44_v27, %v43_v16  ;;  %v73_v39 = vadd.f32 %v72_v28, %v71_v17  ;;  %v58_v40 = vrot.slane %v57_v30, 2  ;;  %v52_v41 = vadd.f32 %v51_v31, %v50_v19  ;;  %v261_v16 = vld [vmem:[%s506_s2] ss:$0 sm:$0xff] }
  0x1c   :  { %248 = vmatpush.msra.mxu3 %v142_v60  ;;  %229 = vmatpush.msra.mxu2 %v125_v2  ;;  %v31_v42 = vadd.f32 %v30_v33, %v29_v22  ;;  %v64_v45 = vadd.f32 %v63_v37, %v62_v25  ;;  %v80_v51 = vadd.f32 %v79_v43, %v78_v34  ;;  %v37_v52 = vrot.slane %v36_v44, 2 }
  0x1d   :  { %208 = vmatpush.msra.mxu1 %v110_v61  ;;  %189 = vmatpush.msra.mxu0 %v93_v3  ;;  %v46_v46 = vrot.slane %v45_v38, 1  ;;  %v74_v47 = vrot.slane %v73_v39, 1  ;;  %v59_v48 = vadd.f32 %v58_v40, %v57_v30  ;;  %v53_v49 = vrot.slane %v52_v41, 1 }
  0x1e   :  { %249 = vmatpush.msra.mxu3 %v141_v8  ;;  %230 = vmatpush.msra.mxu2 %v124_v14  ;;  %v32_v50 = vrot.slane %v31_v42, 1  ;;  %v65_v53 = vrot.slane %v64_v45, 2  ;;  %v81_v59 = vrot.slane %v80_v51, 1  ;;  %v38_v60 = vadd.f32 %v37_v52, %v36_v44 }
  0x1f   :  { %209 = vmatpush.msra.mxu1 %v109_v9  ;;  %190 = vmatpush.msra.mxu0 %v92_v15  ;;  %v47_v54 = vadd.f32 %v46_v46, %v45_v38  ;;  %v75_v55 = vadd.f32 %v74_v47, %v73_v39  ;;  %v60_v56 = vrot.slane %v59_v48, 1  ;;  %v54_v57 = vadd.f32 %v53_v49, %v52_v41 }
  0x20   :  { %250 = vmatpush.msra.mxu3 %v140_v20  ;;  %231 = vmatpush.msra.mxu2 %v123_v26  ;;  %v33_v58 = vadd.f32 %v32_v50, %v31_v42  ;;  %v66_v61 = vadd.f32 %v65_v53, %v64_v45  ;;  %v82_v3 = vadd.f32 %v81_v59, %v80_v51  ;;  %v39_v4 = vrot.slane %v38_v60, 1 }
  0x21   :  { %210 = vmatpush.msra.mxu1 %v108_v21  ;;  %191 = vmatpush.msra.mxu0 %v91_v29  ;;  %v85_v62 = vmul.f32 0.16666667, %v47_v54  ;;  %v89_v63 = vmul.f32 0.16666667, %v75_v55  ;;  %v61_v0 = vadd.f32 %v60_v56, %v59_v48  ;;  %v86_v1 = vmul.f32 0.16666667, %v54_v57 }
  0x22   :  { %251 = vmatpush.msra.mxu3 %v139_v32  ;;  %v83_v2 = vmul.f32 0.16666667, %v33_v58  ;;  %v67_v5 = vrot.slane %v66_v61, 1  ;;  %v90_v8 = vmul.f32 0.16666667, %v82_v3  ;;  %v40_v9 = vadd.f32 %v39_v4, %v38_v60 }
  0x23   :  { %211 = vmatpush.msra.mxu1 %v107_v35  ;;  %v170_v6 = vsel %vm167_vm1, %v89_v63, %v85_v62  ;;  %v87_v7 = vmul.f32 0.16666667, %v61_v0 }
  0x24   :  { %232 = vmatmul.f32.vlgmr.msra.gmra.mxu2 %v170_v6  ;;  %v68_v10 = vadd.f32 %v67_v5, %v66_v61  ;;  %v171_v12 = vsel %vm167_vm1, %v90_v8, %v86_v1  ;;  %v84_v13 = vmul.f32 0.16666667, %v40_v9 }
  0x25   :  { %v168_v11 = vsel %vm167_vm1, %v87_v7, %v83_v2  ;;  %252 = vmatmul.f32.vlgmr.msra.gmra.mxu3 %v171_v12 }
  0x26   :  { %192 = vmatmul.f32.vlgmr.msra.gmra.mxu0 %v168_v11  ;;  %v88_v14 = vmul.f32 0.16666667, %v68_v10 }
  0x28   :  { %v169_v15 = vsel %vm167_vm1, %v88_v14, %v84_v13 }
  0x29   :  { %212 = vmatmul.f32.vlgmr.msra.gmra.mxu1 %v169_v15 }
  0xa3   :  { %v193_v17 = vpop.f32.mrf.mxu0 }
  0xa4   :  { %v194_v18 = vadd.f32 %v261_v16, %v193_v17 }
  0xa6   :  { %v213_v19 = vpop.f32.mrf.mxu1 }
  0xa7   :  { %v214_v20 = vadd.f32 %v213_v19, %v194_v18  ;;  %v233_v21 = vpop.f32.mrf.mxu2 }
  0xa8   :  { %v253_v23 = vpop.f32.mrf.mxu3 }
  0xa9   :  { %v234_v22 = vadd.f32 %v233_v21, %v214_v20 }
  0xab   :  { %v254_v24 = vadd.f32 %v253_v23, %v234_v22 }
  0xad   :  { %256 = vst [vmem:[%s507_s3] sm:$0x3] %v254_v24 }

// kernel: _lambda_.12
= control target key start
LH: loop header
LB: loop body
LE: loop exit
PB: predicated region body
PF: predicated region fallthrough
CT: control target
= control target key end

     0   :  { %s6582_s9 = smov 0   ;;  %s6584_s10 = smov 0   ;;  %s8008_s0 = inlined_call_operand.vmem [shape: bf16[12,2304], index: 0, kind: input, shape index: {}]   ;;  %s8009_s1 = inlined_call_operand.vmem [shape: bf16[2304,512], index: 1, kind: input, shape index: {}]   ;;  %s8010_s2 = inlined_call_operand.vmem [shape: bf16[12,512], index: 2, kind: output, shape index: {}]  }
   0x1   :  { %s6586_s11 = smov 0  }
   0x2 LB: > { %s4972_s12 = sadd.s32 4294967295, %s6565_s11   ;;  %s6599_s13 = sadd.s32 1, %s6565_s11   ;;  %s6565_s11 = sphi %s6586_s11, %s8014_s11   ;;  %s6561_s10 = sphi %s6584_s10, %s8013_s10   ;;  %s6557_s9 = sphi %s6582_s9, %s8012_s9  }
   0x3   : > { %s37_s14 = ssub.s32 %s6565_s11, %s6599_s13  ;;  %s40_s15 = sadd.s32 1, %s6561_s10 }
   0x4   : > { %p38_p0 = scmp.eq.s32.totalorder %s37_s14, 0  ;;  %p47_p1 = scmp.ne.s32.totalorder %s6561_s10, %s6557_s9 }
   0x5   : > { %p48_p2 = scmp.eq.s32.totalorder %s6565_s11, 0  ;;  %p77_p3 = scmp.eq.s32.totalorder %s4972_s12, 1 }
   0x6   : > { %s6610_s16 = scalar_select %p38_p0, %s6561_s10, %s40_s15  }
   0x7   : > { %p49_p4 = por %p48_p2, %p47_p1  ;;  %p6612_p5 = por %p77_p3, %p47_p1 }
   0x8   : > { %p4975_p6 = scmp.ge.s32.totalorder %s6565_s11, 2 }
   0xa   : > { %102 = sbr.rel (%p4975_p6) target bundleno = 307 (0x133), region = 20 }
   0xf   : > { %105 = sbr.rel (!%p49_p4) target bundleno = 307 (0x133), region = 24  ;;  %s107_s18 = sand.u32 (%p49_p4), 1, %s6561_s10  }
  0x10   : > { %s6209_s19 = sshll.u32 (%p49_p4), %s6565_s11, 3  ;;  %s6517_s20 = smul.u32 (%p49_p4), 2304, %s107_s18 }
  0x11   : > { %s6622_s23 = scalar_lea.vmem (%p49_p4), %s8009_s1, %s6209_s19 }
  0x12   : > { %v716_v0 = vld [vmem:[%s6622_s23] sm:$0xff] (%p49_p4)  ;;  %v718_v1 = vld [vmem:[%s6622_s23 + $0x10] sm:$0xff] (%p49_p4)  ;;  %s6627_s24 = scalar_lea.vmem (%p49_p4), [#allocation2], %s6517_s20 }
  0x13   : > { %v720_v2 = vld [vmem:[%s6622_s23 + $0x20] sm:$0xff] (%p49_p4)  ;;  %717 = vst [vmem:[%s6627_s24] sm:$0xff] (%p49_p4), %v716_v0  ;;  %v722_v3 = vld [vmem:[%s6622_s23 + $0x30] sm:$0xff] (%p49_p4) }
  0x14   : > { %719 = vst [vmem:[%s6627_s24 + $0x8] sm:$0xff] %v718_v1  ;;  %v724_v4 = vld [vmem:[%s6622_s23 + $0x40] sm:$0xff]  ;;  %v726_v5 = vld [vmem:[%s6622_s23 + $0x50] sm:$0xff] }
  0x15   : > { %721 = vst [vmem:[%s6627_s24 + $0x10] sm:$0xff] %v720_v2  ;;  %v728_v6 = vld [vmem:[%s6622_s23 + $0x60] sm:$0xff]  ;;  %v730_v7 = vld [vmem:[%s6622_s23 + $0x70] sm:$0xff] }
  0x16   : > { %723 = vst [vmem:[%s6627_s24 + $0x18] sm:$0xff] %v722_v3  ;;  %v732_v8 = vld [vmem:[%s6622_s23 + $0x80] sm:$0xff]  ;;  %v734_v9 = vld [vmem:[%s6622_s23 + $0x90] sm:$0xff] }
  0x17   : > { %725 = vst [vmem:[%s6627_s24 + $0x20] sm:$0xff] %v724_v4  ;;  %v736_v10 = vld [vmem:[%s6622_s23 + $0xa0] sm:$0xff]  ;;  %v738_v11 = vld [vmem:[%s6622_s23 + $0xb0] sm:$0xff] }
  0x18   : > { %727 = vst [vmem:[%s6627_s24 + $0x28] sm:$0xff] %v726_v5  ;;  %v740_v12 = vld [vmem:[%s6622_s23 + $0xc0] sm:$0xff]  ;;  %v742_v13 = vld [vmem:[%s6622_s23 + $0xd0] sm:$0xff] }
  0x19   : > { %729 = vst [vmem:[%s6627_s24 + $0x30] sm:$0xff] %v728_v6  ;;  %v744_v14 = vld [vmem:[%s6622_s23 + $0xe0] sm:$0xff]  ;;  %v746_v15 = vld [vmem:[%s6622_s23 + $0xf0] sm:$0xff] }
  0x1a   : > { %731 = vst [vmem:[%s6627_s24 + $0x38] sm:$0xff] %v730_v7  ;;  %v748_v16 = vld [vmem:[%s6622_s23 + $0x100] sm:$0xff]  ;;  %v750_v17 = vld [vmem:[%s6622_s23 + $0x110] sm:$0xff] }
  0x1b   : > { %733 = vst [vmem:[%s6627_s24 + $0x40] sm:$0xff] %v732_v8  ;;  %v752_v18 = vld [vmem:[%s6622_s23 + $0x120] sm:$0xff]  ;;  %v754_v19 = vld [vmem:[%s6622_s23 + $0x130] sm:$0xff] }
  0x1c   : > { %735 = vst [vmem:[%s6627_s24 + $0x48] sm:$0xff] %v734_v9  ;;  %v756_v20 = vld [vmem:[%s6622_s23 + $0x140] sm:$0xff]  ;;  %v758_v21 = vld [vmem:[%s6622_s23 + $0x150] sm:$0xff] }
  0x1d   : > { %737 = vst [vmem:[%s6627_s24 + $0x50] sm:$0xff] %v736_v10  ;;  %v760_v22 = vld [vmem:[%s6622_s23 + $0x160] sm:$0xff]  ;;  %v762_v23 = vld [vmem:[%s6622_s23 + $0x170] sm:$0xff] }
  0x1e   : > { %739 = vst [vmem:[%s6627_s24 + $0x58] sm:$0xff] %v738_v11  ;;  %v764_v24 = vld [vmem:[%s6622_s23 + $0x180] sm:$0xff]  ;;  %v766_v25 = vld [vmem:[%s6622_s23 + $0x190] sm:$0xff] }
  0x1f   : > { %741 = vst [vmem:[%s6627_s24 + $0x60] sm:$0xff] %v740_v12  ;;  %v768_v26 = vld [vmem:[%s6622_s23 + $0x1a0] sm:$0xff]  ;;  %v770_v27 = vld [vmem:[%s6622_s23 + $0x1b0] sm:$0xff] }
  0x20   : > { %743 = vst [vmem:[%s6627_s24 + $0x68] sm:$0xff] %v742_v13  ;;  %v772_v28 = vld [vmem:[%s6622_s23 + $0x1c0] sm:$0xff]  ;;  %v774_v29 = vld [vmem:[%s6622_s23 + $0x1d0] sm:$0xff] }
  0x21   : > { %745 = vst [vmem:[%s6627_s24 + $0x70] sm:$0xff] %v744_v14  ;;  %v776_v30 = vld [vmem:[%s6622_s23 + $0x1e0] sm:$0xff]  ;;  %v778_v31 = vld [vmem:[%s6622_s23 + $0x1f0] sm:$0xff] }
  0x22   : > { %747 = vst [vmem:[%s6627_s24 + $0x78] sm:$0xff] %v746_v15  ;;  %v780_v32 = vld [vmem:[%s6622_s23 + $0x200] sm:$0xff]  ;;  %v782_v33 = vld [vmem:[%s6622_s23 + $0x210] sm:$0xff] }
  0x23   : > { %749 = vst [vmem:[%s6627_s24 + $0x80] sm:$0xff] %v748_v16  ;;  %v784_v34 = vld [vmem:[%s6622_s23 + $0x220] sm:$0xff]  ;;  %v786_v35 = vld [vmem:[%s6622_s23 + $0x230] sm:$0xff] }
  0x24   : > { %751 = vst [vmem:[%s6627_s24 + $0x88] sm:$0xff] %v750_v17  ;;  %v788_v36 = vld [vmem:[%s6622_s23 + $0x240] sm:$0xff]  ;;  %v790_v37 = vld [vmem:[%s6622_s23 + $0x250] sm:$0xff] }
  0x25   : > { %753 = vst [vmem:[%s6627_s24 + $0x90] sm:$0xff] %v752_v18  ;;  %v792_v38 = vld [vmem:[%s6622_s23 + $0x260] sm:$0xff]  ;;  %v794_v39 = vld [vmem:[%s6622_s23 + $0x270] sm:$0xff] }
  0x26   : > { %755 = vst [vmem:[%s6627_s24 + $0x98] sm:$0xff] %v754_v19  ;;  %v796_v40 = vld [vmem:[%s6622_s23 + $0x280] sm:$0xff]  ;;  %v798_v41 = vld [vmem:[%s6622_s23 + $0x290] sm:$0xff] }
  0x27   : > { %757 = vst [vmem:[%s6627_s24 + $0xa0] sm:$0xff] %v756_v20  ;;  %v800_v42 = vld [vmem:[%s6622_s23 + $0x2a0] sm:$0xff]  ;;  %v802_v43 = vld [vmem:[%s6622_s23 + $0x2b0] sm:$0xff] }
  0x28   : > { %759 = vst [vmem:[%s6627_s24 + $0xa8] sm:$0xff] %v758_v21  ;;  %v804_v44 = vld [vmem:[%s6622_s23 + $0x2c0] sm:$0xff]  ;;  %v806_v45 = vld [vmem:[%s6622_s23 + $0x2d0] sm:$0xff] }
  0x29   : > { %761 = vst [vmem:[%s6627_s24 + $0xb0] sm:$0xff] %v760_v22  ;;  %v808_v46 = vld [vmem:[%s6622_s23 + $0x2e0] sm:$0xff]  ;;  %v810_v47 = vld [vmem:[%s6622_s23 + $0x2f0] sm:$0xff] }
  0x2a   : > { %763 = vst [vmem:[%s6627_s24 + $0xb8] sm:$0xff] %v762_v23  ;;  %v812_v48 = vld [vmem:[%s6622_s23 + $0x300] sm:$0xff]  ;;  %v814_v49 = vld [vmem:[%s6622_s23 + $0x310] sm:$0xff] }
  0x2b   : > { %765 = vst [vmem:[%s6627_s24 + $0xc0] sm:$0xff] %v764_v24  ;;  %v816_v50 = vld [vmem:[%s6622_s23 + $0x320] sm:$0xff]  ;;  %v818_v51 = vld [vmem:[%s6622_s23 + $0x330] sm:$0xff] }
  0x2c   : > { %767 = vst [vmem:[%s6627_s24 + $0xc8] sm:$0xff] %v766_v25  ;;  %v820_v52 = vld [vmem:[%s6622_s23 + $0x340] sm:$0xff]  ;;  %v822_v53 = vld [vmem:[%s6622_s23 + $0x350] sm:$0xff] }
  0x2d   : > { %769 = vst [vmem:[%s6627_s24 + $0xd0] sm:$0xff] %v768_v26  ;;  %v824_v54 = vld [vmem:[%s6622_s23 + $0x360] sm:$0xff]  ;;  %v826_v55 = vld [vmem:[%s6622_s23 + $0x370] sm:$0xff] }
  0x2e   : > { %771 = vst [vmem:[%s6627_s24 + $0xd8] sm:$0xff] %v770_v27  ;;  %v828_v56 = vld [vmem:[%s6622_s23 + $0x380] sm:$0xff]  ;;  %v830_v57 = vld [vmem:[%s6622_s23 + $0x390] sm:$0xff] }
  0x2f   : > { %773 = vst [vmem:[%s6627_s24 + $0xe0] sm:$0xff] %v772_v28  ;;  %v832_v58 = vld [vmem:[%s6622_s23 + $0x3a0] sm:$0xff]  ;;  %v834_v59 = vld [vmem:[%s6622_s23 + $0x3b0] sm:$0xff] }
  0x30   : > { %775 = vst [vmem:[%s6627_s24 + $0xe8] sm:$0xff] %v774_v29  ;;  %v836_v60 = vld [vmem:[%s6622_s23 + $0x3c0] sm:$0xff]  ;;  %v838_v61 = vld [vmem:[%s6622_s23 + $0x3d0] sm:$0xff] }
  0x31   : > { %777 = vst [vmem:[%s6627_s24 + $0xf0] sm:$0xff] %v776_v30  ;;  %v840_v62 = vld [vmem:[%s6622_s23 + $0x3e0] sm:$0xff]  ;;  %v842_v63 = vld [vmem:[%s6622_s23 + $0x3f0] sm:$0xff] }
  0x32   : > { %779 = vst [vmem:[%s6627_s24 + $0xf8] sm:$0xff] %v778_v31  ;;  %v844_v0 = vld [vmem:[%s6622_s23 + $0x400] sm:$0xff]  ;;  %v846_v1 = vld [vmem:[%s6622_s23 + $0x410] sm:$0xff] }
  0x33   : > { %781 = vst [vmem:[%s6627_s24 + $0x100] sm:$0xff] %v780_v32  ;;  %v848_v2 = vld [vmem:[%s6622_s23 + $0x420] sm:$0xff]  ;;  %v850_v3 = vld [vmem:[%s6622_s23 + $0x430] sm:$0xff] }
  0x34   : > { %783 = vst [vmem:[%s6627_s24 + $0x108] sm:$0xff] %v782_v33  ;;  %v852_v4 = vld [vmem:[%s6622_s23 + $0x440] sm:$0xff]  ;;  %v854_v5 = vld [vmem:[%s6622_s23 + $0x450] sm:$0xff] }
  0x35   : > { %785 = vst [vmem:[%s6627_s24 + $0x110] sm:$0xff] %v784_v34  ;;  %v856_v6 = vld [vmem:[%s6622_s23 + $0x460] sm:$0xff]  ;;  %v858_v7 = vld [vmem:[%s6622_s23 + $0x470] sm:$0xff] }
  0x36   : > { %787 = vst [vmem:[%s6627_s24 + $0x118] sm:$0xff] %v786_v35  ;;  %v860_v8 = vld [vmem:[%s6622_s23 + $0x480] sm:$0xff]  ;;  %v862_v9 = vld [vmem:[%s6622_s23 + $0x490] sm:$0xff] }
  0x37   : > { %789 = vst [vmem:[%s6627_s24 + $0x120] sm:$0xff] %v788_v36  ;;  %v864_v10 = vld [vmem:[%s6622_s23 + $0x4a0] sm:$0xff]  ;;  %v866_v11 = vld [vmem:[%s6622_s23 + $0x4b0] sm:$0xff] }
  0x38   : > { %791 = vst [vmem:[%s6627_s24 + $0x128] sm:$0xff] %v790_v37  ;;  %v868_v12 = vld [vmem:[%s6622_s23 + $0x4c0] sm:$0xff]  ;;  %v870_v13 = vld [vmem:[%s6622_s23 + $0x4d0] sm:$0xff] }
  0x39   : > { %793 = vst [vmem:[%s6627_s24 + $0x130] sm:$0xff] %v792_v38  ;;  %v872_v14 = vld [vmem:[%s6622_s23 + $0x4e0] sm:$0xff]  ;;  %v874_v15 = vld [vmem:[%s6622_s23 + $0x4f0] sm:$0xff] }
  0x3a   : > { %795 = vst [vmem:[%s6627_s24 + $0x138] sm:$0xff] %v794_v39  ;;  %v876_v16 = vld [vmem:[%s6622_s23 + $0x500] sm:$0xff]  ;;  %v878_v17 = vld [vmem:[%s6622_s23 + $0x510] sm:$0xff] }
  0x3b   : > { %797 = vst [vmem:[%s6627_s24 + $0x140] sm:$0xff] %v796_v40  ;;  %v880_v18 = vld [vmem:[%s6622_s23 + $0x520] sm:$0xff]  ;;  %v882_v19 = vld [vmem:[%s6622_s23 + $0x530] sm:$0xff] }
  0x3c   : > { %799 = vst [vmem:[%s6627_s24 + $0x148] sm:$0xff] %v798_v41  ;;  %v884_v20 = vld [vmem:[%s6622_s23 + $0x540] sm:$0xff]  ;;  %v886_v21 = vld [vmem:[%s6622_s23 + $0x550] sm:$0xff] }
  0x3d   : > { %801 = vst [vmem:[%s6627_s24 + $0x150] sm:$0xff] %v800_v42  ;;  %v888_v22 = vld [vmem:[%s6622_s23 + $0x560] sm:$0xff]  ;;  %v890_v23 = vld [vmem:[%s6622_s23 + $0x570] sm:$0xff] }
  0x3e   : > { %803 = vst [vmem:[%s6627_s24 + $0x158] sm:$0xff] %v802_v43  ;;  %v892_v24 = vld [vmem:[%s6622_s23 + $0x580] sm:$0xff]  ;;  %v894_v25 = vld [vmem:[%s6622_s23 + $0x590] sm:$0xff] }
  0x3f   : > { %805 = vst [vmem:[%s6627_s24 + $0x160] sm:$0xff] %v804_v44  ;;  %v896_v26 = vld [vmem:[%s6622_s23 + $0x5a0] sm:$0xff]  ;;  %v898_v27 = vld [vmem:[%s6622_s23 + $0x5b0] sm:$0xff] }
  0x40   : > { %807 = vst [vmem:[%s6627_s24 + $0x168] sm:$0xff] %v806_v45  ;;  %v900_v28 = vld [vmem:[%s6622_s23 + $0x5c0] sm:$0xff]  ;;  %v902_v29 = vld [vmem:[%s6622_s23 + $0x5d0] sm:$0xff] }
  0x41   : > { %809 = vst [vmem:[%s6627_s24 + $0x170] sm:$0xff] %v808_v46  ;;  %v904_v30 = vld [vmem:[%s6622_s23 + $0x5e0] sm:$0xff]  ;;  %v906_v31 = vld [vmem:[%s6622_s23 + $0x5f0] sm:$0xff] }
  0x42   : > { %811 = vst [vmem:[%s6627_s24 + $0x178] sm:$0xff] %v810_v47  ;;  %v908_v32 = vld [vmem:[%s6622_s23 + $0x600] sm:$0xff]  ;;  %v910_v33 = vld [vmem:[%s6622_s23 + $0x610] sm:$0xff] }
  0x43   : > { %813 = vst [vmem:[%s6627_s24 + $0x180] sm:$0xff] %v812_v48  ;;  %v912_v34 = vld [vmem:[%s6622_s23 + $0x620] sm:$0xff]  ;;  %v914_v35 = vld [vmem:[%s6622_s23 + $0x630] sm:$0xff] }
  0x44   : > { %815 = vst [vmem:[%s6627_s24 + $0x188] sm:$0xff] %v814_v49  ;;  %v916_v36 = vld [vmem:[%s6622_s23 + $0x640] sm:$0xff]  ;;  %v918_v37 = vld [vmem:[%s6622_s23 + $0x650] sm:$0xff] }
  0x45   : > { %817 = vst [vmem:[%s6627_s24 + $0x190] sm:$0xff] %v816_v50  ;;  %v920_v38 = vld [vmem:[%s6622_s23 + $0x660] sm:$0xff]  ;;  %v922_v39 = vld [vmem:[%s6622_s23 + $0x670] sm:$0xff] }
  0x46   : > { %819 = vst [vmem:[%s6627_s24 + $0x198] sm:$0xff] %v818_v51  ;;  %v924_v40 = vld [vmem:[%s6622_s23 + $0x680] sm:$0xff]  ;;  %v926_v41 = vld [vmem:[%s6622_s23 + $0x690] sm:$0xff] }
  0x47   : > { %821 = vst [vmem:[%s6627_s24 + $0x1a0] sm:$0xff] %v820_v52  ;;  %v928_v42 = vld [vmem:[%s6622_s23 + $0x6a0] sm:$0xff]  ;;  %v930_v43 = vld [vmem:[%s6622_s23 + $0x6b0] sm:$0xff] }
  0x48   : > { %823 = vst [vmem:[%s6627_s24 + $0x1a8] sm:$0xff] %v822_v53  ;;  %v932_v44 = vld [vmem:[%s6622_s23 + $0x6c0] sm:$0xff]  ;;  %v934_v45 = vld [vmem:[%s6622_s23 + $0x6d0] sm:$0xff] }
  0x49   : > { %825 = vst [vmem:[%s6627_s24 + $0x1b0] sm:$0xff] %v824_v54  ;;  %v936_v46 = vld [vmem:[%s6622_s23 + $0x6e0] sm:$0xff]  ;;  %v938_v47 = vld [vmem:[%s6622_s23 + $0x6f0] sm:$0xff] }
  0x4a   : > { %827 = vst [vmem:[%s6627_s24 + $0x1b8] sm:$0xff] %v826_v55  ;;  %v940_v48 = vld [vmem:[%s6622_s23 + $0x700] sm:$0xff]  ;;  %v942_v49 = vld [vmem:[%s6622_s23 + $0x710] sm:$0xff] }
  0x4b   : > { %829 = vst [vmem:[%s6627_s24 + $0x1c0] sm:$0xff] %v828_v56  ;;  %v944_v50 = vld [vmem:[%s6622_s23 + $0x720] sm:$0xff]  ;;  %v946_v51 = vld [vmem:[%s6622_s23 + $0x730] sm:$0xff] }
  0x4c   : > { %831 = vst [vmem:[%s6627_s24 + $0x1c8] sm:$0xff] %v830_v57  ;;  %v948_v52 = vld [vmem:[%s6622_s23 + $0x740] sm:$0xff]  ;;  %v950_v53 = vld [vmem:[%s6622_s23 + $0x750] sm:$0xff] }
  0x4d   : > { %833 = vst [vmem:[%s6627_s24 + $0x1d0] sm:$0xff] %v832_v58  ;;  %v952_v54 = vld [vmem:[%s6622_s23 + $0x760] sm:$0xff]  ;;  %v954_v55 = vld [vmem:[%s6622_s23 + $0x770] sm:$0xff] }
  0x4e   : > { %835 = vst [vmem:[%s6627_s24 + $0x1d8] sm:$0xff] %v834_v59  ;;  %v956_v56 = vld [vmem:[%s6622_s23 + $0x780] sm:$0xff]  ;;  %v958_v57 = vld [vmem:[%s6622_s23 + $0x790] sm:$0xff] }
  0x4f   : > { %837 = vst [vmem:[%s6627_s24 + $0x1e0] sm:$0xff] %v836_v60  ;;  %v960_v58 = vld [vmem:[%s6622_s23 + $0x7a0] sm:$0xff]  ;;  %v962_v59 = vld [vmem:[%s6622_s23 + $0x7b0] sm:$0xff] }
  0x50   : > { %839 = vst [vmem:[%s6627_s24 + $0x1e8] sm:$0xff] %v838_v61  ;;  %v964_v60 = vld [vmem:[%s6622_s23 + $0x7c0] sm:$0xff]  ;;  %v966_v61 = vld [vmem:[%s6622_s23 + $0x7d0] sm:$0xff] }
  0x51   : > { %841 = vst [vmem:[%s6627_s24 + $0x1f0] sm:$0xff] %v840_v62  ;;  %v968_v62 = vld [vmem:[%s6622_s23 + $0x7e0] sm:$0xff] }
  0x52   : > { %843 = vst [vmem:[%s6627_s24 + $0x1f8] sm:$0xff] %v842_v63  ;;  %v970_v63 = vld [vmem:[%s6622_s23 + $0x7f0] sm:$0xff] }
  0x53   : > { %845 = vst [vmem:[%s6627_s24 + $0x200] sm:$0xff] %v844_v0  ;;  %v972_v0 = vld [vmem:[%s6622_s23 + $0x800] sm:$0xff] }
  0x54   : > { %847 = vst [vmem:[%s6627_s24 + $0x208] sm:$0xff] %v846_v1  ;;  %v974_v1 = vld [vmem:[%s6622_s23 + $0x810] sm:$0xff] }
  0x55   : > { %849 = vst [vmem:[%s6627_s24 + $0x210] sm:$0xff] %v848_v2  ;;  %v976_v2 = vld [vmem:[%s6622_s23 + $0x820] sm:$0xff] }
  0x56   : > { %851 = vst [vmem:[%s6627_s24 + $0x218] sm:$0xff] %v850_v3  ;;  %v978_v3 = vld [vmem:[%s6622_s23 + $0x830] sm:$0xff] }
  0x57   : > { %853 = vst [vmem:[%s6627_s24 + $0x220] sm:$0xff] %v852_v4  ;;  %v980_v4 = vld [vmem:[%s6622_s23 + $0x840] sm:$0xff] }
  0x58   : > { %855 = vst [vmem:[%s6627_s24 + $0x228] sm:$0xff] %v854_v5  ;;  %v982_v5 = vld [vmem:[%s6622_s23 + $0x850] sm:$0xff] }
  0x59   : > { %857 = vst [vmem:[%s6627_s24 + $0x230] sm:$0xff] %v856_v6  ;;  %v984_v6 = vld [vmem:[%s6622_s23 + $0x860] sm:$0xff] }
  0x5a   : > { %859 = vst [vmem:[%s6627_s24 + $0x238] sm:$0xff] %v858_v7  ;;  %v986_v7 = vld [vmem:[%s6622_s23 + $0x870] sm:$0xff] }
  0x5b   : > { %861 = vst [vmem:[%s6627_s24 + $0x240] sm:$0xff] %v860_v8  ;;  %v988_v8 = vld [vmem:[%s6622_s23 + $0x880] sm:$0xff] }
  0x5c   : > { %863 = vst [vmem:[%s6627_s24 + $0x248] sm:$0xff] %v862_v9  ;;  %v990_v9 = vld [vmem:[%s6622_s23 + $0x890] sm:$0xff] }
  0x5d   : > { %865 = vst [vmem:[%s6627_s24 + $0x250] sm:$0xff] %v864_v10  ;;  %v992_v10 = vld [vmem:[%s6622_s23 + $0x8a0] sm:$0xff] }
  0x5e   : > { %867 = vst [vmem:[%s6627_s24 + $0x258] sm:$0xff] %v866_v11  ;;  %v994_v11 = vld [vmem:[%s6622_s23 + $0x8b0] sm:$0xff] }
  0x5f   : > { %869 = vst [vmem:[%s6627_s24 + $0x260] sm:$0xff] %v868_v12  ;;  %v996_v12 = vld [vmem:[%s6622_s23 + $0x8c0] sm:$0xff] }
  0x60   : > { %871 = vst [vmem:[%s6627_s24 + $0x268] sm:$0xff] %v870_v13  ;;  %v998_v13 = vld [vmem:[%s6622_s23 + $0x8d0] sm:$0xff] }
  0x61   : > { %873 = vst [vmem:[%s6627_s24 + $0x270] sm:$0xff] %v872_v14  ;;  %v1000_v14 = vld [vmem:[%s6622_s23 + $0x8e0] sm:$0xff] }
  0x62   : > { %875 = vst [vmem:[%s6627_s24 + $0x278] sm:$0xff] %v874_v15  ;;  %v1002_v15 = vld [vmem:[%s6622_s23 + $0x8f0] sm:$0xff] }
  0x63   : > { %877 = vst [vmem:[%s6627_s24 + $0x280] sm:$0xff] %v876_v16  ;;  %v1004_v16 = vld [vmem:[%s6622_s23 + $0x900] sm:$0xff] }
  0x64   : > { %879 = vst [vmem:[%s6627_s24 + $0x288] sm:$0xff] %v878_v17  ;;  %v1006_v17 = vld [vmem:[%s6622_s23 + $0x910] sm:$0xff] }
  0x65   : > { %881 = vst [vmem:[%s6627_s24 + $0x290] sm:$0xff] %v880_v18  ;;  %v1008_v18 = vld [vmem:[%s6622_s23 + $0x920] sm:$0xff] }
  0x66   : > { %883 = vst [vmem:[%s6627_s24 + $0x298] sm:$0xff] %v882_v19  ;;  %v1010_v19 = vld [vmem:[%s6622_s23 + $0x930] sm:$0xff] }
  0x67   : > { %885 = vst [vmem:[%s6627_s24 + $0x2a0] sm:$0xff] %v884_v20  ;;  %v1012_v20 = vld [vmem:[%s6622_s23 + $0x940] sm:$0xff] }
  0x68   : > { %887 = vst [vmem:[%s6627_s24 + $0x2a8] sm:$0xff] %v886_v21  ;;  %v1014_v21 = vld [vmem:[%s6622_s23 + $0x950] sm:$0xff] }
  0x69   : > { %889 = vst [vmem:[%s6627_s24 + $0x2b0] sm:$0xff] %v888_v22  ;;  %v1016_v22 = vld [vmem:[%s6622_s23 + $0x960] sm:$0xff] }
  0x6a   : > { %891 = vst [vmem:[%s6627_s24 + $0x2b8] sm:$0xff] %v890_v23  ;;  %v1018_v23 = vld [vmem:[%s6622_s23 + $0x970] sm:$0xff] }
  0x6b   : > { %893 = vst [vmem:[%s6627_s24 + $0x2c0] sm:$0xff] %v892_v24  ;;  %v1020_v24 = vld [vmem:[%s6622_s23 + $0x980] sm:$0xff] }
  0x6c   : > { %895 = vst [vmem:[%s6627_s24 + $0x2c8] sm:$0xff] %v894_v25  ;;  %v1022_v25 = vld [vmem:[%s6622_s23 + $0x990] sm:$0xff] }
  0x6d   : > { %897 = vst [vmem:[%s6627_s24 + $0x2d0] sm:$0xff] %v896_v26  ;;  %v1024_v26 = vld [vmem:[%s6622_s23 + $0x9a0] sm:$0xff] }
  0x6e   : > { %899 = vst [vmem:[%s6627_s24 + $0x2d8] sm:$0xff] %v898_v27  ;;  %v1026_v27 = vld [vmem:[%s6622_s23 + $0x9b0] sm:$0xff] }
  0x6f   : > { %901 = vst [vmem:[%s6627_s24 + $0x2e0] sm:$0xff] %v900_v28  ;;  %v1028_v28 = vld [vmem:[%s6622_s23 + $0x9c0] sm:$0xff] }
  0x70   : > { %903 = vst [vmem:[%s6627_s24 + $0x2e8] sm:$0xff] %v902_v29  ;;  %v1030_v29 = vld [vmem:[%s6622_s23 + $0x9d0] sm:$0xff] }
  0x71   : > { %905 = vst [vmem:[%s6627_s24 + $0x2f0] sm:$0xff] %v904_v30  ;;  %v1032_v30 = vld [vmem:[%s6622_s23 + $0x9e0] sm:$0xff] }
  0x72   : > { %907 = vst [vmem:[%s6627_s24 + $0x2f8] sm:$0xff] %v906_v31  ;;  %v1034_v31 = vld [vmem:[%s6622_s23 + $0x9f0] sm:$0xff] }
  0x73   : > { %909 = vst [vmem:[%s6627_s24 + $0x300] sm:$0xff] %v908_v32  ;;  %v1036_v32 = vld [vmem:[%s6622_s23 + $0xa00] sm:$0xff] }
  0x74   : > { %911 = vst [vmem:[%s6627_s24 + $0x308] sm:$0xff] %v910_v33  ;;  %v1038_v33 = vld [vmem:[%s6622_s23 + $0xa10] sm:$0xff] }
  0x75   : > { %913 = vst [vmem:[%s6627_s24 + $0x310] sm:$0xff] %v912_v34  ;;  %v1040_v34 = vld [vmem:[%s6622_s23 + $0xa20] sm:$0xff] }
  0x76   : > { %915 = vst [vmem:[%s6627_s24 + $0x318] sm:$0xff] %v914_v35  ;;  %v1042_v35 = vld [vmem:[%s6622_s23 + $0xa30] sm:$0xff] }
  0x77   : > { %917 = vst [vmem:[%s6627_s24 + $0x320] sm:$0xff] %v916_v36  ;;  %v1044_v36 = vld [vmem:[%s6622_s23 + $0xa40] sm:$0xff] }
  0x78   : > { %919 = vst [vmem:[%s6627_s24 + $0x328] sm:$0xff] %v918_v37  ;;  %v1046_v37 = vld [vmem:[%s6622_s23 + $0xa50] sm:$0xff] }
  0x79   : > { %921 = vst [vmem:[%s6627_s24 + $0x330] sm:$0xff] %v920_v38  ;;  %v1048_v38 = vld [vmem:[%s6622_s23 + $0xa60] sm:$0xff] }
  0x7a   : > { %923 = vst [vmem:[%s6627_s24 + $0x338] sm:$0xff] %v922_v39  ;;  %v1050_v39 = vld [vmem:[%s6622_s23 + $0xa70] sm:$0xff] }
  0x7b   : > { %925 = vst [vmem:[%s6627_s24 + $0x340] sm:$0xff] %v924_v40  ;;  %v1052_v40 = vld [vmem:[%s6622_s23 + $0xa80] sm:$0xff] }
  0x7c   : > { %927 = vst [vmem:[%s6627_s24 + $0x348] sm:$0xff] %v926_v41  ;;  %v1054_v41 = vld [vmem:[%s6622_s23 + $0xa90] sm:$0xff] }
  0x7d   : > { %929 = vst [vmem:[%s6627_s24 + $0x350] sm:$0xff] %v928_v42  ;;  %v1056_v42 = vld [vmem:[%s6622_s23 + $0xaa0] sm:$0xff] }
  0x7e   : > { %931 = vst [vmem:[%s6627_s24 + $0x358] sm:$0xff] %v930_v43  ;;  %v1058_v43 = vld [vmem:[%s6622_s23 + $0xab0] sm:$0xff] }
  0x7f   : > { %933 = vst [vmem:[%s6627_s24 + $0x360] sm:$0xff] %v932_v44  ;;  %v1060_v44 = vld [vmem:[%s6622_s23 + $0xac0] sm:$0xff] }
  0x80   : > { %935 = vst [vmem:[%s6627_s24 + $0x368] sm:$0xff] %v934_v45  ;;  %v1062_v45 = vld [vmem:[%s6622_s23 + $0xad0] sm:$0xff] }
  0x81   : > { %937 = vst [vmem:[%s6627_s24 + $0x370] sm:$0xff] %v936_v46  ;;  %v1064_v46 = vld [vmem:[%s6622_s23 + $0xae0] sm:$0xff] }
  0x82   : > { %939 = vst [vmem:[%s6627_s24 + $0x378] sm:$0xff] %v938_v47  ;;  %v1066_v47 = vld [vmem:[%s6622_s23 + $0xaf0] sm:$0xff] }
  0x83   : > { %941 = vst [vmem:[%s6627_s24 + $0x380] sm:$0xff] %v940_v48  ;;  %v1068_v48 = vld [vmem:[%s6622_s23 + $0xb00] sm:$0xff] }
  0x84   : > { %943 = vst [vmem:[%s6627_s24 + $0x388] sm:$0xff] %v942_v49  ;;  %v1070_v49 = vld [vmem:[%s6622_s23 + $0xb10] sm:$0xff] }
  0x85   : > { %945 = vst [vmem:[%s6627_s24 + $0x390] sm:$0xff] %v944_v50  ;;  %v1072_v50 = vld [vmem:[%s6622_s23 + $0xb20] sm:$0xff] }
  0x86   : > { %947 = vst [vmem:[%s6627_s24 + $0x398] sm:$0xff] %v946_v51  ;;  %v1074_v51 = vld [vmem:[%s6622_s23 + $0xb30] sm:$0xff] }
  0x87   : > { %949 = vst [vmem:[%s6627_s24 + $0x3a0] sm:$0xff] %v948_v52  ;;  %v1076_v52 = vld [vmem:[%s6622_s23 + $0xb40] sm:$0xff] }
  0x88   : > { %951 = vst [vmem:[%s6627_s24 + $0x3a8] sm:$0xff] %v950_v53  ;;  %v1078_v53 = vld [vmem:[%s6622_s23 + $0xb50] sm:$0xff] }
  0x89   : > { %953 = vst [vmem:[%s6627_s24 + $0x3b0] sm:$0xff] %v952_v54  ;;  %v1080_v54 = vld [vmem:[%s6622_s23 + $0xb60] sm:$0xff] }
  0x8a   : > { %955 = vst [vmem:[%s6627_s24 + $0x3b8] sm:$0xff] %v954_v55  ;;  %v1082_v55 = vld [vmem:[%s6622_s23 + $0xb70] sm:$0xff] }
  0x8b   : > { %957 = vst [vmem:[%s6627_s24 + $0x3c0] sm:$0xff] %v956_v56  ;;  %v1084_v56 = vld [vmem:[%s6622_s23 + $0xb80] sm:$0xff] }
  0x8c   : > { %959 = vst [vmem:[%s6627_s24 + $0x3c8] sm:$0xff] %v958_v57  ;;  %v1086_v57 = vld [vmem:[%s6622_s23 + $0xb90] sm:$0xff] }
  0x8d   : > { %961 = vst [vmem:[%s6627_s24 + $0x3d0] sm:$0xff] %v960_v58  ;;  %v1088_v58 = vld [vmem:[%s6622_s23 + $0xba0] sm:$0xff] }
  0x8e   : > { %963 = vst [vmem:[%s6627_s24 + $0x3d8] sm:$0xff] %v962_v59  ;;  %v1090_v59 = vld [vmem:[%s6622_s23 + $0xbb0] sm:$0xff] }
  0x8f   : > { %965 = vst [vmem:[%s6627_s24 + $0x3e0] sm:$0xff] %v964_v60  ;;  %v1092_v60 = vld [vmem:[%s6622_s23 + $0xbc0] sm:$0xff] }
  0x90   : > { %967 = vst [vmem:[%s6627_s24 + $0x3e8] sm:$0xff] %v966_v61  ;;  %v1094_v61 = vld [vmem:[%s6622_s23 + $0xbd0] sm:$0xff] }
  0x91   : > { %969 = vst [vmem:[%s6627_s24 + $0x3f0] sm:$0xff] %v968_v62  ;;  %v1096_v62 = vld [vmem:[%s6622_s23 + $0xbe0] sm:$0xff] }
  0x92   : > { %971 = vst [vmem:[%s6627_s24 + $0x3f8] sm:$0xff] %v970_v63  ;;  %v1098_v63 = vld [vmem:[%s6622_s23 + $0xbf0] sm:$0xff] }
  0x93   : > { %973 = vst [vmem:[%s6627_s24 + $0x400] sm:$0xff] %v972_v0  ;;  %v1100_v0 = vld [vmem:[%s6622_s23 + $0xc00] sm:$0xff] }
  0x94   : > { %975 = vst [vmem:[%s6627_s24 + $0x408] sm:$0xff] %v974_v1  ;;  %v1102_v1 = vld [vmem:[%s6622_s23 + $0xc10] sm:$0xff] }
  0x95   : > { %977 = vst [vmem:[%s6627_s24 + $0x410] sm:$0xff] %v976_v2  ;;  %v1104_v2 = vld [vmem:[%s6622_s23 + $0xc20] sm:$0xff] }
  0x96   : > { %979 = vst [vmem:[%s6627_s24 + $0x418] sm:$0xff] %v978_v3  ;;  %v1106_v3 = vld [vmem:[%s6622_s23 + $0xc30] sm:$0xff] }
  0x97   : > { %981 = vst [vmem:[%s6627_s24 + $0x420] sm:$0xff] %v980_v4  ;;  %v1108_v4 = vld [vmem:[%s6622_s23 + $0xc40] sm:$0xff] }
  0x98   : > { %983 = vst [vmem:[%s6627_s24 + $0x428] sm:$0xff] %v982_v5  ;;  %v1110_v5 = vld [vmem:[%s6622_s23 + $0xc50] sm:$0xff] }
  0x99   : > { %985 = vst [vmem:[%s6627_s24 + $0x430] sm:$0xff] %v984_v6  ;;  %v1112_v6 = vld [vmem:[%s6622_s23 + $0xc60] sm:$0xff] }
  0x9a   : > { %987 = vst [vmem:[%s6627_s24 + $0x438] sm:$0xff] %v986_v7  ;;  %v1114_v7 = vld [vmem:[%s6622_s23 + $0xc70] sm:$0xff] }
  0x9b   : > { %989 = vst [vmem:[%s6627_s24 + $0x440] sm:$0xff] %v988_v8  ;;  %v1116_v8 = vld [vmem:[%s6622_s23 + $0xc80] sm:$0xff] }
  0x9c   : > { %991 = vst [vmem:[%s6627_s24 + $0x448] sm:$0xff] %v990_v9  ;;  %v1118_v9 = vld [vmem:[%s6622_s23 + $0xc90] sm:$0xff] }
  0x9d   : > { %993 = vst [vmem:[%s6627_s24 + $0x450] sm:$0xff] %v992_v10  ;;  %v1120_v10 = vld [vmem:[%s6622_s23 + $0xca0] sm:$0xff] }
  0x9e   : > { %995 = vst [vmem:[%s6627_s24 + $0x458] sm:$0xff] %v994_v11  ;;  %v1122_v11 = vld [vmem:[%s6622_s23 + $0xcb0] sm:$0xff] }
  0x9f   : > { %997 = vst [vmem:[%s6627_s24 + $0x460] sm:$0xff] %v996_v12  ;;  %v1124_v12 = vld [vmem:[%s6622_s23 + $0xcc0] sm:$0xff] }
  0xa0   : > { %999 = vst [vmem:[%s6627_s24 + $0x468] sm:$0xff] %v998_v13  ;;  %v1126_v13 = vld [vmem:[%s6622_s23 + $0xcd0] sm:$0xff] }
  0xa1   : > { %1001 = vst [vmem:[%s6627_s24 + $0x470] sm:$0xff] %v1000_v14  ;;  %v1128_v14 = vld [vmem:[%s6622_s23 + $0xce0] sm:$0xff] }
  0xa2   : > { %1003 = vst [vmem:[%s6627_s24 + $0x478] sm:$0xff] %v1002_v15  ;;  %v1130_v15 = vld [vmem:[%s6622_s23 + $0xcf0] sm:$0xff] }
  0xa3   : > { %1005 = vst [vmem:[%s6627_s24 + $0x480] sm:$0xff] %v1004_v16  ;;  %v1132_v16 = vld [vmem:[%s6622_s23 + $0xd00] sm:$0xff] }
  0xa4   : > { %1007 = vst [vmem:[%s6627_s24 + $0x488] sm:$0xff] %v1006_v17  ;;  %v1134_v17 = vld [vmem:[%s6622_s23 + $0xd10] sm:$0xff] }
  0xa5   : > { %1009 = vst [vmem:[%s6627_s24 + $0x490] sm:$0xff] %v1008_v18  ;;  %v1136_v18 = vld [vmem:[%s6622_s23 + $0xd20] sm:$0xff] }
  0xa6   : > { %1011 = vst [vmem:[%s6627_s24 + $0x498] sm:$0xff] %v1010_v19  ;;  %v1138_v19 = vld [vmem:[%s6622_s23 + $0xd30] sm:$0xff] }
  0xa7   : > { %1013 = vst [vmem:[%s6627_s24 + $0x4a0] sm:$0xff] %v1012_v20  ;;  %v1140_v20 = vld [vmem:[%s6622_s23 + $0xd40] sm:$0xff] }
  0xa8   : > { %1015 = vst [vmem:[%s6627_s24 + $0x4a8] sm:$0xff] %v1014_v21  ;;  %v1142_v21 = vld [vmem:[%s6622_s23 + $0xd50] sm:$0xff] }
  0xa9   : > { %1017 = vst [vmem:[%s6627_s24 + $0x4b0] sm:$0xff] %v1016_v22  ;;  %v1144_v22 = vld [vmem:[%s6622_s23 + $0xd60] sm:$0xff] }
  0xaa   : > { %1019 = vst [vmem:[%s6627_s24 + $0x4b8] sm:$0xff] %v1018_v23  ;;  %v1146_v23 = vld [vmem:[%s6622_s23 + $0xd70] sm:$0xff] }
  0xab   : > { %1021 = vst [vmem:[%s6627_s24 + $0x4c0] sm:$0xff] %v1020_v24  ;;  %v1148_v24 = vld [vmem:[%s6622_s23 + $0xd80] sm:$0xff] }
  0xac   : > { %1023 = vst [vmem:[%s6627_s24 + $0x4c8] sm:$0xff] %v1022_v25  ;;  %v1150_v25 = vld [vmem:[%s6622_s23 + $0xd90] sm:$0xff] }
  0xad   : > { %1025 = vst [vmem:[%s6627_s24 + $0x4d0] sm:$0xff] %v1024_v26  ;;  %v1152_v26 = vld [vmem:[%s6622_s23 + $0xda0] sm:$0xff] }
  0xae   : > { %1027 = vst [vmem:[%s6627_s24 + $0x4d8] sm:$0xff] %v1026_v27  ;;  %v1154_v27 = vld [vmem:[%s6622_s23 + $0xdb0] sm:$0xff] }
  0xaf   : > { %1029 = vst [vmem:[%s6627_s24 + $0x4e0] sm:$0xff] %v1028_v28  ;;  %v1156_v28 = vld [vmem:[%s6622_s23 + $0xdc0] sm:$0xff] }
  0xb0   : > { %1031 = vst [vmem:[%s6627_s24 + $0x4e8] sm:$0xff] %v1030_v29  ;;  %v1158_v29 = vld [vmem:[%s6622_s23 + $0xdd0] sm:$0xff] }
  0xb1   : > { %1033 = vst [vmem:[%s6627_s24 + $0x4f0] sm:$0xff] %v1032_v30  ;;  %v1160_v30 = vld [vmem:[%s6622_s23 + $0xde0] sm:$0xff] }
  0xb2   : > { %1035 = vst [vmem:[%s6627_s24 + $0x4f8] sm:$0xff] %v1034_v31  ;;  %v1162_v31 = vld [vmem:[%s6622_s23 + $0xdf0] sm:$0xff] }
  0xb3   : > { %1037 = vst [vmem:[%s6627_s24 + $0x500] sm:$0xff] %v1036_v32  ;;  %v1164_v32 = vld [vmem:[%s6622_s23 + $0xe00] sm:$0xff] }
  0xb4   : > { %1039 = vst [vmem:[%s6627_s24 + $0x508] sm:$0xff] %v1038_v33  ;;  %v1166_v33 = vld [vmem:[%s6622_s23 + $0xe10] sm:$0xff] }
  0xb5   : > { %1041 = vst [vmem:[%s6627_s24 + $0x510] sm:$0xff] %v1040_v34  ;;  %v1168_v34 = vld [vmem:[%s6622_s23 + $0xe20] sm:$0xff] }
  0xb6   : > { %1043 = vst [vmem:[%s6627_s24 + $0x518] sm:$0xff] %v1042_v35  ;;  %v1170_v35 = vld [vmem:[%s6622_s23 + $0xe30] sm:$0xff] }
  0xb7   : > { %1045 = vst [vmem:[%s6627_s24 + $0x520] sm:$0xff] %v1044_v36  ;;  %v1172_v36 = vld [vmem:[%s6622_s23 + $0xe40] sm:$0xff] }
  0xb8   : > { %1047 = vst [vmem:[%s6627_s24 + $0x528] sm:$0xff] %v1046_v37  ;;  %v1174_v37 = vld [vmem:[%s6622_s23 + $0xe50] sm:$0xff] }
  0xb9   : > { %1049 = vst [vmem:[%s6627_s24 + $0x530] sm:$0xff] %v1048_v38  ;;  %v1176_v38 = vld [vmem:[%s6622_s23 + $0xe60] sm:$0xff] }
  0xba   : > { %1051 = vst [vmem:[%s6627_s24 + $0x538] sm:$0xff] %v1050_v39  ;;  %v1178_v39 = vld [vmem:[%s6622_s23 + $0xe70] sm:$0xff] }
  0xbb   : > { %1053 = vst [vmem:[%s6627_s24 + $0x540] sm:$0xff] %v1052_v40  ;;  %v1180_v40 = vld [vmem:[%s6622_s23 + $0xe80] sm:$0xff] }
  0xbc   : > { %1055 = vst [vmem:[%s6627_s24 + $0x548] sm:$0xff] %v1054_v41  ;;  %v1182_v41 = vld [vmem:[%s6622_s23 + $0xe90] sm:$0xff] }
  0xbd   : > { %1057 = vst [vmem:[%s6627_s24 + $0x550] sm:$0xff] %v1056_v42  ;;  %v1184_v42 = vld [vmem:[%s6622_s23 + $0xea0] sm:$0xff] }
  0xbe   : > { %1059 = vst [vmem:[%s6627_s24 + $0x558] sm:$0xff] %v1058_v43  ;;  %v1186_v43 = vld [vmem:[%s6622_s23 + $0xeb0] sm:$0xff] }
  0xbf   : > { %1061 = vst [vmem:[%s6627_s24 + $0x560] sm:$0xff] %v1060_v44  ;;  %v1188_v44 = vld [vmem:[%s6622_s23 + $0xec0] sm:$0xff] }
  0xc0   : > { %1063 = vst [vmem:[%s6627_s24 + $0x568] sm:$0xff] %v1062_v45  ;;  %v1190_v45 = vld [vmem:[%s6622_s23 + $0xed0] sm:$0xff] }
  0xc1   : > { %1065 = vst [vmem:[%s6627_s24 + $0x570] sm:$0xff] %v1064_v46  ;;  %v1192_v46 = vld [vmem:[%s6622_s23 + $0xee0] sm:$0xff] }
  0xc2   : > { %1067 = vst [vmem:[%s6627_s24 + $0x578] sm:$0xff] %v1066_v47  ;;  %v1194_v47 = vld [vmem:[%s6622_s23 + $0xef0] sm:$0xff] }
  0xc3   : > { %1069 = vst [vmem:[%s6627_s24 + $0x580] sm:$0xff] %v1068_v48  ;;  %v1196_v48 = vld [vmem:[%s6622_s23 + $0xf00] sm:$0xff] }
  0xc4   : > { %1071 = vst [vmem:[%s6627_s24 + $0x588] sm:$0xff] %v1070_v49  ;;  %v1198_v49 = vld [vmem:[%s6622_s23 + $0xf10] sm:$0xff] }
  0xc5   : > { %1073 = vst [vmem:[%s6627_s24 + $0x590] sm:$0xff] %v1072_v50  ;;  %v1200_v50 = vld [vmem:[%s6622_s23 + $0xf20] sm:$0xff] }
  0xc6   : > { %1075 = vst [vmem:[%s6627_s24 + $0x598] sm:$0xff] %v1074_v51  ;;  %v1202_v51 = vld [vmem:[%s6622_s23 + $0xf30] sm:$0xff] }
  0xc7   : > { %1077 = vst [vmem:[%s6627_s24 + $0x5a0] sm:$0xff] %v1076_v52  ;;  %v1204_v52 = vld [vmem:[%s6622_s23 + $0xf40] sm:$0xff] }
  0xc8   : > { %1079 = vst [vmem:[%s6627_s24 + $0x5a8] sm:$0xff] %v1078_v53  ;;  %v1206_v53 = vld [vmem:[%s6622_s23 + $0xf50] sm:$0xff] }
  0xc9   : > { %1081 = vst [vmem:[%s6627_s24 + $0x5b0] sm:$0xff] %v1080_v54  ;;  %v1208_v54 = vld [vmem:[%s6622_s23 + $0xf60] sm:$0xff] }
  0xca   : > { %1083 = vst [vmem:[%s6627_s24 + $0x5b8] sm:$0xff] %v1082_v55  ;;  %v1210_v55 = vld [vmem:[%s6622_s23 + $0xf70] sm:$0xff] }
  0xcb   : > { %1085 = vst [vmem:[%s6627_s24 + $0x5c0] sm:$0xff] %v1084_v56  ;;  %v1212_v56 = vld [vmem:[%s6622_s23 + $0xf80] sm:$0xff] }
  0xcc   : > { %1087 = vst [vmem:[%s6627_s24 + $0x5c8] sm:$0xff] %v1086_v57  ;;  %v1214_v57 = vld [vmem:[%s6622_s23 + $0xf90] sm:$0xff] }
  0xcd   : > { %1089 = vst [vmem:[%s6627_s24 + $0x5d0] sm:$0xff] %v1088_v58  ;;  %v1216_v58 = vld [vmem:[%s6622_s23 + $0xfa0] sm:$0xff] }
  0xce   : > { %1091 = vst [vmem:[%s6627_s24 + $0x5d8] sm:$0xff] %v1090_v59  ;;  %v1218_v59 = vld [vmem:[%s6622_s23 + $0xfb0] sm:$0xff] }
  0xcf   : > { %1093 = vst [vmem:[%s6627_s24 + $0x5e0] sm:$0xff] %v1092_v60  ;;  %v1220_v60 = vld [vmem:[%s6622_s23 + $0xfc0] sm:$0xff] }
  0xd0   : > { %1095 = vst [vmem:[%s6627_s24 + $0x5e8] sm:$0xff] %v1094_v61  ;;  %v1222_v61 = vld [vmem:[%s6622_s23 + $0xfd0] sm:$0xff] }
  0xd1   : > { %1097 = vst [vmem:[%s6627_s24 + $0x5f0] sm:$0xff] %v1096_v62  ;;  %v1224_v62 = vld [vmem:[%s6622_s23 + $0xfe0] sm:$0xff] }
  0xd2   : > { %1099 = vst [vmem:[%s6627_s24 + $0x5f8] sm:$0xff] %v1098_v63  ;;  %v1226_v63 = vld [vmem:[%s6622_s23 + $0xff0] sm:$0xff] }
  0xd3   : > { %1101 = vst [vmem:[%s6627_s24 + $0x600] sm:$0xff] %v1100_v0  ;;  %v1228_v0 = vld [vmem:[%s6622_s23 + $0x1000] sm:$0xff] }
  0xd4   : > { %1103 = vst [vmem:[%s6627_s24 + $0x608] sm:$0xff] %v1102_v1  ;;  %v1230_v1 = vld [vmem:[%s6622_s23 + $0x1010] sm:$0xff] }
  0xd5   : > { %1105 = vst [vmem:[%s6627_s24 + $0x610] sm:$0xff] %v1104_v2  ;;  %v1232_v2 = vld [vmem:[%s6622_s23 + $0x1020] sm:$0xff] }
  0xd6   : > { %1107 = vst [vmem:[%s6627_s24 + $0x618] sm:$0xff] %v1106_v3  ;;  %v1234_v3 = vld [vmem:[%s6622_s23 + $0x1030] sm:$0xff] }
  0xd7   : > { %1109 = vst [vmem:[%s6627_s24 + $0x620] sm:$0xff] %v1108_v4  ;;  %v1236_v4 = vld [vmem:[%s6622_s23 + $0x1040] sm:$0xff] }
  0xd8   : > { %1111 = vst [vmem:[%s6627_s24 + $0x628] sm:$0xff] %v1110_v5  ;;  %v1238_v5 = vld [vmem:[%s6622_s23 + $0x1050] sm:$0xff] }
  0xd9   : > { %1113 = vst [vmem:[%s6627_s24 + $0x630] sm:$0xff] %v1112_v6  ;;  %v1240_v6 = vld [vmem:[%s6622_s23 + $0x1060] sm:$0xff] }
  0xda   : > { %1115 = vst [vmem:[%s6627_s24 + $0x638] sm:$0xff] %v1114_v7  ;;  %v1242_v7 = vld [vmem:[%s6622_s23 + $0x1070] sm:$0xff] }
  0xdb   : > { %1117 = vst [vmem:[%s6627_s24 + $0x640] sm:$0xff] %v1116_v8  ;;  %v1244_v8 = vld [vmem:[%s6622_s23 + $0x1080] sm:$0xff] }
  0xdc   : > { %1119 = vst [vmem:[%s6627_s24 + $0x648] sm:$0xff] %v1118_v9  ;;  %v1246_v9 = vld [vmem:[%s6622_s23 + $0x1090] sm:$0xff] }
  0xdd   : > { %1121 = vst [vmem:[%s6627_s24 + $0x650] sm:$0xff] %v1120_v10  ;;  %v1248_v10 = vld [vmem:[%s6622_s23 + $0x10a0] sm:$0xff] }
  0xde   : > { %1123 = vst [vmem:[%s6627_s24 + $0x658] sm:$0xff] %v1122_v11  ;;  %v1250_v11 = vld [vmem:[%s6622_s23 + $0x10b0] sm:$0xff] }
  0xdf   : > { %1125 = vst [vmem:[%s6627_s24 + $0x660] sm:$0xff] %v1124_v12  ;;  %v1252_v12 = vld [vmem:[%s6622_s23 + $0x10c0] sm:$0xff] }
  0xe0   : > { %1127 = vst [vmem:[%s6627_s24 + $0x668] sm:$0xff] %v1126_v13  ;;  %v1254_v13 = vld [vmem:[%s6622_s23 + $0x10d0] sm:$0xff] }
  0xe1   : > { %1129 = vst [vmem:[%s6627_s24 + $0x670] sm:$0xff] %v1128_v14  ;;  %v1256_v14 = vld [vmem:[%s6622_s23 + $0x10e0] sm:$0xff] }
  0xe2   : > { %1131 = vst [vmem:[%s6627_s24 + $0x678] sm:$0xff] %v1130_v15  ;;  %v1258_v15 = vld [vmem:[%s6622_s23 + $0x10f0] sm:$0xff] }
  0xe3   : > { %1133 = vst [vmem:[%s6627_s24 + $0x680] sm:$0xff] %v1132_v16  ;;  %v1260_v16 = vld [vmem:[%s6622_s23 + $0x1100] sm:$0xff] }
  0xe4   : > { %1135 = vst [vmem:[%s6627_s24 + $0x688] sm:$0xff] %v1134_v17  ;;  %v1262_v17 = vld [vmem:[%s6622_s23 + $0x1110] sm:$0xff] }
  0xe5   : > { %1137 = vst [vmem:[%s6627_s24 + $0x690] sm:$0xff] %v1136_v18  ;;  %v1264_v18 = vld [vmem:[%s6622_s23 + $0x1120] sm:$0xff] }
  0xe6   : > { %1139 = vst [vmem:[%s6627_s24 + $0x698] sm:$0xff] %v1138_v19  ;;  %v1266_v19 = vld [vmem:[%s6622_s23 + $0x1130] sm:$0xff] }
  0xe7   : > { %1141 = vst [vmem:[%s6627_s24 + $0x6a0] sm:$0xff] %v1140_v20  ;;  %v1268_v20 = vld [vmem:[%s6622_s23 + $0x1140] sm:$0xff] }
  0xe8   : > { %1143 = vst [vmem:[%s6627_s24 + $0x6a8] sm:$0xff] %v1142_v21  ;;  %v1270_v21 = vld [vmem:[%s6622_s23 + $0x1150] sm:$0xff] }
  0xe9   : > { %1145 = vst [vmem:[%s6627_s24 + $0x6b0] sm:$0xff] %v1144_v22  ;;  %v1272_v22 = vld [vmem:[%s6622_s23 + $0x1160] sm:$0xff] }
  0xea   : > { %1147 = vst [vmem:[%s6627_s24 + $0x6b8] sm:$0xff] %v1146_v23  ;;  %v1274_v23 = vld [vmem:[%s6622_s23 + $0x1170] sm:$0xff] }
  0xeb   : > { %1149 = vst [vmem:[%s6627_s24 + $0x6c0] sm:$0xff] %v1148_v24  ;;  %v1276_v24 = vld [vmem:[%s6622_s23 + $0x1180] sm:$0xff] }
  0xec   : > { %1151 = vst [vmem:[%s6627_s24 + $0x6c8] sm:$0xff] %v1150_v25  ;;  %v1278_v25 = vld [vmem:[%s6622_s23 + $0x1190] sm:$0xff] }
  0xed   : > { %1153 = vst [vmem:[%s6627_s24 + $0x6d0] sm:$0xff] %v1152_v26  ;;  %v1280_v26 = vld [vmem:[%s6622_s23 + $0x11a0] sm:$0xff] }
  0xee   : > { %1155 = vst [vmem:[%s6627_s24 + $0x6d8] sm:$0xff] %v1154_v27  ;;  %v1282_v27 = vld [vmem:[%s6622_s23 + $0x11b0] sm:$0xff] }
  0xef   : > { %1157 = vst [vmem:[%s6627_s24 + $0x6e0] sm:$0xff] %v1156_v28  ;;  %v1284_v28 = vld [vmem:[%s6622_s23 + $0x11c0] sm:$0xff] }
  0xf0   : > { %1159 = vst [vmem:[%s6627_s24 + $0x6e8] sm:$0xff] %v1158_v29  ;;  %v1286_v29 = vld [vmem:[%s6622_s23 + $0x11d0] sm:$0xff] }
  0xf1   : > { %1161 = vst [vmem:[%s6627_s24 + $0x6f0] sm:$0xff] %v1160_v30  ;;  %v1288_v30 = vld [vmem:[%s6622_s23 + $0x11e0] sm:$0xff] }
  0xf2   : > { %1163 = vst [vmem:[%s6627_s24 + $0x6f8] sm:$0xff] %v1162_v31  ;;  %v1290_v31 = vld [vmem:[%s6622_s23 + $0x11f0] sm:$0xff] }
  0xf3   : > { %1165 = vst [vmem:[%s6627_s24 + $0x700] sm:$0xff] %v1164_v32 }
  0xf4   : > { %1167 = vst [vmem:[%s6627_s24 + $0x708] sm:$0xff] %v1166_v33 }
  0xf5   : > { %1169 = vst [vmem:[%s6627_s24 + $0x710] sm:$0xff] %v1168_v34 }
  0xf6   : > { %1171 = vst [vmem:[%s6627_s24 + $0x718] sm:$0xff] %v1170_v35 }
  0xf7   : > { %1173 = vst [vmem:[%s6627_s24 + $0x720] sm:$0xff] %v1172_v36 }
  0xf8   : > { %1175 = vst [vmem:[%s6627_s24 + $0x728] sm:$0xff] %v1174_v37 }
  0xf9   : > { %1177 = vst [vmem:[%s6627_s24 + $0x730] sm:$0xff] %v1176_v38 }
  0xfa   : > { %1179 = vst [vmem:[%s6627_s24 + $0x738] sm:$0xff] %v1178_v39 }
  0xfb   : > { %1181 = vst [vmem:[%s6627_s24 + $0x740] sm:$0xff] %v1180_v40 }
  0xfc   : > { %1183 = vst [vmem:[%s6627_s24 + $0x748] sm:$0xff] %v1182_v41 }
  0xfd   : > { %1185 = vst [vmem:[%s6627_s24 + $0x750] sm:$0xff] %v1184_v42 }
  0xfe   : > { %1187 = vst [vmem:[%s6627_s24 + $0x758] sm:$0xff] %v1186_v43 }
  0xff   : > { %1189 = vst [vmem:[%s6627_s24 + $0x760] sm:$0xff] %v1188_v44 }
 0x100   : > { %1191 = vst [vmem:[%s6627_s24 + $0x768] sm:$0xff] %v1190_v45 }
 0x101   : > { %1193 = vst [vmem:[%s6627_s24 + $0x770] sm:$0xff] %v1192_v46 }
 0x102   : > { %1195 = vst [vmem:[%s6627_s24 + $0x778] sm:$0xff] %v1194_v47 }
 0x103   : > { %1197 = vst [vmem:[%s6627_s24 + $0x780] sm:$0xff] %v1196_v48 }
 0x104   : > { %1199 = vst [vmem:[%s6627_s24 + $0x788] sm:$0xff] %v1198_v49 }
 0x105   : > { %1201 = vst [vmem:[%s6627_s24 + $0x790] sm:$0xff] %v1200_v50 }
 0x106   : > { %1203 = vst [vmem:[%s6627_s24 + $0x798] sm:$0xff] %v1202_v51 }
 0x107   : > { %1205 = vst [vmem:[%s6627_s24 + $0x7a0] sm:$0xff] %v1204_v52 }
 0x108   : > { %1207 = vst [vmem:[%s6627_s24 + $0x7a8] sm:$0xff] %v1206_v53 }
 0x109   : > { %1209 = vst [vmem:[%s6627_s24 + $0x7b0] sm:$0xff] %v1208_v54 }
 0x10a   : > { %1211 = vst [vmem:[%s6627_s24 + $0x7b8] sm:$0xff] %v1210_v55 }
 0x10b   : > { %1213 = vst [vmem:[%s6627_s24 + $0x7c0] sm:$0xff] %v1212_v56 }
 0x10c   : > { %1215 = vst [vmem:[%s6627_s24 + $0x7c8] sm:$0xff] %v1214_v57 }
 0x10d   : > { %1217 = vst [vmem:[%s6627_s24 + $0x7d0] sm:$0xff] %v1216_v58 }
 0x10e   : > { %1219 = vst [vmem:[%s6627_s24 + $0x7d8] sm:$0xff] %v1218_v59 }
 0x10f   : > { %1221 = vst [vmem:[%s6627_s24 + $0x7e0] sm:$0xff] %v1220_v60 }
 0x110   : > { %1223 = vst [vmem:[%s6627_s24 + $0x7e8] sm:$0xff] %v1222_v61 }
 0x111   : > { %1225 = vst [vmem:[%s6627_s24 + $0x7f0] sm:$0xff] %v1224_v62 }
 0x112   : > { %1227 = vst [vmem:[%s6627_s24 + $0x7f8] sm:$0xff] %v1226_v63 }
 0x113   : > { %1229 = vst [vmem:[%s6627_s24 + $0x800] sm:$0xff] %v1228_v0 }
 0x114   : > { %1231 = vst [vmem:[%s6627_s24 + $0x808] sm:$0xff] %v1230_v1 }
 0x115   : > { %1233 = vst [vmem:[%s6627_s24 + $0x810] sm:$0xff] %v1232_v2 }
 0x116   : > { %1235 = vst [vmem:[%s6627_s24 + $0x818] sm:$0xff] %v1234_v3 }
 0x117   : > { %1237 = vst [vmem:[%s6627_s24 + $0x820] sm:$0xff] %v1236_v4 }
 0x118   : > { %1239 = vst [vmem:[%s6627_s24 + $0x828] sm:$0xff] %v1238_v5 }
 0x119   : > { %1241 = vst [vmem:[%s6627_s24 + $0x830] sm:$0xff] %v1240_v6 }
 0x11a   : > { %1243 = vst [vmem:[%s6627_s24 + $0x838] sm:$0xff] %v1242_v7 }
 0x11b   : > { %1245 = vst [vmem:[%s6627_s24 + $0x840] sm:$0xff] %v1244_v8 }
 0x11c   : > { %1247 = vst [vmem:[%s6627_s24 + $0x848] sm:$0xff] %v1246_v9 }
 0x11d   : > { %1249 = vst [vmem:[%s6627_s24 + $0x850] sm:$0xff] %v1248_v10 }
 0x11e   : > { %1251 = vst [vmem:[%s6627_s24 + $0x858] sm:$0xff] %v1250_v11 }
 0x11f   : > { %1253 = vst [vmem:[%s6627_s24 + $0x860] sm:$0xff] %v1252_v12 }
 0x120   : > { %1255 = vst [vmem:[%s6627_s24 + $0x868] sm:$0xff] %v1254_v13 }
 0x121   : > { %1257 = vst [vmem:[%s6627_s24 + $0x870] sm:$0xff] %v1256_v14 }
 0x122   : > { %1259 = vst [vmem:[%s6627_s24 + $0x878] sm:$0xff] %v1258_v15 }
 0x123   : > { %1261 = vst [vmem:[%s6627_s24 + $0x880] sm:$0xff] %v1260_v16 }
 0x124   : > { %1263 = vst [vmem:[%s6627_s24 + $0x888] sm:$0xff] %v1262_v17 }
 0x125   : > { %1265 = vst [vmem:[%s6627_s24 + $0x890] sm:$0xff] %v1264_v18 }
 0x126   : > { %1267 = vst [vmem:[%s6627_s24 + $0x898] sm:$0xff] %v1266_v19 }
 0x127   : > { %1269 = vst [vmem:[%s6627_s24 + $0x8a0] sm:$0xff] %v1268_v20 }
 0x128   : > { %1271 = vst [vmem:[%s6627_s24 + $0x8a8] sm:$0xff] %v1270_v21 }
 0x129   : > { %1273 = vst [vmem:[%s6627_s24 + $0x8b0] sm:$0xff] %v1272_v22 }
 0x12a   : > { %1275 = vst [vmem:[%s6627_s24 + $0x8b8] sm:$0xff] %v1274_v23 }
 0x12b   : > { %1277 = vst [vmem:[%s6627_s24 + $0x8c0] sm:$0xff] %v1276_v24 }
 0x12c   : > { %1279 = vst [vmem:[%s6627_s24 + $0x8c8] sm:$0xff] %v1278_v25 }
 0x12d   : > { %1281 = vst [vmem:[%s6627_s24 + $0x8d0] sm:$0xff] %v1280_v26 }
 0x12e   : > { %1283 = vst [vmem:[%s6627_s24 + $0x8d8] sm:$0xff] %v1282_v27 }
 0x12f   : > { %1285 = vst [vmem:[%s6627_s24 + $0x8e0] sm:$0xff] %v1284_v28 }
 0x130   : > { %1287 = vst [vmem:[%s6627_s24 + $0x8e8] sm:$0xff] %v1286_v29 }
 0x131   : > { %1289 = vst [vmem:[%s6627_s24 + $0x8f0] sm:$0xff] %v1288_v30 }
 0x132   : > { %1291 = vst [vmem:[%s6627_s24 + $0x8f8] sm:$0xff] %v1290_v31 }
 0x133 PF: > { %p4978_p7 = scmp.ge.s32.totalorder %s6565_s11, 1  ;;  %p2483_p8 = scmp.lt.s32.totalorder %s6565_s11, 3 }
 0x135   : > { %p2484_p9 = pnand %p4978_p7, %p2483_p8 }
 0x136   : > { %s2490_s25 = sand.u32 (!%p2484_p9), 1, %s6557_s9  }
 0x137   : > { %2487 = sbr.rel (%p2484_p9) target bundleno = 765 (0x2fd), region = 76 }
 0x138   : > { %s6518_s26 = smul.u32 (!%p2484_p9), 2304, %s2490_s25 }
 0x13a   : > { %s7207_s27 = scalar_lea.vmem (!%p2484_p9), [#allocation2], %s6518_s26 }
 0x13c   : > { %v5110_v32 = vld [vmem:[%s7207_s27 + $0x70] sm:$0xf]  ;;  %v6243_v33 = vld [vmem:[%s7207_s27 + $0x74] sm:$0xf0]  ;;  %v5102_v43 = vld [vmem:[%s7207_s27 + $0x60] sm:$0xf] }
 0x13d   : > { %v5174_v34 = vld [vmem:[%s7207_s27 + $0xf0] sm:$0xf]  ;;  %v5111_v35 = vor.u32 %v6243_v33, %v5110_v32  ;;  %v6259_v36 = vld [vmem:[%s7207_s27 + $0xf4] sm:$0xf0]  ;;  %v6241_v45 = vld [vmem:[%s7207_s27 + $0x64] sm:$0xf0] }
 0x13e   : > { %v5238_v37 = vld [vmem:[%s7207_s27 + $0x170] sm:$0xf]  ;;  %v6275_v38 = vld [vmem:[%s7207_s27 + $0x174] sm:$0xf0]  ;;  %v5175_v39 = vor.u32 %v6259_v36, %v5174_v34  ;;  %v5166_v46 = vld [vmem:[%s7207_s27 + $0xe0] sm:$0xf]  ;;  %v5103_v48 = vor.u32 %v6241_v45, %v5102_v43 }
 0x13f   : > { %v5239_v40 = vor.u32 %v6275_v38, %v5238_v37  ;;  %v5302_v41 = vld [vmem:[%s7207_s27 + $0x1f0] sm:$0xf]  ;;  %v6291_v42 = vld [vmem:[%s7207_s27 + $0x1f4] sm:$0xf0]  ;;  %4348 = vmatpush.bf16.msra.mxu0 %v5111_v35  ;;  %v6257_v47 = vld [vmem:[%s7207_s27 + $0xe4] sm:$0xf0] }
 0x140   : > { %v5303_v44 = vor.u32 %v6291_v42, %v5302_v41  ;;  %4362 = vmatpush.bf16.msra.mxu1 %v5175_v39  ;;  %v5167_v49 = vor.u32 %v6257_v47, %v5166_v46  ;;  %v5230_v50 = vld [vmem:[%s7207_s27 + $0x160] sm:$0xf]  ;;  %v6273_v51 = vld [vmem:[%s7207_s27 + $0x164] sm:$0xf0]  ;;  %v5094_v55 = vld [vmem:[%s7207_s27 + $0x50] sm:$0xf] }
 0x141   : > { %4376 = vmatpush.bf16.msra.mxu2 %v5239_v40  ;;  %v5294_v52 = vld [vmem:[%s7207_s27 + $0x1e0] sm:$0xf]  ;;  %v5231_v53 = vor.u32 %v6273_v51, %v5230_v50  ;;  %v6289_v54 = vld [vmem:[%s7207_s27 + $0x1e4] sm:$0xf0]  ;;  %v6239_v56 = vld [vmem:[%s7207_s27 + $0x54] sm:$0xf0] }
 0x142   : > { %4390 = vmatpush.bf16.msra.mxu3 %v5303_v44  ;;  %v5295_v57 = vor.u32 %v6289_v54, %v5294_v52  ;;  %v5158_v58 = vld [vmem:[%s7207_s27 + $0xd0] sm:$0xf]  ;;  %v6255_v59 = vld [vmem:[%s7207_s27 + $0xd4] sm:$0xf0]  ;;  %v5095_v61 = vor.u32 %v6239_v56, %v5094_v55  ;;  %v5086_v3 = vld [vmem:[%s7207_s27 + $0x40] sm:$0xf] }
 0x143   : > { %v5222_v60 = vld [vmem:[%s7207_s27 + $0x150] sm:$0xf]  ;;  %4349 = vmatpush.bf16.msra.mxu0 %v5103_v48  ;;  %v6271_v62 = vld [vmem:[%s7207_s27 + $0x154] sm:$0xf0]  ;;  %v5159_v1 = vor.u32 %v6255_v59, %v5158_v58  ;;  %v6237_v4 = vld [vmem:[%s7207_s27 + $0x44] sm:$0xf0] }
 0x144   : > { %v5286_v63 = vld [vmem:[%s7207_s27 + $0x1d0] sm:$0xf]  ;;  %v6287_v0 = vld [vmem:[%s7207_s27 + $0x1d4] sm:$0xf0]  ;;  %4363 = vmatpush.bf16.msra.mxu1 %v5167_v49  ;;  %v5223_v2 = vor.u32 %v6271_v62, %v5222_v60  ;;  %v5150_v5 = vld [vmem:[%s7207_s27 + $0xc0] sm:$0xf]  ;;  %v5087_v12 = vor.u32 %v6237_v4, %v5086_v3 }
 0x145   : > { %4377 = vmatpush.bf16.msra.mxu2 %v5231_v53  ;;  %v5287_v6 = vor.u32 %v6287_v0, %v5286_v63  ;;  %v6253_v7 = vld [vmem:[%s7207_s27 + $0xc4] sm:$0xf0]  ;;  %v5214_v8 = vld [vmem:[%s7207_s27 + $0x140] sm:$0xf]  ;;  %v5078_v15 = vld [vmem:[%s7207_s27 + $0x30] sm:$0xf] }
 0x146   : > { %4391 = vmatpush.bf16.msra.mxu3 %v5295_v57  ;;  %v6269_v9 = vld [vmem:[%s7207_s27 + $0x144] sm:$0xf0]  ;;  %v5278_v10 = vld [vmem:[%s7207_s27 + $0x1c0] sm:$0xf]  ;;  %v5151_v13 = vor.u32 %v6253_v7, %v5150_v5  ;;  %v6235_v16 = vld [vmem:[%s7207_s27 + $0x34] sm:$0xf0] }
 0x147   : > { %v6285_v11 = vld [vmem:[%s7207_s27 + $0x1c4] sm:$0xf0]  ;;  %4350 = vmatpush.bf16.msra.mxu0 %v5095_v61  ;;  %v5215_v14 = vor.u32 %v6269_v9, %v5214_v8  ;;  %v5142_v17 = vld [vmem:[%s7207_s27 + $0xb0] sm:$0xf]  ;;  %v6251_v19 = vld [vmem:[%s7207_s27 + $0xb4] sm:$0xf0]  ;;  %v5079_v24 = vor.u32 %v6235_v16, %v5078_v15 }
 0x148   : > { %4364 = vmatpush.bf16.msra.mxu1 %v5159_v1  ;;  %v5279_v18 = vor.u32 %v6285_v11, %v5278_v10  ;;  %v5206_v20 = vld [vmem:[%s7207_s27 + $0x130] sm:$0xf]  ;;  %v6267_v21 = vld [vmem:[%s7207_s27 + $0x134] sm:$0xf0]  ;;  %v5143_v25 = vor.u32 %v6251_v19, %v5142_v17  ;;  %v5070_v27 = vld [vmem:[%s7207_s27 + $0x20] sm:$0xf] }
 0x149   : > { %4378 = vmatpush.bf16.msra.mxu2 %v5223_v2  ;;  %v5270_v22 = vld [vmem:[%s7207_s27 + $0x1b0] sm:$0xf]  ;;  %v6283_v23 = vld [vmem:[%s7207_s27 + $0x1b4] sm:$0xf0]  ;;  %v5207_v26 = vor.u32 %v6267_v21, %v5206_v20  ;;  %v6233_v28 = vld [vmem:[%s7207_s27 + $0x24] sm:$0xf0] }
 0x14a   : > { %4392 = vmatpush.bf16.msra.mxu3 %v5287_v6  ;;  %v5134_v29 = vld [vmem:[%s7207_s27 + $0xa0] sm:$0xf]  ;;  %v5271_v30 = vor.u32 %v6283_v23, %v5270_v22  ;;  %v6249_v31 = vld [vmem:[%s7207_s27 + $0xa4] sm:$0xf0]  ;;  %v5071_v36 = vor.u32 %v6233_v28, %v5070_v27  ;;  %v5062_v39 = vld [vmem:[%s7207_s27 + $0x10] sm:$0xf] }
 0x14b   : > { %4351 = vmatpush.bf16.msra.mxu0 %v5087_v12  ;;  %v5198_v32 = vld [vmem:[%s7207_s27 + $0x120] sm:$0xf]  ;;  %v6265_v33 = vld [vmem:[%s7207_s27 + $0x124] sm:$0xf0]  ;;  %v5135_v37 = vor.u32 %v6249_v31, %v5134_v29  ;;  %v6231_v40 = vld [vmem:[%s7207_s27 + $0x14] sm:$0xf0] }
 0x14c   : > { %4365 = vmatpush.bf16.msra.mxu1 %v5151_v13  ;;  %v5262_v34 = vld [vmem:[%s7207_s27 + $0x1a0] sm:$0xf]  ;;  %v6281_v35 = vld [vmem:[%s7207_s27 + $0x1a4] sm:$0xf0]  ;;  %v5199_v38 = vor.u32 %v6265_v33, %v5198_v32  ;;  %v5126_v41 = vld [vmem:[%s7207_s27 + $0x90] sm:$0xf]  ;;  %v5063_v48 = vor.u32 %v6231_v40, %v5062_v39 }
 0x14d   : > { %4379 = vmatpush.bf16.msra.mxu2 %v5215_v14  ;;  %v5263_v42 = vor.u32 %v6281_v35, %v5262_v34  ;;  %v6247_v43 = vld [vmem:[%s7207_s27 + $0x94] sm:$0xf0]  ;;  %v5190_v44 = vld [vmem:[%s7207_s27 + $0x110] sm:$0xf]  ;;  %v5054_v49 = vld [vmem:[%s7207_s27] sm:$0xf] }
 0x14e   : > { %4393 = vmatpush.bf16.msra.mxu3 %v5279_v18  ;;  %v6263_v45 = vld [vmem:[%s7207_s27 + $0x114] sm:$0xf0]  ;;  %v5254_v46 = vld [vmem:[%s7207_s27 + $0x190] sm:$0xf]  ;;  %v6229_v50 = vld [vmem:[%s7207_s27 + $0x4] sm:$0xf0]  ;;  %v5127_v51 = vor.u32 %v6247_v43, %v5126_v41 }
 0x14f   : > { %4352 = vmatpush.bf16.msra.mxu0 %v5079_v24  ;;  %v6279_v47 = vld [vmem:[%s7207_s27 + $0x194] sm:$0xf0]  ;;  %v5191_v52 = vor.u32 %v6263_v45, %v5190_v44  ;;  %v5118_v53 = vld [vmem:[%s7207_s27 + $0x80] sm:$0xf]  ;;  %v6245_v54 = vld [vmem:[%s7207_s27 + $0x84] sm:$0xf0]  ;;  %v5055_v63 = vor.u32 %v6229_v50, %v5054_v49 }
 0x150   : > { %4366 = vmatpush.bf16.msra.mxu1 %v5143_v25  ;;  %v5182_v55 = vld [vmem:[%s7207_s27 + $0x100] sm:$0xf]  ;;  %v5255_v56 = vor.u32 %v6279_v47, %v5254_v46  ;;  %v6261_v57 = vld [vmem:[%s7207_s27 + $0x104] sm:$0xf0]  ;;  %v5366_v60 = vld [vmem:[%s7207_s27 + $0x270] sm:$0xf]  ;;  %v5119_v3 = vor.u32 %v6245_v54, %v5118_v53 }
 0x151   : > { %4380 = vmatpush.bf16.msra.mxu2 %v5207_v26  ;;  %v5246_v58 = vld [vmem:[%s7207_s27 + $0x180] sm:$0xf]  ;;  %v6277_v59 = vld [vmem:[%s7207_s27 + $0x184] sm:$0xf0]  ;;  %v6307_v61 = vld [vmem:[%s7207_s27 + $0x274] sm:$0xf0]  ;;  %v5183_v4 = vor.u32 %v6261_v57, %v5182_v55 }
 0x152   : > { %4394 = vmatpush.bf16.msra.mxu3 %v5271_v30  ;;  %v5430_v62 = vld [vmem:[%s7207_s27 + $0x2f0] sm:$0xf]  ;;  %v6323_v0 = vld [vmem:[%s7207_s27 + $0x2f4] sm:$0xf0]  ;;  %v5247_v7 = vor.u32 %v6277_v59, %v5246_v58  ;;  %v5367_v8 = vor.u32 %v6307_v61, %v5366_v60  ;;  %v5358_v9 = vld [vmem:[%s7207_s27 + $0x260] sm:$0xf] }
 0x153   : > { %4353 = vmatpush.bf16.msra.mxu0 %v5071_v36  ;;  %v5494_v1 = vld [vmem:[%s7207_s27 + $0x370] sm:$0xf]  ;;  %v6339_v2 = vld [vmem:[%s7207_s27 + $0x374] sm:$0xf0]  ;;  %v6305_v10 = vld [vmem:[%s7207_s27 + $0x264] sm:$0xf0]  ;;  %v5431_v11 = vor.u32 %v6323_v0, %v5430_v62 }
 0x154   : > { %4367 = vmatpush.bf16.msra.mxu1 %v5135_v37  ;;  %v5558_v5 = vld [vmem:[%s7207_s27 + $0x3f0] sm:$0xf]  ;;  %v6355_v6 = vld [vmem:[%s7207_s27 + $0x3f4] sm:$0xf0]  ;;  %v5495_v12 = vor.u32 %v6339_v2, %v5494_v1  ;;  %v5422_v13 = vld [vmem:[%s7207_s27 + $0x2e0] sm:$0xf]  ;;  %v5359_v23 = vor.u32 %v6305_v10, %v5358_v9 }
 0x155   : > { %4381 = vmatpush.bf16.msra.mxu2 %v5199_v38  ;;  %v6321_v14 = vld [vmem:[%s7207_s27 + $0x2e4] sm:$0xf0]  ;;  %v5486_v15 = vld [vmem:[%s7207_s27 + $0x360] sm:$0xf]  ;;  %v5559_v16 = vor.u32 %v6355_v6, %v5558_v5  ;;  %v5350_v24 = vld [vmem:[%s7207_s27 + $0x250] sm:$0xf] }
 0x156   : > { %4395 = vmatpush.bf16.msra.mxu3 %v5263_v42  ;;  %v6337_v17 = vld [vmem:[%s7207_s27 + $0x364] sm:$0xf0]  ;;  %v5550_v18 = vld [vmem:[%s7207_s27 + $0x3e0] sm:$0xf]  ;;  %v6303_v25 = vld [vmem:[%s7207_s27 + $0x254] sm:$0xf0]  ;;  %v5423_v28 = vor.u32 %v6321_v14, %v5422_v13 }
 0x157   : > { %4354 = vmatpush.bf16.msra.mxu0 %v5063_v48  ;;  %v6353_v19 = vld [vmem:[%s7207_s27 + $0x3e4] sm:$0xf0]  ;;  %v4982_v20 = vld [vmem:[%s8008_s0] sm:$0xf]  ;;  %v6220_v27 = vld [vmem:[%s8008_s0 + $0x4c] sm:$0x30]  ;;  %v5487_v29 = vor.u32 %v6337_v17, %v5486_v15  ;;  %v5351_v41 = vor.u32 %v6303_v25, %v5350_v24 }
 0x158   : > { %4368 = vmatpush.bf16.msra.mxu1 %v5127_v51  ;;  %v6219_v21 = vld [vmem:[%s8008_s0 + $0x44] sm:$0x30]  ;;  %v5414_v30 = vld [vmem:[%s7207_s27 + $0x2d0] sm:$0xf]  ;;  %v6319_v31 = vld [vmem:[%s7207_s27 + $0x2d4] sm:$0xf0]  ;;  %v5551_v34 = vor.u32 %v6353_v19, %v5550_v18 }
 0x159   : > { %4382 = vmatpush.bf16.msra.mxu2 %v5191_v52  ;;  %v4990_v22 = vld [vmem:[%s8008_s0 + $0x8] sm:$0xf]  ;;  %v7300_v26 = vor.u32 %v6219_v21, %v4982_v20  ;;  %v5478_v32 = vld [vmem:[%s7207_s27 + $0x350] sm:$0xf]  ;;  %v6335_v35 = vld [vmem:[%s7207_s27 + $0x354] sm:$0xf0]  ;;  %v5415_v44 = vor.u32 %v6319_v31, %v5414_v30 }
 0x15a   : > { %4396 = vmatpush.bf16.msra.mxu3 %v5255_v56  ;;  %v7308_v33 = vor.u32 %v6220_v27, %v4990_v22  ;;  %v5542_v36 = vld [vmem:[%s7207_s27 + $0x3d0] sm:$0xf]  ;;  %v6351_v37 = vld [vmem:[%s7207_s27 + $0x3d4] sm:$0xf0]  ;;  %v6210_v38 = vld [vmem:[%s8008_s0 + $0x4] sm:$0xf]  ;;  %v5479_v45 = vor.u32 %v6335_v35, %v5478_v32 }
 0x15b   : > { %4355 = vmatpush.bf16.msra.mxu0 %v5055_v63  ;;  %v4984_v39 = vld [vmem:[%s8008_s0 + $0x48] sm:$0x30]  ;;  %v4992_v43 = vld [vmem:[%s8008_s0 + $0x50] sm:$0x30]  ;;  %v5342_v46 = vld [vmem:[%s7207_s27 + $0x240] sm:$0xf]  ;;  %v5543_v50 = vor.u32 %v6351_v37, %v5542_v36 }
 0x15c   : > { %4369 = vmatpush.bf16.msra.mxu1 %v5119_v3  ;;  %v6211_v40 = vld [vmem:[%s8008_s0 + $0xc] sm:$0xf]  ;;  %v7324_v42 = vor.u32 %v6210_v38, %v4984_v39  ;;  %v6301_v47 = vld [vmem:[%s7207_s27 + $0x244] sm:$0xf0]  ;;  %v5406_v48 = vld [vmem:[%s7207_s27 + $0x2c0] sm:$0xf] }
 0x15d   : > { %4383 = vmatpush.bf16.msra.mxu2 %v5183_v4  ;;  %v7332_v49 = vor.u32 %v6211_v40, %v4992_v43  ;;  %v6317_v51 = vld [vmem:[%s7207_s27 + $0x2c4] sm:$0xf0]  ;;  %v5470_v52 = vld [vmem:[%s7207_s27 + $0x340] sm:$0xf]  ;;  %v5343_v56 = vor.u32 %v6301_v47, %v5342_v46  ;;  %v5334_v59 = vld [vmem:[%s7207_s27 + $0x230] sm:$0xf] }
 0x15e   : > { %4397 = vmatpush.bf16.msra.mxu3 %v5247_v7  ;;  %4356 = vmatmul.bf16.vlgmr.msra.gmra.mxu0 %v7300_v26  ;;  %v6333_v53 = vld [vmem:[%s7207_s27 + $0x344] sm:$0xf0]  ;;  %v5534_v54 = vld [vmem:[%s7207_s27 + $0x3c0] sm:$0xf]  ;;  %v5407_v57 = vor.u32 %v6317_v51, %v5406_v48  ;;  %v6299_v60 = vld [vmem:[%s7207_s27 + $0x234] sm:$0xf0] }
 0x15f   : > { %4404 = vmatpush.bf16.msrb.mxu0 %v5367_v8  ;;  %4370 = vmatmul.bf16.vlgmr.msra.gmra.mxu1 %v7324_v42  ;;  %v6349_v55 = vld [vmem:[%s7207_s27 + $0x3c4] sm:$0xf0]  ;;  %v5471_v58 = vor.u32 %v6333_v53, %v5470_v52  ;;  %v5398_v61 = vld [vmem:[%s7207_s27 + $0x2b0] sm:$0xf]  ;;  %v6315_v63 = vld [vmem:[%s7207_s27 + $0x2b4] sm:$0xf0]  ;;  %v5335_v4 = vor.u32 %v6299_v60, %v5334_v59 }
 0x160   : > { %4418 = vmatpush.bf16.msrb.mxu1 %v5431_v11  ;;  %4384 = vmatmul.bf16.vlgmr.msra.gmra.mxu2 %v7308_v33  ;;  %v5535_v62 = vor.u32 %v6349_v55, %v5534_v54  ;;  %v5462_v0 = vld [vmem:[%s7207_s27 + $0x330] sm:$0xf]  ;;  %v6331_v1 = vld [vmem:[%s7207_s27 + $0x334] sm:$0xf0]  ;;  %v5399_v5 = vor.u32 %v6315_v63, %v5398_v61  ;;  %v5326_v7 = vld [vmem:[%s7207_s27 + $0x220] sm:$0xf] }
 0x161   : > { %4432 = vmatpush.bf16.msrb.mxu2 %v5495_v12  ;;  %4398 = vmatmul.bf16.vlgmr.msra.gmra.mxu3 %v7332_v49  ;;  %v5526_v2 = vld [vmem:[%s7207_s27 + $0x3b0] sm:$0xf]  ;;  %v6347_v3 = vld [vmem:[%s7207_s27 + $0x3b4] sm:$0xf0]  ;;  %v5463_v6 = vor.u32 %v6331_v1, %v5462_v0  ;;  %v6297_v8 = vld [vmem:[%s7207_s27 + $0x224] sm:$0xf0] }
 0x162   : > { %4446 = vmatpush.bf16.msrb.mxu3 %v5559_v16  ;;  %v5390_v9 = vld [vmem:[%s7207_s27 + $0x2a0] sm:$0xf]  ;;  %v5527_v10 = vor.u32 %v6347_v3, %v5526_v2  ;;  %v6313_v11 = vld [vmem:[%s7207_s27 + $0x2a4] sm:$0xf0]  ;;  %v5327_v16 = vor.u32 %v6297_v8, %v5326_v7  ;;  %v5318_v17 = vld [vmem:[%s7207_s27 + $0x210] sm:$0xf] }
 0x163   : > { %4405 = vmatpush.bf16.msrb.mxu0 %v5359_v23  ;;  %v5454_v12 = vld [vmem:[%s7207_s27 + $0x320] sm:$0xf]  ;;  %v6329_v13 = vld [vmem:[%s7207_s27 + $0x324] sm:$0xf0]  ;;  %v5391_v18 = vor.u32 %v6313_v11, %v5390_v9  ;;  %v6295_v20 = vld [vmem:[%s7207_s27 + $0x214] sm:$0xf0] }
 0x164   : > { %4419 = vmatpush.bf16.msrb.mxu1 %v5423_v28  ;;  %v5518_v14 = vld [vmem:[%s7207_s27 + $0x3a0] sm:$0xf]  ;;  %v6345_v15 = vld [vmem:[%s7207_s27 + $0x3a4] sm:$0xf0]  ;;  %v5455_v19 = vor.u32 %v6329_v13, %v5454_v12  ;;  %v5382_v21 = vld [vmem:[%s7207_s27 + $0x290] sm:$0xf]  ;;  %v5319_v31 = vor.u32 %v6295_v20, %v5318_v17 }
 0x165   : > { %4433 = vmatpush.bf16.msrb.mxu2 %v5487_v29  ;;  %v6311_v22 = vld [vmem:[%s7207_s27 + $0x294] sm:$0xf0]  ;;  %v5519_v23 = vor.u32 %v6345_v15, %v5518_v14  ;;  %v5446_v24 = vld [vmem:[%s7207_s27 + $0x310] sm:$0xf]  ;;  %v5310_v29 = vld [vmem:[%s7207_s27 + $0x200] sm:$0xf] }
 0x166   : > { %4447 = vmatpush.bf16.msrb.mxu3 %v5551_v34  ;;  %v6327_v25 = vld [vmem:[%s7207_s27 + $0x314] sm:$0xf0]  ;;  %v5510_v27 = vld [vmem:[%s7207_s27 + $0x390] sm:$0xf]  ;;  %v6293_v30 = vld [vmem:[%s7207_s27 + $0x204] sm:$0xf0]  ;;  %v5383_v37 = vor.u32 %v6311_v22, %v5382_v21 }
 0x167   : > { %4406 = vmatpush.bf16.msrb.mxu0 %v5351_v41  ;;  %v6343_v28 = vld [vmem:[%s7207_s27 + $0x394] sm:$0xf0]  ;;  %v5374_v32 = vld [vmem:[%s7207_s27 + $0x280] sm:$0xf]  ;;  %v6309_v34 = vld [vmem:[%s7207_s27 + $0x284] sm:$0xf0]  ;;  %v5447_v38 = vor.u32 %v6327_v25, %v5446_v24  ;;  %v5311_v51 = vor.u32 %v6293_v30, %v5310_v29 }
 0x168   : > { %4420 = vmatpush.bf16.msrb.mxu1 %v5415_v44  ;;  %v5438_v35 = vld [vmem:[%s7207_s27 + $0x300] sm:$0xf]  ;;  %v6325_v36 = vld [vmem:[%s7207_s27 + $0x304] sm:$0xf0]  ;;  %v5622_v41 = vld [vmem:[%s7207_s27 + $0x470] sm:$0xf]  ;;  %v5511_v43 = vor.u32 %v6343_v28, %v5510_v27  ;;  %v5375_v55 = vor.u32 %v6309_v34, %v5374_v32 }
 0x169   : > { %4434 = vmatpush.bf16.msrb.mxu2 %v5479_v45  ;;  %v5502_v39 = vld [vmem:[%s7207_s27 + $0x380] sm:$0xf]  ;;  %v6341_v40 = vld [vmem:[%s7207_s27 + $0x384] sm:$0xf0]  ;;  %v6371_v44 = vld [vmem:[%s7207_s27 + $0x474] sm:$0xf0] }
 0x16a   : > { %4448 = vmatpush.bf16.msrb.mxu3 %v5543_v50  ;;  %v5686_v45 = vld [vmem:[%s7207_s27 + $0x4f0] sm:$0xf]  ;;  %v6387_v46 = vld [vmem:[%s7207_s27 + $0x4f4] sm:$0xf0]  ;;  %v6212_v59 = vld [vmem:[%s8008_s0 + $0x14] sm:$0xf]  ;;  %v5503_v60 = vor.u32 %v6341_v40, %v5502_v39  ;;  %v5623_v61 = vor.u32 %v6371_v44, %v5622_v41 }
 0x16b   : > { %4407 = vmatpush.bf16.msrb.mxu0 %v5343_v56  ;;  %v5750_v47 = vld [vmem:[%s7207_s27 + $0x570] sm:$0xf]  ;;  %v6403_v48 = vld [vmem:[%s7207_s27 + $0x574] sm:$0xf0]  ;;  %v5439_v56 = vor.u32 %v6325_v36, %v5438_v35  ;;  %v6213_v63 = vld [vmem:[%s8008_s0 + $0x1c] sm:$0xf]  ;;  %v5687_v1 = vor.u32 %v6387_v46, %v5686_v45 }
 0x16c   : > { %4421 = vmatpush.bf16.msrb.mxu1 %v5407_v57  ;;  %v5814_v50 = vld [vmem:[%s7207_s27 + $0x5f0] sm:$0xf]  ;;  %v6419_v52 = vld [vmem:[%s7207_s27 + $0x5f4] sm:$0xf0]  ;;  %v5008_v0 = vld [vmem:[%s8008_s0 + $0x60] sm:$0x30]  ;;  %v5751_v2 = vor.u32 %v6403_v48, %v5750_v47 }
 0x16d   : > { %4435 = vmatpush.bf16.msrb.mxu2 %v5471_v58  ;;  %v4998_v53 = vld [vmem:[%s8008_s0 + $0x10] sm:$0xf]  ;;  %v6221_v54 = vld [vmem:[%s8008_s0 + $0x54] sm:$0x30]  ;;  %v6222_v58 = vld [vmem:[%s8008_s0 + $0x5c] sm:$0x30]  ;;  %v7419_v15 = vor.u32 %v6213_v63, %v5008_v0 }
 0x16e   : > { %4449 = vmatpush.bf16.msrb.mxu3 %v5535_v62  ;;  %v5006_v57 = vld [vmem:[%s8008_s0 + $0x18] sm:$0xf]  ;;  %v5000_v62 = vld [vmem:[%s8008_s0 + $0x58] sm:$0x30]  ;;  %v5614_v3 = vld [vmem:[%s7207_s27 + $0x460] sm:$0xf]  ;;  %v7408_v7 = vor.u32 %v6221_v54, %v4998_v53 }
 0x16f   : > { %4408 = vmatpush.bf16.msrb.mxu0 %v5335_v4  ;;  %v6369_v4 = vld [vmem:[%s7207_s27 + $0x464] sm:$0xf0]  ;;  %v5742_v9 = vld [vmem:[%s7207_s27 + $0x560] sm:$0xf]  ;;  %v7413_v11 = vor.u32 %v6222_v58, %v5006_v57  ;;  %v7415_v12 = vor.u32 %v6212_v59, %v5000_v62  ;;  %v6367_v20 = vld [vmem:[%s7207_s27 + $0x454] sm:$0xf0] }
 0x170   : > { %4422 = vmatpush.bf16.msrb.mxu1 %v5399_v5  ;;  %v5678_v5 = vld [vmem:[%s7207_s27 + $0x4e0] sm:$0xf]  ;;  %v6385_v8 = vld [vmem:[%s7207_s27 + $0x4e4] sm:$0xf0]  ;;  %v5670_v21 = vld [vmem:[%s7207_s27 + $0x4d0] sm:$0xf] }
 0x171   : > { %4436 = vmatpush.bf16.msrb.mxu2 %v5463_v6  ;;  %v5815_v6 = vor.u32 %v6419_v52, %v5814_v50  ;;  %v5806_v13 = vld [vmem:[%s7207_s27 + $0x5e0] sm:$0xf]  ;;  %v6417_v14 = vld [vmem:[%s7207_s27 + $0x5e4] sm:$0xf0]  ;;  %v5679_v17 = vor.u32 %v6385_v8, %v5678_v5  ;;  %v5734_v24 = vld [vmem:[%s7207_s27 + $0x550] sm:$0xf] }
 0x172   : > { %4450 = vmatpush.bf16.msrb.mxu3 %v5527_v10  ;;  %v6401_v10 = vld [vmem:[%s7207_s27 + $0x564] sm:$0xf0]  ;;  %v5807_v22 = vor.u32 %v6417_v14, %v5806_v13  ;;  %v6399_v25 = vld [vmem:[%s7207_s27 + $0x554] sm:$0xf0]  ;;  %v5798_v27 = vld [vmem:[%s7207_s27 + $0x5d0] sm:$0xf] }
 0x173   : > { %4409 = vmatpush.bf16.msrb.mxu0 %v5327_v16  ;;  %v5615_v16 = vor.u32 %v6369_v4, %v5614_v3  ;;  %v6415_v28 = vld [vmem:[%s7207_s27 + $0x5d4] sm:$0xf0]  ;;  %v5598_v32 = vld [vmem:[%s7207_s27 + $0x440] sm:$0xf]  ;;  %v6365_v34 = vld [vmem:[%s7207_s27 + $0x444] sm:$0xf0] }
 0x174   : > { %4423 = vmatpush.bf16.msrb.mxu1 %v5391_v18  ;;  %v5743_v18 = vor.u32 %v6401_v10, %v5742_v9  ;;  %v5662_v35 = vld [vmem:[%s7207_s27 + $0x4c0] sm:$0xf]  ;;  %v5799_v36 = vor.u32 %v6415_v28, %v5798_v27  ;;  %v6397_v39 = vld [vmem:[%s7207_s27 + $0x544] sm:$0xf0]  ;;  %v5590_v46 = vld [vmem:[%s7207_s27 + $0x430] sm:$0xf] }
 0x175   : > { %4437 = vmatpush.bf16.msrb.mxu2 %v5455_v19  ;;  %v5606_v19 = vld [vmem:[%s7207_s27 + $0x450] sm:$0xf]  ;;  %v5790_v40 = vld [vmem:[%s7207_s27 + $0x5c0] sm:$0xf]  ;;  %v6413_v41 = vld [vmem:[%s7207_s27 + $0x5c4] sm:$0xf0] }
 0x176   : > { %4451 = vmatpush.bf16.msrb.mxu3 %v5519_v23  ;;  %v6383_v23 = vld [vmem:[%s7207_s27 + $0x4d4] sm:$0xf0]  ;;  %v5607_v29 = vor.u32 %v6367_v20, %v5606_v19  ;;  %v5654_v48 = vld [vmem:[%s7207_s27 + $0x4b0] sm:$0xf]  ;;  %v5791_v50 = vor.u32 %v6413_v41, %v5790_v40  ;;  %v5582_v59 = vld [vmem:[%s7207_s27 + $0x420] sm:$0xf] }
 0x177   : > { %4410 = vmatpush.bf16.msrb.mxu0 %v5319_v31  ;;  %v5671_v30 = vor.u32 %v6383_v23, %v5670_v21  ;;  %v5735_v31 = vor.u32 %v6399_v25, %v5734_v24  ;;  %v6363_v47 = vld [vmem:[%s7207_s27 + $0x434] sm:$0xf0]  ;;  %v5718_v52 = vld [vmem:[%s7207_s27 + $0x530] sm:$0xf]  ;;  %v6377_v63 = vld [vmem:[%s7207_s27 + $0x4a4] sm:$0xf0] }
 0x178   : > { %4424 = vmatpush.bf16.msrb.mxu1 %v5383_v37  ;;  %v6381_v37 = vld [vmem:[%s7207_s27 + $0x4c4] sm:$0xf0]  ;;  %v6395_v53 = vld [vmem:[%s7207_s27 + $0x534] sm:$0xf0]  ;;  %v5782_v54 = vld [vmem:[%s7207_s27 + $0x5b0] sm:$0xf] }
 0x179   : > { %4438 = vmatpush.bf16.msrb.mxu2 %v5447_v38  ;;  %v5726_v38 = vld [vmem:[%s7207_s27 + $0x540] sm:$0xf]  ;;  %v5663_v44 = vor.u32 %v6381_v37, %v5662_v35  ;;  %v5719_v58 = vor.u32 %v6395_v53, %v5718_v52  ;;  %v6409_v3 = vld [vmem:[%s7207_s27 + $0x5a4] sm:$0xf0]  ;;  %v5574_v5 = vld [vmem:[%s7207_s27 + $0x410] sm:$0xf] }
 0x17a   : > { %4452 = vmatpush.bf16.msrb.mxu3 %v5511_v43  ;;  %v5599_v43 = vor.u32 %v6365_v34, %v5598_v32  ;;  %v5727_v45 = vor.u32 %v6397_v39, %v5726_v38  ;;  %v5710_v0 = vld [vmem:[%s7207_s27 + $0x520] sm:$0xf]  ;;  %v6359_v9 = vld [vmem:[%s7207_s27 + $0x414] sm:$0xf0]  ;;  %v5638_v10 = vld [vmem:[%s7207_s27 + $0x490] sm:$0xf] }
 0x17b   : > { %4411 = vmatpush.bf16.msrb.mxu0 %v5311_v51  ;;  %v6379_v51 = vld [vmem:[%s7207_s27 + $0x4b4] sm:$0xf0]  ;;  %v5566_v20 = vld [vmem:[%s7207_s27 + $0x400] sm:$0xf]  ;;  %v6357_v21 = vld [vmem:[%s7207_s27 + $0x404] sm:$0xf0] }
 0x17c   : > { %4425 = vmatpush.bf16.msrb.mxu1 %v5375_v55  ;;  %v6411_v55 = vld [vmem:[%s7207_s27 + $0x5b4] sm:$0xf0]  ;;  %v5655_v57 = vor.u32 %v6379_v51, %v5654_v48  ;;  %v5630_v23 = vld [vmem:[%s7207_s27 + $0x480] sm:$0xf]  ;;  %v6373_v24 = vld [vmem:[%s7207_s27 + $0x484] sm:$0xf0]  ;;  %v5567_v41 = vor.u32 %v6357_v21, %v5566_v20 }
 0x17d   : > { %4439 = vmatpush.bf16.msrb.mxu2 %v5439_v56  ;;  %v5591_v56 = vor.u32 %v6363_v47, %v5590_v46  ;;  %v5783_v62 = vor.u32 %v6411_v55, %v5782_v54  ;;  %v6375_v13 = vld [vmem:[%s7207_s27 + $0x494] sm:$0xf0]  ;;  %v5694_v25 = vld [vmem:[%s7207_s27 + $0x500] sm:$0xf]  ;;  %v6389_v27 = vld [vmem:[%s7207_s27 + $0x504] sm:$0xf0]  ;;  %v5631_v46 = vor.u32 %v6373_v24, %v5630_v23 }
 0x17e   : > { %4453 = vmatpush.bf16.msrb.mxu3 %v5503_v60  ;;  %4412 = vmatmul.bf16.vlgmr.msrb.gmra.mxu0 %v7408_v7  ;;  %v6361_v60 = vld [vmem:[%s7207_s27 + $0x424] sm:$0xf0]  ;;  %v6407_v19 = vld [vmem:[%s7207_s27 + $0x594] sm:$0xf0]  ;;  %v5639_v28 = vor.u32 %v6375_v13, %v5638_v10  ;;  %v5878_v32 = vld [vmem:[%s7207_s27 + $0x670] sm:$0xf]  ;;  %v5695_v47 = vor.u32 %v6389_v27, %v5694_v25 }
 0x17f   : > { %4460 = vmatpush.bf16.msra.mxu0 %v5623_v61  ;;  %4426 = vmatmul.bf16.vlgmr.msrb.gmra.mxu1 %v7415_v12  ;;  %v5646_v61 = vld [vmem:[%s7207_s27 + $0x4a0] sm:$0xf]  ;;  %v5583_v4 = vor.u32 %v6361_v60, %v5582_v59  ;;  %v6435_v35 = vld [vmem:[%s7207_s27 + $0x674] sm:$0xf0]  ;;  %v6006_v38 = vld [vmem:[%s7207_s27 + $0x770] sm:$0xf] }
 0x180   : > { %4474 = vmatpush.bf16.msra.mxu1 %v5687_v1  ;;  %4440 = vmatmul.bf16.vlgmr.msrb.gmra.mxu2 %v7413_v11  ;;  %v6393_v1 = vld [vmem:[%s7207_s27 + $0x524] sm:$0xf0]  ;;  %v6451_v37 = vld [vmem:[%s7207_s27 + $0x6f4] sm:$0xf0]  ;;  %v6070_v40 = vld [vmem:[%s7207_s27 + $0x7f0] sm:$0xf]  ;;  %v5879_v53 = vor.u32 %v6435_v35, %v5878_v32 }
 0x181   : > { %4488 = vmatpush.bf16.msra.mxu2 %v5751_v2  ;;  %4454 = vmatmul.bf16.vlgmr.msrb.gmra.mxu3 %v7419_v15  ;;  %v5774_v2 = vld [vmem:[%s7207_s27 + $0x5a0] sm:$0xf]  ;;  %v5711_v8 = vor.u32 %v6393_v1, %v5710_v0  ;;  %v6467_v39 = vld [vmem:[%s7207_s27 + $0x774] sm:$0xf0]  ;;  %v5022_v48 = vld [vmem:[%s8008_s0 + $0x28] sm:$0xf] }
 0x182   : > { %4502 = vmatpush.bf16.msra.mxu3 %v5815_v6  ;;  %v5647_v6 = vor.u32 %v6377_v63, %v5646_v61  ;;  %v5775_v14 = vor.u32 %v6409_v3, %v5774_v2  ;;  %v6214_v51 = vld [vmem:[%s8008_s0 + $0x24] sm:$0xf]  ;;  %v5016_v54 = vld [vmem:[%s8008_s0 + $0x68] sm:$0x30]  ;;  %v5870_v59 = vld [vmem:[%s7207_s27 + $0x660] sm:$0xf] }
 0x183   : > { %4461 = vmatpush.bf16.msra.mxu0 %v5615_v16  ;;  %v5702_v16 = vld [vmem:[%s7207_s27 + $0x510] sm:$0xf]  ;;  %v6215_v55 = vld [vmem:[%s8008_s0 + $0x2c] sm:$0xf]  ;;  %v6433_v60 = vld [vmem:[%s7207_s27 + $0x664] sm:$0xf0] }
 0x184   : > { %4475 = vmatpush.bf16.msra.mxu1 %v5679_v17  ;;  %v6391_v17 = vld [vmem:[%s7207_s27 + $0x514] sm:$0xf0]  ;;  %v5934_v61 = vld [vmem:[%s7207_s27 + $0x6e0] sm:$0xf]  ;;  %v6449_v0 = vld [vmem:[%s7207_s27 + $0x6e4] sm:$0xf0] }
 0x185   : > { %4489 = vmatpush.bf16.msra.mxu2 %v5743_v18  ;;  %v5766_v18 = vld [vmem:[%s7207_s27 + $0x590] sm:$0xf]  ;;  %v5998_v1 = vld [vmem:[%s7207_s27 + $0x760] sm:$0xf]  ;;  %v6465_v2 = vld [vmem:[%s7207_s27 + $0x764] sm:$0xf0]  ;;  %v5935_v10 = vor.u32 %v6449_v0, %v5934_v61 }
 0x186   : > { %4503 = vmatpush.bf16.msra.mxu3 %v5807_v22  ;;  %v5575_v22 = vor.u32 %v6359_v9, %v5574_v5  ;;  %v5767_v34 = vor.u32 %v6407_v19, %v5766_v18  ;;  %v6062_v5 = vld [vmem:[%s7207_s27 + $0x7e0] sm:$0xf]  ;;  %v5871_v9 = vor.u32 %v6433_v60, %v5870_v59  ;;  %v5999_v13 = vor.u32 %v6465_v2, %v5998_v1  ;;  %v6447_v19 = vld [vmem:[%s7207_s27 + $0x6d4] sm:$0xf0]  ;;  %v5990_v20 = vld [vmem:[%s7207_s27 + $0x750] sm:$0xf] }
 0x187   : > { %4462 = vmatpush.bf16.msra.mxu0 %v5607_v29  ;;  %v5703_v29 = vor.u32 %v6391_v17, %v5702_v16  ;;  %v6431_v16 = vld [vmem:[%s7207_s27 + $0x654] sm:$0xf0]  ;;  %v5926_v17 = vld [vmem:[%s7207_s27 + $0x6d0] sm:$0xf]  ;;  %v6445_v32 = vld [vmem:[%s7207_s27 + $0x6c4] sm:$0xf0] }
 0x188   : > { %4476 = vmatpush.bf16.msra.mxu1 %v5671_v30  ;;  %v5758_v30 = vld [vmem:[%s7207_s27 + $0x580] sm:$0xf]  ;;  %v6463_v21 = vld [vmem:[%s7207_s27 + $0x754] sm:$0xf0]  ;;  %v5927_v25 = vor.u32 %v6447_v19, %v5926_v17  ;;  %v6461_v35 = vld [vmem:[%s7207_s27 + $0x744] sm:$0xf0] }
 0x189   : > { %4490 = vmatpush.bf16.msra.mxu2 %v5735_v31  ;;  %v6405_v31 = vld [vmem:[%s7207_s27 + $0x584] sm:$0xf0]  ;;  %v6479_v23 = vld [vmem:[%s7207_s27 + $0x7d4] sm:$0xf0]  ;;  %v5991_v27 = vor.u32 %v6463_v21, %v5990_v20  ;;  %v5966_v60 = vld [vmem:[%s7207_s27 + $0x720] sm:$0xf] }
 0x18a   : > { %4504 = vmatpush.bf16.msra.mxu3 %v5799_v36  ;;  %v5942_v36 = vld [vmem:[%s7207_s27 + $0x6f0] sm:$0xf]  ;;  %v5759_v52 = vor.u32 %v6405_v31, %v5758_v30  ;;  %v5918_v30 = vld [vmem:[%s7207_s27 + $0x6c0] sm:$0xf]  ;;  %v6441_v59 = vld [vmem:[%s7207_s27 + $0x6a4] sm:$0xf0] }
 0x18b   : > { %4463 = vmatpush.bf16.msra.mxu0 %v5599_v43  ;;  %v6483_v43 = vld [vmem:[%s7207_s27 + $0x7f4] sm:$0xf0]  ;;  %v6457_v61 = vld [vmem:[%s7207_s27 + $0x724] sm:$0xf0]  ;;  %v5830_v2 = vld [vmem:[%s7207_s27 + $0x610] sm:$0xf] }
 0x18c   : > { %4477 = vmatpush.bf16.msra.mxu1 %v5663_v44  ;;  %v5014_v44 = vld [vmem:[%s8008_s0 + $0x20] sm:$0xf]  ;;  %v6473_v0 = vld [vmem:[%s7207_s27 + $0x7a4] sm:$0xf0]  ;;  %v6455_v17 = vld [vmem:[%s7207_s27 + $0x714] sm:$0xf0] }
 0x18d   : > { %4491 = vmatpush.bf16.msra.mxu2 %v5727_v45  ;;  %v6223_v45 = vld [vmem:[%s8008_s0 + $0x64] sm:$0x30]  ;;  %v6471_v19 = vld [vmem:[%s7207_s27 + $0x794] sm:$0xf0]  ;;  %v5822_v20 = vld [vmem:[%s7207_s27 + $0x600] sm:$0xf] }
 0x18e   : > { %4505 = vmatpush.bf16.msra.mxu3 %v5791_v50  ;;  %v6224_v50 = vld [vmem:[%s8008_s0 + $0x6c] sm:$0x30]  ;;  %v7508_v63 = vor.u32 %v6223_v45, %v5014_v44  ;;  %v6421_v21 = vld [vmem:[%s7207_s27 + $0x604] sm:$0xf0]  ;;  %s6516_s9 = sshll.u32 (%p6612_p5), %s4972_s12, 3 }
 0x18f   : > { %4464 = vmatpush.bf16.msra.mxu0 %v5591_v56  ;;  %v5024_v56 = vld [vmem:[%s8008_s0 + $0x70] sm:$0x30]  ;;  %v7513_v3 = vor.u32 %v6224_v50, %v5022_v48  ;;  %v5910_v44 = vld [vmem:[%s7207_s27 + $0x6b0] sm:$0xf]  ;;  %v6459_v48 = vld [vmem:[%s7207_s27 + $0x734] sm:$0xf0]  ;;  %s4869_s24 = scalar_lea.vmem (%p6612_p5), %s8010_s2, %s6516_s9 }
 0x190   : > { %4478 = vmatpush.bf16.msra.mxu1 %v5655_v57  ;;  %v5943_v57 = vor.u32 %v6451_v37, %v5942_v36  ;;  %v6046_v36 = vld [vmem:[%s7207_s27 + $0x7c0] sm:$0xf]  ;;  %v6477_v37 = vld [vmem:[%s7207_s27 + $0x7c4] sm:$0xf0]  ;;  %v6038_v50 = vld [vmem:[%s7207_s27 + $0x7b0] sm:$0xf] }
 0x191   : > { %4492 = vmatpush.bf16.msra.mxu2 %v5719_v58  ;;  %v6007_v58 = vor.u32 %v6467_v39, %v6006_v38  ;;  %v5919_v39 = vor.u32 %v6445_v32, %v5918_v30  ;;  %v6047_v45 = vor.u32 %v6477_v37, %v6046_v36  ;;  %v6014_v30 = vld [vmem:[%s7207_s27 + $0x780] sm:$0xf]  ;;  %v6134_v32 = vld [vmem:[%s7207_s27 + $0x870] sm:$0xf]  ;;  %v6515_v37 = vld [vmem:[%s7207_s27 + $0x8f4] sm:$0xf0] }
 0x192   : > { %4506 = vmatpush.bf16.msra.mxu3 %v5783_v62  ;;  %v6071_v62 = vor.u32 %v6483_v43, %v6070_v40  ;;  %v6427_v43 = vld [vmem:[%s7207_s27 + $0x634] sm:$0xf0]  ;;  %v6198_v36 = vld [vmem:[%s7207_s27 + $0x8f0] sm:$0xf] }
 0x193   : > { %4465 = vmatpush.bf16.msra.mxu0 %v5583_v4  ;;  %v7515_v4 = vor.u32 %v6214_v51, %v5016_v54  ;;  %v6475_v51 = vld [vmem:[%s7207_s27 + $0x7b4] sm:$0xf0] }
 0x194   : > { %4479 = vmatpush.bf16.msra.mxu1 %v5647_v6  ;;  %v6481_v6 = vld [vmem:[%s7207_s27 + $0x7e4] sm:$0xf0] }
 0x195   : > { %4493 = vmatpush.bf16.msra.mxu2 %v5711_v8  ;;  %v7519_v8 = vor.u32 %v6215_v55, %v5024_v56  ;;  %v6063_v18 = vor.u32 %v6481_v6, %v6062_v5  ;;  %v5838_v55 = vld [vmem:[%s7207_s27 + $0x620] sm:$0xf]  ;;  %v6425_v56 = vld [vmem:[%s7207_s27 + $0x624] sm:$0xf0]  ;;  %v5967_v6 = vor.u32 %v6457_v61, %v5966_v60 }
 0x196   : > { %4507 = vmatpush.bf16.msra.mxu3 %v5775_v14  ;;  %v5862_v14 = vld [vmem:[%s7207_s27 + $0x650] sm:$0xf]  ;;  %v5839_v1 = vor.u32 %v6425_v56, %v5838_v55  ;;  %v6217_v55 = vld [vmem:[%s8008_s0 + $0x3c] sm:$0xf]  ;;  %v5040_v56 = vld [vmem:[%s8008_s0 + $0x80] sm:$0x30] }
 0x197   : > { %4466 = vmatpush.bf16.msra.mxu0 %v5575_v22  ;;  %v6054_v22 = vld [vmem:[%s7207_s27 + $0x7d0] sm:$0xf]  ;;  %v5863_v24 = vor.u32 %v6431_v16, %v5862_v14  ;;  %v6497_v60 = vld [vmem:[%s7207_s27 + $0x864] sm:$0xf0]  ;;  %v6190_v61 = vld [vmem:[%s7207_s27 + $0x8e0] sm:$0xf] }
 0x198   : > { %4480 = vmatpush.bf16.msra.mxu1 %v5639_v28  ;;  %v5854_v28 = vld [vmem:[%s7207_s27 + $0x640] sm:$0xf]  ;;  %v6055_v31 = vor.u32 %v6479_v23, %v6054_v22  ;;  %v5958_v16 = vld [vmem:[%s7207_s27 + $0x710] sm:$0xf] }
 0x199   : > { %4494 = vmatpush.bf16.msra.mxu2 %v5703_v29  ;;  %v6429_v29 = vld [vmem:[%s7207_s27 + $0x644] sm:$0xf0]  ;;  %v5886_v23 = vld [vmem:[%s7207_s27 + $0x680] sm:$0xf] }
 0x19a   : > { %4508 = vmatpush.bf16.msra.mxu3 %v5767_v34  ;;  %v5982_v34 = vld [vmem:[%s7207_s27 + $0x740] sm:$0xf]  ;;  %v5855_v38 = vor.u32 %v6429_v29, %v5854_v28  ;;  %v5959_v29 = vor.u32 %v6455_v17, %v5958_v16 }
 0x19b   : > { %4467 = vmatpush.bf16.msra.mxu0 %v5567_v41  ;;  %v5983_v40 = vor.u32 %v6461_v35, %v5982_v34  ;;  %v5846_v41 = vld [vmem:[%s7207_s27 + $0x630] sm:$0xf]  ;;  %v6499_v35 = vld [vmem:[%s7207_s27 + $0x874] sm:$0xf0] }
 0x19c   : > { %4481 = vmatpush.bf16.msra.mxu1 %v5631_v46  ;;  %v6443_v46 = vld [vmem:[%s7207_s27 + $0x6b4] sm:$0xf0] }
 0x19d   : > { %4495 = vmatpush.bf16.msra.mxu2 %v5695_v47  ;;  %v5974_v47 = vld [vmem:[%s7207_s27 + $0x730] sm:$0xf] }
 0x19e   : > { %4509 = vmatpush.bf16.msra.mxu3 %v5759_v52  ;;  %4468 = vmatmul.bf16.vlgmr.msra.gmra.mxu0 %v7508_v63  ;;  %v5847_v52 = vor.u32 %v6427_v43, %v5846_v41  ;;  %v5975_v54 = vor.u32 %v6459_v48, %v5974_v47  ;;  %v5823_v41 = vor.u32 %v6421_v21, %v5822_v20  ;;  %v5176_v43 = vld [vmem:[%s7207_s27 + $0xf8] sm:$0xf0]  ;;  %v5038_v48 = vld [vmem:[%s8008_s0 + $0x38] sm:$0xf]  ;;  %v6182_v21 = vld [vmem:[%s7207_s27 + $0x8d0] sm:$0xf] }
 0x19f   : > { %4516 = vmatpush.bf16.msrb.mxu0 %v5879_v53  ;;  %4482 = vmatmul.bf16.vlgmr.msra.gmra.mxu1 %v7515_v4  ;;  %v5911_v53 = vor.u32 %v6443_v46, %v5910_v44  ;;  %v5030_v44 = vld [vmem:[%s8008_s0 + $0x30] sm:$0xf]  ;;  %v6495_v20 = vld [vmem:[%s7207_s27 + $0x854] sm:$0xf0] }
 0x1a0   : > { %4530 = vmatpush.bf16.msrb.mxu1 %v5943_v57  ;;  %4496 = vmatmul.bf16.vlgmr.msra.gmra.mxu2 %v7513_v3  ;;  %v5902_v57 = vld [vmem:[%s7207_s27 + $0x6a0] sm:$0xf] }
 0x1a1   : > { %4544 = vmatpush.bf16.msrb.mxu2 %v6007_v58  ;;  %4510 = vmatmul.bf16.vlgmr.msra.gmra.mxu3 %v7519_v8  ;;  %v6039_v58 = vor.u32 %v6475_v51, %v6038_v50  ;;  %v5903_v5 = vor.u32 %v6441_v59, %v5902_v57  ;;  %v6226_v50 = vld [vmem:[%s8008_s0 + $0x7c] sm:$0x30]  ;;  %v6216_v51 = vld [vmem:[%s8008_s0 + $0x34] sm:$0xf]  ;;  %v6199_v57 = vor.u32 %v6515_v37, %v6198_v36  ;;  %v6509_v37 = vld [vmem:[%s7207_s27 + $0x8c4] sm:$0xf0] }
 0x1a2   : > { %4558 = vmatpush.bf16.msrb.mxu3 %v6071_v62  ;;  %v6030_v62 = vld [vmem:[%s7207_s27 + $0x7a0] sm:$0xf] }
 0x1a3   : > { %4517 = vmatpush.bf16.msrb.mxu0 %v5871_v9  ;;  %v6423_v9 = vld [vmem:[%s7207_s27 + $0x614] sm:$0xf0]  ;;  %v6031_v14 = vor.u32 %v6473_v0, %v6030_v62  ;;  %v6126_v59 = vld [vmem:[%s7207_s27 + $0x860] sm:$0xf] }
 0x1a4   : > { %4531 = vmatpush.bf16.msrb.mxu1 %v5935_v10  ;;  %v5894_v10 = vld [vmem:[%s7207_s27 + $0x690] sm:$0xf]  ;;  %v5831_v22 = vor.u32 %v6423_v9, %v5830_v2  ;;  %v6240_v2 = vld [vmem:[%s7207_s27 + $0x64] sm:$0xf]  ;;  %v6127_v16 = vor.u32 %v6497_v60, %v6126_v59  ;;  %v6094_v59 = vld [vmem:[%s7207_s27 + $0x820] sm:$0xf] }
 0x1a5   : > { %4545 = vmatpush.bf16.msrb.mxu2 %v5999_v13  ;;  %v6439_v13 = vld [vmem:[%s7207_s27 + $0x694] sm:$0xf0]  ;;  %v6489_v60 = vld [vmem:[%s7207_s27 + $0x824] sm:$0xf0] }
 0x1a6   : > { %4559 = vmatpush.bf16.msrb.mxu3 %v6063_v18  ;;  %v6022_v18 = vld [vmem:[%s7207_s27 + $0x790] sm:$0xf]  ;;  %v5895_v28 = vor.u32 %v6439_v13, %v5894_v10  ;;  %v6256_v10 = vld [vmem:[%s7207_s27 + $0xe4] sm:$0xf]  ;;  %v5168_v13 = vld [vmem:[%s7207_s27 + $0xe8] sm:$0xf0] }
 0x1a7   : > { %4518 = vmatpush.bf16.msrb.mxu0 %v5863_v24  ;;  %v6437_v24 = vld [vmem:[%s7207_s27 + $0x684] sm:$0xf0]  ;;  %v6023_v34 = vor.u32 %v6471_v19, %v6022_v18  ;;  %v6118_v19 = vld [vmem:[%s7207_s27 + $0x850] sm:$0xf] }
 0x1a8   : > { %4532 = vmatpush.bf16.msrb.mxu1 %v5927_v25  ;;  %v5950_v25 = vld [vmem:[%s7207_s27 + $0x700] sm:$0xf]  ;;  %v5887_v46 = vor.u32 %v6437_v24, %v5886_v23  ;;  %v6511_v23 = vld [vmem:[%s7207_s27 + $0x8d4] sm:$0xf0]  ;;  %v6238_v24 = vld [vmem:[%s7207_s27 + $0x54] sm:$0xf] }
 0x1a9   : > { %4546 = vmatpush.bf16.msrb.mxu2 %v5991_v27  ;;  %v6453_v27 = vld [vmem:[%s7207_s27 + $0x704] sm:$0xf0] }
 0x1aa   : > { %4560 = vmatpush.bf16.msrb.mxu3 %v6055_v31  ;;  %v6469_v31 = vld [vmem:[%s7207_s27 + $0x784] sm:$0xf0]  ;;  %v5951_v47 = vor.u32 %v6453_v27, %v5950_v25  ;;  %v5096_v25 = vld [vmem:[%s7207_s27 + $0x58] sm:$0xf0]  ;;  %v6254_v27 = vld [vmem:[%s7207_s27 + $0xd4] sm:$0xf] }
 0x1ab   : > { %4519 = vmatpush.bf16.msrb.mxu0 %v5855_v38  ;;  %v6242_v38 = vld [vmem:[%s7207_s27 + $0x74] sm:$0xf] }
 0x1ac   : > { %4533 = vmatpush.bf16.msrb.mxu1 %v5919_v39  ;;  %v5112_v39 = vld [vmem:[%s7207_s27 + $0x78] sm:$0xf0] }
 0x1ad   : > { %4547 = vmatpush.bf16.msrb.mxu2 %v5983_v40  ;;  %v6258_v40 = vld [vmem:[%s7207_s27 + $0xf4] sm:$0xf] }
 0x1ae   : > { %4561 = vmatpush.bf16.msrb.mxu3 %v6047_v45  ;;  %v6225_v45 = vld [vmem:[%s8008_s0 + $0x74] sm:$0x30]  ;;  %v5179_v62 = vor.u32 %v6258_v40, %v5176_v43  ;;  %v6252_v40 = vld [vmem:[%s7207_s27 + $0xc4] sm:$0xf] }
 0x1af   : > { %4520 = vmatpush.bf16.msrb.mxu0 %v5847_v52  ;;  %v6015_v52 = vor.u32 %v6469_v31, %v6014_v30  ;;  %v7608_v0 = vor.u32 %v6225_v45, %v5030_v44  ;;  %v6183_v30 = vor.u32 %v6511_v23, %v6182_v21  ;;  %v5099_v31 = vor.u32 %v6238_v24, %v5096_v25  ;;  %v6150_v21 = vld [vmem:[%s7207_s27 + $0x890] sm:$0xf]  ;;  %v6503_v23 = vld [vmem:[%s7207_s27 + $0x894] sm:$0xf0]  ;;  %v6230_v24 = vld [vmem:[%s7207_s27 + $0x14] sm:$0xf] }
 0x1b0   : > { %4534 = vmatpush.bf16.msrb.mxu1 %v5911_v53  ;;  %v6135_v53 = vor.u32 %v6499_v35, %v6134_v32  ;;  %v6110_v32 = vld [vmem:[%s7207_s27 + $0x840] sm:$0xf]  ;;  %v5064_v25 = vld [vmem:[%s7207_s27 + $0x18] sm:$0xf0] }
 0x1b1   : > { %4548 = vmatpush.bf16.msrb.mxu2 %v5975_v54  ;;  %v5032_v54 = vld [vmem:[%s8008_s0 + $0x78] sm:$0x30]  ;;  %v6174_v35 = vld [vmem:[%s7207_s27 + $0x8c0] sm:$0xf] }
 0x1b2   : > { %4562 = vmatpush.bf16.msrb.mxu3 %v6039_v58  ;;  %v5115_v58 = vor.u32 %v6242_v38, %v5112_v39  ;;  %v7615_v9 = vor.u32 %v6216_v51, %v5032_v54  ;;  %v6236_v38 = vld [vmem:[%s7207_s27 + $0x44] sm:$0xf]  ;;  %v5088_v39 = vld [vmem:[%s7207_s27 + $0x48] sm:$0xf0]  ;;  %v6175_v44 = vor.u32 %v6509_v37, %v6174_v35  ;;  %v6507_v51 = vld [vmem:[%s7207_s27 + $0x8b4] sm:$0xf0]  ;;  %v5067_v35 = vor.u32 %v6230_v24, %v5064_v25 }
 0x1b3   : > { %4521 = vmatpush.bf16.msrb.mxu0 %v5839_v1  ;;  %v6513_v1 = vld [vmem:[%s7207_s27 + $0x8e4] sm:$0xf0]  ;;  %v5091_v45 = vor.u32 %v6236_v38, %v5088_v39  ;;  %v6250_v54 = vld [vmem:[%s7207_s27 + $0xb4] sm:$0xf]  ;;  %v6228_v37 = vld [vmem:[%s7207_s27 + $0x4] sm:$0xf] }
 0x1b4   : > { %4535 = vmatpush.bf16.msrb.mxu1 %v5903_v5  ;;  %v5104_v5 = vld [vmem:[%s7207_s27 + $0x68] sm:$0xf0]  ;;  %v6191_v17 = vor.u32 %v6513_v1, %v6190_v61  ;;  %v6158_v61 = vld [vmem:[%s7207_s27 + $0x8a0] sm:$0xf]  ;;  %v6505_v1 = vld [vmem:[%s7207_s27 + $0x8a4] sm:$0xf0] }
 0x1b5   : > { %4549 = vmatpush.bf16.msrb.mxu2 %v5967_v6  ;;  %v7613_v6 = vor.u32 %v6226_v50, %v5038_v48  ;;  %v5107_v18 = vor.u32 %v6240_v2, %v5104_v5  ;;  %v6166_v48 = vld [vmem:[%s7207_s27 + $0x8b0] sm:$0xf]  ;;  %v6232_v2 = vld [vmem:[%s7207_s27 + $0x24] sm:$0xf]  ;;  %v5072_v5 = vld [vmem:[%s7207_s27 + $0x28] sm:$0xf0] }
 0x1b6   : > { %4563 = vmatpush.bf16.msrb.mxu3 %v6031_v14  ;;  %v7619_v14 = vor.u32 %v6217_v55, %v5040_v56  ;;  %v5144_v55 = vld [vmem:[%s7207_s27 + $0xb8] sm:$0xf0]  ;;  %v5056_v38 = vld [vmem:[%s7207_s27 + $0x8] sm:$0xf0]  ;;  %v6270_v25 = vld [vmem:[%s7207_s27 + $0x154] sm:$0xf] }
 0x1b7   : > { %4522 = vmatpush.bf16.msrb.mxu0 %v5831_v22  ;;  %v5171_v22 = vor.u32 %v6256_v10, %v5168_v13  ;;  %v6248_v10 = vld [vmem:[%s7207_s27 + $0xa4] sm:$0xf]  ;;  %v5136_v13 = vld [vmem:[%s7207_s27 + $0xa8] sm:$0xf0] }
 0x1b8   : > { %4536 = vmatpush.bf16.msrb.mxu1 %v5895_v28  ;;  %v5160_v28 = vld [vmem:[%s7207_s27 + $0xd8] sm:$0xf0] }
 0x1b9   : > { %4550 = vmatpush.bf16.msrb.mxu2 %v5959_v29  ;;  %v6119_v29 = vor.u32 %v6495_v20, %v6118_v19  ;;  %v5163_v36 = vor.u32 %v6254_v27, %v5160_v28  ;;  %v6086_v19 = vld [vmem:[%s7207_s27 + $0x810] sm:$0xf]  ;;  %v6487_v20 = vld [vmem:[%s7207_s27 + $0x814] sm:$0xf0]  ;;  %v6246_v27 = vld [vmem:[%s7207_s27 + $0x94] sm:$0xf] }
 0x1ba   : > { %4564 = vmatpush.bf16.msrb.mxu3 %v6023_v34  ;;  %v6493_v34 = vld [vmem:[%s7207_s27 + $0x844] sm:$0xf0]  ;;  %v5128_v28 = vld [vmem:[%s7207_s27 + $0x98] sm:$0xf0] }
 0x1bb   : > { %4523 = vmatpush.bf16.msrb.mxu0 %v5823_v41  ;;  %v5152_v41 = vld [vmem:[%s7207_s27 + $0xc8] sm:$0xf0]  ;;  %v6111_v43 = vor.u32 %v6493_v34, %v6110_v32  ;;  %v6142_v32 = vld [vmem:[%s7207_s27 + $0x880] sm:$0xf]  ;;  %v6151_v34 = vor.u32 %v6503_v23, %v6150_v21  ;;  %v5131_v39 = vor.u32 %v6246_v27, %v5128_v28  ;;  %v5224_v27 = vld [vmem:[%s7207_s27 + $0x158] sm:$0xf0] }
 0x1bc   : > { %4537 = vmatpush.bf16.msrb.mxu1 %v5887_v46  ;;  %v6102_v46 = vld [vmem:[%s7207_s27 + $0x830] sm:$0xf]  ;;  %v5155_v50 = vor.u32 %v6252_v40, %v5152_v41  ;;  %v6244_v40 = vld [vmem:[%s7207_s27 + $0x84] sm:$0xf]  ;;  %v5120_v41 = vld [vmem:[%s7207_s27 + $0x88] sm:$0xf0] }
 0x1bd   : > { %4551 = vmatpush.bf16.msrb.mxu2 %v5951_v47  ;;  %v6491_v47 = vld [vmem:[%s7207_s27 + $0x834] sm:$0xf0]  ;;  %v5424_v21 = vld [vmem:[%s7207_s27 + $0x2e8] sm:$0xf0]  ;;  %v6286_v28 = vld [vmem:[%s7207_s27 + $0x1d4] sm:$0xf] }
 0x1be   : > { %4565 = vmatpush.bf16.msrb.mxu3 %v6015_v52  ;;  %4524 = vmatmul.bf16.vlgmr.msrb.gmra.mxu0 %v7608_v0  ;;  %v6234_v52 = vld [vmem:[%s7207_s27 + $0x34] sm:$0xf]  ;;  %v6103_v56 = vor.u32 %v6491_v47, %v6102_v46  ;;  %v5304_v46 = vld [vmem:[%s7207_s27 + $0x1f8] sm:$0xf0] }
 0x1bf   : > { %4572 = vmatpush.bf16.msra.mxu0 %v6135_v53  ;;  %4538 = vmatmul.bf16.vlgmr.msrb.gmra.mxu1 %v7615_v9  ;;  %v5080_v53 = vld [vmem:[%s7207_s27 + $0x38] sm:$0xf0] }
 0x1c0   : > { %4586 = vmatpush.bf16.msra.mxu1 %v6199_v57  ;;  %4552 = vmatmul.bf16.vlgmr.msrb.gmra.mxu2 %v7613_v6  ;;  %v6167_v57 = vor.u32 %v6507_v51, %v6166_v48  ;;  %v6306_v48 = vld [vmem:[%s7207_s27 + $0x274] sm:$0xf] }
 0x1c1   : > { %4600 = vmatpush.bf16.msra.mxu2 %v5115_v58  ;;  %4566 = vmatmul.bf16.vlgmr.msrb.gmra.mxu3 %v7619_v14  ;;  %v5083_v58 = vor.u32 %v6234_v52, %v5080_v53  ;;  %v6322_v51 = vld [vmem:[%s7207_s27 + $0x2f4] sm:$0xf]  ;;  %v5059_v53 = vor.u32 %v6228_v37, %v5056_v38 }
 0x1c2   : > { %4614 = vmatpush.bf16.msra.mxu3 %v5179_v62  ;;  %v5147_v62 = vor.u32 %v6250_v54, %v5144_v55  ;;  %v5432_v54 = vld [vmem:[%s7207_s27 + $0x2f8] sm:$0xf0]  ;;  %v5046_v55 = vld [vmem:[%s8008_s0 + $0x40] sm:$0xf] }
 0x1c3   : > { %4573 = vmatpush.bf16.msra.mxu0 %v6127_v16  ;;  %v6095_v16 = vor.u32 %v6489_v60, %v6094_v59  ;;  %v6218_v59 = vld [vmem:[%s8008_s0 + $0x44] sm:$0xf]  ;;  %v5048_v60 = vld [vmem:[%s8008_s0 + $0x88] sm:$0x30] }
 0x1c4   : > { %4587 = vmatpush.bf16.msra.mxu1 %v6191_v17  ;;  %v6159_v17 = vor.u32 %v6505_v1, %v6158_v61  ;;  %v6272_v1 = vld [vmem:[%s7207_s27 + $0x164] sm:$0xf] }
 0x1c5   : > { %4601 = vmatpush.bf16.msra.mxu2 %v5107_v18  ;;  %v5075_v18 = vor.u32 %v6232_v2, %v5072_v5  ;;  %v5232_v2 = vld [vmem:[%s7207_s27 + $0x168] sm:$0xf0]  ;;  %v6288_v5 = vld [vmem:[%s7207_s27 + $0x1e4] sm:$0xf] }
 0x1c6   : > { %4615 = vmatpush.bf16.msra.mxu3 %v5171_v22  ;;  %v5139_v22 = vor.u32 %v6248_v10, %v5136_v13  ;;  %v5435_v10 = vor.u32 %v6322_v51, %v5432_v54  ;;  %v6266_v51 = vld [vmem:[%s7207_s27 + $0x134] sm:$0xf] }
 0x1c7   : > { %4574 = vmatpush.bf16.msra.mxu0 %v6119_v29  ;;  %v6087_v29 = vor.u32 %v6487_v20, %v6086_v19  ;;  %v7701_v19 = vor.u32 %v6218_v59, %v5048_v60  ;;  %v6320_v20 = vld [vmem:[%s7207_s27 + $0x2e4] sm:$0xf]  ;;  %v6314_v59 = vld [vmem:[%s7207_s27 + $0x2b4] sm:$0xf]  ;;  %v5400_v60 = vld [vmem:[%s7207_s27 + $0x2b8] sm:$0xf0] }
 0x1c8   : > { %4588 = vmatpush.bf16.msra.mxu1 %v6183_v30  ;;  %v6078_v30 = vld [vmem:[%s7207_s27 + $0x800] sm:$0xf] }
 0x1c9   : > { %4602 = vmatpush.bf16.msra.mxu2 %v5099_v31  ;;  %v6485_v31 = vld [vmem:[%s7207_s27 + $0x804] sm:$0xf0] }
 0x1ca   : > { %4616 = vmatpush.bf16.msra.mxu3 %v5163_v36  ;;  %v6501_v36 = vld [vmem:[%s7207_s27 + $0x884] sm:$0xf0]  ;;  %v6079_v47 = vor.u32 %v6485_v31, %v6078_v30  ;;  %v5288_v30 = vld [vmem:[%s7207_s27 + $0x1d8] sm:$0xf0]  ;;  %v6302_v31 = vld [vmem:[%s7207_s27 + $0x254] sm:$0xf] }
 0x1cb   : > { %4575 = vmatpush.bf16.msra.mxu0 %v6111_v43  ;;  %v6274_v43 = vld [vmem:[%s7207_s27 + $0x174] sm:$0xf]  ;;  %v6143_v52 = vor.u32 %v6501_v36, %v6142_v32  ;;  %v5352_v32 = vld [vmem:[%s7207_s27 + $0x258] sm:$0xf0]  ;;  %v5227_v36 = vor.u32 %v6270_v25, %v5224_v27  ;;  %v5291_v37 = vor.u32 %v6286_v28, %v5288_v30  ;;  %v5392_v25 = vld [vmem:[%s7207_s27 + $0x2a8] sm:$0xf0] }
 0x1cc   : > { %4589 = vmatpush.bf16.msra.mxu1 %v6175_v44  ;;  %v5240_v44 = vld [vmem:[%s7207_s27 + $0x178] sm:$0xf0]  ;;  %v5355_v38 = vor.u32 %v6302_v31, %v5352_v32  ;;  %v6262_v31 = vld [vmem:[%s7207_s27 + $0x114] sm:$0xf] }
 0x1cd   : > { %4603 = vmatpush.bf16.msra.mxu2 %v5091_v45  ;;  %v6290_v45 = vld [vmem:[%s7207_s27 + $0x1f4] sm:$0xf]  ;;  %v5192_v32 = vld [vmem:[%s7207_s27 + $0x118] sm:$0xf0] }
 0x1ce   : > { %4617 = vmatpush.bf16.msra.mxu3 %v5155_v50  ;;  %v5368_v50 = vld [vmem:[%s7207_s27 + $0x278] sm:$0xf0]  ;;  %v5307_v61 = vor.u32 %v6290_v45, %v5304_v46  ;;  %v5344_v45 = vld [vmem:[%s7207_s27 + $0x248] sm:$0xf0]  ;;  %v6316_v46 = vld [vmem:[%s7207_s27 + $0x2c4] sm:$0xf] }
 0x1cf   : > { %4576 = vmatpush.bf16.msra.mxu0 %v6103_v56  ;;  %v6227_v56 = vld [vmem:[%s8008_s0 + $0x84] sm:$0x30] }
 0x1d0   : > { %4590 = vmatpush.bf16.msra.mxu1 %v6167_v57  ;;  %v5123_v57 = vor.u32 %v6244_v40, %v5120_v41  ;;  %v7696_v13 = vor.u32 %v6227_v56, %v5046_v55  ;;  %v5216_v40 = vld [vmem:[%s7207_s27 + $0x148] sm:$0xf0]  ;;  %v6284_v41 = vld [vmem:[%s7207_s27 + $0x1c4] sm:$0xf]  ;;  %v5272_v56 = vld [vmem:[%s7207_s27 + $0x1b8] sm:$0xf0] }
 0x1d1   : > { %4604 = vmatpush.bf16.msra.mxu2 %v5083_v58  ;;  %v5243_v58 = vor.u32 %v6274_v43, %v5240_v44  ;;  %v5280_v44 = vld [vmem:[%s7207_s27 + $0x1c8] sm:$0xf0] }
 0x1d2   : > { %4618 = vmatpush.bf16.msra.mxu3 %v5147_v62  ;;  %v5371_v62 = vor.u32 %v6306_v48, %v5368_v50  ;;  %v5283_v48 = vor.u32 %v6284_v41, %v5280_v44  ;;  %v5384_v41 = vld [vmem:[%s7207_s27 + $0x298] sm:$0xf0] }
 0x1d3   : > { %4577 = vmatpush.bf16.msra.mxu0 %v6095_v16  ;;  %v5296_v16 = vld [vmem:[%s7207_s27 + $0x1e8] sm:$0xf0] }
 0x1d4   : > { %4591 = vmatpush.bf16.msra.mxu1 %v6159_v17  ;;  %v6304_v17 = vld [vmem:[%s7207_s27 + $0x264] sm:$0xf]  ;;  %v5299_v23 = vor.u32 %v6288_v5, %v5296_v16  ;;  %v5200_v16 = vld [vmem:[%s7207_s27 + $0x128] sm:$0xf0] }
 0x1d5   : > { %4605 = vmatpush.bf16.msra.mxu2 %v5075_v18  ;;  %v5360_v18 = vld [vmem:[%s7207_s27 + $0x268] sm:$0xf0] }
 0x1d6   : > { %4619 = vmatpush.bf16.msra.mxu3 %v5139_v22  ;;  %v5235_v22 = vor.u32 %v6272_v1, %v5232_v2  ;;  %v5363_v24 = vor.u32 %v6304_v17, %v5360_v18  ;;  %v6280_v17 = vld [vmem:[%s7207_s27 + $0x1a4] sm:$0xf]  ;;  %v5403_v18 = vor.u32 %v6314_v59, %v5400_v60  ;;  %v6338_v59 = vld [vmem:[%s7207_s27 + $0x374] sm:$0xf]  ;;  %v5496_v60 = vld [vmem:[%s7207_s27 + $0x378] sm:$0xf0] }
 0x1d7   : > { %4578 = vmatpush.bf16.msra.mxu0 %v6087_v29  ;;  %v5427_v29 = vor.u32 %v6320_v20, %v5424_v21  ;;  %v5264_v20 = vld [vmem:[%s7207_s27 + $0x1a8] sm:$0xf0]  ;;  %v6296_v21 = vld [vmem:[%s7207_s27 + $0x224] sm:$0xf] }
 0x1d8   : > { %4592 = vmatpush.bf16.msra.mxu1 %v6151_v34  ;;  %v6318_v34 = vld [vmem:[%s7207_s27 + $0x2d4] sm:$0xf] }
 0x1d9   : > { %4606 = vmatpush.bf16.msra.mxu2 %v5067_v35  ;;  %v5416_v35 = vld [vmem:[%s7207_s27 + $0x2d8] sm:$0xf0] }
 0x1da   : > { %4620 = vmatpush.bf16.msra.mxu3 %v5131_v39  ;;  %v6268_v39 = vld [vmem:[%s7207_s27 + $0x144] sm:$0xf]  ;;  %v5419_v43 = vor.u32 %v6318_v34, %v5416_v35  ;;  %v6278_v34 = vld [vmem:[%s7207_s27 + $0x194] sm:$0xf] }
 0x1db   : > { %4579 = vmatpush.bf16.msra.mxu0 %v6079_v47  ;;  %v5219_v47 = vor.u32 %v6268_v39, %v5216_v40  ;;  %v4357_v54 = vpop.f32.mrf.mxu0  ;;  %v6310_v40 = vld [vmem:[%s7207_s27 + $0x294] sm:$0xf] }
 0x1dc   : > { %4593 = vmatpush.bf16.msra.mxu1 %v6143_v52  ;;  %v5208_v52 = vld [vmem:[%s7207_s27 + $0x138] sm:$0xf0] }
 0x1dd   : > { %4607 = vmatpush.bf16.msra.mxu2 %v5059_v53  ;;  %v6282_v53 = vld [vmem:[%s7207_s27 + $0x1b4] sm:$0xf] }
 0x1de   : > { %4621 = vmatpush.bf16.msra.mxu3 %v5123_v57  ;;  %4580 = vmatmul.bf16.vlgmr.msra.gmra.mxu0 %v7696_v13  ;;  %v6298_v57 = vld [vmem:[%s7207_s27 + $0x234] sm:$0xf]  ;;  %v5275_v2 = vor.u32 %v6282_v53, %v5272_v56  ;;  %v6292_v53 = vld [vmem:[%s7207_s27 + $0x204] sm:$0xf] }
 0x1df   : > { %4628 = vmatpush.bf16.msrb.mxu0 %v5243_v58  ;;  %4594 = vmatmul.bf16.vlgmr.msra.gmra.mxu1 %v7701_v19  ;;  %v5336_v58 = vld [vmem:[%s7207_s27 + $0x238] sm:$0xf0]  ;;  %v6308_v56 = vld [vmem:[%s7207_s27 + $0x284] sm:$0xf] }
 0x1e0   : > { %4642 = vmatpush.bf16.msrb.mxu1 %v5307_v61  ;;  %4608 = vmatmul.bf16.vlgmr.msra.gmra.mxu2 %v7300_v26  ;;  %v6300_v26 = vld [vmem:[%s7207_s27 + $0x244] sm:$0xf]  ;;  %v4371_v61 = vpop.f32.mrf.mxu1  ;;  %v5339_v5 = vor.u32 %v6298_v57, %v5336_v58  ;;  %v5376_v57 = vld [vmem:[%s7207_s27 + $0x288] sm:$0xf0] }
 0x1e1   : > { %4656 = vmatpush.bf16.msrb.mxu2 %v5371_v62  ;;  %4622 = vmatmul.bf16.vlgmr.msra.gmra.mxu3 %v7324_v42  ;;  %v5408_v42 = vld [vmem:[%s7207_s27 + $0x2c8] sm:$0xf0]  ;;  %v5347_v50 = vor.u32 %v6300_v26, %v5344_v45  ;;  %v5211_v62 = vor.u32 %v6266_v51, %v5208_v52  ;;  %v4372_v1 = vadd.f32 %v4371_v61, %v4357_v54  ;;  %v6276_v51 = vld [vmem:[%s7207_s27 + $0x184] sm:$0xf]  ;;  %v6354_v61 = vld [vmem:[%s7207_s27 + $0x3f4] sm:$0xf] }
 0x1e2   : > { %4670 = vmatpush.bf16.msrb.mxu3 %v5435_v10  ;;  %v5411_v55 = vor.u32 %v6316_v46, %v5408_v42  ;;  %v6264_v10 = vld [vmem:[%s7207_s27 + $0x124] sm:$0xf]  ;;  %v5195_v45 = vor.u32 %v6262_v31, %v5192_v32  ;;  %v5184_v42 = vld [vmem:[%s7207_s27 + $0x108] sm:$0xf0]  ;;  %v5387_v54 = vor.u32 %v6310_v40, %v5384_v41  ;;  %v6334_v41 = vld [vmem:[%s7207_s27 + $0x354] sm:$0xf] }
 0x1e3   : > { %4629 = vmatpush.bf16.msrb.mxu0 %v5235_v22  ;;  %v5328_v22 = vld [vmem:[%s7207_s27 + $0x228] sm:$0xf0]  ;;  %v5203_v28 = vor.u32 %v6264_v10, %v5200_v16  ;;  %v6260_v46 = vld [vmem:[%s7207_s27 + $0x104] sm:$0xf]  ;;  %v5624_v10 = vld [vmem:[%s7207_s27 + $0x478] sm:$0xf0] }
 0x1e4   : > { %4643 = vmatpush.bf16.msrb.mxu1 %v5299_v23  ;;  %v4385_v23 = vpop.f32.mrf.mxu2  ;;  %v5331_v30 = vor.u32 %v6296_v21, %v5328_v22  ;;  %v4399_v39 = vpop.f32.mrf.mxu3  ;;  %v5248_v52 = vld [vmem:[%s7207_s27 + $0x188] sm:$0xf0]  ;;  %v5379_v21 = vor.u32 %v6308_v56, %v5376_v57  ;;  %v5499_v22 = vor.u32 %v6338_v59, %v5496_v60  ;;  %v6364_v56 = vld [vmem:[%s7207_s27 + $0x444] sm:$0xf] }
 0x1e5   : > { %4657 = vmatpush.bf16.msrb.mxu2 %v5363_v24  ;;  %v6312_v24 = vld [vmem:[%s7207_s27 + $0x2a4] sm:$0xf]  ;;  %v4386_v27 = vadd.f32 %v4385_v23, %v4372_v1  ;;  %v5187_v1 = vor.u32 %v6260_v46, %v5184_v42  ;;  %v5251_v16 = vor.u32 %v6276_v51, %v5248_v52  ;;  %v5552_v32 = vld [vmem:[%s7207_s27 + $0x3e8] sm:$0xf0]  ;;  %v5544_v46 = vld [vmem:[%s7207_s27 + $0x3d8] sm:$0xf0] }
 0x1e6   : > { %4671 = vmatpush.bf16.msrb.mxu3 %v5427_v29  ;;  %v5267_v29 = vor.u32 %v6280_v17, %v5264_v20  ;;  %v5395_v35 = vor.u32 %v6312_v24, %v5392_v25  ;;  %v5688_v20 = vld [vmem:[%s7207_s27 + $0x4f8] sm:$0xf0]  ;;  %v6366_v42 = vld [vmem:[%s7207_s27 + $0x454] sm:$0xf]  ;;  %v5600_v57 = vld [vmem:[%s7207_s27 + $0x448] sm:$0xf0] }
 0x1e7   : > { %4630 = vmatpush.bf16.msrb.mxu0 %v5227_v36  ;;  %v5256_v36 = vld [vmem:[%s7207_s27 + $0x198] sm:$0xf0]  ;;  %v7749_v44 = vadd.f32 %v4399_v39, %v4386_v27  ;;  %v6336_v27 = vld [vmem:[%s7207_s27 + $0x364] sm:$0xf]  ;;  %v5664_v59 = vld [vmem:[%s7207_s27 + $0x4c8] sm:$0xf0] }
 0x1e8   : > { %4644 = vmatpush.bf16.msrb.mxu1 %v5291_v37  ;;  %v6294_v37 = vld [vmem:[%s7207_s27 + $0x214] sm:$0xf]  ;;  %v4373_v26 = vpop.f32.mrf.mxu1 }
 0x1e9   : > { %4658 = vmatpush.bf16.msrb.mxu2 %v5355_v38  ;;  %v5320_v38 = vld [vmem:[%s7207_s27 + $0x218] sm:$0xf0] }
 0x1ea   : > { %4672 = vmatpush.bf16.msrb.mxu3 %v5419_v43  ;;  %v4359_v43 = vpop.f32.mrf.mxu0 }
 0x1eb   : > { %4631 = vmatpush.bf16.msrb.mxu0 %v5219_v47  ;;  %v4374_v47 = vadd.f32 %v4373_v26, %v4359_v43  ;;  %v5480_v43 = vld [vmem:[%s7207_s27 + $0x358] sm:$0xf0]  ;;  %v6350_v26 = vld [vmem:[%s7207_s27 + $0x3d4] sm:$0xf] }
 0x1ec   : > { %4645 = vmatpush.bf16.msrb.mxu1 %v5283_v48  ;;  %v5259_v48 = vor.u32 %v6278_v34, %v5256_v36  ;;  %v4387_v58 = vpop.f32.mrf.mxu2  ;;  %v4401_v23 = vpop.f32.mrf.mxu3  ;;  %v6368_v34 = vld [vmem:[%s7207_s27 + $0x464] sm:$0xf]  ;;  %v5547_v51 = vor.u32 %v6350_v26, %v5544_v46 }
 0x1ed   : > { %4659 = vmatpush.bf16.msrb.mxu2 %v5347_v50  ;;  %v5323_v50 = vor.u32 %v6294_v37, %v5320_v38  ;;  %v6384_v36 = vld [vmem:[%s7207_s27 + $0x4e4] sm:$0xf]  ;;  %v5680_v37 = vld [vmem:[%s7207_s27 + $0x4e8] sm:$0xf0] }
 0x1ee   : > { %4673 = vmatpush.bf16.msrb.mxu3 %v5411_v55  ;;  %v5312_v55 = vld [vmem:[%s7207_s27 + $0x208] sm:$0xf0] }
 0x1ef   : > { %4632 = vmatpush.bf16.msrb.mxu0 %v5211_v62  ;;  %v4388_v62 = vadd.f32 %v4387_v58, %v4374_v47  ;;  %v5315_v17 = vor.u32 %v6292_v53, %v5312_v55  ;;  %v5608_v47 = vld [vmem:[%s7207_s27 + $0x458] sm:$0xf0]  ;;  %v6332_v53 = vld [vmem:[%s7207_s27 + $0x344] sm:$0xf]  ;;  %v5536_v55 = vld [vmem:[%s7207_s27 + $0x3c8] sm:$0xf0] }
 0x1f0   : > { %4646 = vmatpush.bf16.msrb.mxu1 %v5275_v2  ;;  %v5560_v2 = vld [vmem:[%s7207_s27 + $0x3f8] sm:$0xf0]  ;;  %v5611_v52 = vor.u32 %v6366_v42, %v5608_v47  ;;  %v6380_v58 = vld [vmem:[%s7207_s27 + $0x4c4] sm:$0xf] }
 0x1f1   : > { %4660 = vmatpush.bf16.msrb.mxu2 %v5339_v5  ;;  %v6370_v5 = vld [vmem:[%s7207_s27 + $0x474] sm:$0xf]  ;;  %v5563_v24 = vor.u32 %v6354_v61, %v5560_v2  ;;  %v5603_v2 = vor.u32 %v6364_v56, %v5600_v57  ;;  %v6324_v57 = vld [vmem:[%s7207_s27 + $0x304] sm:$0xf] }
 0x1f2   : > { %4674 = vmatpush.bf16.msrb.mxu3 %v5403_v18  ;;  %v6386_v18 = vld [vmem:[%s7207_s27 + $0x4f4] sm:$0xf]  ;;  %v5627_v25 = vor.u32 %v6370_v5, %v5624_v10  ;;  %v5464_v10 = vld [vmem:[%s7207_s27 + $0x338] sm:$0xf0] }
 0x1f3   : > { %4633 = vmatpush.bf16.msrb.mxu0 %v5203_v28  ;;  %v5488_v28 = vld [vmem:[%s7207_s27 + $0x368] sm:$0xf0]  ;;  %v5691_v31 = vor.u32 %v6386_v18, %v5688_v20  ;;  %v6330_v5 = vld [vmem:[%s7207_s27 + $0x334] sm:$0xf]  ;;  %v5528_v20 = vld [vmem:[%s7207_s27 + $0x3b8] sm:$0xf0] }
 0x1f4   : > { %4647 = vmatpush.bf16.msrb.mxu1 %v5267_v29  ;;  %v6352_v29 = vld [vmem:[%s7207_s27 + $0x3e4] sm:$0xf]  ;;  %v5491_v38 = vor.u32 %v6336_v27, %v5488_v28 }
 0x1f5   : > { %4661 = vmatpush.bf16.msrb.mxu2 %v5331_v30  ;;  %v7770_v30 = vadd.f32 %v4401_v23, %v4388_v62  ;;  %v5555_v39 = vor.u32 %v6352_v29, %v5552_v32  ;;  %v5656_v23 = vld [vmem:[%s7207_s27 + $0x4b8] sm:$0xf0]  ;;  %v6328_v28 = vld [vmem:[%s7207_s27 + $0x324] sm:$0xf]  ;;  %v5456_v29 = vld [vmem:[%s7207_s27 + $0x328] sm:$0xf0] }
 0x1f6   : > { %4675 = vmatpush.bf16.msrb.mxu3 %v5395_v35  ;;  %v5616_v35 = vld [vmem:[%s7207_s27 + $0x468] sm:$0xf0] }
 0x1f7   : > { %4634 = vmatpush.bf16.msrb.mxu0 %v5195_v45  ;;  %v5619_v40 = vor.u32 %v6368_v34, %v5616_v35  ;;  %v5683_v45 = vor.u32 %v6384_v36, %v5680_v37  ;;  %v5520_v35 = vld [vmem:[%s7207_s27 + $0x3a8] sm:$0xf0]  ;;  %v6360_v36 = vld [vmem:[%s7207_s27 + $0x424] sm:$0xf] }
 0x1f8   : > { %4648 = vmatpush.bf16.msrb.mxu1 %v5259_v48  ;;  %v6382_v48 = vld [vmem:[%s7207_s27 + $0x4d4] sm:$0xf]  ;;  %v5584_v37 = vld [vmem:[%s7207_s27 + $0x428] sm:$0xf0] }
 0x1f9   : > { %4662 = vmatpush.bf16.msrb.mxu2 %v5323_v50  ;;  %v5672_v50 = vld [vmem:[%s7207_s27 + $0x4d8] sm:$0xf0] }
 0x1fa   : > { %4676 = vmatpush.bf16.msrb.mxu3 %v5387_v54  ;;  %v5472_v54 = vld [vmem:[%s7207_s27 + $0x348] sm:$0xf0] }
 0x1fb   : > { %4635 = vmatpush.bf16.msrb.mxu0 %v5187_v1  ;;  %v5475_v61 = vor.u32 %v6332_v53, %v5472_v54  ;;  %v5512_v53 = vld [vmem:[%s7207_s27 + $0x398] sm:$0xf0]  ;;  %v6358_v54 = vld [vmem:[%s7207_s27 + $0x414] sm:$0xf] }
 0x1fc   : > { %4649 = vmatpush.bf16.msrb.mxu1 %v5251_v16  ;;  %v4427_v62 = vpop.f32.mrf.mxu1  ;;  %v6346_v16 = vld [vmem:[%s7207_s27 + $0x3b4] sm:$0xf] }
 0x1fd   : > { %4663 = vmatpush.bf16.msrb.mxu2 %v5315_v17  ;;  %v5667_v17 = vor.u32 %v6380_v58, %v5664_v59 }
 0x1fe   : > { %4677 = vmatpush.bf16.msrb.mxu3 %v5379_v21  ;;  %4636 = vmatmul.bf16.vlgmr.msrb.gmra.mxu0 %v7308_v33  ;;  %v5483_v33 = vor.u32 %v6334_v41, %v5480_v43  ;;  %v6362_v21 = vld [vmem:[%s7207_s27 + $0x434] sm:$0xf]  ;;  %v6376_v41 = vld [vmem:[%s7207_s27 + $0x4a4] sm:$0xf]  ;;  %v5648_v43 = vld [vmem:[%s7207_s27 + $0x4a8] sm:$0xf0] }
 0x1ff   : > { %4684 = vmatpush.bf16.msra.mxu0 %v5499_v22  ;;  %4650 = vmatmul.bf16.vlgmr.msrb.gmra.mxu1 %v7332_v49  ;;  %v5675_v49 = vor.u32 %v6382_v48, %v5672_v50  ;;  %v6378_v22 = vld [vmem:[%s7207_s27 + $0x4b4] sm:$0xf]  ;;  %v5587_v48 = vor.u32 %v6360_v36, %v5584_v37 }
 0x200   : > { %4698 = vmatpush.bf16.msra.mxu1 %v5563_v24  ;;  %4664 = vmatmul.bf16.vlgmr.msrb.gmra.mxu2 %v7408_v7  ;;  %v6348_v7 = vld [vmem:[%s7207_s27 + $0x3c4] sm:$0xf]  ;;  %v5467_v24 = vor.u32 %v6330_v5, %v5464_v10  ;;  %v5659_v32 = vor.u32 %v6378_v22, %v5656_v23  ;;  %v6326_v50 = vld [vmem:[%s7207_s27 + $0x314] sm:$0xf]  ;;  %v5568_v5 = vld [vmem:[%s7207_s27 + $0x408] sm:$0xf0] }
 0x201   : > { %4712 = vmatpush.bf16.msra.mxu2 %v5627_v25  ;;  %4678 = vmatmul.bf16.vlgmr.msrb.gmra.mxu3 %v7415_v12  ;;  %v4413_v12 = vpop.f32.mrf.mxu0  ;;  %v5539_v1 = vor.u32 %v6348_v7, %v5536_v55  ;;  %v5531_v25 = vor.u32 %v6346_v16, %v5528_v20  ;;  %v5576_v7 = vld [vmem:[%s7207_s27 + $0x418] sm:$0xf0]  ;;  %v6372_v10 = vld [vmem:[%s7207_s27 + $0x484] sm:$0xf]  ;;  %v5632_v16 = vld [vmem:[%s7207_s27 + $0x488] sm:$0xf0] }
 0x202   : > { %4726 = vmatpush.bf16.msra.mxu3 %v5691_v31  ;;  %v4414_v60 = vadd.f32 %v4413_v12, %v7749_v44  ;;  %v5592_v44 = vld [vmem:[%s7207_s27 + $0x438] sm:$0xf0]  ;;  %v6344_v31 = vld [vmem:[%s7207_s27 + $0x3a4] sm:$0xf]  ;;  %v5440_v12 = vld [vmem:[%s7207_s27 + $0x308] sm:$0xf0]  ;;  %v5579_v59 = vor.u32 %v6358_v54, %v5576_v7 }
 0x203   : > { %4685 = vmatpush.bf16.msra.mxu0 %v5491_v38  ;;  %v5595_v27 = vor.u32 %v6362_v21, %v5592_v44  ;;  %v4441_v34 = vpop.f32.mrf.mxu2  ;;  %v5523_v47 = vor.u32 %v6344_v31, %v5520_v35  ;;  %v5640_v55 = vld [vmem:[%s7207_s27 + $0x498] sm:$0xf0]  ;;  %v6402_v20 = vld [vmem:[%s7207_s27 + $0x574] sm:$0xf]  ;;  %v5443_v22 = vor.u32 %v6324_v57, %v5440_v12 }
 0x204   : > { %4699 = vmatpush.bf16.msra.mxu1 %v5555_v39  ;;  %v4428_v18 = vadd.f32 %v4427_v62, %v4414_v60  ;;  %v4429_v46 = vpop.f32.mrf.mxu1  ;;  %v6340_v60 = vld [vmem:[%s7207_s27 + $0x384] sm:$0xf]  ;;  %v5752_v21 = vld [vmem:[%s7207_s27 + $0x578] sm:$0xf0]  ;;  %v6418_v44 = vld [vmem:[%s7207_s27 + $0x5f4] sm:$0xf] }
 0x205   : > { %4713 = vmatpush.bf16.msra.mxu2 %v5619_v40  ;;  %v4455_v40 = vpop.f32.mrf.mxu3  ;;  %v6356_v62 = vld [vmem:[%s7207_s27 + $0x404] sm:$0xf]  ;;  %v5816_v23 = vld [vmem:[%s7207_s27 + $0x5f8] sm:$0xf0]  ;;  %v6450_v31 = vld [vmem:[%s7207_s27 + $0x6f4] sm:$0xf]  ;;  %v5755_v35 = vor.u32 %v6402_v20, %v5752_v21 }
 0x206   : > { %4727 = vmatpush.bf16.msra.mxu3 %v5683_v45  ;;  %v4442_v38 = vadd.f32 %v4441_v34, %v4428_v18  ;;  %v5459_v45 = vor.u32 %v6328_v28, %v5456_v29  ;;  %v5571_v29 = vor.u32 %v6356_v62, %v5568_v5  ;;  %v5635_v34 = vor.u32 %v6372_v10, %v5632_v16  ;;  %v5800_v54 = vld [vmem:[%s7207_s27 + $0x5d8] sm:$0xf0]  ;;  %v6430_v7 = vld [vmem:[%s7207_s27 + $0x654] sm:$0xf]  ;;  %v5856_v62 = vld [vmem:[%s7207_s27 + $0x648] sm:$0xf0] }
 0x207   : > { %4686 = vmatpush.bf16.msra.mxu0 %v5483_v33  ;;  %v5448_v33 = vld [vmem:[%s7207_s27 + $0x318] sm:$0xf0]  ;;  %v5819_v36 = vor.u32 %v6418_v44, %v5816_v23  ;;  %v6394_v20 = vld [vmem:[%s7207_s27 + $0x534] sm:$0xf] }
 0x208   : > { %4700 = vmatpush.bf16.msra.mxu1 %v5547_v51  ;;  %v7815_v42 = vadd.f32 %v4455_v40, %v4442_v38  ;;  %v6342_v51 = vld [vmem:[%s7207_s27 + $0x394] sm:$0xf]  ;;  %v5451_v56 = vor.u32 %v6326_v50, %v5448_v33  ;;  %v6400_v38 = vld [vmem:[%s7207_s27 + $0x564] sm:$0xf]  ;;  %v5720_v21 = vld [vmem:[%s7207_s27 + $0x538] sm:$0xf0] }
 0x209   : > { %4714 = vmatpush.bf16.msra.mxu2 %v5611_v52  ;;  %v4415_v39 = vpop.f32.mrf.mxu0  ;;  %v5651_v52 = vor.u32 %v6376_v41, %v5648_v43  ;;  %v5515_v58 = vor.u32 %v6342_v51, %v5512_v53  ;;  %v6416_v40 = vld [vmem:[%s7207_s27 + $0x5e4] sm:$0xf]  ;;  %v5808_v43 = vld [vmem:[%s7207_s27 + $0x5e8] sm:$0xf0]  ;;  %v6398_v51 = vld [vmem:[%s7207_s27 + $0x554] sm:$0xf] }
 0x20a   : > { %4728 = vmatpush.bf16.msra.mxu3 %v5675_v49  ;;  %v4416_v26 = vadd.f32 %v4415_v39, %v7770_v30  ;;  %v6374_v49 = vld [vmem:[%s7207_s27 + $0x494] sm:$0xf]  ;;  %v5744_v39 = vld [vmem:[%s7207_s27 + $0x568] sm:$0xf0]  ;;  %v5811_v50 = vor.u32 %v6416_v40, %v5808_v43 }
 0x20b   : > { %4687 = vmatpush.bf16.msra.mxu0 %v5475_v61  ;;  %v5504_v61 = vld [vmem:[%s7207_s27 + $0x388] sm:$0xf0]  ;;  %v6410_v44 = vld [vmem:[%s7207_s27 + $0x5b4] sm:$0xf] }
 0x20c   : > { %4701 = vmatpush.bf16.msra.mxu1 %v5539_v1  ;;  %v4430_v30 = vadd.f32 %v4429_v46, %v4416_v26  ;;  %v5643_v1 = vor.u32 %v6374_v49, %v5640_v55  ;;  %v5507_v28 = vor.u32 %v6340_v60, %v5504_v61  ;;  %v6432_v26 = vld [vmem:[%s7207_s27 + $0x664] sm:$0xf]  ;;  %v5864_v49 = vld [vmem:[%s7207_s27 + $0x658] sm:$0xf0]  ;;  %v6446_v55 = vld [vmem:[%s7207_s27 + $0x6d4] sm:$0xf] }
 0x20d   : > { %4715 = vmatpush.bf16.msra.mxu2 %v5603_v2  ;;  %v4443_v2 = vpop.f32.mrf.mxu2  ;;  %v4457_v18 = vpop.f32.mrf.mxu3  ;;  %v6448_v46 = vld [vmem:[%s7207_s27 + $0x6e4] sm:$0xf]  ;;  %v5867_v12 = vor.u32 %v6430_v7, %v5864_v49  ;;  %v5792_v60 = vld [vmem:[%s7207_s27 + $0x5c8] sm:$0xf0]  ;;  %v5704_v7 = vld [vmem:[%s7207_s27 + $0x518] sm:$0xf0] }
 0x20e   : > { %4729 = vmatpush.bf16.msra.mxu3 %v5667_v17  ;;  %v4444_v17 = vadd.f32 %v4443_v2, %v4430_v30  ;;  %v6414_v30 = vld [vmem:[%s7207_s27 + $0x5d4] sm:$0xf]  ;;  %v6428_v61 = vld [vmem:[%s7207_s27 + $0x644] sm:$0xf]  ;;  %v5920_v2 = vld [vmem:[%s7207_s27 + $0x6c8] sm:$0xf0] }
 0x20f   : > { %4688 = vmatpush.bf16.msra.mxu0 %v5467_v24  ;;  %v6434_v24 = vld [vmem:[%s7207_s27 + $0x674] sm:$0xf]  ;;  %v5803_v57 = vor.u32 %v6414_v30, %v5800_v54  ;;  %v5776_v40 = vld [vmem:[%s7207_s27 + $0x5a8] sm:$0xf0] }
 0x210   : > { %4702 = vmatpush.bf16.msra.mxu1 %v5531_v25  ;;  %v5880_v25 = vld [vmem:[%s7207_s27 + $0x678] sm:$0xf0]  ;;  %v5840_v43 = vld [vmem:[%s7207_s27 + $0x628] sm:$0xf0]  ;;  %v6390_v54 = vld [vmem:[%s7207_s27 + $0x514] sm:$0xf] }
 0x211   : > { %4716 = vmatpush.bf16.msra.mxu2 %v5595_v27  ;;  %v7839_v27 = vadd.f32 %v4457_v18, %v4444_v17  ;;  %v5883_v37 = vor.u32 %v6434_v24, %v5880_v25  ;;  %v5859_v18 = vor.u32 %v6428_v61, %v5856_v62  ;;  %v5784_v24 = vld [vmem:[%s7207_s27 + $0x5b8] sm:$0xf0]  ;;  %v6426_v25 = vld [vmem:[%s7207_s27 + $0x634] sm:$0xf]  ;;  %v6404_v62 = vld [vmem:[%s7207_s27 + $0x584] sm:$0xf] }
 0x212   : > { %4730 = vmatpush.bf16.msra.mxu3 %v5659_v32  ;;  %v5944_v32 = vld [vmem:[%s7207_s27 + $0x6f8] sm:$0xf0]  ;;  %v6406_v49 = vld [vmem:[%s7207_s27 + $0x594] sm:$0xf] }
 0x213   : > { %4689 = vmatpush.bf16.msra.mxu0 %v5459_v45  ;;  %v5947_v41 = vor.u32 %v6450_v31, %v5944_v32  ;;  %v5872_v45 = vld [vmem:[%s7207_s27 + $0x668] sm:$0xf0]  ;;  %v5723_v31 = vor.u32 %v6394_v20, %v5720_v21  ;;  %v5787_v32 = vor.u32 %v6410_v44, %v5784_v24  ;;  %v6466_v21 = vld [vmem:[%s7207_s27 + $0x774] sm:$0xf]  ;;  %v6008_v44 = vld [vmem:[%s7207_s27 + $0x778] sm:$0xf0] }
 0x214   : > { %4703 = vmatpush.bf16.msra.mxu1 %v5523_v47  ;;  %v5936_v47 = vld [vmem:[%s7207_s27 + $0x6e8] sm:$0xf0]  ;;  %v5875_v33 = vor.u32 %v6432_v26, %v5872_v45  ;;  %v6072_v24 = vld [vmem:[%s7207_s27 + $0x7f8] sm:$0xf0] }
 0x215   : > { %4717 = vmatpush.bf16.msra.mxu2 %v5587_v48  ;;  %v5747_v48 = vor.u32 %v6400_v38, %v5744_v39  ;;  %v5939_v53 = vor.u32 %v6448_v46, %v5936_v47  ;;  %v6440_v47 = vld [vmem:[%s7207_s27 + $0x6a4] sm:$0xf] }
 0x216   : > { %4731 = vmatpush.bf16.msra.mxu3 %v5651_v52  ;;  %v5736_v52 = vld [vmem:[%s7207_s27 + $0x558] sm:$0xf0] }
 0x217   : > { %4690 = vmatpush.bf16.msra.mxu0 %v5451_v56  ;;  %v5928_v56 = vld [vmem:[%s7207_s27 + $0x6d8] sm:$0xf0] }
 0x218   : > { %4704 = vmatpush.bf16.msra.mxu1 %v5515_v58  ;;  %v6396_v58 = vld [vmem:[%s7207_s27 + $0x544] sm:$0xf] }
 0x219   : > { %4718 = vmatpush.bf16.msra.mxu2 %v5579_v59  ;;  %v5728_v59 = vld [vmem:[%s7207_s27 + $0x548] sm:$0xf0] }
 0x21a   : > { %4732 = vmatpush.bf16.msra.mxu3 %v5643_v1  ;;  %v6444_v1 = vld [vmem:[%s7207_s27 + $0x6c4] sm:$0xf]  ;;  %v5731_v10 = vor.u32 %v6396_v58, %v5728_v59  ;;  %v5896_v58 = vld [vmem:[%s7207_s27 + $0x698] sm:$0xf0]  ;;  %v5707_v59 = vor.u32 %v6390_v54, %v5704_v7  ;;  %v6478_v54 = vld [vmem:[%s7207_s27 + $0x7d4] sm:$0xf] }
 0x21b   : > { %4691 = vmatpush.bf16.msra.mxu0 %v5443_v22  ;;  %v5923_v22 = vor.u32 %v6444_v1, %v5920_v2  ;;  %v6420_v1 = vld [vmem:[%s7207_s27 + $0x604] sm:$0xf] }
 0x21c   : > { %4705 = vmatpush.bf16.msra.mxu1 %v5507_v28  ;;  %v4483_v16 = vpop.f32.mrf.mxu1  ;;  %v6442_v28 = vld [vmem:[%s7207_s27 + $0x6b4] sm:$0xf] }
 0x21d   : > { %4719 = vmatpush.bf16.msra.mxu2 %v5571_v29  ;;  %v5912_v29 = vld [vmem:[%s7207_s27 + $0x6b8] sm:$0xf0] }
 0x21e   : > { %4733 = vmatpush.bf16.msra.mxu3 %v5635_v34  ;;  %4692 = vmatmul.bf16.vlgmr.msra.gmra.mxu0 %v7413_v11  ;;  %v5739_v11 = vor.u32 %v6398_v51, %v5736_v52  ;;  %v5915_v38 = vor.u32 %v6442_v28, %v5912_v29 }
 0x21f   : > { %4740 = vmatpush.bf16.msrb.mxu0 %v5755_v35  ;;  %4706 = vmatmul.bf16.vlgmr.msra.gmra.mxu1 %v7419_v15  ;;  %v5931_v15 = vor.u32 %v6446_v55, %v5928_v56  ;;  %v6392_v35 = vld [vmem:[%s7207_s27 + $0x524] sm:$0xf]  ;;  %v5768_v56 = vld [vmem:[%s7207_s27 + $0x598] sm:$0xf0] }
 0x220   : > { %4754 = vmatpush.bf16.msrb.mxu1 %v5819_v36  ;;  %4720 = vmatmul.bf16.vlgmr.msra.gmra.mxu2 %v7508_v63  ;;  %v6412_v63 = vld [vmem:[%s7207_s27 + $0x5c4] sm:$0xf]  ;;  %v5712_v36 = vld [vmem:[%s7207_s27 + $0x528] sm:$0xf0] }
 0x221   : > { %4768 = vmatpush.bf16.msrb.mxu2 %v5883_v37  ;;  %4734 = vmatmul.bf16.vlgmr.msra.gmra.mxu3 %v7515_v4  ;;  %v4469_v4 = vpop.f32.mrf.mxu0  ;;  %v5795_v17 = vor.u32 %v6412_v63, %v5792_v60  ;;  %v6408_v37 = vld [vmem:[%s7207_s27 + $0x5a4] sm:$0xf]  ;;  %v5771_v60 = vor.u32 %v6406_v49, %v5768_v56  ;;  %v6056_v49 = vld [vmem:[%s7207_s27 + $0x7d8] sm:$0xf0]  ;;  %v6510_v56 = vld [vmem:[%s7207_s27 + $0x8d4] sm:$0xf] }
 0x222   : > { %4782 = vmatpush.bf16.msrb.mxu3 %v5947_v41  ;;  %v4470_v5 = vadd.f32 %v4469_v4, %v7815_v42  ;;  %v5848_v42 = vld [vmem:[%s7207_s27 + $0x638] sm:$0xf0]  ;;  %v6424_v41 = vld [vmem:[%s7207_s27 + $0x624] sm:$0xf]  ;;  %v5779_v30 = vor.u32 %v6408_v37, %v5776_v40  ;;  %v5760_v4 = vld [vmem:[%s7207_s27 + $0x588] sm:$0xf0] }
 0x223   : > { %4741 = vmatpush.bf16.msrb.mxu0 %v5747_v48  ;;  %v5851_v34 = vor.u32 %v6426_v25, %v5848_v42  ;;  %v4497_v39 = vpop.f32.mrf.mxu2  ;;  %v5904_v48 = vld [vmem:[%s7207_s27 + $0x6a8] sm:$0xf0]  ;;  %v6388_v63 = vld [vmem:[%s7207_s27 + $0x504] sm:$0xf]  ;;  %v6498_v25 = vld [vmem:[%s7207_s27 + $0x874] sm:$0xf]  ;;  %v5763_v29 = vor.u32 %v6404_v62, %v5760_v4 }
 0x224   : > { %4755 = vmatpush.bf16.msrb.mxu1 %v5811_v50  ;;  %v4484_v23 = vadd.f32 %v4483_v16, %v4470_v5  ;;  %v4511_v46 = vpop.f32.mrf.mxu3  ;;  %v4485_v51 = vpop.f32.mrf.mxu1  ;;  %v5907_v55 = vor.u32 %v6440_v47, %v5904_v48  ;;  %v6436_v16 = vld [vmem:[%s7207_s27 + $0x684] sm:$0xf]  ;;  %v6136_v42 = vld [vmem:[%s7207_s27 + $0x878] sm:$0xf0]  ;;  %v6000_v40 = vld [vmem:[%s7207_s27 + $0x768] sm:$0xf0] }
 0x225   : > { %4769 = vmatpush.bf16.msrb.mxu2 %v5875_v33  ;;  %v5715_v33 = vor.u32 %v6392_v35, %v5712_v36  ;;  %v6011_v36 = vor.u32 %v6466_v21, %v6008_v44  ;;  %v6512_v47 = vld [vmem:[%s7207_s27 + $0x8e4] sm:$0xf]  ;;  %v6192_v48 = vld [vmem:[%s7207_s27 + $0x8e8] sm:$0xf0]  ;;  %v6040_v44 = vld [vmem:[%s7207_s27 + $0x7b8] sm:$0xf0] }
 0x226   : > { %4783 = vmatpush.bf16.msrb.mxu3 %v5939_v53  ;;  %v4498_v26 = vadd.f32 %v4497_v39, %v4484_v23  ;;  %v5843_v53 = vor.u32 %v6424_v41, %v5840_v43  ;;  %v6464_v39 = vld [vmem:[%s7207_s27 + $0x764] sm:$0xf]  ;;  %v6195_v7 = vor.u32 %v6512_v47, %v6192_v48  ;;  %v6176_v62 = vld [vmem:[%s7207_s27 + $0x8c8] sm:$0xf0] }
 0x227   : > { %4742 = vmatpush.bf16.msrb.mxu0 %v5739_v11  ;;  %v6422_v11 = vld [vmem:[%s7207_s27 + $0x614] sm:$0xf]  ;;  %v6480_v41 = vld [vmem:[%s7207_s27 + $0x7e4] sm:$0xf] }
 0x228   : > { %4756 = vmatpush.bf16.msrb.mxu1 %v5803_v57  ;;  %v7889_v52 = vadd.f32 %v4511_v46, %v4498_v26  ;;  %v5832_v57 = vld [vmem:[%s7207_s27 + $0x618] sm:$0xf0]  ;;  %v6064_v26 = vld [vmem:[%s7207_s27 + $0x7e8] sm:$0xf0] }
 0x229   : > { %4770 = vmatpush.bf16.msrb.mxu2 %v5867_v12  ;;  %v4471_v45 = vpop.f32.mrf.mxu0  ;;  %v6438_v12 = vld [vmem:[%s7207_s27 + $0x694] sm:$0xf]  ;;  %v5835_v61 = vor.u32 %v6422_v11, %v5832_v57  ;;  %v6128_v46 = vld [vmem:[%s7207_s27 + $0x868] sm:$0xf0]  ;;  %v6184_v11 = vld [vmem:[%s7207_s27 + $0x8d8] sm:$0xf0]  ;;  %v6059_v57 = vor.u32 %v6478_v54, %v6056_v49 }
 0x22a   : > { %4784 = vmatpush.bf16.msrb.mxu3 %v5931_v15  ;;  %v4472_v50 = vadd.f32 %v4471_v45, %v7839_v27  ;;  %v5696_v15 = vld [vmem:[%s7207_s27 + $0x508] sm:$0xf0]  ;;  %v5899_v2 = vor.u32 %v6438_v12, %v5896_v58  ;;  %v6496_v45 = vld [vmem:[%s7207_s27 + $0x864] sm:$0xf]  ;;  %v6470_v54 = vld [vmem:[%s7207_s27 + $0x794] sm:$0xf] }
 0x22b   : > { %4743 = vmatpush.bf16.msrb.mxu0 %v5731_v10  ;;  %v4499_v5 = vpop.f32.mrf.mxu2  ;;  %v5824_v10 = vld [vmem:[%s7207_s27 + $0x608] sm:$0xf0]  ;;  %v5699_v23 = vor.u32 %v6388_v63, %v5696_v15  ;;  %v6460_v58 = vld [vmem:[%s7207_s27 + $0x744] sm:$0xf] }
 0x22c   : > { %4757 = vmatpush.bf16.msrb.mxu1 %v5795_v17  ;;  %v4486_v27 = vadd.f32 %v4485_v51, %v4472_v50  ;;  %v5888_v17 = vld [vmem:[%s7207_s27 + $0x688] sm:$0xf0]  ;;  %v4513_v20 = vpop.f32.mrf.mxu3  ;;  %v6003_v50 = vor.u32 %v6464_v39, %v6000_v40  ;;  %v6131_v51 = vor.u32 %v6496_v45, %v6128_v46  ;;  %v6492_v15 = vld [vmem:[%s7207_s27 + $0x844] sm:$0xf] }
 0x22d   : > { %4771 = vmatpush.bf16.msrb.mxu2 %v5859_v18  ;;  %v5891_v35 = vor.u32 %v6436_v16, %v5888_v17  ;;  %v6048_v63 = vld [vmem:[%s7207_s27 + $0x7c8] sm:$0xf0]  ;;  %v6458_v16 = vld [vmem:[%s7207_s27 + $0x734] sm:$0xf]  ;;  %v5976_v17 = vld [vmem:[%s7207_s27 + $0x738] sm:$0xf0] }
 0x22e   : > { %4785 = vmatpush.bf16.msrb.mxu3 %v5923_v22  ;;  %v4500_v18 = vadd.f32 %v4499_v5, %v4486_v27  ;;  %v6482_v22 = vld [vmem:[%s7207_s27 + $0x7f4] sm:$0xf]  ;;  %v6120_v27 = vld [vmem:[%s7207_s27 + $0x858] sm:$0xf0]  ;;  %v6096_v39 = vld [vmem:[%s7207_s27 + $0x828] sm:$0xf0] }
 0x22f   : > { %4744 = vmatpush.bf16.msrb.mxu0 %v5723_v31  ;;  %v5827_v31 = vor.u32 %v6420_v1, %v5824_v10  ;;  %v6075_v37 = vor.u32 %v6482_v22, %v6072_v24  ;;  %v6490_v22 = vld [vmem:[%s7207_s27 + $0x834] sm:$0xf]  ;;  %v6168_v24 = vld [vmem:[%s7207_s27 + $0x8b8] sm:$0xf0]  ;;  %v6160_v45 = vld [vmem:[%s7207_s27 + $0x8a8] sm:$0xf0] }
 0x230   : > { %4758 = vmatpush.bf16.msrb.mxu1 %v5787_v32  ;;  %v7913_v28 = vadd.f32 %v4513_v20, %v4500_v18  ;;  %v6514_v32 = vld [vmem:[%s7207_s27 + $0x8f4] sm:$0xf] }
 0x231   : > { %4772 = vmatpush.bf16.msrb.mxu2 %v5851_v34  ;;  %v6200_v34 = vld [vmem:[%s7207_s27 + $0x8f8] sm:$0xf0]  ;;  %v6474_v18 = vld [vmem:[%s7207_s27 + $0x7b4] sm:$0xf] }
 0x232   : > { %4786 = vmatpush.bf16.msrb.mxu3 %v5915_v38  ;;  %v6139_v38 = vor.u32 %v6498_v25, %v6136_v42  ;;  %v6203_v43 = vor.u32 %v6514_v32, %v6200_v34  ;;  %v5979_v25 = vor.u32 %v6458_v16, %v5976_v17  ;;  %v6043_v42 = vor.u32 %v6474_v18, %v6040_v44  ;;  %v5968_v32 = vld [vmem:[%s7207_s27 + $0x728] sm:$0xf0]  ;;  %v6472_v34 = vld [vmem:[%s7207_s27 + $0x7a4] sm:$0xf] }
 0x233   : > { %4745 = vmatpush.bf16.msrb.mxu0 %v5715_v33  ;;  %v6067_v33 = vor.u32 %v6480_v41, %v6064_v26  ;;  %v6504_v26 = vld [vmem:[%s7207_s27 + $0x8a4] sm:$0xf] }
 0x234   : > { %4759 = vmatpush.bf16.msrb.mxu1 %v5779_v30  ;;  %v6462_v30 = vld [vmem:[%s7207_s27 + $0x754] sm:$0xf] }
 0x235   : > { %4773 = vmatpush.bf16.msrb.mxu2 %v5843_v53  ;;  %v5992_v53 = vld [vmem:[%s7207_s27 + $0x758] sm:$0xf0] }
 0x236   : > { %4787 = vmatpush.bf16.msrb.mxu3 %v5907_v55  ;;  %v6494_v55 = vld [vmem:[%s7207_s27 + $0x854] sm:$0xf] }
 0x237   : > { %4746 = vmatpush.bf16.msrb.mxu0 %v5707_v59  ;;  %v6123_v12 = vor.u32 %v6494_v55, %v6120_v27  ;;  %v5984_v59 = vld [vmem:[%s7207_s27 + $0x748] sm:$0xf0]  ;;  %v6486_v55 = vld [vmem:[%s7207_s27 + $0x814] sm:$0xf]  ;;  %v6088_v27 = vld [vmem:[%s7207_s27 + $0x818] sm:$0xf0] }
 0x238   : > { %4760 = vmatpush.bf16.msrb.mxu1 %v5771_v60  ;;  %v6112_v60 = vld [vmem:[%s7207_s27 + $0x848] sm:$0xf0]  ;;  %v5987_v1 = vor.u32 %v6460_v58, %v5984_v59  ;;  %v6452_v58 = vld [vmem:[%s7207_s27 + $0x704] sm:$0xf] }
 0x239   : > { %4774 = vmatpush.bf16.msrb.mxu2 %v5835_v61  ;;  %v6508_v61 = vld [vmem:[%s7207_s27 + $0x8c4] sm:$0xf]  ;;  %v6115_v10 = vor.u32 %v6492_v15, %v6112_v60  ;;  %v5952_v59 = vld [vmem:[%s7207_s27 + $0x708] sm:$0xf0] }
 0x23a   : > { %4788 = vmatpush.bf16.msrb.mxu3 %v5899_v2  ;;  %v6179_v20 = vor.u32 %v6508_v61, %v6176_v62  ;;  %v6016_v15 = vld [vmem:[%s7207_s27 + $0x788] sm:$0xf0]  ;;  %v6484_v60 = vld [vmem:[%s7207_s27 + $0x804] sm:$0xf] }
 0x23b   : > { %4747 = vmatpush.bf16.msrb.mxu0 %v5699_v23  ;;  %v6506_v23 = vld [vmem:[%s7207_s27 + $0x8b4] sm:$0xf] }
 0x23c   : > { %4761 = vmatpush.bf16.msrb.mxu1 %v5763_v29  ;;  %v4539_v2 = vpop.f32.mrf.mxu1 }
 0x23d   : > { %4775 = vmatpush.bf16.msrb.mxu2 %v5827_v31  ;;  %v6456_v31 = vld [vmem:[%s7207_s27 + $0x724] sm:$0xf] }
 0x23e   : > { %4789 = vmatpush.bf16.msrb.mxu3 %v5891_v35  ;;  %4748 = vmatmul.bf16.vlgmr.msrb.gmra.mxu0 %v7513_v3  ;;  %v5995_v3 = vor.u32 %v6462_v30, %v5992_v53  ;;  %v6171_v35 = vor.u32 %v6506_v23, %v6168_v24  ;;  %v5971_v47 = vor.u32 %v6456_v31, %v5968_v32  ;;  %v6454_v30 = vld [vmem:[%s7207_s27 + $0x714] sm:$0xf]  ;;  %v5960_v53 = vld [vmem:[%s7207_s27 + $0x718] sm:$0xf0] }
 0x23f   : > { %4796 = vmatpush.bf16.msra.mxu0 %v6011_v36  ;;  %4762 = vmatmul.bf16.vlgmr.msrb.gmra.mxu1 %v7519_v8  ;;  %v6187_v8 = vor.u32 %v6510_v56, %v6184_v11  ;;  %v6502_v56 = vld [vmem:[%s7207_s27 + $0x894] sm:$0xf]  ;;  %v6152_v11 = vld [vmem:[%s7207_s27 + $0x898] sm:$0xf0] }
 0x240   : > { %4810 = vmatpush.bf16.msra.mxu1 %v6075_v37  ;;  %4776 = vmatmul.bf16.vlgmr.msrb.gmra.mxu2 %v7608_v0  ;;  %v6476_v0 = vld [vmem:[%s7207_s27 + $0x7c4] sm:$0xf]  ;;  %v6032_v37 = vld [vmem:[%s7207_s27 + $0x7a8] sm:$0xf0] }
 0x241   : > { %4824 = vmatpush.bf16.msra.mxu2 %v6139_v38  ;;  %4790 = vmatmul.bf16.vlgmr.msrb.gmra.mxu3 %v7615_v9  ;;  %v4525_v9 = vpop.f32.mrf.mxu0  ;;  %v6051_v5 = vor.u32 %v6476_v0, %v6048_v63  ;;  %v6488_v38 = vld [vmem:[%s7207_s27 + $0x824] sm:$0xf] }
 0x242   : > { %4838 = vmatpush.bf16.msra.mxu3 %v6203_v43  ;;  %v4526_v4 = vadd.f32 %v4525_v9, %v7889_v52  ;;  %v6104_v52 = vld [vmem:[%s7207_s27 + $0x838] sm:$0xf0]  ;;  %v6468_v0 = vld [vmem:[%s7207_s27 + $0x784] sm:$0xf]  ;;  %v6080_v9 = vld [vmem:[%s7207_s27 + $0x808] sm:$0xf0] }
 0x243   : > { %4797 = vmatpush.bf16.msra.mxu0 %v6003_v50  ;;  %v6107_v29 = vor.u32 %v6490_v22, %v6104_v52  ;;  %v4553_v36 = vpop.f32.mrf.mxu2  ;;  %v6083_v16 = vor.u32 %v6484_v60, %v6080_v9 }
 0x244   : > { %4811 = vmatpush.bf16.msra.mxu1 %v6067_v33  ;;  %v4540_v21 = vadd.f32 %v4539_v2, %v4526_v4  ;;  %v4567_v43 = vpop.f32.mrf.mxu3  ;;  %v4541_v48 = vpop.f32.mrf.mxu1  ;;  %v6035_v33 = vor.u32 %v6472_v34, %v6032_v37  ;;  %v6500_v4 = vld [vmem:[%s7207_s27 + $0x884] sm:$0xf]  ;;  %v5955_v2 = vor.u32 %v6452_v58, %v5952_v59 }
 0x245   : > { %4825 = vmatpush.bf16.msra.mxu2 %v6131_v51  ;;  %v6099_v51 = vor.u32 %v6488_v38, %v6096_v39 }
 0x246   : > { %4839 = vmatpush.bf16.msra.mxu3 %v6195_v7  ;;  %v4554_v40 = vadd.f32 %v4553_v36, %v4540_v21  ;;  %v6163_v7 = vor.u32 %v6504_v26, %v6160_v45 }
 0x247   : > { %4798 = vmatpush.bf16.msra.mxu0 %v5995_v3  ;;  %v5963_v3 = vor.u32 %v6454_v30, %v5960_v53 }
 0x248   : > { %4812 = vmatpush.bf16.msra.mxu1 %v6059_v57  ;;  %v4568_v50 = vadd.f32 %v4567_v43, %v4554_v40 }
 0x249   : > { %4826 = vmatpush.bf16.msra.mxu2 %v6123_v12  ;;  %v4527_v41 = vpop.f32.mrf.mxu0  ;;  %v6091_v12 = vor.u32 %v6486_v55, %v6088_v27 }
 0x24a   : > { %4840 = vmatpush.bf16.msra.mxu3 %v6187_v8  ;;  %v4528_v46 = vadd.f32 %v4527_v41, %v7913_v28  ;;  %v6024_v28 = vld [vmem:[%s7207_s27 + $0x798] sm:$0xf0]  ;;  %v6155_v8 = vor.u32 %v6502_v56, %v6152_v11 }
 0x24b   : > { %4799 = vmatpush.bf16.msra.mxu0 %v5987_v1  ;;  %v6027_v57 = vor.u32 %v6470_v54, %v6024_v28  ;;  %v4555_v63 = vpop.f32.mrf.mxu2  ;;  %v6144_v1 = vld [vmem:[%s7207_s27 + $0x888] sm:$0xf0]  ;;  %s4979_s27 = sshll.u32 %s2490_s25, 4 }
 0x24c   : > { %4813 = vmatpush.bf16.msra.mxu1 %v6051_v5  ;;  %v4542_v49 = vadd.f32 %v4541_v48, %v4528_v46  ;;  %v4569_v62 = vpop.f32.mrf.mxu3  ;;  %v6147_v17 = vor.u32 %v6500_v4, %v6144_v1  ;;  %s2509_s22 = scalar_lea.vmem [#allocation3], %s4979_s27 }
 0x24d   : > { %4827 = vmatpush.bf16.msra.mxu2 %v6115_v10  ;;  %v6019_v10 = vor.u32 %v6468_v0, %v6016_v15 }
 0x24e   : > { %4841 = vmatpush.bf16.msra.mxu3 %v6179_v20  ;;  %v4556_v61 = vadd.f32 %v4555_v63, %v4542_v49 }
 0x24f   : > { %4800 = vmatpush.bf16.msra.mxu0 %v5979_v25 }
 0x250   : > { %4814 = vmatpush.bf16.msra.mxu1 %v6043_v42  ;;  %v4570_v5 = vadd.f32 %v4569_v62, %v4556_v61 }
 0x251   : > { %4828 = vmatpush.bf16.msra.mxu2 %v6107_v29 }
 0x252   : > { %4842 = vmatpush.bf16.msra.mxu3 %v6171_v35 }
 0x253   : > { %4801 = vmatpush.bf16.msra.mxu0 %v5971_v47 }
 0x254   : > { %4815 = vmatpush.bf16.msra.mxu1 %v6035_v33 }
 0x255   : > { %4829 = vmatpush.bf16.msra.mxu2 %v6099_v51 }
 0x256   : > { %4843 = vmatpush.bf16.msra.mxu3 %v6163_v7 }
 0x257   : > { %4802 = vmatpush.bf16.msra.mxu0 %v5963_v3 }
 0x258   : > { %4816 = vmatpush.bf16.msra.mxu1 %v6027_v57 }
 0x259   : > { %4830 = vmatpush.bf16.msra.mxu2 %v6091_v12 }
 0x25a   : > { %4844 = vmatpush.bf16.msra.mxu3 %v6155_v8 }
 0x25b   : > { %4803 = vmatpush.bf16.msra.mxu0 %v5955_v2  ;;  %v4581_v18 = vpop.f32.mrf.mxu0 }
 0x25c   : > { %4817 = vmatpush.bf16.msra.mxu1 %v6019_v10  ;;  %v4582_v20 = vadd.f32 %v4581_v18, %v4568_v50  ;;  %v4595_v21 = vpop.f32.mrf.mxu1 }
 0x25d   : > { %4831 = vmatpush.bf16.msra.mxu2 %v6083_v16 }
 0x25e   : > { %4845 = vmatpush.bf16.msra.mxu3 %v6147_v17  ;;  %4804 = vmatmul.bf16.vlgmr.msra.gmra.mxu0 %v7613_v6  ;;  %v7983_v44 = vadd.f32 %v4595_v21, %v4582_v20 }
 0x25f   : > { %4818 = vmatmul.bf16.vlgmr.msra.gmra.mxu1 %v7619_v14 }
 0x260   : > { %4832 = vmatmul.bf16.vlgmr.msra.gmra.mxu2 %v7696_v13 }
 0x261   : > { %4846 = vmatmul.bf16.vlgmr.msra.gmra.mxu3 %v7701_v19 }
 0x263   : > { %v4583_v22 = vpop.f32.mrf.mxu0  ;;  %v4609_v25 = vpop.f32.mrf.mxu2 }
 0x264   : > { %v4584_v52 = vadd.f32 %v4583_v22, %v4570_v5  ;;  %v4597_v23 = vpop.f32.mrf.mxu1  ;;  %v4623_v42 = vpop.f32.mrf.mxu3 }
 0x265   : > { %v4624_v35 = vadd.f32 %v4623_v42, %v4609_v25 }
 0x266   : > { %v7985_v24 = vadd.f32 %v4597_v23, %v4584_v52 }
 0x26b   : > { %v4611_v29 = vpop.f32.mrf.mxu2 }
 0x26c   : > { %v4625_v6 = vpop.f32.mrf.mxu3 }
 0x26d   : > { %v4626_v26 = vadd.f32 %v4625_v6, %v4611_v29  ;;  %v4852_v29 = vmax.f32 %v7983_v44, 0.0 }
 0x27b   : > { %v4637_v31 = vpop.f32.mrf.mxu0 }
 0x27c   : > { %v4651_v14 = vpop.f32.mrf.mxu1  ;;  %v4638_v37 = vadd.f32 %v4637_v31, %v4624_v35 }
 0x27e   : > { %v4652_v41 = vadd.f32 %v4651_v14, %v4638_v37 }
 0x283   : > { %v4665_v32 = vpop.f32.mrf.mxu2  ;;  %v4639_v34 = vpop.f32.mrf.mxu0 }
 0x284   : > { %v4679_v13 = vpop.f32.mrf.mxu3  ;;  %v4653_v19 = vpop.f32.mrf.mxu1  ;;  %v4666_v45 = vadd.f32 %v4665_v32, %v4652_v41  ;;  %v4640_v47 = vadd.f32 %v4639_v34, %v4626_v26 }
 0x286   : > { %v4680_v50 = vadd.f32 %v4679_v13, %v4666_v45  ;;  %v4654_v51 = vadd.f32 %v4653_v19, %v4640_v47 }
 0x28b   : > { %v4667_v36 = vpop.f32.mrf.mxu2 }
 0x28c   : > { %v4681_v38 = vpop.f32.mrf.mxu3  ;;  %v4668_v53 = vadd.f32 %v4667_v36, %v4654_v51  ;;  %v4854_v36 = vmax.f32 %v7985_v24, 0.0 }
 0x28e   : > { %v4682_v55 = vadd.f32 %v4681_v38, %v4668_v53 }
 0x29b   : > { %v4693_v39 = vpop.f32.mrf.mxu0 }
 0x29c   : > { %v4707_v40 = vpop.f32.mrf.mxu1  ;;  %v4694_v30 = vadd.f32 %v4693_v39, %v4680_v50 }
 0x29e   : > { %v4708_v7 = vadd.f32 %v4707_v40, %v4694_v30 }
 0x2a3   : > { %v4721_v43 = vpop.f32.mrf.mxu2  ;;  %v4695_v48 = vpop.f32.mrf.mxu0 }
 0x2a4   : > { %v4735_v46 = vpop.f32.mrf.mxu3  ;;  %v4709_v33 = vpop.f32.mrf.mxu1  ;;  %v4722_v27 = vadd.f32 %v4721_v43, %v4708_v7  ;;  %v4696_v11 = vadd.f32 %v4695_v48, %v4682_v55 }
 0x2a6   : > { %v4736_v3 = vadd.f32 %v4735_v46, %v4722_v27  ;;  %v4710_v12 = vadd.f32 %v4709_v33, %v4696_v11 }
 0x2ab   : > { %v4723_v54 = vpop.f32.mrf.mxu2 }
 0x2ac   : > { %v4737_v49 = vpop.f32.mrf.mxu3  ;;  %v4724_v0 = vadd.f32 %v4723_v54, %v4710_v12 }
 0x2ae   : > { %v4738_v60 = vadd.f32 %v4737_v49, %v4724_v0 }
 0x2bb   : > { %v4749_v28 = vpop.f32.mrf.mxu0 }
 0x2bc   : > { %v4763_v56 = vpop.f32.mrf.mxu1  ;;  %v4750_v58 = vadd.f32 %v4749_v28, %v4736_v3 }
 0x2be   : > { %v4764_v63 = vadd.f32 %v4763_v56, %v4750_v58 }
 0x2c3   : > { %v4777_v57 = vpop.f32.mrf.mxu2  ;;  %v4751_v8 = vpop.f32.mrf.mxu0 }
 0x2c4   : > { %v4791_v59 = vpop.f32.mrf.mxu3  ;;  %v4765_v15 = vpop.f32.mrf.mxu1  ;;  %v4778_v9 = vadd.f32 %v4777_v57, %v4764_v63  ;;  %v4752_v61 = vadd.f32 %v4751_v8, %v4738_v60 }
 0x2c6   : > { %v4792_v4 = vadd.f32 %v4791_v59, %v4778_v9  ;;  %v4766_v5 = vadd.f32 %v4765_v15, %v4752_v61 }
 0x2cb   : > { %v4779_v62 = vpop.f32.mrf.mxu2 }
 0x2cc   : > { %v4793_v1 = vpop.f32.mrf.mxu3  ;;  %v4780_v17 = vadd.f32 %v4779_v62, %v4766_v5 }
 0x2ce   : > { %v4794_v21 = vadd.f32 %v4793_v1, %v4780_v17 }
 0x2db   : > { %v4805_v2 = vpop.f32.mrf.mxu0 }
 0x2dc   : > { %v4806_v10 = vadd.f32 %v4805_v2, %v4792_v4  ;;  %v4819_v16 = vpop.f32.mrf.mxu1 }
 0x2de   : > { %v4820_v18 = vadd.f32 %v4819_v16, %v4806_v10 }
 0x2e3   : > { %v4833_v20 = vpop.f32.mrf.mxu2  ;;  %v4807_v23 = vpop.f32.mrf.mxu0 }
 0x2e4   : > { %v4834_v22 = vadd.f32 %v4833_v20, %v4820_v18  ;;  %v4847_v52 = vpop.f32.mrf.mxu3  ;;  %v4808_v42 = vadd.f32 %v4807_v23, %v4794_v21  ;;  %v4821_v31 = vpop.f32.mrf.mxu1 }
 0x2e6   : > { %v4848_v25 = vadd.f32 %v4847_v52, %v4834_v22  ;;  %v4822_v32 = vadd.f32 %v4821_v31, %v4808_v42 }
 0x2e8   : > { %v4853_v6 = vmax.f32 %v4848_v25, 0.0 }
 0x2ea   : > { %v4856_v14 = vpack.c.bf16 %v4853_v6, %v4852_v29 }
 0x2eb   : > { %v4835_v13 = vpop.f32.mrf.mxu2 }
 0x2ec   : > { %4858 = vst [vmem:[%s2509_s22] sm:$0xff] %v4856_v14  ;;  %v4836_v34 = vadd.f32 %v4835_v13, %v4822_v32  ;;  %v4849_v19 = vpop.f32.mrf.mxu3 }
 0x2ee   : > { %v4850_v35 = vadd.f32 %v4849_v19, %v4836_v34 }
 0x2f0   : > { %v4855_v37 = vmax.f32 %v4850_v35, 0.0  ;;  %4866 = sbr.rel (!%p6612_p5) target bundleno = 765 (0x2fd), region = 84 }
 0x2f2   : > { %v4857_v38 = vpack.c.bf16 %v4855_v37, %v4854_v36 }
 0x2f3   : > { %v4900_v44 = vld [vmem:[%s2509_s22] sm:$0xff] (%p6612_p5) }
 0x2f4   : > { %4859 = vst [vmem:[%s2509_s22 + $0x8] sm:$0x33] %v4857_v38 }
 0x2f5   : > { %4901 = vst [vmem:[%s4869_s24] sm:$0xff] %v4900_v44 }
 0x2fb   : > { %v4902_v39 = vld [vmem:[%s2509_s22 + $0x8] sm:$0xff] }
 0x2fc   : > { %4903 = vst [vmem:[%s4869_s24 + $0x10] sm:$0xff] %v4902_v39 }
 0x2fd PF: > { %p9_p10 = scmp.ge.s32.totalorder %s6599_s13, 4   ;;  %s8012_s9 = smov %s6561_s10 }
 0x2fe   : > { %s8013_s10 = smov %s6610_s16  ;;  %s8014_s11 = smov %s6599_s13 }
 0x2ff   :  { %11 = sbr.rel (!%p9_p10) target bundleno = 2 (0x2), region = 159 }

// kernel: _lambda_.11
= control target key start
LH: loop header
LB: loop body
LE: loop exit
PB: predicated region body
PF: predicated region fallthrough
CT: control target
= control target key end

     0   :  { %s7166_s1 = inlined_call_operand.vmem [shape: bf16[2304,256], index: 1, kind: input, shape index: {}]   ;;  %s7167_s0 = inlined_call_operand.vmem [shape: bf16[48,2304], index: 0, kind: input, shape index: {}]   ;;  %s7168_s2 = inlined_call_operand.vmem [shape: bf16[48,256], index: 2, kind: input, shape index: {}]   ;;  %s7169_s3 = inlined_call_operand.vmem [shape: bf16[48,256], index: 3, kind: output, shape index: {}]  }
   0x1   :  { %v3274_v0 = vld [vmem:[%s7166_s1 + $0x70] sm:$0xf]  ;;  %v4437_v1 = vld [vmem:[%s7166_s1 + $0x74] sm:$0xf0]  ;;  %v3266_v11 = vld [vmem:[%s7166_s1 + $0x60] sm:$0xf] }
   0x2   :  { %v3338_v2 = vld [vmem:[%s7166_s1 + $0xf0] sm:$0xf]  ;;  %v3275_v3 = vor.u32 %v4437_v1, %v3274_v0  ;;  %v4453_v4 = vld [vmem:[%s7166_s1 + $0xf4] sm:$0xf0]  ;;  %v4435_v13 = vld [vmem:[%s7166_s1 + $0x64] sm:$0xf0] }
   0x3   :  { %v3402_v5 = vld [vmem:[%s7166_s1 + $0x170] sm:$0xf]  ;;  %v4469_v6 = vld [vmem:[%s7166_s1 + $0x174] sm:$0xf0]  ;;  %v3339_v7 = vor.u32 %v4453_v4, %v3338_v2  ;;  %v3330_v14 = vld [vmem:[%s7166_s1 + $0xe0] sm:$0xf]  ;;  %v3267_v16 = vor.u32 %v4435_v13, %v3266_v11 }
   0x4   :  { %v3403_v8 = vor.u32 %v4469_v6, %v3402_v5  ;;  %v3466_v9 = vld [vmem:[%s7166_s1 + $0x1f0] sm:$0xf]  ;;  %v4485_v10 = vld [vmem:[%s7166_s1 + $0x1f4] sm:$0xf0]  ;;  %2066 = vmatpush.bf16.msra.mxu0 %v3275_v3  ;;  %v4451_v15 = vld [vmem:[%s7166_s1 + $0xe4] sm:$0xf0] }
   0x5   :  { %v3467_v12 = vor.u32 %v4485_v10, %v3466_v9  ;;  %2090 = vmatpush.bf16.msra.mxu1 %v3339_v7  ;;  %v3331_v17 = vor.u32 %v4451_v15, %v3330_v14  ;;  %v3394_v18 = vld [vmem:[%s7166_s1 + $0x160] sm:$0xf]  ;;  %v4467_v19 = vld [vmem:[%s7166_s1 + $0x164] sm:$0xf0]  ;;  %v3258_v23 = vld [vmem:[%s7166_s1 + $0x50] sm:$0xf] }
   0x6   :  { %2114 = vmatpush.bf16.msra.mxu2 %v3403_v8  ;;  %v3458_v20 = vld [vmem:[%s7166_s1 + $0x1e0] sm:$0xf]  ;;  %v3395_v21 = vor.u32 %v4467_v19, %v3394_v18  ;;  %v4483_v22 = vld [vmem:[%s7166_s1 + $0x1e4] sm:$0xf0]  ;;  %v4433_v24 = vld [vmem:[%s7166_s1 + $0x54] sm:$0xf0] }
   0x7   :  { %2138 = vmatpush.bf16.msra.mxu3 %v3467_v12  ;;  %v3459_v25 = vor.u32 %v4483_v22, %v3458_v20  ;;  %v3322_v26 = vld [vmem:[%s7166_s1 + $0xd0] sm:$0xf]  ;;  %v4449_v27 = vld [vmem:[%s7166_s1 + $0xd4] sm:$0xf0]  ;;  %v3259_v29 = vor.u32 %v4433_v24, %v3258_v23  ;;  %v3250_v35 = vld [vmem:[%s7166_s1 + $0x40] sm:$0xf] }
   0x8   :  { %v3386_v28 = vld [vmem:[%s7166_s1 + $0x150] sm:$0xf]  ;;  %2067 = vmatpush.bf16.msra.mxu0 %v3267_v16  ;;  %v4465_v30 = vld [vmem:[%s7166_s1 + $0x154] sm:$0xf0]  ;;  %v3323_v33 = vor.u32 %v4449_v27, %v3322_v26  ;;  %v4431_v36 = vld [vmem:[%s7166_s1 + $0x44] sm:$0xf0] }
   0x9   :  { %v3450_v31 = vld [vmem:[%s7166_s1 + $0x1d0] sm:$0xf]  ;;  %v4481_v32 = vld [vmem:[%s7166_s1 + $0x1d4] sm:$0xf0]  ;;  %2091 = vmatpush.bf16.msra.mxu1 %v3331_v17  ;;  %v3387_v34 = vor.u32 %v4465_v30, %v3386_v28  ;;  %v3314_v37 = vld [vmem:[%s7166_s1 + $0xc0] sm:$0xf]  ;;  %v3251_v44 = vor.u32 %v4431_v36, %v3250_v35 }
   0xa   :  { %2115 = vmatpush.bf16.msra.mxu2 %v3395_v21  ;;  %v3451_v38 = vor.u32 %v4481_v32, %v3450_v31  ;;  %v4447_v39 = vld [vmem:[%s7166_s1 + $0xc4] sm:$0xf0]  ;;  %v3378_v40 = vld [vmem:[%s7166_s1 + $0x140] sm:$0xf]  ;;  %v3242_v47 = vld [vmem:[%s7166_s1 + $0x30] sm:$0xf] }
   0xb   :  { %2139 = vmatpush.bf16.msra.mxu3 %v3459_v25  ;;  %v4463_v41 = vld [vmem:[%s7166_s1 + $0x144] sm:$0xf0]  ;;  %v3442_v42 = vld [vmem:[%s7166_s1 + $0x1c0] sm:$0xf]  ;;  %v3315_v45 = vor.u32 %v4447_v39, %v3314_v37  ;;  %v4429_v48 = vld [vmem:[%s7166_s1 + $0x34] sm:$0xf0] }
   0xc   :  { %v4479_v43 = vld [vmem:[%s7166_s1 + $0x1c4] sm:$0xf0]  ;;  %2068 = vmatpush.bf16.msra.mxu0 %v3259_v29  ;;  %v3379_v46 = vor.u32 %v4463_v41, %v3378_v40  ;;  %v3306_v49 = vld [vmem:[%s7166_s1 + $0xb0] sm:$0xf]  ;;  %v4445_v51 = vld [vmem:[%s7166_s1 + $0xb4] sm:$0xf0]  ;;  %v3243_v56 = vor.u32 %v4429_v48, %v3242_v47 }
   0xd   :  { %2092 = vmatpush.bf16.msra.mxu1 %v3323_v33  ;;  %v3443_v50 = vor.u32 %v4479_v43, %v3442_v42  ;;  %v3370_v52 = vld [vmem:[%s7166_s1 + $0x130] sm:$0xf]  ;;  %v4461_v53 = vld [vmem:[%s7166_s1 + $0x134] sm:$0xf0]  ;;  %v3307_v57 = vor.u32 %v4445_v51, %v3306_v49  ;;  %v3234_v59 = vld [vmem:[%s7166_s1 + $0x20] sm:$0xf] }
   0xe   :  { %2116 = vmatpush.bf16.msra.mxu2 %v3387_v34  ;;  %v3434_v54 = vld [vmem:[%s7166_s1 + $0x1b0] sm:$0xf]  ;;  %v4477_v55 = vld [vmem:[%s7166_s1 + $0x1b4] sm:$0xf0]  ;;  %v3371_v58 = vor.u32 %v4461_v53, %v3370_v52  ;;  %v4427_v60 = vld [vmem:[%s7166_s1 + $0x24] sm:$0xf0] }
   0xf   :  { %2140 = vmatpush.bf16.msra.mxu3 %v3451_v38  ;;  %v3298_v61 = vld [vmem:[%s7166_s1 + $0xa0] sm:$0xf]  ;;  %v3435_v62 = vor.u32 %v4477_v55, %v3434_v54  ;;  %v4443_v63 = vld [vmem:[%s7166_s1 + $0xa4] sm:$0xf0]  ;;  %v3235_v4 = vor.u32 %v4427_v60, %v3234_v59  ;;  %v3226_v7 = vld [vmem:[%s7166_s1 + $0x10] sm:$0xf] }
  0x10   :  { %2069 = vmatpush.bf16.msra.mxu0 %v3251_v44  ;;  %v3362_v0 = vld [vmem:[%s7166_s1 + $0x120] sm:$0xf]  ;;  %v4459_v1 = vld [vmem:[%s7166_s1 + $0x124] sm:$0xf0]  ;;  %v3299_v5 = vor.u32 %v4443_v63, %v3298_v61  ;;  %v4425_v8 = vld [vmem:[%s7166_s1 + $0x14] sm:$0xf0] }
  0x11   :  { %2093 = vmatpush.bf16.msra.mxu1 %v3315_v45  ;;  %v3426_v2 = vld [vmem:[%s7166_s1 + $0x1a0] sm:$0xf]  ;;  %v4475_v3 = vld [vmem:[%s7166_s1 + $0x1a4] sm:$0xf0]  ;;  %v3363_v6 = vor.u32 %v4459_v1, %v3362_v0  ;;  %v3290_v9 = vld [vmem:[%s7166_s1 + $0x90] sm:$0xf]  ;;  %v3227_v17 = vor.u32 %v4425_v8, %v3226_v7 }
  0x12   :  { %2117 = vmatpush.bf16.msra.mxu2 %v3379_v46  ;;  %v3427_v10 = vor.u32 %v4475_v3, %v3426_v2  ;;  %v4441_v11 = vld [vmem:[%s7166_s1 + $0x94] sm:$0xf0]  ;;  %v3354_v12 = vld [vmem:[%s7166_s1 + $0x110] sm:$0xf]  ;;  %v3218_v16 = vld [vmem:[%s7166_s1] sm:$0xf] }
  0x13   :  { %2141 = vmatpush.bf16.msra.mxu3 %v3443_v50  ;;  %v4457_v13 = vld [vmem:[%s7166_s1 + $0x114] sm:$0xf0]  ;;  %v3418_v14 = vld [vmem:[%s7166_s1 + $0x190] sm:$0xf]  ;;  %v4423_v18 = vld [vmem:[%s7166_s1 + $0x4] sm:$0xf0]  ;;  %v3291_v21 = vor.u32 %v4441_v11, %v3290_v9 }
  0x14   :  { %2070 = vmatpush.bf16.msra.mxu0 %v3243_v56  ;;  %v4473_v15 = vld [vmem:[%s7166_s1 + $0x194] sm:$0xf0]  ;;  %v3282_v19 = vld [vmem:[%s7166_s1 + $0x80] sm:$0xf]  ;;  %v4439_v20 = vld [vmem:[%s7166_s1 + $0x84] sm:$0xf0]  ;;  %v3355_v22 = vor.u32 %v4457_v13, %v3354_v12  ;;  %v3219_v34 = vor.u32 %v4423_v18, %v3218_v16 }
  0x15   :  { %2094 = vmatpush.bf16.msra.mxu1 %v3307_v57  ;;  %v3346_v23 = vld [vmem:[%s7166_s1 + $0x100] sm:$0xf]  ;;  %v4455_v24 = vld [vmem:[%s7166_s1 + $0x104] sm:$0xf0]  ;;  %v3419_v26 = vor.u32 %v4473_v15, %v3418_v14  ;;  %v4368_v30 = vld [vmem:[%s7167_s0 + $0x4] sm:$0xf]  ;;  %v3283_v38 = vor.u32 %v4439_v20, %v3282_v19 }
  0x16   :  { %2118 = vmatpush.bf16.msra.mxu2 %v3371_v58  ;;  %v3410_v25 = vld [vmem:[%s7166_s1 + $0x180] sm:$0xf]  ;;  %v4471_v27 = vld [vmem:[%s7166_s1 + $0x184] sm:$0xf0]  ;;  %v3004_v31 = vld [vmem:[%s7167_s0 + $0x48] sm:$0xf0]  ;;  %v3347_v39 = vor.u32 %v4455_v24, %v3346_v23 }
  0x17   :  { %2142 = vmatpush.bf16.msra.mxu3 %v3435_v62  ;;  %v3002_v28 = vld [vmem:[%s7167_s0] sm:$0xf]  ;;  %v4377_v29 = vld [vmem:[%s7167_s0 + $0x44] sm:$0xf0]  ;;  %v3658_v32 = vld [vmem:[%s7166_s1 + $0x370] sm:$0xf]  ;;  %v3411_v43 = vor.u32 %v4471_v27, %v3410_v25  ;;  %v4978_v53 = vor.u32 %v4368_v30, %v3004_v31 }
  0x18   :  { %2071 = vmatpush.bf16.msra.mxu0 %v3235_v4  ;;  %v4533_v33 = vld [vmem:[%s7166_s1 + $0x374] sm:$0xf0]  ;;  %v3010_v35 = vld [vmem:[%s7167_s0 + $0x8] sm:$0xf]  ;;  %v3722_v36 = vld [vmem:[%s7166_s1 + $0x3f0] sm:$0xf]  ;;  %v4967_v48 = vor.u32 %v4377_v29, %v3002_v28 }
  0x19   :  { %2095 = vmatpush.bf16.msra.mxu1 %v3299_v5  ;;  %v4549_v37 = vld [vmem:[%s7166_s1 + $0x3f4] sm:$0xf0]  ;;  %v4378_v40 = vld [vmem:[%s7167_s0 + $0x4c] sm:$0xf0]  ;;  %v4369_v41 = vld [vmem:[%s7167_s0 + $0xc] sm:$0xf]  ;;  %v3659_v44 = vor.u32 %v4533_v33, %v3658_v32 }
  0x1a   :  { %2119 = vmatpush.bf16.msra.mxu2 %v3363_v6  ;;  %v3012_v42 = vld [vmem:[%s7167_s0 + $0x50] sm:$0xf0]  ;;  %v3530_v45 = vld [vmem:[%s7166_s1 + $0x270] sm:$0xf]  ;;  %v4501_v46 = vld [vmem:[%s7166_s1 + $0x274] sm:$0xf0]  ;;  %v3723_v49 = vor.u32 %v4549_v37, %v3722_v36  ;;  %v4980_v54 = vor.u32 %v4378_v40, %v3010_v35 }
  0x1b   :  { %2143 = vmatpush.bf16.msra.mxu3 %v3427_v10  ;;  %v3594_v47 = vld [vmem:[%s7166_s1 + $0x2f0] sm:$0xf]  ;;  %v4517_v50 = vld [vmem:[%s7166_s1 + $0x2f4] sm:$0xf0]  ;;  %v3650_v51 = vld [vmem:[%s7166_s1 + $0x360] sm:$0xf]  ;;  %v4988_v57 = vor.u32 %v4369_v41, %v3012_v42  ;;  %v3531_v58 = vor.u32 %v4501_v46, %v3530_v45 }
  0x1c   :  { %2072 = vmatpush.bf16.msra.mxu0 %v3227_v17  ;;  %v4531_v52 = vld [vmem:[%s7166_s1 + $0x364] sm:$0xf0]  ;;  %v3714_v55 = vld [vmem:[%s7166_s1 + $0x3e0] sm:$0xf]  ;;  %v3595_v59 = vor.u32 %v4517_v50, %v3594_v47  ;;  %v3642_v2 = vld [vmem:[%s7166_s1 + $0x350] sm:$0xf] }
  0x1d   :  { %2096 = vmatpush.bf16.msra.mxu1 %v3291_v21  ;;  %v4547_v56 = vld [vmem:[%s7166_s1 + $0x3e4] sm:$0xf0]  ;;  %v3651_v60 = vor.u32 %v4531_v52, %v3650_v51  ;;  %v3522_v61 = vld [vmem:[%s7166_s1 + $0x260] sm:$0xf]  ;;  %v4529_v3 = vld [vmem:[%s7166_s1 + $0x354] sm:$0xf0] }
  0x1e   :  { %2120 = vmatpush.bf16.msra.mxu2 %v3355_v22  ;;  %v4499_v62 = vld [vmem:[%s7166_s1 + $0x264] sm:$0xf0]  ;;  %v3586_v63 = vld [vmem:[%s7166_s1 + $0x2e0] sm:$0xf]  ;;  %v3715_v0 = vor.u32 %v4547_v56, %v3714_v55  ;;  %v3706_v4 = vld [vmem:[%s7166_s1 + $0x3d0] sm:$0xf]  ;;  %v3643_v8 = vor.u32 %v4529_v3, %v3642_v2 }
  0x1f   :  { %2144 = vmatpush.bf16.msra.mxu3 %v3419_v26  ;;  %v4515_v1 = vld [vmem:[%s7166_s1 + $0x2e4] sm:$0xf0]  ;;  %v4545_v5 = vld [vmem:[%s7166_s1 + $0x3d4] sm:$0xf0]  ;;  %v3523_v6 = vor.u32 %v4499_v62, %v3522_v61  ;;  %v3514_v9 = vld [vmem:[%s7166_s1 + $0x250] sm:$0xf] }
  0x20   :  { %2073 = vmatpush.bf16.msra.mxu0 %v3219_v34  ;;  %v3587_v7 = vor.u32 %v4515_v1, %v3586_v63  ;;  %v4497_v10 = vld [vmem:[%s7166_s1 + $0x254] sm:$0xf0]  ;;  %v3578_v11 = vld [vmem:[%s7166_s1 + $0x2d0] sm:$0xf]  ;;  %v3707_v12 = vor.u32 %v4545_v5, %v3706_v4  ;;  %v3634_v14 = vld [vmem:[%s7166_s1 + $0x340] sm:$0xf] }
  0x21   :  { %2097 = vmatpush.bf16.msra.mxu1 %v3283_v38  ;;  %v4513_v13 = vld [vmem:[%s7166_s1 + $0x2d4] sm:$0xf0]  ;;  %v4527_v15 = vld [vmem:[%s7166_s1 + $0x344] sm:$0xf0]  ;;  %v3698_v16 = vld [vmem:[%s7166_s1 + $0x3c0] sm:$0xf]  ;;  %v3515_v18 = vor.u32 %v4497_v10, %v3514_v9 }
  0x22   :  { %2121 = vmatpush.bf16.msra.mxu2 %v3347_v39  ;;  %v4543_v17 = vld [vmem:[%s7166_s1 + $0x3c4] sm:$0xf0]  ;;  %v3074_v19 = vld [vmem:[%s7167_s0 + $0x90] sm:$0xf]  ;;  %v4395_v20 = vld [vmem:[%s7167_s0 + $0xd4] sm:$0xf0]  ;;  %v3579_v21 = vor.u32 %v4513_v13, %v3578_v11  ;;  %v3635_v22 = vor.u32 %v4527_v15, %v3634_v14 }
  0x23   :  { %2145 = vmatpush.bf16.msra.mxu3 %v3411_v43  ;;  %2074 = vmatmul.bf16.vlgmr.msra.gmra.mxu0 %v4967_v48  ;;  %v3506_v23 = vld [vmem:[%s7166_s1 + $0x240] sm:$0xf]  ;;  %v4495_v24 = vld [vmem:[%s7166_s1 + $0x244] sm:$0xf0]  ;;  %v4386_v26 = vld [vmem:[%s7167_s0 + $0x94] sm:$0xf]  ;;  %v3699_v28 = vor.u32 %v4543_v17, %v3698_v16 }
  0x24   :  { %2098 = vmatmul.bf16.vlgmr.msra.gmra.mxu1 %v4978_v53  ;;  %2162 = vmatpush.bf16.msrb.mxu0 %v3531_v58  ;;  %v3570_v25 = vld [vmem:[%s7166_s1 + $0x2c0] sm:$0xf]  ;;  %v3076_v27 = vld [vmem:[%s7167_s0 + $0xd8] sm:$0xf0]  ;;  %v4511_v29 = vld [vmem:[%s7166_s1 + $0x2c4] sm:$0xf0]  ;;  %v3507_v38 = vor.u32 %v4495_v24, %v3506_v23 }
  0x25   :  { %2122 = vmatmul.bf16.vlgmr.msra.gmra.mxu2 %v4980_v54  ;;  %2186 = vmatpush.bf16.msrb.mxu1 %v3595_v59  ;;  %v3626_v30 = vld [vmem:[%s7166_s1 + $0x330] sm:$0xf]  ;;  %v4525_v31 = vld [vmem:[%s7166_s1 + $0x334] sm:$0xf0]  ;;  %v4396_v35 = vld [vmem:[%s7167_s0 + $0xdc] sm:$0xf0]  ;;  %v3571_v39 = vor.u32 %v4511_v29, %v3570_v25  ;;  %v5110_v50 = vor.u32 %v4386_v26, %v3076_v27 }
  0x26   :  { %2210 = vmatpush.bf16.msrb.mxu2 %v3659_v44  ;;  %2146 = vmatmul.bf16.vlgmr.msra.gmra.mxu3 %v4988_v57  ;;  %v3082_v32 = vld [vmem:[%s7167_s0 + $0x98] sm:$0xf]  ;;  %v3690_v33 = vld [vmem:[%s7166_s1 + $0x3b0] sm:$0xf]  ;;  %v4387_v36 = vld [vmem:[%s7167_s0 + $0x9c] sm:$0xf]  ;;  %v3627_v40 = vor.u32 %v4525_v31, %v3626_v30  ;;  %v5099_v44 = vor.u32 %v4395_v20, %v3074_v19 }
  0x27   :  { %2234 = vmatpush.bf16.msrb.mxu3 %v3723_v49  ;;  %v4541_v34 = vld [vmem:[%s7166_s1 + $0x3b4] sm:$0xf0]  ;;  %v3084_v37 = vld [vmem:[%s7167_s0 + $0xe0] sm:$0xf0]  ;;  %v3498_v41 = vld [vmem:[%s7166_s1 + $0x230] sm:$0xf]  ;;  %v5112_v51 = vor.u32 %v4396_v35, %v3082_v32 }
  0x28   :  { %2163 = vmatpush.bf16.msrb.mxu0 %v3523_v6  ;;  %v4493_v42 = vld [vmem:[%s7166_s1 + $0x234] sm:$0xf0]  ;;  %v3562_v43 = vld [vmem:[%s7166_s1 + $0x2b0] sm:$0xf]  ;;  %v3691_v45 = vor.u32 %v4541_v34, %v3690_v33  ;;  %v3618_v47 = vld [vmem:[%s7166_s1 + $0x320] sm:$0xf]  ;;  %v5120_v56 = vor.u32 %v4387_v36, %v3084_v37 }
  0x29   :  { %2187 = vmatpush.bf16.msrb.mxu1 %v3587_v7  ;;  %v4509_v46 = vld [vmem:[%s7166_s1 + $0x2b4] sm:$0xf0]  ;;  %v4523_v49 = vld [vmem:[%s7166_s1 + $0x324] sm:$0xf0]  ;;  %v3682_v52 = vld [vmem:[%s7166_s1 + $0x3a0] sm:$0xf]  ;;  %v3499_v58 = vor.u32 %v4493_v42, %v3498_v41 }
  0x2a   :  { %2211 = vmatpush.bf16.msrb.mxu2 %v3651_v60  ;;  %v4539_v55 = vld [vmem:[%s7166_s1 + $0x3a4] sm:$0xf0]  ;;  %v3563_v59 = vor.u32 %v4509_v46, %v3562_v43  ;;  %v3619_v60 = vor.u32 %v4523_v49, %v3618_v47  ;;  %v3490_v61 = vld [vmem:[%s7166_s1 + $0x220] sm:$0xf]  ;;  %v3610_v2 = vld [vmem:[%s7166_s1 + $0x310] sm:$0xf] }
  0x2b   :  { %2235 = vmatpush.bf16.msrb.mxu3 %v3715_v0  ;;  %v4491_v62 = vld [vmem:[%s7166_s1 + $0x224] sm:$0xf0]  ;;  %v3554_v63 = vld [vmem:[%s7166_s1 + $0x2a0] sm:$0xf]  ;;  %v3683_v0 = vor.u32 %v4539_v55, %v3682_v52  ;;  %v4521_v3 = vld [vmem:[%s7166_s1 + $0x314] sm:$0xf0] }
  0x2c   :  { %2164 = vmatpush.bf16.msrb.mxu0 %v3515_v18  ;;  %v4507_v1 = vld [vmem:[%s7166_s1 + $0x2a4] sm:$0xf0]  ;;  %v3674_v4 = vld [vmem:[%s7166_s1 + $0x390] sm:$0xf]  ;;  %v4537_v5 = vld [vmem:[%s7166_s1 + $0x394] sm:$0xf0]  ;;  %v3491_v6 = vor.u32 %v4491_v62, %v3490_v61  ;;  %v3611_v9 = vor.u32 %v4521_v3, %v3610_v2 }
  0x2d   :  { %2188 = vmatpush.bf16.msrb.mxu1 %v3579_v21  ;;  %v3482_v7 = vld [vmem:[%s7166_s1 + $0x210] sm:$0xf]  ;;  %v4489_v10 = vld [vmem:[%s7166_s1 + $0x214] sm:$0xf0]  ;;  %v3675_v13 = vor.u32 %v4537_v5, %v3674_v4  ;;  %v3602_v14 = vld [vmem:[%s7166_s1 + $0x300] sm:$0xf] }
  0x2e   :  { %2212 = vmatpush.bf16.msrb.mxu2 %v3643_v8  ;;  %v3555_v8 = vor.u32 %v4507_v1, %v3554_v63  ;;  %v3546_v11 = vld [vmem:[%s7166_s1 + $0x290] sm:$0xf]  ;;  %v4519_v15 = vld [vmem:[%s7166_s1 + $0x304] sm:$0xf0]  ;;  %v3666_v16 = vld [vmem:[%s7166_s1 + $0x380] sm:$0xf]  ;;  %v3483_v20 = vor.u32 %v4489_v10, %v3482_v7 }
  0x2f   :  { %2236 = vmatpush.bf16.msrb.mxu3 %v3707_v12  ;;  %v4505_v12 = vld [vmem:[%s7166_s1 + $0x294] sm:$0xf0]  ;;  %v4535_v17 = vld [vmem:[%s7166_s1 + $0x384] sm:$0xf0]  ;;  %v3914_v18 = vld [vmem:[%s7166_s1 + $0x570] sm:$0xf]  ;;  %v3603_v26 = vor.u32 %v4519_v15, %v3602_v14 }
  0x30   :  { %2165 = vmatpush.bf16.msrb.mxu0 %v3507_v38  ;;  %v4597_v19 = vld [vmem:[%s7166_s1 + $0x574] sm:$0xf0]  ;;  %v3978_v21 = vld [vmem:[%s7166_s1 + $0x5f0] sm:$0xf]  ;;  %v3146_v23 = vld [vmem:[%s7167_s0 + $0x120] sm:$0xf]  ;;  %v3547_v25 = vor.u32 %v4505_v12, %v3546_v11  ;;  %v3667_v32 = vor.u32 %v4535_v17, %v3666_v16 }
  0x31   :  { %2189 = vmatpush.bf16.msrb.mxu1 %v3571_v39  ;;  %v4413_v24 = vld [vmem:[%s7167_s0 + $0x164] sm:$0xf0]  ;;  %v3474_v27 = vld [vmem:[%s7166_s1 + $0x200] sm:$0xf]  ;;  %v4404_v30 = vld [vmem:[%s7167_s0 + $0x124] sm:$0xf]  ;;  %v3915_v34 = vor.u32 %v4597_v19, %v3914_v18 }
  0x32   :  { %2213 = vmatpush.bf16.msrb.mxu2 %v3635_v22  ;;  %v4613_v22 = vld [vmem:[%s7166_s1 + $0x5f4] sm:$0xf0]  ;;  %v3538_v29 = vld [vmem:[%s7166_s1 + $0x280] sm:$0xf]  ;;  %v3148_v31 = vld [vmem:[%s7167_s0 + $0x168] sm:$0xf0] }
  0x33   :  { %2237 = vmatpush.bf16.msrb.mxu3 %v3699_v28  ;;  %2079 = vmatmul.bf16.gmra.mxu0 %v5099_v44  ;;  %v4487_v28 = vld [vmem:[%s7166_s1 + $0x204] sm:$0xf0]  ;;  %v3786_v35 = vld [vmem:[%s7166_s1 + $0x470] sm:$0xf]  ;;  %v4565_v36 = vld [vmem:[%s7166_s1 + $0x474] sm:$0xf0]  ;;  %v3979_v38 = vor.u32 %v4613_v22, %v3978_v21  ;;  %v5254_v63 = vor.u32 %v4404_v30, %v3148_v31 }
  0x34   :  { %2103 = vmatmul.bf16.gmra.mxu1 %v5110_v50  ;;  %2166 = vmatpush.bf16.msrb.mxu0 %v3499_v58  ;;  %v4503_v33 = vld [vmem:[%s7166_s1 + $0x284] sm:$0xf0]  ;;  %v3850_v39 = vld [vmem:[%s7166_s1 + $0x4f0] sm:$0xf]  ;;  %v4405_v42 = vld [vmem:[%s7167_s0 + $0x12c] sm:$0xf]  ;;  %v3787_v47 = vor.u32 %v4565_v36, %v3786_v35  ;;  %v5243_v58 = vor.u32 %v4413_v24, %v3146_v23 }
  0x35   :  { %2127 = vmatmul.bf16.gmra.mxu2 %v5112_v51  ;;  %2190 = vmatpush.bf16.msrb.mxu1 %v3563_v59  ;;  %v3154_v37 = vld [vmem:[%s7167_s0 + $0x128] sm:$0xf]  ;;  %v4414_v41 = vld [vmem:[%s7167_s0 + $0x16c] sm:$0xf0]  ;;  %v3156_v43 = vld [vmem:[%s7167_s0 + $0x170] sm:$0xf0]  ;;  %v3539_v46 = vor.u32 %v4503_v33, %v3538_v29 }
  0x36   :  { %2214 = vmatpush.bf16.msrb.mxu2 %v3627_v40  ;;  %2151 = vmatmul.bf16.gmra.mxu3 %v5120_v56  ;;  %v4581_v40 = vld [vmem:[%s7166_s1 + $0x4f4] sm:$0xf0]  ;;  %v3906_v49 = vld [vmem:[%s7166_s1 + $0x560] sm:$0xf]  ;;  %v4595_v52 = vld [vmem:[%s7166_s1 + $0x564] sm:$0xf0]  ;;  %v5264_v3 = vor.u32 %v4405_v42, %v3156_v43 }
  0x37   :  { %2238 = vmatpush.bf16.msrb.mxu3 %v3691_v45  ;;  %v3475_v45 = vor.u32 %v4487_v28, %v3474_v27  ;;  %v3778_v55 = vld [vmem:[%s7166_s1 + $0x460] sm:$0xf]  ;;  %v3851_v59 = vor.u32 %v4581_v40, %v3850_v39  ;;  %v4611_v62 = vld [vmem:[%s7166_s1 + $0x5e4] sm:$0xf0]  ;;  %v3907_v4 = vor.u32 %v4595_v52, %v3906_v49  ;;  %v3898_v7 = vld [vmem:[%s7166_s1 + $0x550] sm:$0xf] }
  0x38   :  { %2167 = vmatpush.bf16.msrb.mxu0 %v3491_v6  ;;  %v3970_v61 = vld [vmem:[%s7166_s1 + $0x5e0] sm:$0xf]  ;;  %v4579_v2 = vld [vmem:[%s7166_s1 + $0x4e4] sm:$0xf0]  ;;  %v4561_v11 = vld [vmem:[%s7166_s1 + $0x454] sm:$0xf0] }
  0x39   :  { %2191 = vmatpush.bf16.msrb.mxu1 %v3555_v8  ;;  %v3842_v1 = vld [vmem:[%s7166_s1 + $0x4e0] sm:$0xf]  ;;  %v3971_v6 = vor.u32 %v4611_v62, %v3970_v61  ;;  %v4593_v8 = vld [vmem:[%s7166_s1 + $0x554] sm:$0xf0]  ;;  %v3962_v12 = vld [vmem:[%s7166_s1 + $0x5d0] sm:$0xf] }
  0x3a   :  { %2215 = vmatpush.bf16.msrb.mxu2 %v3619_v60  ;;  %v4563_v60 = vld [vmem:[%s7166_s1 + $0x464] sm:$0xf0]  ;;  %v3843_v10 = vor.u32 %v4579_v2, %v3842_v1  ;;  %v3899_v14 = vor.u32 %v4593_v8, %v3898_v7  ;;  %v3834_v15 = vld [vmem:[%s7166_s1 + $0x4d0] sm:$0xf]  ;;  %v4577_v16 = vld [vmem:[%s7166_s1 + $0x4d4] sm:$0xf0] }
  0x3b   :  { %2239 = vmatpush.bf16.msrb.mxu3 %v3683_v0  ;;  %v5256_v0 = vor.u32 %v4414_v41, %v3154_v37  ;;  %v3779_v5 = vor.u32 %v4563_v60, %v3778_v55  ;;  %v3890_v19 = vld [vmem:[%s7166_s1 + $0x540] sm:$0xf]  ;;  %v3835_v22 = vor.u32 %v4577_v16, %v3834_v15  ;;  %v4559_v23 = vld [vmem:[%s7166_s1 + $0x444] sm:$0xf0]  ;;  %v3018_v29 = vld [vmem:[%s7167_s0 + $0x10] sm:$0xf] }
  0x3c   :  { %2168 = vmatpush.bf16.msrb.mxu0 %v3483_v20  ;;  %v4591_v20 = vld [vmem:[%s7166_s1 + $0x544] sm:$0xf0]  ;;  %v3762_v21 = vld [vmem:[%s7166_s1 + $0x440] sm:$0xf]  ;;  %v4379_v30 = vld [vmem:[%s7167_s0 + $0x54] sm:$0xf0] }
  0x3d   :  { %2192 = vmatpush.bf16.msrb.mxu1 %v3547_v25  ;;  %v3954_v24 = vld [vmem:[%s7166_s1 + $0x5c0] sm:$0xf]  ;;  %v4607_v25 = vld [vmem:[%s7166_s1 + $0x5c4] sm:$0xf0]  ;;  %v3891_v28 = vor.u32 %v4591_v20, %v3890_v19  ;;  %v3763_v31 = vor.u32 %v4559_v23, %v3762_v21  ;;  %v3882_v33 = vld [vmem:[%s7166_s1 + $0x530] sm:$0xf]  ;;  %v5372_v62 = vor.u32 %v4379_v30, %v3018_v29 }
  0x3e   :  { %2216 = vmatpush.bf16.msrb.mxu2 %v3611_v9  ;;  %v3770_v9 = vld [vmem:[%s7166_s1 + $0x450] sm:$0xf]  ;;  %v4575_v27 = vld [vmem:[%s7166_s1 + $0x4c4] sm:$0xf0]  ;;  %v4370_v36 = vld [vmem:[%s7167_s0 + $0x14] sm:$0xf] }
  0x3f   :  { %2240 = vmatpush.bf16.msrb.mxu3 %v3675_v13  ;;  %v4609_v13 = vld [vmem:[%s7166_s1 + $0x5d4] sm:$0xf0]  ;;  %v3771_v17 = vor.u32 %v4561_v11, %v3770_v9  ;;  %v3754_v35 = vld [vmem:[%s7166_s1 + $0x430] sm:$0xf]  ;;  %v3020_v41 = vld [vmem:[%s7167_s0 + $0x58] sm:$0xf0] }
  0x40   :  { %2169 = vmatpush.bf16.msrb.mxu0 %v3475_v45  ;;  %v3963_v18 = vor.u32 %v4609_v13, %v3962_v12  ;;  %v3946_v39 = vld [vmem:[%s7166_s1 + $0x5b0] sm:$0xf]  ;;  %v4605_v40 = vld [vmem:[%s7166_s1 + $0x5b4] sm:$0xf0]  ;;  %v3028_v52 = vld [vmem:[%s7167_s0 + $0x60] sm:$0xf0]  ;;  %v5374_v2 = vor.u32 %v4370_v36, %v3020_v41 }
  0x41   :  { %2193 = vmatpush.bf16.msrb.mxu1 %v3539_v46  ;;  %v3818_v42 = vld [vmem:[%s7166_s1 + $0x4b0] sm:$0xf]  ;;  %v4573_v43 = vld [vmem:[%s7166_s1 + $0x4b4] sm:$0xf0]  ;;  %v4380_v46 = vld [vmem:[%s7167_s0 + $0x5c] sm:$0xf0] }
  0x42   :  { %2217 = vmatpush.bf16.msrb.mxu2 %v3603_v26  ;;  %v3826_v26 = vld [vmem:[%s7166_s1 + $0x4c0] sm:$0xf]  ;;  %v3026_v45 = vld [vmem:[%s7167_s0 + $0x18] sm:$0xf]  ;;  %v4587_v61 = vld [vmem:[%s7166_s1 + $0x524] sm:$0xf0]  ;;  %v3819_v1 = vor.u32 %v4573_v43, %v3818_v42 }
  0x43   :  { %2241 = vmatpush.bf16.msrb.mxu3 %v3667_v32  ;;  %2084 = vmatmul.bf16.gmra.mxu0 %v5243_v58  ;;  %v3955_v32 = vor.u32 %v4607_v25, %v3954_v24  ;;  %v3827_v37 = vor.u32 %v4575_v27, %v3826_v26  ;;  %v3874_v60 = vld [vmem:[%s7166_s1 + $0x520] sm:$0xf]  ;;  %v4555_v8 = vld [vmem:[%s7166_s1 + $0x424] sm:$0xf0]  ;;  %v3866_v16 = vld [vmem:[%s7166_s1 + $0x510] sm:$0xf] }
  0x44   :  { %2258 = vmatpush.bf16.msra.mxu0 %v3787_v47  ;;  %2108 = vmatmul.bf16.gmra.mxu1 %v5254_v63  ;;  %v4371_v47 = vld [vmem:[%s7167_s0 + $0x1c] sm:$0xf]  ;;  %v3746_v7 = vld [vmem:[%s7166_s1 + $0x420] sm:$0xf]  ;;  %v4603_v11 = vld [vmem:[%s7166_s1 + $0x5a4] sm:$0xf0] }
  0x45   :  { %2282 = vmatpush.bf16.msra.mxu1 %v3851_v59  ;;  %2132 = vmatmul.bf16.gmra.mxu2 %v5256_v0  ;;  %v3947_v59 = vor.u32 %v4605_v40, %v3946_v39  ;;  %v3938_v9 = vld [vmem:[%s7166_s1 + $0x5a0] sm:$0xf]  ;;  %v4571_v13 = vld [vmem:[%s7166_s1 + $0x4a4] sm:$0xf0]  ;;  %v4553_v20 = vld [vmem:[%s7166_s1 + $0x414] sm:$0xf0] }
  0x46   :  { %2306 = vmatpush.bf16.msra.mxu2 %v3915_v34  ;;  %2156 = vmatmul.bf16.gmra.mxu3 %v5264_v3  ;;  %v4589_v34 = vld [vmem:[%s7166_s1 + $0x534] sm:$0xf0]  ;;  %v3810_v12 = vld [vmem:[%s7166_s1 + $0x4a0] sm:$0xf]  ;;  %v3930_v21 = vld [vmem:[%s7166_s1 + $0x590] sm:$0xf] }
  0x47   :  { %2330 = vmatpush.bf16.msra.mxu3 %v3979_v38  ;;  %v4557_v38 = vld [vmem:[%s7166_s1 + $0x434] sm:$0xf0]  ;;  %v3883_v49 = vor.u32 %v4589_v34, %v3882_v33  ;;  %v3811_v15 = vor.u32 %v4571_v13, %v3810_v12  ;;  %v3802_v25 = vld [vmem:[%s7166_s1 + $0x490] sm:$0xf]  ;;  %v3858_v27 = vld [vmem:[%s7166_s1 + $0x500] sm:$0xf] }
  0x48   :  { %2259 = vmatpush.bf16.msra.mxu0 %v3779_v5  ;;  %v3755_v55 = vor.u32 %v4557_v38, %v3754_v35  ;;  %v5378_v5 = vor.u32 %v4371_v47, %v3028_v52  ;;  %v4569_v26 = vld [vmem:[%s7166_s1 + $0x494] sm:$0xf0]  ;;  %v4583_v30 = vld [vmem:[%s7166_s1 + $0x504] sm:$0xf0]  ;;  %v3922_v34 = vld [vmem:[%s7166_s1 + $0x580] sm:$0xf] }
  0x49   :  { %2283 = vmatpush.bf16.msra.mxu1 %v3843_v10  ;;  %v3747_v10 = vor.u32 %v4555_v8, %v3746_v7  ;;  %v3803_v29 = vor.u32 %v4569_v26, %v3802_v25  ;;  %v3859_v33 = vor.u32 %v4583_v30, %v3858_v27  ;;  %v4599_v35 = vld [vmem:[%s7166_s1 + $0x584] sm:$0xf0]  ;;  %v3794_v36 = vld [vmem:[%s7166_s1 + $0x480] sm:$0xf]  ;;  %v4388_v38 = vld [vmem:[%s7167_s0 + $0xa4] sm:$0xf] }
  0x4a   :  { %2307 = vmatpush.bf16.msra.mxu2 %v3907_v4  ;;  %v5376_v4 = vor.u32 %v4380_v46, %v3026_v45  ;;  %v4567_v40 = vld [vmem:[%s7166_s1 + $0x484] sm:$0xf0]  ;;  %v3092_v41 = vld [vmem:[%s7167_s0 + $0xe8] sm:$0xf0]  ;;  %v4398_v43 = vld [vmem:[%s7167_s0 + $0xec] sm:$0xf0]  ;;  %v3923_v45 = vor.u32 %v4599_v35, %v3922_v34 }
  0x4b   :  { %2331 = vmatpush.bf16.msra.mxu3 %v3971_v6  ;;  %v3875_v6 = vor.u32 %v4587_v61, %v3874_v60  ;;  %v3098_v42 = vld [vmem:[%s7167_s0 + $0xa8] sm:$0xf]  ;;  %v3795_v46 = vor.u32 %v4567_v40, %v3794_v36  ;;  %v4389_v47 = vld [vmem:[%s7167_s0 + $0xac] sm:$0xf]  ;;  %v4170_v61 = vld [vmem:[%s7166_s1 + $0x770] sm:$0xf] }
  0x4c   :  { %2260 = vmatpush.bf16.msra.mxu0 %v3771_v17  ;;  %v4585_v17 = vld [vmem:[%s7166_s1 + $0x514] sm:$0xf0]  ;;  %v4106_v13 = vld [vmem:[%s7166_s1 + $0x6f0] sm:$0xf]  ;;  %v4643_v27 = vld [vmem:[%s7166_s1 + $0x6e4] sm:$0xf0] }
  0x4d   :  { %2284 = vmatpush.bf16.msra.mxu1 %v3835_v22  ;;  %v3867_v19 = vor.u32 %v4585_v17, %v3866_v16  ;;  %v4601_v22 = vld [vmem:[%s7166_s1 + $0x594] sm:$0xf0]  ;;  %v4659_v17 = vld [vmem:[%s7166_s1 + $0x764] sm:$0xf0]  ;;  %v3162_v25 = vld [vmem:[%s7167_s0 + $0x130] sm:$0xf] }
  0x4e   :  { %2308 = vmatpush.bf16.msra.mxu2 %v3899_v14  ;;  %v3939_v14 = vor.u32 %v4603_v11, %v3938_v9  ;;  %v3931_v24 = vor.u32 %v4601_v22, %v3930_v21  ;;  %v4629_v8 = vld [vmem:[%s7166_s1 + $0x674] sm:$0xf0]  ;;  %v4234_v9 = vld [vmem:[%s7166_s1 + $0x7f0] sm:$0xf]  ;;  %v4226_v22 = vld [vmem:[%s7166_s1 + $0x7e0] sm:$0xf] }
  0x4f   :  { %2332 = vmatpush.bf16.msra.mxu3 %v3963_v18  ;;  %v3738_v18 = vld [vmem:[%s7166_s1 + $0x410] sm:$0xf]  ;;  %v4415_v34 = vld [vmem:[%s7167_s0 + $0x174] sm:$0xf0]  ;;  %v4406_v35 = vld [vmem:[%s7167_s0 + $0x134] sm:$0xf] }
  0x50   :  { %2261 = vmatpush.bf16.msra.mxu0 %v3763_v31  ;;  %v3739_v23 = vor.u32 %v4553_v20, %v3738_v18  ;;  %v3730_v31 = vld [vmem:[%s7166_s1 + $0x400] sm:$0xf] }
  0x51   :  { %2285 = vmatpush.bf16.msra.mxu1 %v3827_v37  ;;  %v4397_v37 = vld [vmem:[%s7167_s0 + $0xe4] sm:$0xf0]  ;;  %v4034_v18 = vld [vmem:[%s7166_s1 + $0x660] sm:$0xf] }
  0x52   :  { %2309 = vmatpush.bf16.msra.mxu2 %v3891_v28  ;;  %v3090_v28 = vld [vmem:[%s7167_s0 + $0xa0] sm:$0xf] }
  0x53   :  { %2333 = vmatpush.bf16.msra.mxu3 %v3955_v32  ;;  %2170 = vmatmul.bf16.vlgmr.msrb.gmra.mxu0 %v5372_v62  ;;  %v4551_v32 = vld [vmem:[%s7166_s1 + $0x404] sm:$0xf0]  ;;  %v5474_v52 = vor.u32 %v4397_v37, %v3090_v28  ;;  %v4154_v28 = vld [vmem:[%s7166_s1 + $0x750] sm:$0xf]  ;;  %v4673_v37 = vld [vmem:[%s7166_s1 + $0x7d4] sm:$0xf0] }
  0x54   :  { %2262 = vmatpush.bf16.msra.mxu0 %v3755_v55  ;;  %2194 = vmatmul.bf16.vlgmr.msrb.gmra.mxu1 %v5374_v2  ;;  %v3731_v39 = vor.u32 %v4551_v32, %v3730_v31  ;;  %v5476_v55 = vor.u32 %v4388_v38, %v3092_v41  ;;  %v4026_v31 = vld [vmem:[%s7166_s1 + $0x650] sm:$0xf]  ;;  %v4625_v32 = vld [vmem:[%s7166_s1 + $0x654] sm:$0xf0]  ;;  %v3164_v38 = vld [vmem:[%s7167_s0 + $0x178] sm:$0xf0] }
  0x55   :  { %2286 = vmatpush.bf16.msra.mxu1 %v3819_v1  ;;  %2218 = vmatmul.bf16.vlgmr.msrb.gmra.mxu2 %v5376_v4  ;;  %v4661_v1 = vld [vmem:[%s7166_s1 + $0x774] sm:$0xf0]  ;;  %v4416_v40 = vld [vmem:[%s7167_s0 + $0x17c] sm:$0xf0]  ;;  %v4027_v41 = vor.u32 %v4625_v32, %v4026_v31  ;;  %v4381_v32 = vld [vmem:[%s7167_s0 + $0x64] sm:$0xf0] }
  0x56   :  { %2310 = vmatpush.bf16.msra.mxu2 %v3883_v49  ;;  %2242 = vmatmul.bf16.vlgmr.msrb.gmra.mxu3 %v5378_v5  ;;  %v3100_v49 = vld [vmem:[%s7167_s0 + $0xf0] sm:$0xf0]  ;;  %v4171_v7 = vor.u32 %v4661_v1, %v4170_v61  ;;  %v4090_v1 = vld [vmem:[%s7166_s1 + $0x6d0] sm:$0xf]  ;;  %v3034_v31 = vld [vmem:[%s7167_s0 + $0x20] sm:$0xf] }
  0x57   :  { %2334 = vmatpush.bf16.msra.mxu3 %v3947_v59  ;;  %v5478_v59 = vor.u32 %v4398_v43, %v3098_v42  ;;  %v5480_v60 = vor.u32 %v4389_v47, %v3100_v49  ;;  %v4407_v43 = vld [vmem:[%s7167_s0 + $0x13c] sm:$0xf]  ;;  %v5578_v47 = vor.u32 %v4406_v35, %v3164_v38  ;;  %v3036_v35 = vld [vmem:[%s7167_s0 + $0x68] sm:$0xf0] }
  0x58   :  { %2263 = vmatpush.bf16.msra.mxu0 %v3747_v10  ;;  %v4677_v10 = vld [vmem:[%s7166_s1 + $0x7f4] sm:$0xf0]  ;;  %v4373_v38 = vld [vmem:[%s7167_s0 + $0x2c] sm:$0xf] }
  0x59   :  { %2287 = vmatpush.bf16.msra.mxu1 %v3811_v15  ;;  %v4235_v12 = vor.u32 %v4677_v10, %v4234_v9  ;;  %v4162_v15 = vld [vmem:[%s7166_s1 + $0x760] sm:$0xf]  ;;  %v4655_v9 = vld [vmem:[%s7166_s1 + $0x744] sm:$0xf0] }
  0x5a   :  { %2311 = vmatpush.bf16.msra.mxu2 %v3875_v6  ;;  %v4042_v6 = vld [vmem:[%s7166_s1 + $0x670] sm:$0xf]  ;;  %v4163_v20 = vor.u32 %v4659_v17, %v4162_v15  ;;  %v4018_v10 = vld [vmem:[%s7166_s1 + $0x640] sm:$0xf]  ;;  %v4671_v15 = vld [vmem:[%s7166_s1 + $0x7c4] sm:$0xf0] }
  0x5b   :  { %2335 = vmatpush.bf16.msra.mxu3 %v3939_v14  ;;  %v4043_v11 = vor.u32 %v4629_v8, %v4042_v6  ;;  %v4645_v14 = vld [vmem:[%s7166_s1 + $0x6f4] sm:$0xf0] }
  0x5c   :  { %2264 = vmatpush.bf16.msra.mxu0 %v3739_v23  ;;  %v4107_v16 = vor.u32 %v4645_v14, %v4106_v13  ;;  %v4675_v23 = vld [vmem:[%s7166_s1 + $0x7e4] sm:$0xf0]  ;;  %v4641_v6 = vld [vmem:[%s7166_s1 + $0x6d4] sm:$0xf0]  ;;  %v4210_v14 = vld [vmem:[%s7166_s1 + $0x7c0] sm:$0xf] }
  0x5d   :  { %2288 = vmatpush.bf16.msra.mxu1 %v3803_v29  ;;  %v4227_v26 = vor.u32 %v4675_v23, %v4226_v22  ;;  %v4657_v29 = vld [vmem:[%s7166_s1 + $0x754] sm:$0xf0]  ;;  %v4091_v8 = vor.u32 %v4641_v6, %v4090_v1  ;;  %v4211_v17 = vor.u32 %v4671_v15, %v4210_v14  ;;  %v4010_v23 = vld [vmem:[%s7166_s1 + $0x630] sm:$0xf]  ;;  %v4651_v1 = vld [vmem:[%s7166_s1 + $0x724] sm:$0xf0] }
  0x5e   :  { %2312 = vmatpush.bf16.msra.mxu2 %v3867_v19  ;;  %v4627_v19 = vld [vmem:[%s7166_s1 + $0x664] sm:$0xf0]  ;;  %v4155_v36 = vor.u32 %v4657_v29, %v4154_v28  ;;  %v4074_v28 = vld [vmem:[%s7166_s1 + $0x6b0] sm:$0xf]  ;;  %v4637_v29 = vld [vmem:[%s7166_s1 + $0x6b4] sm:$0xf0] }
  0x5f   :  { %2336 = vmatpush.bf16.msra.mxu3 %v3931_v24  ;;  %v4035_v21 = vor.u32 %v4627_v19, %v4034_v18  ;;  %v4098_v24 = vld [vmem:[%s7166_s1 + $0x6e0] sm:$0xf]  ;;  %v4639_v18 = vld [vmem:[%s7166_s1 + $0x6c4] sm:$0xf0]  ;;  %v4138_v19 = vld [vmem:[%s7166_s1 + $0x730] sm:$0xf] }
  0x60   :  { %2265 = vmatpush.bf16.msra.mxu0 %v3731_v39  ;;  %v4099_v30 = vor.u32 %v4643_v27, %v4098_v24  ;;  %v3170_v39 = vld [vmem:[%s7167_s0 + $0x138] sm:$0xf]  ;;  %v4635_v14 = vld [vmem:[%s7166_s1 + $0x6a4] sm:$0xf0] }
  0x61   :  { %2289 = vmatpush.bf16.msra.mxu1 %v3795_v46  ;;  %v5576_v46 = vor.u32 %v4415_v34, %v3162_v25  ;;  %v5580_v49 = vor.u32 %v4416_v40, %v3170_v39  ;;  %v4621_v24 = vld [vmem:[%s7166_s1 + $0x634] sm:$0xf0]  ;;  %v4202_v25 = vld [vmem:[%s7166_s1 + $0x7b0] sm:$0xf]  ;;  %v4075_v34 = vor.u32 %v4637_v29, %v4074_v28  ;;  %v3044_v39 = vld [vmem:[%s7167_s0 + $0x70] sm:$0xf0]  ;;  %v5666_v40 = vor.u32 %v4381_v32, %v3034_v31 }
  0x62   :  { %2313 = vmatpush.bf16.msra.mxu2 %v3859_v33  ;;  %v4218_v33 = vld [vmem:[%s7166_s1 + $0x7d0] sm:$0xf]  ;;  %v4669_v27 = vld [vmem:[%s7166_s1 + $0x7b4] sm:$0xf0]  ;;  %v4114_v31 = vld [vmem:[%s7166_s1 + $0x700] sm:$0xf] }
  0x63   :  { %2337 = vmatpush.bf16.msra.mxu3 %v3923_v45  ;;  %2175 = vmatmul.bf16.gmra.mxu0 %v5474_v52  ;;  %v4219_v42 = vor.u32 %v4673_v37, %v4218_v33  ;;  %v3172_v45 = vld [vmem:[%s7167_s0 + $0x180] sm:$0xf0]  ;;  %v4382_v37 = vld [vmem:[%s7167_s0 + $0x6c] sm:$0xf0]  ;;  %v3114_v32 = vld [vmem:[%s7167_s0 + $0xb8] sm:$0xf] }
  0x64   :  { %2199 = vmatmul.bf16.gmra.mxu1 %v5476_v55  ;;  %2354 = vmatpush.bf16.msrb.mxu0 %v4043_v11  ;;  %v5582_v61 = vor.u32 %v4407_v43, %v3172_v45  ;;  %v4623_v11 = vld [vmem:[%s7166_s1 + $0x644] sm:$0xf0]  ;;  %v4372_v33 = vld [vmem:[%s7167_s0 + $0x24] sm:$0xf]  ;;  %v5672_v43 = vor.u32 %v4373_v38, %v3044_v39  ;;  %v4130_v45 = vld [vmem:[%s7166_s1 + $0x720] sm:$0xf] }
  0x65   :  { %2223 = vmatmul.bf16.gmra.mxu2 %v5478_v59  ;;  %2378 = vmatpush.bf16.msrb.mxu1 %v4107_v16  ;;  %v4019_v13 = vor.u32 %v4623_v11, %v4018_v10  ;;  %v4082_v16 = vld [vmem:[%s7166_s1 + $0x6c0] sm:$0xf]  ;;  %v4131_v6 = vor.u32 %v4651_v1, %v4130_v45  ;;  %v4667_v11 = vld [vmem:[%s7166_s1 + $0x7a4] sm:$0xf0]  ;;  %v4058_v29 = vld [vmem:[%s7166_s1 + $0x690] sm:$0xf] }
  0x66   :  { %2247 = vmatmul.bf16.gmra.mxu3 %v5480_v60  ;;  %2402 = vmatpush.bf16.msrb.mxu2 %v4171_v7  ;;  %v4146_v7 = vld [vmem:[%s7166_s1 + $0x740] sm:$0xf]  ;;  %v4615_v1 = vld [vmem:[%s7166_s1 + $0x604] sm:$0xf0] }
  0x67   :  { %2426 = vmatpush.bf16.msrb.mxu3 %v4235_v12  ;;  %v4147_v12 = vor.u32 %v4655_v9, %v4146_v7  ;;  %v4002_v7 = vld [vmem:[%s7166_s1 + $0x620] sm:$0xf] }
  0x68   :  { %2355 = vmatpush.bf16.msrb.mxu0 %v4035_v21  ;;  %v4083_v21 = vor.u32 %v4639_v18, %v4082_v16  ;;  %v4194_v10 = vld [vmem:[%s7166_s1 + $0x7a0] sm:$0xf]  ;;  %v3106_v16 = vld [vmem:[%s7167_s0 + $0xb0] sm:$0xf] }
  0x69   :  { %2379 = vmatpush.bf16.msrb.mxu1 %v4099_v30  ;;  %v4203_v30 = vor.u32 %v4669_v27, %v4202_v25  ;;  %v4122_v18 = vld [vmem:[%s7166_s1 + $0x710] sm:$0xf]  ;;  %v3986_v45 = vld [vmem:[%s7166_s1 + $0x600] sm:$0xf] }
  0x6a   :  { %2403 = vmatpush.bf16.msrb.mxu2 %v4163_v20  ;;  %v4653_v20 = vld [vmem:[%s7166_s1 + $0x734] sm:$0xf0]  ;;  %v4186_v25 = vld [vmem:[%s7166_s1 + $0x790] sm:$0xf] }
  0x6b   :  { %2427 = vmatpush.bf16.msrb.mxu3 %v4227_v26  ;;  %v4139_v22 = vor.u32 %v4653_v20, %v4138_v19  ;;  %v4011_v26 = vor.u32 %v4621_v24, %v4010_v23  ;;  %v4649_v19 = vld [vmem:[%s7166_s1 + $0x714] sm:$0xf0]  ;;  %v3994_v20 = vld [vmem:[%s7166_s1 + $0x610] sm:$0xf] }
  0x6c   :  { %2356 = vmatpush.bf16.msrb.mxu0 %v4027_v41  ;;  %v5668_v41 = vor.u32 %v4372_v33, %v3036_v35  ;;  %v4123_v23 = vor.u32 %v4649_v19, %v4122_v18  ;;  %v4617_v24 = vld [vmem:[%s7166_s1 + $0x614] sm:$0xf0]  ;;  %v4400_v33 = vld [vmem:[%s7167_s0 + $0xfc] sm:$0xf0]  ;;  %v4647_v35 = vld [vmem:[%s7166_s1 + $0x704] sm:$0xf0] }
  0x6d   :  { %2380 = vmatpush.bf16.msrb.mxu1 %v4091_v8  ;;  %v4619_v8 = vld [vmem:[%s7166_s1 + $0x624] sm:$0xf0]  ;;  %v3995_v27 = vor.u32 %v4617_v24, %v3994_v20  ;;  %v4115_v38 = vor.u32 %v4647_v35, %v4114_v31  ;;  %v4298_v18 = vld [vmem:[%s7166_s1 + $0x870] sm:$0xf]  ;;  %v4693_v20 = vld [vmem:[%s7166_s1 + $0x874] sm:$0xf0] }
  0x6e   :  { %2404 = vmatpush.bf16.msrb.mxu2 %v4155_v36  ;;  %v3042_v36 = vld [vmem:[%s7167_s0 + $0x28] sm:$0xf]  ;;  %v4003_v9 = vor.u32 %v4619_v8, %v4002_v7  ;;  %v5769_v8 = vor.u32 %v4400_v33, %v3114_v32  ;;  %v3180_v31 = vld [vmem:[%s7167_s0 + $0x188] sm:$0xf0] }
  0x6f   :  { %2428 = vmatpush.bf16.msrb.mxu3 %v4219_v42  ;;  %v5670_v42 = vor.u32 %v4382_v37, %v3042_v36  ;;  %v4391_v36 = vld [vmem:[%s7167_s0 + $0xbc] sm:$0xf]  ;;  %v3116_v37 = vld [vmem:[%s7167_s0 + $0x100] sm:$0xf0]  ;;  %v3268_v33 = vld [vmem:[%s7166_s1 + $0x68] sm:$0xf0] }
  0x70   :  { %2357 = vmatpush.bf16.msrb.mxu0 %v4019_v13  ;;  %v4195_v13 = vor.u32 %v4667_v11, %v4194_v10  ;;  %7182 = vst [vmem:[#allocation2_spill] sm:$0xff] %v5769_v8  ;;  %v4663_v10 = vld [vmem:[%s7166_s1 + $0x784] sm:$0xf0]  ;;  %v4050_v11 = vld [vmem:[%s7166_s1 + $0x680] sm:$0xf] }
  0x71   :  { %2381 = vmatpush.bf16.msrb.mxu1 %v4083_v21  ;;  %v4390_v21 = vld [vmem:[%s7167_s0 + $0xb4] sm:$0xf]  ;;  %v4691_v35 = vld [vmem:[%s7166_s1 + $0x864] sm:$0xf0] }
  0x72   :  { %2405 = vmatpush.bf16.msrb.mxu2 %v4147_v12  ;;  %v4066_v12 = vld [vmem:[%s7166_s1 + $0x6a0] sm:$0xf] }
  0x73   :  { %2180 = vmatmul.bf16.gmra.mxu0 %v5576_v46  ;;  %2429 = vmatpush.bf16.msrb.mxu3 %v4211_v17  ;;  %v4067_v15 = vor.u32 %v4635_v14, %v4066_v12  ;;  %v4399_v17 = vld [vmem:[%s7167_s0 + $0xf4] sm:$0xf0]  ;;  %v4631_v12 = vld [vmem:[%s7166_s1 + $0x684] sm:$0xf0] }
  0x74   :  { %2204 = vmatmul.bf16.gmra.mxu1 %v5578_v47  ;;  %2358 = vmatpush.bf16.msrb.mxu0 %v4011_v26  ;;  %v4665_v26 = vld [vmem:[%s7166_s1 + $0x794] sm:$0xf0]  ;;  %v5756_v39 = vor.u32 %v4399_v17, %v3106_v16  ;;  %v4436_v16 = vld [vmem:[%s7166_s1 + $0x74] sm:$0xf]  ;;  %v3276_v17 = vld [vmem:[%s7166_s1 + $0x78] sm:$0xf0] }
  0x75   :  { %2228 = vmatmul.bf16.gmra.mxu2 %v5580_v49  ;;  %2382 = vmatpush.bf16.msrb.mxu1 %v4075_v34  ;;  %v4187_v28 = vor.u32 %v4665_v26, %v4186_v25  ;;  %v3279_v19 = vor.u32 %v4436_v16, %v3276_v17  ;;  %v3178_v25 = vld [vmem:[%s7167_s0 + $0x140] sm:$0xf]  ;;  %v4417_v26 = vld [vmem:[%s7167_s0 + $0x184] sm:$0xf0] }
  0x76   :  { %2252 = vmatmul.bf16.gmra.mxu3 %v5582_v61  ;;  %2406 = vmatpush.bf16.msrb.mxu2 %v4139_v22  ;;  %v3108_v22 = vld [vmem:[%s7167_s0 + $0xf8] sm:$0xf0]  ;;  %v5858_v16 = vor.u32 %v4417_v26, %v3178_v25  ;;  %v4282_v25 = vld [vmem:[%s7166_s1 + $0x850] sm:$0xf] }
  0x77   :  { %2430 = vmatpush.bf16.msrb.mxu3 %v4203_v30  ;;  %v4633_v30 = vld [vmem:[%s7166_s1 + $0x694] sm:$0xf0]  ;;  %v5767_v7 = vor.u32 %v4390_v21, %v3108_v22  ;;  %v4452_v21 = vld [vmem:[%s7166_s1 + $0xf4] sm:$0xf]  ;;  %v3340_v22 = vld [vmem:[%s7166_s1 + $0xf8] sm:$0xf0] }
  0x78   :  { %2359 = vmatpush.bf16.msrb.mxu0 %v4003_v9  ;;  %v4059_v34 = vor.u32 %v4633_v30, %v4058_v29  ;;  %v3987_v9 = vor.u32 %v4615_v1, %v3986_v45  ;;  %v3343_v24 = vor.u32 %v4452_v21, %v3340_v22  ;;  %v4434_v29 = vld [vmem:[%s7166_s1 + $0x64] sm:$0xf]  ;;  %v3332_v45 = vld [vmem:[%s7166_s1 + $0xe8] sm:$0xf0]  ;;  %v4354_v1 = vld [vmem:[%s7166_s1 + $0x8e0] sm:$0xf] }
  0x79   :  { %2383 = vmatpush.bf16.msrb.mxu1 %v4067_v15  ;;  %v4051_v15 = vor.u32 %v4631_v12, %v4050_v11  ;;  %v4408_v30 = vld [vmem:[%s7167_s0 + $0x144] sm:$0xf]  ;;  %v4707_v11 = vld [vmem:[%s7166_s1 + $0x8e4] sm:$0xf0]  ;;  %v4409_v12 = vld [vmem:[%s7167_s0 + $0x14c] sm:$0xf] }
  0x7a   :  { %2407 = vmatpush.bf16.msrb.mxu2 %v4131_v6  ;;  %v4178_v6 = vld [vmem:[%s7166_s1 + $0x780] sm:$0xf] }
  0x7b   :  { %2431 = vmatpush.bf16.msrb.mxu3 %v4195_v13  ;;  %v5780_v13 = vor.u32 %v4391_v36, %v3116_v37  ;;  %v4179_v14 = vor.u32 %v4663_v10, %v4178_v6  ;;  %v3271_v36 = vor.u32 %v4434_v29, %v3268_v33  ;;  %v3186_v6 = vld [vmem:[%s7167_s0 + $0x148] sm:$0xf]  ;;  %v3324_v29 = vld [vmem:[%s7166_s1 + $0xd8] sm:$0xf0] }
  0x7c   :  { %2360 = vmatpush.bf16.msrb.mxu0 %v3995_v27  ;;  %v4362_v27 = vld [vmem:[%s7166_s1 + $0x8f0] sm:$0xf] }
  0x7d   :  { %2384 = vmatpush.bf16.msrb.mxu1 %v4059_v34  ;;  %7183 = vst [vmem:[#allocation3_spill] sm:$0xff] %v5780_v13  ;;  %v4290_v34 = vld [vmem:[%s7166_s1 + $0x860] sm:$0xf] }
  0x7e   :  { %2408 = vmatpush.bf16.msrb.mxu2 %v4123_v23  ;;  %v4299_v23 = vor.u32 %v4693_v20, %v4298_v18  ;;  %v4291_v37 = vor.u32 %v4691_v35, %v4290_v34  ;;  %v5860_v18 = vor.u32 %v4408_v30, %v3180_v31  ;;  %v4705_v34 = vld [vmem:[%s7166_s1 + $0x8d4] sm:$0xf0]  ;;  %v4430_v35 = vld [vmem:[%s7166_s1 + $0x44] sm:$0xf] }
  0x7f   :  { %2432 = vmatpush.bf16.msrb.mxu3 %v4187_v28  ;;  %v4709_v28 = vld [vmem:[%s7166_s1 + $0x8f4] sm:$0xf0] }
  0x80   :  { %2361 = vmatpush.bf16.msrb.mxu0 %v3987_v9  ;;  %v4363_v32 = vor.u32 %v4709_v28, %v4362_v27  ;;  %v4418_v9 = vld [vmem:[%s7167_s0 + $0x18c] sm:$0xf0]  ;;  %v4689_v27 = vld [vmem:[%s7166_s1 + $0x854] sm:$0xf0]  ;;  %v4448_v28 = vld [vmem:[%s7166_s1 + $0xd4] sm:$0xf] }
  0x81   :  { %2385 = vmatpush.bf16.msrb.mxu1 %v4051_v15  ;;  %v4355_v15 = vor.u32 %v4707_v11, %v4354_v1  ;;  %v4283_v30 = vor.u32 %v4689_v27, %v4282_v25  ;;  %v3327_v31 = vor.u32 %v4448_v28, %v3324_v29  ;;  %v4384_v25 = vld [vmem:[%s7167_s0 + $0x7c] sm:$0xf0]  ;;  %v3316_v27 = vld [vmem:[%s7166_s1 + $0xc8] sm:$0xf0]  ;;  %v4703_v29 = vld [vmem:[%s7166_s1 + $0x8c4] sm:$0xf0] }
  0x82   :  { %2409 = vmatpush.bf16.msrb.mxu2 %v4115_v38  ;;  %v4450_v38 = vld [vmem:[%s7166_s1 + $0xe4] sm:$0xf]  ;;  %v4338_v28 = vld [vmem:[%s7166_s1 + $0x8c0] sm:$0xf] }
  0x83   :  { %2266 = vmatmul.bf16.vlgmr.msra.gmra.mxu0 %v5666_v40  ;;  %2433 = vmatpush.bf16.msrb.mxu3 %v4179_v14  ;;  %v3335_v10 = vor.u32 %v4450_v38, %v3332_v45  ;;  %v3188_v14 = vld [vmem:[%s7167_s0 + $0x190] sm:$0xf0] }
  0x84   :  { %2290 = vmatmul.bf16.vlgmr.msra.gmra.mxu1 %v5668_v41  ;;  %2450 = vmatpush.bf16.msra.mxu0 %v4299_v23  ;;  %v5864_v21 = vor.u32 %v4409_v12, %v3188_v14  ;;  %v4432_v23 = vld [vmem:[%s7166_s1 + $0x54] sm:$0xf]  ;;  %v3050_v12 = vld [vmem:[%s7167_s0 + $0x30] sm:$0xf]  ;;  %v4383_v14 = vld [vmem:[%s7167_s0 + $0x74] sm:$0xf0] }
  0x85   :  { %2314 = vmatmul.bf16.vlgmr.msra.gmra.mxu2 %v5670_v42  ;;  %2474 = vmatpush.bf16.msra.mxu1 %v4363_v32  ;;  %v4346_v32 = vld [vmem:[%s7166_s1 + $0x8d0] sm:$0xf] }
  0x86   :  { %2338 = vmatmul.bf16.vlgmr.msra.gmra.mxu3 %v5672_v43  ;;  %2498 = vmatpush.bf16.msra.mxu2 %v3279_v19  ;;  %v5862_v19 = vor.u32 %v4418_v9, %v3186_v6  ;;  %7185 = vst [vmem:[#allocation5_spill] sm:$0xff] %v5864_v21  ;;  %v4347_v1 = vor.u32 %v4705_v34, %v4346_v32  ;;  %v4428_v32 = vld [vmem:[%s7166_s1 + $0x34] sm:$0xf]  ;;  %v4266_v34 = vld [vmem:[%s7166_s1 + $0x830] sm:$0xf] }
  0x87   :  { %2522 = vmatpush.bf16.msra.mxu3 %v3343_v24  ;;  %v3260_v24 = vld [vmem:[%s7166_s1 + $0x58] sm:$0xf0] }
  0x88   :  { %2451 = vmatpush.bf16.msra.mxu0 %v4291_v37  ;;  %7184 = vst [vmem:[#allocation4_spill] sm:$0xff] %v5862_v19  ;;  %v3263_v26 = vor.u32 %v4432_v23, %v3260_v24  ;;  %v3052_v23 = vld [vmem:[%s7167_s0 + $0x78] sm:$0xf0]  ;;  %v3058_v24 = vld [vmem:[%s7167_s0 + $0x38] sm:$0xf] }
  0x89   :  { %2475 = vmatpush.bf16.msra.mxu1 %v4355_v15  ;;  %v4274_v15 = vld [vmem:[%s7166_s1 + $0x840] sm:$0xf] }
  0x8a   :  { %2499 = vmatpush.bf16.msra.mxu2 %v3271_v36  ;;  %v3252_v36 = vld [vmem:[%s7166_s1 + $0x48] sm:$0xf0] }
  0x8b   :  { %2523 = vmatpush.bf16.msra.mxu3 %v3335_v10  ;;  %v3255_v6 = vor.u32 %v4430_v35, %v3252_v36  ;;  %v4685_v36 = vld [vmem:[%s7166_s1 + $0x834] sm:$0xf0] }
  0x8c   :  { %2452 = vmatpush.bf16.msra.mxu0 %v4283_v30 }
  0x8d   :  { %2476 = vmatpush.bf16.msra.mxu1 %v4347_v1  ;;  %v3060_v1 = vld [vmem:[%s7167_s0 + $0x80] sm:$0xf0] }
  0x8e   :  { %2500 = vmatpush.bf16.msra.mxu2 %v3263_v26 }
  0x8f   :  { %2524 = vmatpush.bf16.msra.mxu3 %v3327_v31  ;;  %v4339_v31 = vor.u32 %v4703_v29, %v4338_v28  ;;  %v5966_v29 = vor.u32 %v4384_v25, %v3058_v24  ;;  %v4258_v25 = vld [vmem:[%s7166_s1 + $0x820] sm:$0xf] }
  0x91   :  { %2477 = vmatpush.bf16.msra.mxu1 %v4339_v31  ;;  %7186 = vst [vmem:[#allocation6_spill] sm:$0xff] %v5966_v29  ;;  %v4683_v31 = vld [vmem:[%s7166_s1 + $0x824] sm:$0xf0] }
  0x92   :  { %2501 = vmatpush.bf16.msra.mxu2 %v3255_v6  ;;  %v4267_v6 = vor.u32 %v4685_v36, %v4266_v34  ;;  %v4442_v34 = vld [vmem:[%s7166_s1 + $0xa4] sm:$0xf]  ;;  %v4259_v36 = vor.u32 %v4683_v31, %v4258_v25  ;;  %v4250_v31 = vld [vmem:[%s7166_s1 + $0x810] sm:$0xf] }
  0x93   :  { %2271 = vmatmul.bf16.gmra.mxu0 %v5756_v39 }
  0x94   :  { %2295 = vmatmul.bf16.gmra.mxu1 %v5767_v7 }
  0x95   :  { %2319 = vmatmul.bf16.gmra.mxu2 %v5769_v8 }
  0x96   :  { %2343 = vmatmul.bf16.gmra.mxu3 %v5780_v13 }
  0xa0   :  { %v2075_v17 = vpop.f32.mrf.mxu0 }
  0xa1   :  { %v2099_v20 = vpop.f32.mrf.mxu1 }
  0xa2   :  { %v2100_v22 = vadd.f32 %v2099_v20, %v2075_v17  ;;  %v4687_v17 = vld [vmem:[%s7166_s1 + $0x844] sm:$0xf0]  ;;  %v4446_v20 = vld [vmem:[%s7166_s1 + $0xc4] sm:$0xf] }
  0xa3   :  { %2276 = vmatmul.bf16.gmra.mxu0 %v5858_v16  ;;  %v4275_v26 = vor.u32 %v4687_v17, %v4274_v15  ;;  %v3319_v30 = vor.u32 %v4446_v20, %v3316_v27  ;;  %v5962_v17 = vor.u32 %v4383_v14, %v3050_v12  ;;  %v4330_v12 = vld [vmem:[%s7166_s1 + $0x8b0] sm:$0xf] }
  0xa4   :  { %2300 = vmatmul.bf16.gmra.mxu1 %v5860_v18 }
  0xa5   :  { %2324 = vmatmul.bf16.gmra.mxu2 %v5862_v19  ;;  %2453 = vmatpush.bf16.msra.mxu0 %v4275_v26 }
  0xa6   :  { %2348 = vmatmul.bf16.gmra.mxu3 %v5864_v21 }
  0xa7   :  { %2525 = vmatpush.bf16.msra.mxu3 %v3319_v30 }
  0xa8   :  { %v2123_v33 = vpop.f32.mrf.mxu2  ;;  %v2077_v45 = vpop.f32.mrf.mxu0 }
  0xa9   :  { %v2124_v37 = vadd.f32 %v2123_v33, %v2100_v22  ;;  %v2147_v38 = vpop.f32.mrf.mxu3  ;;  %v2101_v9 = vpop.f32.mrf.mxu1  ;;  %v4374_v22 = vld [vmem:[%s7167_s0 + $0x34] sm:$0xf]  ;;  %v3244_v33 = vld [vmem:[%s7166_s1 + $0x38] sm:$0xf0]  ;;  %2454 = vmatpush.bf16.msra.mxu0 %v4267_v6 }
  0xaa   :  { %v2102_v11 = vadd.f32 %v2101_v9, %v2077_v45  ;;  %v3247_v35 = vor.u32 %v4428_v32, %v3244_v33  ;;  %v4375_v45 = vld [vmem:[%s7167_s0 + $0x3c] sm:$0xf]  ;;  %v5964_v28 = vor.u32 %v4374_v22, %v3052_v23  ;;  %v4426_v22 = vld [vmem:[%s7166_s1 + $0x24] sm:$0xf]  ;;  %v3236_v23 = vld [vmem:[%s7166_s1 + $0x28] sm:$0xf0] }
  0xab   :  { %v5900_v10 = vadd.f32 %v2147_v38, %v2124_v37  ;;  %v4444_v37 = vld [vmem:[%s7166_s1 + $0xb4] sm:$0xf]  ;;  %v3308_v38 = vld [vmem:[%s7166_s1 + $0xb8] sm:$0xf0]  ;;  %v5968_v33 = vor.u32 %v4375_v45, %v3060_v1  ;;  %v3239_v24 = vor.u32 %v4426_v22, %v3236_v23  ;;  %v4699_v45 = vld [vmem:[%s7166_s1 + $0x8a4] sm:$0xf0] }
  0xac   :  { %v3311_v9 = vor.u32 %v4444_v37, %v3308_v38  ;;  %2502 = vmatpush.bf16.msra.mxu2 %v3247_v35  ;;  %v3300_v37 = vld [vmem:[%s7166_s1 + $0xa8] sm:$0xf0]  ;;  %v4322_v38 = vld [vmem:[%s7166_s1 + $0x8a0] sm:$0xf]  ;;  %v4392_v22 = vld [vmem:[%s7167_s0 + $0xc4] sm:$0xf] }
  0xad   :  { %7187 = vst [vmem:[#allocation7_spill] sm:$0xff] %v5968_v33  ;;  %2455 = vmatpush.bf16.msra.mxu0 %v4259_v36  ;;  %v3124_v23 = vld [vmem:[%s7167_s0 + $0x108] sm:$0xf0] }
  0xae   :  { %2526 = vmatpush.bf16.msra.mxu3 %v3311_v9 }
  0xb0   :  { %v2125_v15 = vpop.f32.mrf.mxu2  ;;  %v2080_v27 = vpop.f32.mrf.mxu0  ;;  %2503 = vmatpush.bf16.msra.mxu2 %v3239_v24  ;;  %v3130_v24 = vld [vmem:[%s7167_s0 + $0xc8] sm:$0xf] }
  0xb1   :  { %v2126_v20 = vadd.f32 %v2125_v15, %v2102_v11  ;;  %v2149_v26 = vpop.f32.mrf.mxu3  ;;  %v2104_v32 = vpop.f32.mrf.mxu1  ;;  %v4701_v11 = vld [vmem:[%s7166_s1 + $0x8b4] sm:$0xf0]  ;;  %v3303_v15 = vor.u32 %v4442_v34, %v3300_v37  ;;  %v3292_v37 = vld [vmem:[%s7166_s1 + $0x98] sm:$0xf0] }
  0xb2   :  { %v2105_v30 = vadd.f32 %v2104_v32, %v2080_v27  ;;  %v4331_v14 = vor.u32 %v4701_v11, %v4330_v12  ;;  %v3122_v12 = vld [vmem:[%s7167_s0 + $0xc0] sm:$0xf]  ;;  %v4401_v11 = vld [vmem:[%s7167_s0 + $0x104] sm:$0xf0]  ;;  %v4681_v34 = vld [vmem:[%s7166_s1 + $0x814] sm:$0xf0] }
  0xb3   :  { %v5970_v21 = vadd.f32 %v2149_v26, %v2126_v20  ;;  %2362 = vmatmul.bf16.vlgmr.msrb.gmra.mxu0 %v5962_v17  ;;  %v4323_v20 = vor.u32 %v4699_v45, %v4322_v38  ;;  %2527 = vmatpush.bf16.msra.mxu3 %v3303_v15  ;;  %v4251_v36 = vor.u32 %v4681_v34, %v4250_v31  ;;  %v4314_v38 = vld [vmem:[%s7166_s1 + $0x890] sm:$0xf]  ;;  %v4697_v45 = vld [vmem:[%s7166_s1 + $0x894] sm:$0xf0]  ;;  %v4422_v15 = vld [vmem:[%s7166_s1 + $0x4] sm:$0xf] }
  0xb4   :  { %2386 = vmatmul.bf16.vlgmr.msrb.gmra.mxu1 %v5964_v28  ;;  %v6062_v31 = vor.u32 %v4401_v11, %v3122_v12  ;;  %v4242_v34 = vld [vmem:[%s7166_s1 + $0x800] sm:$0xf] }
  0xb5   :  { %2410 = vmatmul.bf16.vlgmr.msrb.gmra.mxu2 %v5966_v29  ;;  %2478 = vmatpush.bf16.msra.mxu1 %v4331_v14  ;;  %v3228_v14 = vld [vmem:[%s7166_s1 + $0x18] sm:$0xf0] }
  0xb6   :  { %2434 = vmatmul.bf16.vlgmr.msrb.gmra.mxu3 %v5968_v33  ;;  %2456 = vmatpush.bf16.msra.mxu0 %v4251_v36  ;;  %7188 = vst [vmem:[#allocation8_spill] sm:$0xff] %v6062_v31  ;;  %v3204_v33 = vld [vmem:[%s7167_s0 + $0x1a0] sm:$0xf0] }
  0xb8   :  { %v2128_v35 = vpop.f32.mrf.mxu2  ;;  %v2082_v9 = vpop.f32.mrf.mxu0 }
  0xb9   :  { %v2129_v1 = vadd.f32 %v2128_v35, %v2105_v30  ;;  %v2152_v6 = vpop.f32.mrf.mxu3  ;;  %v2106_v26 = vpop.f32.mrf.mxu1  ;;  %2479 = vmatpush.bf16.msra.mxu1 %v4323_v20  ;;  %v4424_v30 = vld [vmem:[%s7166_s1 + $0x14] sm:$0xf]  ;;  %v3220_v20 = vld [vmem:[%s7166_s1 + $0x8] sm:$0xf0] }
  0xba   :  { %v2107_v32 = vadd.f32 %v2106_v26, %v2082_v9  ;;  %v3231_v25 = vor.u32 %v4424_v30, %v3228_v14  ;;  %v4440_v35 = vld [vmem:[%s7166_s1 + $0x94] sm:$0xf]  ;;  %v4315_v9 = vor.u32 %v4697_v45, %v4314_v38  ;;  %v4393_v26 = vld [vmem:[%s7167_s0 + $0xcc] sm:$0xf]  ;;  %v3223_v14 = vor.u32 %v4422_v15, %v3220_v20  ;;  %v4695_v20 = vld [vmem:[%s7166_s1 + $0x884] sm:$0xf0] }
  0xbb   :  { %v6006_v27 = vadd.f32 %v2152_v6, %v2129_v1  ;;  %v4402_v1 = vld [vmem:[%s7167_s0 + $0x10c] sm:$0xf0]  ;;  %v3295_v6 = vor.u32 %v4440_v35, %v3292_v37  ;;  %v3132_v30 = vld [vmem:[%s7167_s0 + $0x110] sm:$0xf0]  ;;  %v4679_v35 = vld [vmem:[%s7166_s1 + $0x804] sm:$0xf0]  ;;  %v6073_v15 = vor.u32 %v4392_v22, %v3124_v23 }
  0xbc   :  { %2504 = vmatpush.bf16.msra.mxu2 %v3231_v25  ;;  %v4438_v37 = vld [vmem:[%s7166_s1 + $0x84] sm:$0xf]  ;;  %v6075_v12 = vor.u32 %v4402_v1, %v3130_v24  ;;  %v4243_v11 = vor.u32 %v4679_v35, %v4242_v34  ;;  %v3404_v35 = vld [vmem:[%s7166_s1 + $0x178] sm:$0xf0] }
  0xbd   :  { %2528 = vmatpush.bf16.msra.mxu3 %v3295_v6  ;;  %2480 = vmatpush.bf16.msra.mxu1 %v4315_v9  ;;  %7189 = vst [vmem:[#allocation9_spill] sm:$0xff] %v6073_v15  ;;  %v3284_v6 = vld [vmem:[%s7166_s1 + $0x88] sm:$0xf0]  ;;  %v4306_v9 = vld [vmem:[%s7166_s1 + $0x880] sm:$0xf] }
  0xbe   :  { %7190 = vst [vmem:[#allocation10_spill] sm:$0xff] %v6075_v12  ;;  %v3287_v22 = vor.u32 %v4438_v37, %v3284_v6  ;;  %v4307_v23 = vor.u32 %v4695_v20, %v4306_v9  ;;  %2457 = vmatpush.bf16.msra.mxu0 %v4243_v11  ;;  %v4516_v37 = vld [vmem:[%s7166_s1 + $0x2f4] sm:$0xf] }
  0xc0   :  { %v2130_v25 = vpop.f32.mrf.mxu2  ;;  %v2085_v45 = vpop.f32.mrf.mxu0  ;;  %2505 = vmatpush.bf16.msra.mxu2 %v3223_v14  ;;  %v4468_v14 = vld [vmem:[%s7166_s1 + $0x174] sm:$0xf] }
  0xc1   :  { %v2131_v38 = vadd.f32 %v2130_v25, %v2107_v32  ;;  %v2154_v36 = vpop.f32.mrf.mxu3  ;;  %v2109_v32 = vpop.f32.mrf.mxu1  ;;  %v6086_v25 = vor.u32 %v4393_v26, %v3132_v30  ;;  %2529 = vmatpush.bf16.msra.mxu3 %v3287_v22  ;;  %2481 = vmatpush.bf16.msra.mxu1 %v4307_v23  ;;  %v4500_v26 = vld [vmem:[%s7166_s1 + $0x274] sm:$0xf]  ;;  %v3532_v30 = vld [vmem:[%s7166_s1 + $0x278] sm:$0xf0] }
  0xc2   :  { %v2110_v1 = vadd.f32 %v2109_v32, %v2085_v45  ;;  %v3535_v34 = vor.u32 %v4500_v26, %v3532_v30  ;;  %v3407_v45 = vor.u32 %v4468_v14, %v3404_v35  ;;  %v3194_v26 = vld [vmem:[%s7167_s0 + $0x150] sm:$0xf]  ;;  %v4419_v30 = vld [vmem:[%s7167_s0 + $0x194] sm:$0xf0]  ;;  %v3468_v14 = vld [vmem:[%s7166_s1 + $0x1f8] sm:$0xf0] }
  0xc3   :  { %7191 = vst [vmem:[#allocation11_spill] sm:$0xff] %v6086_v25  ;;  %v6088_v24 = vadd.f32 %v2154_v36, %v2131_v38  ;;  %2367 = vmatmul.bf16.gmra.mxu0 %v6062_v31  ;;  %v3596_v38 = vld [vmem:[%s7166_s1 + $0x2f8] sm:$0xf0] }
  0xc4   :  { %2391 = vmatmul.bf16.gmra.mxu1 %v6073_v15  ;;  %v3599_v11 = vor.u32 %v4516_v37, %v3596_v38  ;;  %2594 = vmatpush.bf16.msrb.mxu2 %v3535_v34  ;;  %v4410_v34 = vld [vmem:[%s7167_s0 + $0x154] sm:$0xf]  ;;  %v3196_v35 = vld [vmem:[%s7167_s0 + $0x198] sm:$0xf0]  ;;  %v3202_v37 = vld [vmem:[%s7167_s0 + $0x158] sm:$0xf] }
  0xc5   :  { %2415 = vmatmul.bf16.gmra.mxu2 %v6075_v12  ;;  %2546 = vmatpush.bf16.msrb.mxu0 %v3407_v45  ;;  %v3524_v45 = vld [vmem:[%s7166_s1 + $0x268] sm:$0xf0]  ;;  %v4411_v12 = vld [vmem:[%s7167_s0 + $0x15c] sm:$0xf]  ;;  %v6170_v19 = vor.u32 %v4410_v34, %v3196_v35  ;;  %v4480_v34 = vld [vmem:[%s7166_s1 + $0x1d4] sm:$0xf] }
  0xc6   :  { %2439 = vmatmul.bf16.gmra.mxu3 %v6086_v25  ;;  %v6175_v8 = vor.u32 %v4411_v12, %v3204_v33  ;;  %v4512_v33 = vld [vmem:[%s7166_s1 + $0x2d4] sm:$0xf]  ;;  %v3452_v35 = vld [vmem:[%s7166_s1 + $0x1d8] sm:$0xf0] }
  0xc7   :  { %2618 = vmatpush.bf16.msrb.mxu3 %v3599_v11  ;;  %v4466_v11 = vld [vmem:[%s7166_s1 + $0x164] sm:$0xf] }
  0xc8   :  { %v2133_v36 = vpop.f32.mrf.mxu2  ;;  %v2087_v20 = vpop.f32.mrf.mxu0  ;;  %7193 = vst [vmem:[#allocation13_spill] sm:$0xff] %v6175_v8 }
  0xc9   :  { %v2134_v6 = vadd.f32 %v2133_v36, %v2110_v1  ;;  %v2157_v9 = vpop.f32.mrf.mxu3  ;;  %v2111_v32 = vpop.f32.mrf.mxu1  ;;  %v4484_v1 = vld [vmem:[%s7166_s1 + $0x1f4] sm:$0xf]  ;;  %v4498_v36 = vld [vmem:[%s7166_s1 + $0x264] sm:$0xf] }
  0xca   :  { %v2112_v23 = vadd.f32 %v2111_v32, %v2087_v20  ;;  %v3471_v38 = vor.u32 %v4484_v1, %v3468_v14  ;;  %v4514_v20 = vld [vmem:[%s7166_s1 + $0x2e4] sm:$0xf]  ;;  %v3588_v32 = vld [vmem:[%s7166_s1 + $0x2e8] sm:$0xf0]  ;;  %v4420_v1 = vld [vmem:[%s7167_s0 + $0x19c] sm:$0xf0] }
  0xcb   :  { %v6112_v22 = vadd.f32 %v2157_v9, %v2134_v6  ;;  %v3527_v6 = vor.u32 %v4498_v36, %v3524_v45  ;;  %v3396_v9 = vld [vmem:[%s7166_s1 + $0x168] sm:$0xf0]  ;;  %v3591_v25 = vor.u32 %v4514_v20, %v3588_v32  ;;  %v4482_v36 = vld [vmem:[%s7166_s1 + $0x1e4] sm:$0xf]  ;;  %v6172_v15 = vor.u32 %v4420_v1, %v3202_v37 }
  0xcc   :  { %2570 = vmatpush.bf16.msrb.mxu1 %v3471_v38  ;;  %v3399_v14 = vor.u32 %v4466_v11, %v3396_v9  ;;  %v3460_v45 = vld [vmem:[%s7166_s1 + $0x1e8] sm:$0xf0]  ;;  %v6168_v9 = vor.u32 %v4419_v30, %v3194_v26  ;;  %v4496_v26 = vld [vmem:[%s7166_s1 + $0x254] sm:$0xf]  ;;  %v3455_v37 = vor.u32 %v4480_v34, %v3452_v35  ;;  %v4494_v1 = vld [vmem:[%s7166_s1 + $0x244] sm:$0xf] }
  0xcd   :  { %2595 = vmatpush.bf16.msrb.mxu2 %v3527_v6  ;;  %v3463_v38 = vor.u32 %v4482_v36, %v3460_v45  ;;  %2619 = vmatpush.bf16.msrb.mxu3 %v3591_v25  ;;  %7192 = vst [vmem:[#allocation12_spill] sm:$0xff] %v6172_v15  ;;  %v3516_v25 = vld [vmem:[%s7166_s1 + $0x258] sm:$0xf0]  ;;  %v3572_v34 = vld [vmem:[%s7166_s1 + $0x2c8] sm:$0xf0] }
  0xce   :  { %2547 = vmatpush.bf16.msrb.mxu0 %v3399_v14  ;;  %v3519_v30 = vor.u32 %v4496_v26, %v3516_v25  ;;  %v3508_v14 = vld [vmem:[%s7166_s1 + $0x248] sm:$0xf0]  ;;  %v4478_v35 = vld [vmem:[%s7166_s1 + $0x1c4] sm:$0xf] }
  0xcf   :  { %v3511_v45 = vor.u32 %v4494_v1, %v3508_v14 }
  0xd0   :  { %v2135_v11 = vpop.f32.mrf.mxu2  ;;  %v2171_v29 = vpop.f32.mrf.mxu0  ;;  %2571 = vmatpush.bf16.msrb.mxu1 %v3463_v38 }
  0xd1   :  { %v2136_v20 = vadd.f32 %v2135_v11, %v2112_v23  ;;  %v2159_v32 = vpop.f32.mrf.mxu3  ;;  %v2172_v31 = vadd.f32 %v2171_v29, %v5900_v10  ;;  %v2195_v13 = vpop.f32.mrf.mxu1  ;;  %v4464_v10 = vld [vmem:[%s7166_s1 + $0x154] sm:$0xf]  ;;  %v3388_v29 = vld [vmem:[%s7166_s1 + $0x158] sm:$0xf0]  ;;  %2596 = vmatpush.bf16.msrb.mxu2 %v3519_v30  ;;  %v3066_v30 = vld [vmem:[%s7167_s0 + $0x40] sm:$0xf] }
  0xd3   :  { %v6177_v6 = vadd.f32 %v2159_v32, %v2136_v20  ;;  %v2196_v23 = vadd.f32 %v2195_v13, %v2172_v31  ;;  %2372 = vmatmul.bf16.gmra.mxu0 %v6168_v9  ;;  %v3391_v13 = vor.u32 %v4464_v10, %v3388_v29  ;;  %v3580_v31 = vld [vmem:[%s7166_s1 + $0x2d8] sm:$0xf0]  ;;  %v4385_v10 = vld [vmem:[%s7167_s0 + $0x84] sm:$0xf0]  ;;  %v4510_v29 = vld [vmem:[%s7166_s1 + $0x2c4] sm:$0xf] }
  0xd4   :  { %2396 = vmatmul.bf16.gmra.mxu1 %v6170_v19  ;;  %v3583_v12 = vor.u32 %v4512_v33, %v3580_v31  ;;  %v3068_v31 = vld [vmem:[%s7167_s0 + $0x88] sm:$0xf0]  ;;  %v3575_v1 = vor.u32 %v4510_v29, %v3572_v34  ;;  %v6264_v34 = vor.u32 %v4385_v10, %v3066_v30  ;;  %v3436_v30 = vld [vmem:[%s7166_s1 + $0x1b8] sm:$0xf0] }
  0xd5   :  { %2420 = vmatmul.bf16.gmra.mxu2 %v6172_v15  ;;  %2548 = vmatpush.bf16.msrb.mxu0 %v3391_v13  ;;  %v4376_v13 = vld [vmem:[%s7167_s0 + $0x44] sm:$0xf] }
  0xd6   :  { %2444 = vmatmul.bf16.gmra.mxu3 %v6175_v8  ;;  %2572 = vmatpush.bf16.msrb.mxu1 %v3455_v37  ;;  %v3444_v37 = vld [vmem:[%s7166_s1 + $0x1c8] sm:$0xf0] }
  0xd7   :  { %2620 = vmatpush.bf16.msrb.mxu3 %v3583_v12  ;;  %2597 = vmatpush.bf16.msrb.mxu2 %v3511_v45  ;;  %v3447_v14 = vor.u32 %v4478_v35, %v3444_v37  ;;  %v3500_v45 = vld [vmem:[%s7166_s1 + $0x238] sm:$0xf0] }
  0xd8   :  { %v2219_v36 = vpop.f32.mrf.mxu2  ;;  %v2173_v20 = vpop.f32.mrf.mxu0 }
  0xd9   :  { %v2220_v38 = vadd.f32 %v2219_v36, %v2196_v23  ;;  %v2243_v11 = vpop.f32.mrf.mxu3  ;;  %v2174_v32 = vadd.f32 %v2173_v20, %v5970_v21  ;;  %v2197_v26 = vpop.f32.mrf.mxu1  ;;  %v4462_v23 = vld [vmem:[%s7166_s1 + $0x144] sm:$0xf]  ;;  %v3380_v21 = vld [vmem:[%s7166_s1 + $0x148] sm:$0xf0]  ;;  %v4492_v36 = vld [vmem:[%s7166_s1 + $0x234] sm:$0xf] }
  0xda   :  { %v3383_v12 = vor.u32 %v4462_v23, %v3380_v21  ;;  %v3372_v20 = vld [vmem:[%s7166_s1 + $0x138] sm:$0xf0]  ;;  %2573 = vmatpush.bf16.msrb.mxu1 %v3447_v14  ;;  %v3364_v14 = vld [vmem:[%s7166_s1 + $0x128] sm:$0xf0] }
  0xdb   :  { %v6214_v25 = vadd.f32 %v2243_v11, %v2220_v38  ;;  %v2198_v33 = vadd.f32 %v2197_v26, %v2174_v32  ;;  %v4460_v38 = vld [vmem:[%s7166_s1 + $0x134] sm:$0xf]  ;;  %v3503_v11 = vor.u32 %v4492_v36, %v3500_v45  ;;  %v3564_v26 = vld [vmem:[%s7166_s1 + $0x2b8] sm:$0xf0]  ;;  %2621 = vmatpush.bf16.msrb.mxu3 %v3575_v1  ;;  %v6266_v36 = vor.u32 %v4376_v13, %v3068_v31  ;;  %v3492_v13 = vld [vmem:[%s7166_s1 + $0x228] sm:$0xf0] }
  0xdc   :  { %2549 = vmatpush.bf16.msrb.mxu0 %v3383_v12  ;;  %v4508_v32 = vld [vmem:[%s7166_s1 + $0x2b4] sm:$0xf]  ;;  %v3375_v23 = vor.u32 %v4460_v38, %v3372_v20  ;;  %v4506_v38 = vld [vmem:[%s7166_s1 + $0x2a4] sm:$0xf]  ;;  %v3428_v20 = vld [vmem:[%s7166_s1 + $0x1a8] sm:$0xf0] }
  0xdd   :  { %v3567_v21 = vor.u32 %v4508_v32, %v3564_v26  ;;  %2598 = vmatpush.bf16.msrb.mxu2 %v3503_v11  ;;  %v4476_v1 = vld [vmem:[%s7166_s1 + $0x1b4] sm:$0xf] }
  0xdf   :  { %2622 = vmatpush.bf16.msrb.mxu3 %v3567_v21 }
  0xe0   :  { %v2221_v29 = vpop.f32.mrf.mxu2  ;;  %v2176_v37 = vpop.f32.mrf.mxu0  ;;  %2550 = vmatpush.bf16.msrb.mxu0 %v3375_v23 }
  0xe1   :  { %v2222_v12 = vadd.f32 %v2221_v29, %v2198_v33  ;;  %v2245_v35 = vpop.f32.mrf.mxu3  ;;  %v2177_v45 = vadd.f32 %v2176_v37, %v6006_v27  ;;  %v2200_v8 = vpop.f32.mrf.mxu1  ;;  %v3439_v33 = vor.u32 %v4476_v1, %v3436_v30  ;;  %v4490_v27 = vld [vmem:[%s7166_s1 + $0x224] sm:$0xf]  ;;  %v3138_v1 = vld [vmem:[%s7167_s0 + $0xd0] sm:$0xf]  ;;  %v4403_v30 = vld [vmem:[%s7167_s0 + $0x114] sm:$0xf0] }
  0xe2   :  { %v3495_v31 = vor.u32 %v4490_v27, %v3492_v13  ;;  %v4394_v27 = vld [vmem:[%s7167_s0 + $0xd4] sm:$0xf] }
  0xe3   :  { %v6269_v15 = vadd.f32 %v2245_v35, %v2222_v12  ;;  %v2201_v10 = vadd.f32 %v2200_v8, %v2177_v45  ;;  %2458 = vmatmul.bf16.vlgmr.msra.gmra.mxu0 %v6264_v34  ;;  %2574 = vmatpush.bf16.msrb.mxu1 %v3439_v33  ;;  %v4458_v8 = vld [vmem:[%s7166_s1 + $0x124] sm:$0xf] }
  0xe4   :  { %2482 = vmatmul.bf16.vlgmr.msra.gmra.mxu1 %v6266_v36  ;;  %2599 = vmatpush.bf16.msrb.mxu2 %v3495_v31  ;;  %v3367_v11 = vor.u32 %v4458_v8, %v3364_v14  ;;  %v4456_v31 = vld [vmem:[%s7166_s1 + $0x114] sm:$0xf]  ;;  %v3356_v8 = vld [vmem:[%s7166_s1 + $0x118] sm:$0xf0] }
  0xe5   :  { %2506 = vmatmul.bf16.vlgmr.msra.gmra.mxu2 %v4967_v48  ;;  %v3556_v48 = vld [vmem:[%s7166_s1 + $0x2a8] sm:$0xf0]  ;;  %v4504_v14 = vld [vmem:[%s7166_s1 + $0x294] sm:$0xf] }
  0xe6   :  { %2530 = vmatmul.bf16.vlgmr.msra.gmra.mxu3 %v4978_v53  ;;  %v4474_v53 = vld [vmem:[%s7166_s1 + $0x1a4] sm:$0xf]  ;;  %v3559_v26 = vor.u32 %v4506_v38, %v3556_v48  ;;  %2551 = vmatpush.bf16.msrb.mxu0 %v3367_v11  ;;  %v3359_v38 = vor.u32 %v4456_v31, %v3356_v8  ;;  %v3548_v11 = vld [vmem:[%s7166_s1 + $0x298] sm:$0xf0]  ;;  %v4472_v48 = vld [vmem:[%s7166_s1 + $0x194] sm:$0xf] }
  0xe7   :  { %v3431_v23 = vor.u32 %v4474_v53, %v3428_v20  ;;  %v3420_v53 = vld [vmem:[%s7166_s1 + $0x198] sm:$0xf0] }
  0xe8   :  { %v2224_v32 = vpop.f32.mrf.mxu2  ;;  %v2178_v12 = vpop.f32.mrf.mxu0  ;;  %2623 = vmatpush.bf16.msrb.mxu3 %v3559_v26  ;;  %v3140_v20 = vld [vmem:[%s7167_s0 + $0x118] sm:$0xf0]  ;;  %v3423_v26 = vor.u32 %v4472_v48, %v3420_v53 }
  0xe9   :  { %v2225_v21 = vadd.f32 %v2224_v32, %v2201_v10  ;;  %v2248_v29 = vpop.f32.mrf.mxu3  ;;  %v2179_v35 = vadd.f32 %v2178_v12, %v6088_v24  ;;  %v2202_v37 = vpop.f32.mrf.mxu1  ;;  %2575 = vmatpush.bf16.msrb.mxu1 %v3431_v23  ;;  %v4488_v10 = vld [vmem:[%s7166_s1 + $0x214] sm:$0xf]  ;;  %v3484_v24 = vld [vmem:[%s7166_s1 + $0x218] sm:$0xf0]  ;;  %v3551_v32 = vor.u32 %v4504_v14, %v3548_v11  ;;  %v4486_v23 = vld [vmem:[%s7166_s1 + $0x204] sm:$0xf]  ;;  %v6361_v14 = vor.u32 %v4394_v27, %v3140_v20 }
  0xea   :  { %v3487_v13 = vor.u32 %v4488_v10, %v3484_v24  ;;  %2552 = vmatpush.bf16.msrb.mxu0 %v3359_v38  ;;  %v3348_v10 = vld [vmem:[%s7166_s1 + $0x108] sm:$0xf0]  ;;  %v4502_v24 = vld [vmem:[%s7166_s1 + $0x284] sm:$0xf] }
  0xeb   :  { %v6306_v45 = vadd.f32 %v2248_v29, %v2225_v21  ;;  %v2203_v33 = vadd.f32 %v2202_v37, %v2179_v35  ;;  %v3476_v21 = vld [vmem:[%s7166_s1 + $0x208] sm:$0xf0]  ;;  %v6350_v35 = vor.u32 %v4403_v30, %v3138_v1  ;;  %v4454_v37 = vld [vmem:[%s7166_s1 + $0x104] sm:$0xf] }
  0xec   :  { %2600 = vmatpush.bf16.msrb.mxu2 %v3487_v13  ;;  %v3479_v29 = vor.u32 %v4486_v23, %v3476_v21  ;;  %2624 = vmatpush.bf16.msrb.mxu3 %v3551_v32  ;;  %v3351_v1 = vor.u32 %v4454_v37, %v3348_v10  ;;  %v3540_v30 = vld [vmem:[%s7166_s1 + $0x288] sm:$0xf0]  ;;  %v4470_v38 = vld [vmem:[%s7166_s1 + $0x184] sm:$0xf]  ;;  %v4532_v23 = vld [vmem:[%s7166_s1 + $0x374] sm:$0xf] }
  0xed   :  { %2576 = vmatpush.bf16.msrb.mxu1 %v3423_v26  ;;  %v3412_v11 = vld [vmem:[%s7166_s1 + $0x188] sm:$0xf0]  ;;  %v3543_v53 = vor.u32 %v4502_v24, %v3540_v30  ;;  %v3788_v26 = vld [vmem:[%s7166_s1 + $0x478] sm:$0xf0] }
  0xee   :  { %v3415_v27 = vor.u32 %v4470_v38, %v3412_v11  ;;  %2553 = vmatpush.bf16.msrb.mxu0 %v3351_v1  ;;  %v3210_v38 = vld [vmem:[%s7167_s0 + $0x160] sm:$0xf]  ;;  %v4421_v11 = vld [vmem:[%s7167_s0 + $0x1a4] sm:$0xf0] }
  0xf0   :  { %v2226_v12 = vpop.f32.mrf.mxu2  ;;  %v2181_v8 = vpop.f32.mrf.mxu0  ;;  %2601 = vmatpush.bf16.msrb.mxu2 %v3479_v29  ;;  %2625 = vmatpush.bf16.msrb.mxu3 %v3543_v53  ;;  %v3852_v29 = vld [vmem:[%s7166_s1 + $0x4f8] sm:$0xf0]  ;;  %v4412_v53 = vld [vmem:[%s7167_s0 + $0x164] sm:$0xf] }
  0xf1   :  { %v2227_v13 = vadd.f32 %v2226_v12, %v2203_v33  ;;  %v2250_v31 = vpop.f32.mrf.mxu3  ;;  %v2182_v48 = vadd.f32 %v2181_v8, %v6112_v22  ;;  %v2205_v33 = vpop.f32.mrf.mxu1  ;;  %2577 = vmatpush.bf16.msrb.mxu1 %v3415_v27  ;;  %v4564_v22 = vld [vmem:[%s7166_s1 + $0x474] sm:$0xf] }
  0xf2   :  { %v3791_v21 = vor.u32 %v4564_v22, %v3788_v26  ;;  %v3780_v22 = vld [vmem:[%s7166_s1 + $0x468] sm:$0xf0]  ;;  %v4530_v26 = vld [vmem:[%s7166_s1 + $0x364] sm:$0xf] }
  0xf3   :  { %v6373_v20 = vadd.f32 %v2250_v31, %v2227_v13  ;;  %v2206_v32 = vadd.f32 %v2205_v33, %v2182_v48  ;;  %2463 = vmatmul.bf16.gmra.mxu0 %v6350_v35  ;;  %v4548_v48 = vld [vmem:[%s7166_s1 + $0x3f4] sm:$0xf] }
  0xf4   :  { %2487 = vmatmul.bf16.gmra.mxu1 %v6361_v14  ;;  %2690 = vmatpush.bf16.msra.mxu2 %v3791_v21  ;;  %v3652_v21 = vld [vmem:[%s7166_s1 + $0x368] sm:$0xf0] }
  0xf5   :  { %2511 = vmatmul.bf16.gmra.mxu2 %v5099_v44  ;;  %v3660_v44 = vld [vmem:[%s7166_s1 + $0x378] sm:$0xf0] }
  0xf6   :  { %2535 = vmatmul.bf16.gmra.mxu3 %v5110_v50  ;;  %v4580_v50 = vld [vmem:[%s7166_s1 + $0x4f4] sm:$0xf]  ;;  %v3663_v37 = vor.u32 %v4532_v23, %v3660_v44  ;;  %v4578_v44 = vld [vmem:[%s7166_s1 + $0x4e4] sm:$0xf] }
  0xf7   :  { %v3855_v10 = vor.u32 %v4580_v50, %v3852_v29  ;;  %v3844_v50 = vld [vmem:[%s7166_s1 + $0x4e8] sm:$0xf0] }
  0xf8   :  { %v2229_v12 = vpop.f32.mrf.mxu2  ;;  %v2183_v31 = vpop.f32.mrf.mxu0  ;;  %2642 = vmatpush.bf16.msra.mxu0 %v3663_v37  ;;  %v3212_v29 = vld [vmem:[%s7167_s0 + $0x1a8] sm:$0xf0]  ;;  %v3847_v37 = vor.u32 %v4578_v44, %v3844_v50  ;;  %v3836_v50 = vld [vmem:[%s7166_s1 + $0x4d8] sm:$0xf0] }
  0xf9   :  { %v2230_v24 = vadd.f32 %v2229_v12, %v2206_v32  ;;  %v2253_v13 = vpop.f32.mrf.mxu3  ;;  %v2184_v8 = vadd.f32 %v2183_v31, %v6177_v6  ;;  %v2207_v1 = vpop.f32.mrf.mxu1  ;;  %2714 = vmatpush.bf16.msra.mxu3 %v3855_v10  ;;  %v3724_v6 = vld [vmem:[%s7166_s1 + $0x3f8] sm:$0xf0]  ;;  %v4562_v32 = vld [vmem:[%s7166_s1 + $0x464] sm:$0xf]  ;;  %v3655_v12 = vor.u32 %v4530_v26, %v3652_v21  ;;  %v4576_v21 = vld [vmem:[%s7166_s1 + $0x4d4] sm:$0xf] }
  0xfa   :  { %v3727_v27 = vor.u32 %v4548_v48, %v3724_v6  ;;  %v3783_v23 = vor.u32 %v4562_v32, %v3780_v22  ;;  %v4546_v10 = vld [vmem:[%s7166_s1 + $0x3e4] sm:$0xf] }
  0xfb   :  { %v6398_v30 = vadd.f32 %v2253_v13, %v2230_v24  ;;  %v2208_v33 = vadd.f32 %v2207_v1, %v2184_v8  ;;  %v3716_v24 = vld [vmem:[%s7166_s1 + $0x3e8] sm:$0xf0]  ;;  %v6442_v8 = vor.u32 %v4421_v11, %v3210_v38  ;;  %v3772_v38 = vld [vmem:[%s7166_s1 + $0x458] sm:$0xf0] }
  0xfc   :  { %2666 = vmatpush.bf16.msra.mxu1 %v3727_v27  ;;  %2691 = vmatpush.bf16.msra.mxu2 %v3783_v23  ;;  %v3719_v13 = vor.u32 %v4546_v10, %v3716_v24  ;;  %v6444_v27 = vor.u32 %v4412_v53, %v3212_v29  ;;  %v4560_v23 = vld [vmem:[%s7166_s1 + $0x454] sm:$0xf]  ;;  %v3644_v53 = vld [vmem:[%s7166_s1 + $0x358] sm:$0xf0]  ;;  %v3839_v29 = vor.u32 %v4576_v21, %v3836_v50  ;;  %v3700_v21 = vld [vmem:[%s7166_s1 + $0x3c8] sm:$0xf0] }
  0xfd   :  { %2643 = vmatpush.bf16.msra.mxu0 %v3655_v12  ;;  %2715 = vmatpush.bf16.msra.mxu3 %v3847_v37  ;;  %v4544_v12 = vld [vmem:[%s7166_s1 + $0x3d4] sm:$0xf]  ;;  %v3708_v37 = vld [vmem:[%s7166_s1 + $0x3d8] sm:$0xf0] }
  0xfe   :  { %v3711_v10 = vor.u32 %v4544_v12, %v3708_v37  ;;  %v3756_v12 = vld [vmem:[%s7166_s1 + $0x438] sm:$0xf0]  ;;  %v4524_v37 = vld [vmem:[%s7166_s1 + $0x334] sm:$0xf] }
 0x100   :  { %v2231_v31 = vpop.f32.mrf.mxu2  ;;  %v2267_v6 = vpop.f32.mrf.mxu0  ;;  %2667 = vmatpush.bf16.msra.mxu1 %v3719_v13 }
 0x101   :  { %v2232_v1 = vadd.f32 %v2231_v31, %v2208_v33  ;;  %v2255_v48 = vpop.f32.mrf.mxu3  ;;  %v2268_v32 = vadd.f32 %v2267_v6, %v6214_v25  ;;  %v2291_v22 = vpop.f32.mrf.mxu1  ;;  %v3775_v33 = vor.u32 %v4560_v23, %v3772_v38  ;;  %v4528_v25 = vld [vmem:[%s7166_s1 + $0x354] sm:$0xf]  ;;  %2716 = vmatpush.bf16.msra.mxu3 %v3839_v29  ;;  %v4526_v23 = vld [vmem:[%s7166_s1 + $0x344] sm:$0xf]  ;;  %v3636_v38 = vld [vmem:[%s7166_s1 + $0x348] sm:$0xf0] }
 0x102   :  { %v3647_v44 = vor.u32 %v4528_v25, %v3644_v53  ;;  %v3639_v25 = vor.u32 %v4526_v23, %v3636_v38  ;;  %v4542_v53 = vld [vmem:[%s7166_s1 + $0x3c4] sm:$0xf]  ;;  %v4556_v29 = vld [vmem:[%s7166_s1 + $0x434] sm:$0xf] }
 0x103   :  { %v6447_v26 = vadd.f32 %v2255_v48, %v2232_v1  ;;  %v2292_v11 = vadd.f32 %v2291_v22, %v2268_v32  ;;  %2468 = vmatmul.bf16.gmra.mxu0 %v6442_v8  ;;  %2692 = vmatpush.bf16.msra.mxu2 %v3775_v33  ;;  %v3703_v50 = vor.u32 %v4542_v53, %v3700_v21  ;;  %v3748_v21 = vld [vmem:[%s7166_s1 + $0x428] sm:$0xf0] }
 0x104   :  { %2492 = vmatmul.bf16.gmra.mxu1 %v6444_v27  ;;  %2644 = vmatpush.bf16.msra.mxu0 %v3647_v44 }
 0x105   :  { %2516 = vmatmul.bf16.gmra.mxu2 %v5243_v58  ;;  %v4558_v58 = vld [vmem:[%s7166_s1 + $0x444] sm:$0xf]  ;;  %2668 = vmatpush.bf16.msra.mxu1 %v3711_v10  ;;  %v3628_v10 = vld [vmem:[%s7166_s1 + $0x338] sm:$0xf0] }
 0x106   :  { %2540 = vmatmul.bf16.gmra.mxu3 %v5254_v63  ;;  %v3764_v63 = vld [vmem:[%s7166_s1 + $0x448] sm:$0xf0] }
 0x107   :  { %v3767_v13 = vor.u32 %v4558_v58, %v3764_v63  ;;  %v3759_v58 = vor.u32 %v4556_v29, %v3756_v12  ;;  %v4572_v63 = vld [vmem:[%s7166_s1 + $0x4b4] sm:$0xf]  ;;  %v4570_v29 = vld [vmem:[%s7166_s1 + $0x4a4] sm:$0xf]  ;;  %v3684_v12 = vld [vmem:[%s7166_s1 + $0x3a8] sm:$0xf0] }
 0x108   :  { %v2315_v24 = vpop.f32.mrf.mxu2  ;;  %v2269_v48 = vpop.f32.mrf.mxu0  ;;  %2645 = vmatpush.bf16.msra.mxu0 %v3639_v25  ;;  %v4540_v25 = vld [vmem:[%s7166_s1 + $0x3b4] sm:$0xf] }
 0x109   :  { %v2316_v31 = vadd.f32 %v2315_v24, %v2292_v11  ;;  %v2339_v1 = vpop.f32.mrf.mxu3  ;;  %v2270_v6 = vadd.f32 %v2269_v48, %v6269_v15  ;;  %v2293_v32 = vpop.f32.mrf.mxu1  ;;  %2693 = vmatpush.bf16.msra.mxu2 %v3767_v13  ;;  %v4574_v11 = vld [vmem:[%s7166_s1 + $0x4c4] sm:$0xf]  ;;  %v3828_v15 = vld [vmem:[%s7166_s1 + $0x4c8] sm:$0xf0]  ;;  %v3820_v24 = vld [vmem:[%s7166_s1 + $0x4b8] sm:$0xf0]  ;;  %2669 = vmatpush.bf16.msra.mxu1 %v3703_v50  ;;  %v3631_v13 = vor.u32 %v4524_v37, %v3628_v10 }
 0x10a   :  { %v3831_v44 = vor.u32 %v4574_v11, %v3828_v15  ;;  %v3692_v15 = vld [vmem:[%s7166_s1 + $0x3b8] sm:$0xf0]  ;;  %v3620_v50 = vld [vmem:[%s7166_s1 + $0x328] sm:$0xf0] }
 0x10b   :  { %v6484_v22 = vadd.f32 %v2339_v1, %v2316_v31  ;;  %v2294_v33 = vadd.f32 %v2293_v32, %v2270_v6  ;;  %v3823_v31 = vor.u32 %v4572_v63, %v3820_v24 }
 0x10c   :  { %2717 = vmatpush.bf16.msra.mxu3 %v3831_v44  ;;  %2646 = vmatpush.bf16.msra.mxu0 %v3631_v13 }
 0x10d   :  { %2694 = vmatpush.bf16.msra.mxu2 %v3759_v58 }
 0x110   :  { %v2317_v1 = vpop.f32.mrf.mxu2  ;;  %v2272_v32 = vpop.f32.mrf.mxu0  ;;  %2718 = vmatpush.bf16.msra.mxu3 %v3823_v31 }
 0x111   :  { %v2318_v48 = vadd.f32 %v2317_v1, %v2294_v33  ;;  %v2341_v6 = vpop.f32.mrf.mxu3  ;;  %v2273_v23 = vadd.f32 %v2272_v32, %v6306_v45  ;;  %v2296_v38 = vpop.f32.mrf.mxu1  ;;  %v3695_v33 = vor.u32 %v4540_v25, %v3692_v15  ;;  %v4554_v45 = vld [vmem:[%s7166_s1 + $0x424] sm:$0xf]  ;;  %v3740_v32 = vld [vmem:[%s7166_s1 + $0x418] sm:$0xf0]  ;;  %v4520_v25 = vld [vmem:[%s7166_s1 + $0x314] sm:$0xf] }
 0x112   :  { %v3751_v44 = vor.u32 %v4554_v45, %v3748_v21  ;;  %v4568_v15 = vld [vmem:[%s7166_s1 + $0x494] sm:$0xf]  ;;  %v3676_v21 = vld [vmem:[%s7166_s1 + $0x398] sm:$0xf0] }
 0x113   :  { %v6523_v11 = vadd.f32 %v2341_v6, %v2318_v48  ;;  %v2297_v53 = vadd.f32 %v2296_v38, %v2273_v23  ;;  %2554 = vmatmul.bf16.vlgmr.msrb.gmra.mxu0 %v4980_v54  ;;  %2670 = vmatpush.bf16.msra.mxu1 %v3695_v33  ;;  %v4522_v54 = vld [vmem:[%s7166_s1 + $0x324] sm:$0xf]  ;;  %v4552_v6 = vld [vmem:[%s7166_s1 + $0x414] sm:$0xf]  ;;  %v3804_v33 = vld [vmem:[%s7166_s1 + $0x498] sm:$0xf0] }
 0x114   :  { %2578 = vmatmul.bf16.vlgmr.msrb.gmra.mxu1 %v4988_v57  ;;  %2695 = vmatpush.bf16.msra.mxu2 %v3751_v44  ;;  %v3623_v57 = vor.u32 %v4522_v54, %v3620_v50  ;;  %v3743_v38 = vor.u32 %v4552_v6, %v3740_v32  ;;  %v4536_v45 = vld [vmem:[%s7166_s1 + $0x394] sm:$0xf]  ;;  %v3807_v44 = vor.u32 %v4568_v15, %v3804_v33  ;;  %v4550_v50 = vld [vmem:[%s7166_s1 + $0x404] sm:$0xf]  ;;  %v4044_v15 = vld [vmem:[%s7166_s1 + $0x678] sm:$0xf0] }
 0x115   :  { %2602 = vmatmul.bf16.vlgmr.msrb.gmra.mxu2 %v5372_v62  ;;  %v3812_v62 = vld [vmem:[%s7166_s1 + $0x4a8] sm:$0xf0]  ;;  %v3679_v54 = vor.u32 %v4536_v45, %v3676_v21 }
 0x116   :  { %2626 = vmatmul.bf16.vlgmr.msrb.gmra.mxu3 %v5374_v2  ;;  %v4538_v2 = vld [vmem:[%s7166_s1 + $0x3a4] sm:$0xf]  ;;  %v3815_v58 = vor.u32 %v4570_v29, %v3812_v62  ;;  %2647 = vmatpush.bf16.msra.mxu0 %v3623_v57  ;;  %v3732_v29 = vld [vmem:[%s7166_s1 + $0x408] sm:$0xf0] }
 0x117   :  { %v3687_v10 = vor.u32 %v4538_v2, %v3684_v12  ;;  %v3735_v57 = vor.u32 %v4550_v50, %v3732_v29  ;;  %v4518_v2 = vld [vmem:[%s7166_s1 + $0x304] sm:$0xf]  ;;  %v3604_v12 = vld [vmem:[%s7166_s1 + $0x308] sm:$0xf0] }
 0x118   :  { %v2320_v37 = vpop.f32.mrf.mxu2  ;;  %v2274_v13 = vpop.f32.mrf.mxu0  ;;  %2719 = vmatpush.bf16.msra.mxu3 %v3815_v58  ;;  %2696 = vmatpush.bf16.msra.mxu2 %v3743_v38 }
 0x119   :  { %v2321_v63 = vadd.f32 %v2320_v37, %v2297_v53  ;;  %v2344_v24 = vpop.f32.mrf.mxu3  ;;  %v2275_v31 = vadd.f32 %v2274_v13, %v6373_v20  ;;  %v2298_v1 = vpop.f32.mrf.mxu1  ;;  %2671 = vmatpush.bf16.msra.mxu1 %v3687_v10  ;;  %v3612_v20 = vld [vmem:[%s7166_s1 + $0x318] sm:$0xf0]  ;;  %v4566_v37 = vld [vmem:[%s7166_s1 + $0x484] sm:$0xf]  ;;  %v3796_v13 = vld [vmem:[%s7166_s1 + $0x488] sm:$0xf0] }
 0x11a   :  { %v3615_v53 = vor.u32 %v4520_v25, %v3612_v20 }
 0x11b   :  { %v6560_v48 = vadd.f32 %v2344_v24, %v2321_v63  ;;  %v2299_v23 = vadd.f32 %v2298_v1, %v2275_v31  ;;  %v3607_v24 = vor.u32 %v4518_v2, %v3604_v12  ;;  %v4534_v31 = vld [vmem:[%s7166_s1 + $0x384] sm:$0xf]  ;;  %v3668_v1 = vld [vmem:[%s7166_s1 + $0x388] sm:$0xf0]  ;;  %v4612_v2 = vld [vmem:[%s7166_s1 + $0x5f4] sm:$0xf] }
 0x11c   :  { %2648 = vmatpush.bf16.msra.mxu0 %v3615_v53  ;;  %2720 = vmatpush.bf16.msra.mxu3 %v3807_v44  ;;  %v3671_v38 = vor.u32 %v4534_v31, %v3668_v1  ;;  %v3980_v12 = vld [vmem:[%s7166_s1 + $0x5f8] sm:$0xf0]  ;;  %v4642_v31 = vld [vmem:[%s7166_s1 + $0x6e4] sm:$0xf]  ;;  %v4100_v1 = vld [vmem:[%s7166_s1 + $0x6e8] sm:$0xf0] }
 0x11d   :  { %2672 = vmatpush.bf16.msra.mxu1 %v3679_v54  ;;  %2697 = vmatpush.bf16.msra.mxu2 %v3735_v57 }
 0x120   :  { %v2322_v62 = vpop.f32.mrf.mxu2  ;;  %v2277_v63 = vpop.f32.mrf.mxu0  ;;  %2649 = vmatpush.bf16.msra.mxu0 %v3607_v24 }
 0x121   :  { %v2323_v58 = vadd.f32 %v2322_v62, %v2299_v23  ;;  %v2346_v10 = vpop.f32.mrf.mxu3  ;;  %v2278_v6 = vadd.f32 %v2277_v63, %v6398_v30  ;;  %v2301_v32 = vpop.f32.mrf.mxu1  ;;  %v3799_v23 = vor.u32 %v4566_v37, %v3796_v13  ;;  %2673 = vmatpush.bf16.msra.mxu1 %v3671_v38  ;;  %v4628_v30 = vld [vmem:[%s7166_s1 + $0x674] sm:$0xf]  ;;  %v4594_v63 = vld [vmem:[%s7166_s1 + $0x564] sm:$0xf]  ;;  %v3908_v13 = vld [vmem:[%s7166_s1 + $0x568] sm:$0xf0] }
 0x122   :  { %v4047_v53 = vor.u32 %v4628_v30, %v4044_v15  ;;  %v3972_v38 = vld [vmem:[%s7166_s1 + $0x5e8] sm:$0xf0] }
 0x123   :  { %v6611_v25 = vadd.f32 %v2346_v10, %v2323_v58  ;;  %v2302_v20 = vadd.f32 %v2301_v32, %v2278_v6  ;;  %2559 = vmatmul.bf16.gmra.mxu0 %v5112_v51  ;;  %2721 = vmatpush.bf16.msra.mxu3 %v3799_v23  ;;  %v4596_v51 = vld [vmem:[%s7166_s1 + $0x574] sm:$0xf]  ;;  %v3983_v58 = vor.u32 %v4612_v2, %v3980_v12  ;;  %v4626_v10 = vld [vmem:[%s7166_s1 + $0x664] sm:$0xf]  ;;  %v3964_v12 = vld [vmem:[%s7166_s1 + $0x5d8] sm:$0xf0] }
 0x124   :  { %2583 = vmatmul.bf16.gmra.mxu1 %v5120_v56  ;;  %v3916_v56 = vld [vmem:[%s7166_s1 + $0x578] sm:$0xf0]  ;;  %2786 = vmatpush.bf16.msrb.mxu2 %v4047_v53  ;;  %v3911_v6 = vor.u32 %v4594_v63, %v3908_v13  ;;  %v4103_v32 = vor.u32 %v4642_v31, %v4100_v1  ;;  %v4610_v23 = vld [vmem:[%s7166_s1 + $0x5e4] sm:$0xf]  ;;  %v4608_v2 = vld [vmem:[%s7166_s1 + $0x5d4] sm:$0xf] }
 0x125   :  { %2607 = vmatmul.bf16.gmra.mxu2 %v5474_v52  ;;  %v4644_v52 = vld [vmem:[%s7166_s1 + $0x6f4] sm:$0xf]  ;;  %v3919_v45 = vor.u32 %v4596_v51, %v3916_v56  ;;  %2762 = vmatpush.bf16.msrb.mxu1 %v3983_v58  ;;  %v4590_v1 = vld [vmem:[%s7166_s1 + $0x544] sm:$0xf] }
 0x126   :  { %2631 = vmatmul.bf16.gmra.mxu3 %v5476_v55  ;;  %v4108_v55 = vld [vmem:[%s7166_s1 + $0x6f8] sm:$0xf0] }
 0x127   :  { %v4111_v21 = vor.u32 %v4644_v52, %v4108_v55  ;;  %2738 = vmatpush.bf16.msrb.mxu0 %v3919_v45  ;;  %v4028_v45 = vld [vmem:[%s7166_s1 + $0x658] sm:$0xf0] }
 0x128   :  { %v2325_v33 = vpop.f32.mrf.mxu2  ;;  %v2279_v50 = vpop.f32.mrf.mxu0 }
 0x129   :  { %v2326_v44 = vadd.f32 %v2325_v33, %v2302_v20  ;;  %v2349_v54 = vpop.f32.mrf.mxu3  ;;  %v2280_v29 = vadd.f32 %v2279_v50, %v6447_v26  ;;  %v2303_v57 = vpop.f32.mrf.mxu1  ;;  %2810 = vmatpush.bf16.msrb.mxu3 %v4111_v21  ;;  %v4036_v26 = vld [vmem:[%s7166_s1 + $0x668] sm:$0xf0]  ;;  %v3975_v20 = vor.u32 %v4610_v23, %v3972_v38  ;;  %v4624_v33 = vld [vmem:[%s7166_s1 + $0x654] sm:$0xf] }
 0x12a   :  { %v4039_v24 = vor.u32 %v4626_v10, %v4036_v26  ;;  %v4640_v50 = vld [vmem:[%s7166_s1 + $0x6d4] sm:$0xf] }
 0x12b   :  { %v6636_v62 = vadd.f32 %v2349_v54, %v2326_v44  ;;  %v2304_v37 = vadd.f32 %v2303_v57, %v2280_v29  ;;  %2739 = vmatpush.bf16.msrb.mxu0 %v3911_v6  ;;  %2763 = vmatpush.bf16.msrb.mxu1 %v3975_v20  ;;  %v4031_v44 = vor.u32 %v4624_v33, %v4028_v45  ;;  %v3900_v54 = vld [vmem:[%s7166_s1 + $0x558] sm:$0xf0]  ;;  %v3892_v6 = vld [vmem:[%s7166_s1 + $0x548] sm:$0xf0]  ;;  %v4606_v20 = vld [vmem:[%s7166_s1 + $0x5c4] sm:$0xf] }
 0x12c   :  { %2787 = vmatpush.bf16.msrb.mxu2 %v4039_v24  ;;  %v3895_v38 = vor.u32 %v4590_v1, %v3892_v6  ;;  %v3884_v45 = vld [vmem:[%s7166_s1 + $0x538] sm:$0xf0]  ;;  %v4068_v1 = vld [vmem:[%s7166_s1 + $0x6a8] sm:$0xf0] }
 0x12d   :  { %2811 = vmatpush.bf16.msrb.mxu3 %v4103_v32  ;;  %v4638_v32 = vld [vmem:[%s7166_s1 + $0x6c4] sm:$0xf] }
 0x130   :  { %v2327_v30 = vpop.f32.mrf.mxu2  ;;  %v2363_v53 = vpop.f32.mrf.mxu0  ;;  %2788 = vmatpush.bf16.msrb.mxu2 %v4031_v44  ;;  %v4076_v44 = vld [vmem:[%s7166_s1 + $0x6b8] sm:$0xf0] }
 0x131   :  { %v2328_v15 = vadd.f32 %v2327_v30, %v2304_v37  ;;  %v2351_v51 = vpop.f32.mrf.mxu3  ;;  %v2364_v56 = vadd.f32 %v2363_v53, %v6484_v22  ;;  %v2387_v52 = vpop.f32.mrf.mxu1  ;;  %v4592_v22 = vld [vmem:[%s7166_s1 + $0x554] sm:$0xf]  ;;  %v3956_v30 = vld [vmem:[%s7166_s1 + $0x5c8] sm:$0xf0] }
 0x132   :  { %v3903_v29 = vor.u32 %v4592_v22, %v3900_v54  ;;  %v4620_v53 = vld [vmem:[%s7166_s1 + $0x634] sm:$0xf] }
 0x133   :  { %v6669_v55 = vadd.f32 %v2351_v51, %v2328_v15  ;;  %v2388_v21 = vadd.f32 %v2387_v52, %v2364_v56  ;;  %2564 = vmatmul.bf16.gmra.mxu0 %v5256_v0  ;;  %v4092_v0 = vld [vmem:[%s7166_s1 + $0x6d8] sm:$0xf0]  ;;  %v3959_v51 = vor.u32 %v4606_v20, %v3956_v30  ;;  %v4588_v52 = vld [vmem:[%s7166_s1 + $0x534] sm:$0xf]  ;;  %v3940_v20 = vld [vmem:[%s7166_s1 + $0x5a8] sm:$0xf0] }
 0x134   :  { %2588 = vmatmul.bf16.gmra.mxu1 %v5264_v3  ;;  %v4095_v57 = vor.u32 %v4640_v50, %v4092_v0  ;;  %v4622_v3 = vld [vmem:[%s7166_s1 + $0x644] sm:$0xf]  ;;  %2740 = vmatpush.bf16.msrb.mxu0 %v3903_v29  ;;  %v4012_v56 = vld [vmem:[%s7166_s1 + $0x638] sm:$0xf0]  ;;  %v3887_v22 = vor.u32 %v4588_v52, %v3884_v45  ;;  %v4616_v30 = vld [vmem:[%s7166_s1 + $0x614] sm:$0xf] }
 0x135   :  { %2612 = vmatmul.bf16.gmra.mxu2 %v5576_v46  ;;  %v3967_v46 = vor.u32 %v4608_v2, %v3964_v12  ;;  %v4015_v33 = vor.u32 %v4620_v53, %v4012_v56  ;;  %v4584_v52 = vld [vmem:[%s7166_s1 + $0x514] sm:$0xf] }
 0x136   :  { %2636 = vmatmul.bf16.gmra.mxu3 %v5578_v47  ;;  %v4020_v47 = vld [vmem:[%s7166_s1 + $0x648] sm:$0xf0]  ;;  %v4632_v45 = vld [vmem:[%s7166_s1 + $0x694] sm:$0xf] }
 0x137   :  { %2812 = vmatpush.bf16.msrb.mxu3 %v4095_v57  ;;  %v4023_v58 = vor.u32 %v4622_v3, %v4020_v47  ;;  %2764 = vmatpush.bf16.msrb.mxu1 %v3967_v46  ;;  %v4604_v46 = vld [vmem:[%s7166_s1 + $0x5b4] sm:$0xf]  ;;  %v3948_v47 = vld [vmem:[%s7166_s1 + $0x5b8] sm:$0xf0] }
 0x138   :  { %v2411_v37 = vpop.f32.mrf.mxu2  ;;  %v2365_v63 = vpop.f32.mrf.mxu0  ;;  %2741 = vmatpush.bf16.msrb.mxu0 %v3895_v38 }
 0x139   :  { %v2412_v10 = vadd.f32 %v2411_v37, %v2388_v21  ;;  %v2435_v26 = vpop.f32.mrf.mxu3  ;;  %v2366_v24 = vadd.f32 %v2365_v63, %v6523_v11  ;;  %v2389_v13 = vpop.f32.mrf.mxu1  ;;  %2789 = vmatpush.bf16.msrb.mxu2 %v4023_v58  ;;  %v4084_v11 = vld [vmem:[%s7166_s1 + $0x6c8] sm:$0xf0]  ;;  %v4636_v21 = vld [vmem:[%s7166_s1 + $0x6b4] sm:$0xf]  ;;  %v3951_v58 = vor.u32 %v4604_v46, %v3948_v47 }
 0x13a   :  { %v4087_v15 = vor.u32 %v4638_v32, %v4084_v11  ;;  %v4079_v54 = vor.u32 %v4636_v21, %v4076_v44  ;;  %v4602_v11 = vld [vmem:[%s7166_s1 + $0x5a4] sm:$0xf]  ;;  %v4060_v44 = vld [vmem:[%s7166_s1 + $0x698] sm:$0xf0] }
 0x13b   :  { %v6706_v31 = vadd.f32 %v2435_v26, %v2412_v10  ;;  %v2390_v23 = vadd.f32 %v2389_v13, %v2366_v24  ;;  %2765 = vmatpush.bf16.msrb.mxu1 %v3959_v51  ;;  %v4618_v10 = vld [vmem:[%s7166_s1 + $0x624] sm:$0xf]  ;;  %v4004_v26 = vld [vmem:[%s7166_s1 + $0x628] sm:$0xf0]  ;;  %v3943_v51 = vor.u32 %v4602_v11, %v3940_v20 }
 0x13c   :  { %2813 = vmatpush.bf16.msrb.mxu3 %v4087_v15  ;;  %2742 = vmatpush.bf16.msrb.mxu0 %v3887_v22  ;;  %v4634_v13 = vld [vmem:[%s7166_s1 + $0x6a4] sm:$0xf]  ;;  %v4600_v22 = vld [vmem:[%s7166_s1 + $0x594] sm:$0xf] }
 0x13d   :  { %2790 = vmatpush.bf16.msrb.mxu2 %v4015_v33  ;;  %v4071_v38 = vor.u32 %v4634_v13, %v4068_v1  ;;  %v3868_v33 = vld [vmem:[%s7166_s1 + $0x518] sm:$0xf0] }
 0x13e   :  { %v3871_v21 = vor.u32 %v4584_v52, %v3868_v33  ;;  %v4676_v33 = vld [vmem:[%s7166_s1 + $0x7f4] sm:$0xf] }
 0x13f   :  { %2766 = vmatpush.bf16.msrb.mxu1 %v3951_v58 }
 0x140   :  { %v2413_v50 = vpop.f32.mrf.mxu2  ;;  %v2368_v57 = vpop.f32.mrf.mxu0  ;;  %2814 = vmatpush.bf16.msrb.mxu3 %v4079_v54  ;;  %v3932_v54 = vld [vmem:[%s7166_s1 + $0x598] sm:$0xf0] }
 0x141   :  { %v2414_v29 = vadd.f32 %v2413_v50, %v2390_v23  ;;  %v2437_v0 = vpop.f32.mrf.mxu3  ;;  %v2369_v2 = vadd.f32 %v2368_v57, %v6560_v48  ;;  %v2392_v12 = vpop.f32.mrf.mxu1  ;;  %v4063_v50 = vor.u32 %v4632_v45, %v4060_v44  ;;  %v4614_v57 = vld [vmem:[%s7166_s1 + $0x604] sm:$0xf]  ;;  %v4236_v45 = vld [vmem:[%s7166_s1 + $0x7f8] sm:$0xf0] }
 0x143   :  { %v6745_v3 = vadd.f32 %v2437_v0, %v2414_v29  ;;  %v2393_v37 = vadd.f32 %v2392_v12, %v2369_v2  ;;  %2650 = vmatmul.bf16.vlgmr.msra.gmra.mxu0 %v5376_v4  ;;  %v4586_v4 = vld [vmem:[%s7166_s1 + $0x524] sm:$0xf]  ;;  %2767 = vmatpush.bf16.msrb.mxu1 %v3943_v51  ;;  %v3935_v29 = vor.u32 %v4600_v22, %v3932_v54  ;;  %v3988_v2 = vld [vmem:[%s7166_s1 + $0x608] sm:$0xf0]  ;;  %v4708_v51 = vld [vmem:[%s7166_s1 + $0x8f4] sm:$0xf] }
 0x144   :  { %2674 = vmatmul.bf16.vlgmr.msra.gmra.mxu1 %v5378_v5  ;;  %2815 = vmatpush.bf16.msrb.mxu3 %v4071_v38  ;;  %v4582_v12 = vld [vmem:[%s7166_s1 + $0x504] sm:$0xf]  ;;  %v3991_v58 = vor.u32 %v4614_v57, %v3988_v2  ;;  %v4292_v2 = vld [vmem:[%s7166_s1 + $0x868] sm:$0xf0] }
 0x145   :  { %2698 = vmatmul.bf16.vlgmr.msra.gmra.mxu2 %v5666_v40  ;;  %v4007_v40 = vor.u32 %v4618_v10, %v4004_v26  ;;  %v4630_v10 = vld [vmem:[%s7166_s1 + $0x684] sm:$0xf]  ;;  %v4052_v26 = vld [vmem:[%s7166_s1 + $0x688] sm:$0xf0] }
 0x146   :  { %2722 = vmatmul.bf16.vlgmr.msra.gmra.mxu3 %v5668_v41  ;;  %v3876_v41 = vld [vmem:[%s7166_s1 + $0x528] sm:$0xf0]  ;;  %v4690_v57 = vld [vmem:[%s7166_s1 + $0x864] sm:$0xf] }
 0x147   :  { %v3879_v23 = vor.u32 %v4586_v4, %v3876_v41  ;;  %2791 = vmatpush.bf16.msrb.mxu2 %v4007_v40  ;;  %2768 = vmatpush.bf16.msrb.mxu1 %v3935_v29  ;;  %v4598_v40 = vld [vmem:[%s7166_s1 + $0x584] sm:$0xf]  ;;  %v3924_v41 = vld [vmem:[%s7166_s1 + $0x588] sm:$0xf0] }
 0x148   :  { %v2416_v48 = vpop.f32.mrf.mxu2  ;;  %v2370_v24 = vpop.f32.mrf.mxu0  ;;  %2816 = vmatpush.bf16.msrb.mxu3 %v4063_v50  ;;  %v3927_v1 = vor.u32 %v4598_v40, %v3924_v41 }
 0x149   :  { %v2417_v63 = vadd.f32 %v2416_v48, %v2393_v37  ;;  %v2440_v5 = vpop.f32.mrf.mxu3  ;;  %v2371_v6 = vadd.f32 %v2370_v24, %v6611_v25  ;;  %v2394_v32 = vpop.f32.mrf.mxu1  ;;  %v3996_v25 = vld [vmem:[%s7166_s1 + $0x618] sm:$0xf0]  ;;  %2743 = vmatpush.bf16.msrb.mxu0 %v3879_v23  ;;  %v3860_v48 = vld [vmem:[%s7166_s1 + $0x508] sm:$0xf0]  ;;  %v4055_v24 = vor.u32 %v4630_v10, %v4052_v26 }
 0x14a   :  { %v3999_v56 = vor.u32 %v4616_v30, %v3996_v25  ;;  %v4364_v25 = vld [vmem:[%s7166_s1 + $0x8f8] sm:$0xf0] }
 0x14b   :  { %v6785_v15 = vadd.f32 %v2440_v5, %v2417_v63  ;;  %v2395_v53 = vadd.f32 %v2394_v32, %v2371_v6  ;;  %v3863_v5 = vor.u32 %v4582_v12, %v3860_v48  ;;  %2769 = vmatpush.bf16.msrb.mxu1 %v3927_v1  ;;  %v4367_v52 = vor.u32 %v4708_v51, %v4364_v25  ;;  %v4658_v12 = vld [vmem:[%s7166_s1 + $0x764] sm:$0xf] }
 0x14c   :  { %2792 = vmatpush.bf16.msrb.mxu2 %v3999_v56  ;;  %2817 = vmatpush.bf16.msrb.mxu3 %v4055_v24  ;;  %v4654_v25 = vld [vmem:[%s7166_s1 + $0x744] sm:$0xf] }
 0x14d   :  { %2744 = vmatpush.bf16.msrb.mxu0 %v3871_v21  ;;  %v4239_v21 = vor.u32 %v4676_v33, %v4236_v45  ;;  %v4340_v33 = vld [vmem:[%s7166_s1 + $0x8c8] sm:$0xf0] }
 0x14f   :  { %2858 = vmatpush.bf16.msra.mxu1 %v4239_v21 }
 0x150   :  { %v2418_v0 = vpop.f32.mrf.mxu2  ;;  %v2373_v37 = vpop.f32.mrf.mxu0  ;;  %2793 = vmatpush.bf16.msrb.mxu2 %v3991_v58  ;;  %2906 = vmatpush.bf16.msra.mxu3 %v4367_v52  ;;  %v4356_v58 = vld [vmem:[%s7166_s1 + $0x8e8] sm:$0xf0] }
 0x151   :  { %v2419_v46 = vadd.f32 %v2418_v0, %v2395_v53  ;;  %v2442_v47 = vpop.f32.mrf.mxu3  ;;  %v2374_v4 = vadd.f32 %v2373_v37, %v6636_v62  ;;  %v2397_v63 = vpop.f32.mrf.mxu1  ;;  %2745 = vmatpush.bf16.msrb.mxu0 %v3863_v5  ;;  %v4706_v37 = vld [vmem:[%s7166_s1 + $0x8e4] sm:$0xf]  ;;  %v4688_v5 = vld [vmem:[%s7166_s1 + $0x854] sm:$0xf] }
 0x152   :  { %v4359_v26 = vor.u32 %v4706_v37, %v4356_v58  ;;  %v4652_v37 = vld [vmem:[%s7166_s1 + $0x734] sm:$0xf] }
 0x153   :  { %v6833_v13 = vadd.f32 %v2442_v47, %v2419_v46  ;;  %v2398_v6 = vadd.f32 %v2397_v63, %v2374_v4  ;;  %2655 = vmatmul.bf16.gmra.mxu0 %v5478_v59  ;;  %v4692_v59 = vld [vmem:[%s7166_s1 + $0x874] sm:$0xf]  ;;  %v4295_v47 = vor.u32 %v4690_v57, %v4292_v2  ;;  %v4674_v4 = vld [vmem:[%s7166_s1 + $0x7e4] sm:$0xf]  ;;  %v4228_v63 = vld [vmem:[%s7166_s1 + $0x7e8] sm:$0xf0] }
 0x154   :  { %2679 = vmatmul.bf16.gmra.mxu1 %v5480_v60  ;;  %v4300_v60 = vld [vmem:[%s7166_s1 + $0x878] sm:$0xf0]  ;;  %v4231_v24 = vor.u32 %v4674_v4, %v4228_v63  ;;  %2907 = vmatpush.bf16.msra.mxu3 %v4359_v26  ;;  %v4700_v58 = vld [vmem:[%s7166_s1 + $0x8b4] sm:$0xf] }
 0x155   :  { %2703 = vmatmul.bf16.gmra.mxu2 %v5756_v39  ;;  %v4660_v39 = vld [vmem:[%s7166_s1 + $0x774] sm:$0xf]  ;;  %v4303_v30 = vor.u32 %v4692_v59, %v4300_v60  ;;  %v4220_v60 = vld [vmem:[%s7166_s1 + $0x7d8] sm:$0xf0] }
 0x156   :  { %2727 = vmatmul.bf16.gmra.mxu3 %v5767_v7  ;;  %2859 = vmatpush.bf16.msra.mxu1 %v4231_v24  ;;  %v4332_v4 = vld [vmem:[%s7166_s1 + $0x8b8] sm:$0xf0]  ;;  %v4668_v63 = vld [vmem:[%s7166_s1 + $0x7b4] sm:$0xf] }
 0x157   :  { %2882 = vmatpush.bf16.msra.mxu2 %v4303_v30  ;;  %v4276_v30 = vld [vmem:[%s7166_s1 + $0x848] sm:$0xf0]  ;;  %v4335_v24 = vor.u32 %v4700_v58, %v4332_v4  ;;  %v4662_v58 = vld [vmem:[%s7166_s1 + $0x784] sm:$0xf] }
 0x158   :  { %v2421_v62 = vpop.f32.mrf.mxu2  ;;  %v2375_v38 = vpop.f32.mrf.mxu0 }
 0x159   :  { %v2422_v32 = vadd.f32 %v2421_v62, %v2398_v6  ;;  %v2445_v23 = vpop.f32.mrf.mxu3  ;;  %v2376_v11 = vadd.f32 %v2375_v38, %v6669_v55  ;;  %v2399_v20 = vpop.f32.mrf.mxu1  ;;  %v4172_v55 = vld [vmem:[%s7166_s1 + $0x778] sm:$0xf0]  ;;  %v4704_v38 = vld [vmem:[%s7166_s1 + $0x8d4] sm:$0xf] }
 0x15a   :  { %v4175_v56 = vor.u32 %v4660_v39, %v4172_v55  ;;  %v4686_v39 = vld [vmem:[%s7166_s1 + $0x844] sm:$0xf] }
 0x15b   :  { %v6849_v7 = vadd.f32 %v2445_v23, %v2422_v32  ;;  %v2400_v53 = vadd.f32 %v2399_v20, %v2376_v11  ;;  %2883 = vmatpush.bf16.msra.mxu2 %v4295_v47  ;;  %v4656_v32 = vld [vmem:[%s7166_s1 + $0x754] sm:$0xf]  ;;  %v4348_v11 = vld [vmem:[%s7166_s1 + $0x8d8] sm:$0xf0]  ;;  %v4279_v51 = vor.u32 %v4686_v39, %v4276_v30 }
 0x15c   :  { %2834 = vmatpush.bf16.msra.mxu0 %v4175_v56  ;;  %v4351_v59 = vor.u32 %v4704_v38, %v4348_v11  ;;  %v4702_v56 = vld [vmem:[%s7166_s1 + $0x8c4] sm:$0xf]  ;;  %v4268_v47 = vld [vmem:[%s7166_s1 + $0x838] sm:$0xf0]  ;;  %v4680_v39 = vld [vmem:[%s7166_s1 + $0x814] sm:$0xf] }
 0x15d   :  { %v4343_v45 = vor.u32 %v4702_v56, %v4340_v33  ;;  %v4252_v30 = vld [vmem:[%s7166_s1 + $0x818] sm:$0xf0]  ;;  %v4664_v33 = vld [vmem:[%s7166_s1 + $0x794] sm:$0xf] }
 0x15e   :  { %2908 = vmatpush.bf16.msra.mxu3 %v4351_v59 }
 0x160   :  { %v2423_v44 = vpop.f32.mrf.mxu2  ;;  %v2459_v50 = vpop.f32.mrf.mxu0 }
 0x161   :  { %v2424_v22 = vadd.f32 %v2423_v44, %v2400_v53  ;;  %v2447_v54 = vpop.f32.mrf.mxu3  ;;  %v2460_v29 = vadd.f32 %v2459_v50, %v6706_v31  ;;  %v2483_v0 = vpop.f32.mrf.mxu1  ;;  %v4164_v31 = vld [vmem:[%s7166_s1 + $0x768] sm:$0xf0]  ;;  %v4670_v44 = vld [vmem:[%s7166_s1 + $0x7c4] sm:$0xf] }
 0x162   :  { %v4167_v10 = vor.u32 %v4658_v12, %v4164_v31  ;;  %v4148_v53 = vld [vmem:[%s7166_s1 + $0x748] sm:$0xf0]  ;;  %2909 = vmatpush.bf16.msra.mxu3 %v4343_v45  ;;  %v4684_v12 = vld [vmem:[%s7166_s1 + $0x834] sm:$0xf]  ;;  %v4188_v45 = vld [vmem:[%s7166_s1 + $0x798] sm:$0xf0] }
 0x163   :  { %v6876_v46 = vadd.f32 %v2447_v54, %v2424_v22  ;;  %v6887_v48 = vadd.f32 %v2483_v0, %v2460_v29  ;;  %2660 = vmatmul.bf16.gmra.mxu0 %v5580_v49  ;;  %v4284_v49 = vld [vmem:[%s7166_s1 + $0x858] sm:$0xf0]  ;;  %v4151_v52 = vor.u32 %v4654_v25, %v4148_v53  ;;  %v4212_v22 = vld [vmem:[%s7166_s1 + $0x7c8] sm:$0xf0]  ;;  %v4271_v31 = vor.u32 %v4684_v12, %v4268_v47  ;;  %v4696_v53 = vld [vmem:[%s7166_s1 + $0x894] sm:$0xf] }
 0x164   :  { %2684 = vmatmul.bf16.gmra.mxu1 %v5582_v61  ;;  %v4287_v40 = vor.u32 %v4688_v5, %v4284_v49  ;;  %2835 = vmatpush.bf16.msra.mxu0 %v4167_v10  ;;  %v4215_v29 = vor.u32 %v4670_v44, %v4212_v22  ;;  %v4204_v5 = vld [vmem:[%s7166_s1 + $0x7b8] sm:$0xf0]  ;;  %v4191_v44 = vor.u32 %v4664_v33, %v4188_v45  ;;  %v4678_v22 = vld [vmem:[%s7166_s1 + $0x804] sm:$0xf] }
 0x165   :  { %2708 = vmatmul.bf16.gmra.mxu2 %v5858_v16  ;;  %v4207_v49 = vor.u32 %v4668_v63, %v4204_v5  ;;  %v4124_v25 = vld [vmem:[%s7166_s1 + $0x718] sm:$0xf0]  ;;  %v4694_v12 = vld [vmem:[%s7166_s1 + $0x884] sm:$0xf] }
 0x166   :  { %2732 = vmatmul.bf16.gmra.mxu3 %v5860_v18  ;;  %2884 = vmatpush.bf16.msra.mxu2 %v4287_v40  ;;  %v4156_v18 = vld [vmem:[%s7166_s1 + $0x758] sm:$0xf0]  ;;  %v4260_v40 = vld [vmem:[%s7166_s1 + $0x828] sm:$0xf0] }
 0x167   :  { %v4159_v23 = vor.u32 %v4656_v32, %v4156_v18  ;;  %2910 = vmatpush.bf16.msra.mxu3 %v4335_v24  ;;  %v4196_v18 = vld [vmem:[%s7166_s1 + $0x7a8] sm:$0xf0] }
 0x168   :  { %v2507_v41 = vpop.f32.mrf.mxu2  ;;  %v2461_v6 = vpop.f32.mrf.mxu0 }
 0x169   :  { %v2531_v1 = vpop.f32.mrf.mxu3  ;;  %v2462_v61 = vadd.f32 %v2461_v6, %v6745_v3  ;;  %v2485_v16 = vpop.f32.mrf.mxu1  ;;  %v4672_v3 = vld [vmem:[%s7166_s1 + $0x7d4] sm:$0xf]  ;;  %2836 = vmatpush.bf16.msra.mxu0 %v4159_v23  ;;  %v4698_v6 = vld [vmem:[%s7166_s1 + $0x8a4] sm:$0xf] }
 0x16a   :  { %v6905_v62 = vadd.f32 %v2531_v1, %v2507_v41  ;;  %v4223_v55 = vor.u32 %v4672_v3, %v4220_v60  ;;  %2885 = vmatpush.bf16.msra.mxu2 %v4279_v51  ;;  %v4255_v51 = vor.u32 %v4680_v39, %v4252_v30  ;;  %v7198_v30 = vld [vmem:[#allocation4_spill] sm:$0xff] }
 0x16b   :  { %v6923_v20 = vadd.f32 %v2485_v16, %v2462_v61  ;;  %v4666_v61 = vld [vmem:[%s7166_s1 + $0x7a4] sm:$0xf] }
 0x16c   :  { %2860 = vmatpush.bf16.msra.mxu1 %v4223_v55  ;;  %v4199_v11 = vor.u32 %v4666_v61, %v4196_v18 }
 0x16d   :  { %2837 = vmatpush.bf16.msra.mxu0 %v4151_v52  ;;  %v4316_v52 = vld [vmem:[%s7166_s1 + $0x898] sm:$0xf0] }
 0x16e   :  { %2886 = vmatpush.bf16.msra.mxu2 %v4271_v31 }
 0x170   :  { %v2509_v21 = vpop.f32.mrf.mxu2  ;;  %v2464_v50 = vpop.f32.mrf.mxu0  ;;  %2861 = vmatpush.bf16.msra.mxu1 %v4215_v29 }
 0x171   :  { %v2533_v54 = vpop.f32.mrf.mxu3  ;;  %v2465_v57 = vadd.f32 %v2464_v50, %v6785_v15  ;;  %v2488_v2 = vpop.f32.mrf.mxu1  ;;  %v4140_v15 = vld [vmem:[%s7166_s1 + $0x738] sm:$0xf0] }
 0x172   :  { %v6952_v0 = vadd.f32 %v2533_v54, %v2509_v21  ;;  %v4143_v26 = vor.u32 %v4652_v37, %v4140_v15  ;;  %v4319_v21 = vor.u32 %v4696_v53, %v4316_v52  ;;  %v4244_v54 = vld [vmem:[%s7166_s1 + $0x808] sm:$0xf0] }
 0x173   :  { %v6970_v10 = vadd.f32 %v2488_v2, %v2465_v57  ;;  %2746 = vmatmul.bf16.vlgmr.msrb.gmra.mxu0 %v5670_v42  ;;  %v4682_v42 = vld [vmem:[%s7166_s1 + $0x824] sm:$0xf]  ;;  %v4247_v50 = vor.u32 %v4678_v22, %v4244_v54  ;;  %v4116_v2 = vld [vmem:[%s7166_s1 + $0x708] sm:$0xf0] }
 0x174   :  { %2770 = vmatmul.bf16.vlgmr.msrb.gmra.mxu1 %v5672_v43  ;;  %v4263_v41 = vor.u32 %v4682_v42, %v4260_v40  ;;  %v4650_v43 = vld [vmem:[%s7166_s1 + $0x724] sm:$0xf]  ;;  %2838 = vmatpush.bf16.msra.mxu0 %v4143_v26  ;;  %v4308_v15 = vld [vmem:[%s7166_s1 + $0x888] sm:$0xf0] }
 0x175   :  { %2794 = vmatmul.bf16.vlgmr.msrb.gmra.mxu2 %v5962_v17  ;;  %v4132_v17 = vld [vmem:[%s7166_s1 + $0x728] sm:$0xf0]  ;;  %2862 = vmatpush.bf16.msra.mxu1 %v4207_v49  ;;  %v4646_v57 = vld [vmem:[%s7166_s1 + $0x704] sm:$0xf]  ;;  %v4311_v24 = vor.u32 %v4694_v12, %v4308_v15 }
 0x176   :  { %2818 = vmatmul.bf16.vlgmr.msrb.gmra.mxu3 %v5964_v28  ;;  %v4135_v1 = vor.u32 %v4650_v43, %v4132_v17  ;;  %v4324_v28 = vld [vmem:[%s7166_s1 + $0x8a8] sm:$0xf0]  ;;  %2887 = vmatpush.bf16.msra.mxu2 %v4263_v41  ;;  %v4119_v37 = vor.u32 %v4646_v57, %v4116_v2  ;;  %v7194_v40 = vld [vmem:[#allocation2_spill] sm:$0xff]  ;;  %v7196_v43 = vld [vmem:[#allocation8_spill] sm:$0xff] }
 0x177   :  { %v4327_v32 = vor.u32 %v4698_v6, %v4324_v28  ;;  %v4180_v26 = vld [vmem:[%s7166_s1 + $0x788] sm:$0xf0]  ;;  %v7197_v17 = vld [vmem:[#allocation9_spill] sm:$0xff]  ;;  %v7200_v57 = vld [vmem:[#allocation6_spill] sm:$0xff] }
 0x178   :  { %v2512_v16 = vpop.f32.mrf.mxu2  ;;  %v2466_v38 = vpop.f32.mrf.mxu0  ;;  %2839 = vmatpush.bf16.msra.mxu0 %v4135_v1  ;;  %v4183_v49 = vor.u32 %v4662_v58, %v4180_v26  ;;  %v7195_v41 = vld [vmem:[#allocation3_spill] sm:$0xff] }
 0x179   :  { %v2536_v23 = vpop.f32.mrf.mxu3  ;;  %v2467_v59 = vadd.f32 %v2466_v38, %v6833_v13  ;;  %v2490_v60 = vpop.f32.mrf.mxu1  ;;  %2911 = vmatpush.bf16.msra.mxu3 %v4327_v32  ;;  %2863 = vmatpush.bf16.msra.mxu1 %v4199_v11  ;;  %v4648_v13 = vld [vmem:[%s7166_s1 + $0x714] sm:$0xf] }
 0x17a   :  { %v7009_v3 = vadd.f32 %v2536_v23, %v2512_v16  ;;  %v4127_v56 = vor.u32 %v4648_v13, %v4124_v25  ;;  %2888 = vmatpush.bf16.msra.mxu2 %v4255_v51  ;;  %v7199_v51 = vld [vmem:[#allocation5_spill] sm:$0xff] }
 0x17b   :  { %v7018_v55 = vadd.f32 %v2490_v60, %v2467_v59 }
 0x17c   :  { %2840 = vmatpush.bf16.msra.mxu0 %v4127_v56 }
 0x17d   :  { %2912 = vmatpush.bf16.msra.mxu3 %v4319_v21  ;;  %2864 = vmatpush.bf16.msra.mxu1 %v4191_v44 }
 0x17e   :  { %2889 = vmatpush.bf16.msra.mxu2 %v4247_v50 }
 0x180   :  { %v2514_v29 = vpop.f32.mrf.mxu2  ;;  %v2469_v31 = vpop.f32.mrf.mxu0  ;;  %2841 = vmatpush.bf16.msra.mxu0 %v4119_v37 }
 0x181   :  { %v2538_v47 = vpop.f32.mrf.mxu3  ;;  %v2470_v63 = vadd.f32 %v2469_v31, %v6849_v7  ;;  %v2493_v5 = vpop.f32.mrf.mxu1  ;;  %2913 = vmatpush.bf16.msra.mxu3 %v4311_v24  ;;  %2865 = vmatpush.bf16.msra.mxu1 %v4183_v49 }
 0x182   :  { %v2539_v4 = vadd.f32 %v2538_v47, %v2514_v29 }
 0x183   :  { %v7063_v42 = vadd.f32 %v2493_v5, %v2470_v63  ;;  %2751 = vmatmul.bf16.gmra.mxu0 %v7194_v40 }
 0x184   :  { %2775 = vmatmul.bf16.gmra.mxu1 %v7195_v41 }
 0x185   :  { %2799 = vmatmul.bf16.gmra.mxu2 %v7196_v43  ;;  %v7202_v43 = vld [vmem:[#allocation10_spill] sm:$0xff] }
 0x186   :  { %2823 = vmatmul.bf16.gmra.mxu3 %v7197_v17 }
 0x188   :  { %v2517_v1 = vpop.f32.mrf.mxu2  ;;  %v2471_v7 = vpop.f32.mrf.mxu0 }
 0x189   :  { %v2541_v6 = vpop.f32.mrf.mxu3  ;;  %v2472_v61 = vadd.f32 %v2471_v7, %v6876_v46  ;;  %v2495_v16 = vpop.f32.mrf.mxu1 }
 0x18a   :  { %v2542_v28 = vadd.f32 %v2541_v6, %v2517_v1 }
 0x18b   :  { %v7070_v32 = vadd.f32 %v2495_v16, %v2472_v61 }
 0x190   :  { %v2519_v18 = vpop.f32.mrf.mxu2  ;;  %v2555_v38 = vpop.f32.mrf.mxu0 }
 0x191   :  { %v2543_v23 = vpop.f32.mrf.mxu3  ;;  %v2556_v59 = vadd.f32 %v2555_v38, %v6905_v62  ;;  %v2579_v60 = vpop.f32.mrf.mxu1 }
 0x192   :  { %v2544_v11 = vadd.f32 %v2543_v23, %v2519_v18 }
 0x193   :  { %v2580_v39 = vadd.f32 %v2579_v60, %v2556_v59  ;;  %2756 = vmatmul.bf16.gmra.mxu0 %v7198_v30 }
 0x194   :  { %2780 = vmatmul.bf16.gmra.mxu1 %v7199_v51  ;;  %v7204_v51 = vld [vmem:[#allocation12_spill] sm:$0xff] }
 0x195   :  { %2804 = vmatmul.bf16.gmra.mxu2 %v6168_v9 }
 0x196   :  { %2828 = vmatmul.bf16.gmra.mxu3 %v6170_v19  ;;  %v7201_v19 = vld [vmem:[#allocation7_spill] sm:$0xff] }
 0x198   :  { %v2603_v46 = vpop.f32.mrf.mxu2  ;;  %v2557_v53 = vpop.f32.mrf.mxu0 }
 0x199   :  { %v2604_v13 = vadd.f32 %v2603_v46, %v2580_v39  ;;  %v2627_v25 = vpop.f32.mrf.mxu3  ;;  %v2558_v56 = vadd.f32 %v2557_v53, %v6952_v0  ;;  %v2581_v52 = vpop.f32.mrf.mxu1 }
 0x19b   :  { %v2628_v33 = vadd.f32 %v2627_v25, %v2604_v13  ;;  %v2582_v45 = vadd.f32 %v2581_v52, %v2558_v56 }
 0x1a0   :  { %v2605_v62 = vpop.f32.mrf.mxu2  ;;  %v2560_v22 = vpop.f32.mrf.mxu0 }
 0x1a1   :  { %v2606_v21 = vadd.f32 %v2605_v62, %v2582_v45  ;;  %v2629_v44 = vpop.f32.mrf.mxu3  ;;  %v2561_v54 = vadd.f32 %v2560_v22, %v7009_v3  ;;  %v2584_v50 = vpop.f32.mrf.mxu1 }
 0x1a3   :  { %v2630_v29 = vadd.f32 %v2629_v44, %v2606_v21  ;;  %v2585_v9 = vadd.f32 %v2584_v50, %v2561_v54  ;;  %2842 = vmatmul.bf16.vlgmr.msra.gmra.mxu0 %v7200_v57 }
 0x1a4   :  { %2866 = vmatmul.bf16.vlgmr.msra.gmra.mxu1 %v7201_v19 }
 0x1a5   :  { %2890 = vmatmul.bf16.vlgmr.msra.gmra.mxu2 %v6264_v34  ;;  %v7203_v34 = vld [vmem:[#allocation11_spill] sm:$0xff] }
 0x1a6   :  { %2914 = vmatmul.bf16.vlgmr.msra.gmra.mxu3 %v6266_v36 }
 0x1a8   :  { %v2608_v0 = vpop.f32.mrf.mxu2  ;;  %v2562_v47 = vpop.f32.mrf.mxu0 }
 0x1a9   :  { %v2609_v2 = vadd.f32 %v2608_v0, %v2585_v9  ;;  %v2632_v12 = vpop.f32.mrf.mxu3  ;;  %v2563_v31 = vadd.f32 %v2562_v47, %v2539_v4  ;;  %v2586_v37 = vpop.f32.mrf.mxu1 }
 0x1ab   :  { %v2633_v15 = vadd.f32 %v2632_v12, %v2609_v2  ;;  %v2587_v58 = vadd.f32 %v2586_v37, %v2563_v31 }
 0x1b0   :  { %v2610_v3 = vpop.f32.mrf.mxu2  ;;  %v2565_v5 = vpop.f32.mrf.mxu0 }
 0x1b1   :  { %v2611_v26 = vadd.f32 %v2610_v3, %v2587_v58  ;;  %v2634_v63 = vpop.f32.mrf.mxu3  ;;  %v2566_v24 = vadd.f32 %v2565_v5, %v2542_v28  ;;  %v2589_v49 = vpop.f32.mrf.mxu1 }
 0x1b3   :  { %v2635_v40 = vadd.f32 %v2634_v63, %v2611_v26  ;;  %v2590_v41 = vadd.f32 %v2589_v49, %v2566_v24  ;;  %2847 = vmatmul.bf16.gmra.mxu0 %v7202_v43 }
 0x1b4   :  { %2871 = vmatmul.bf16.gmra.mxu1 %v7203_v34 }
 0x1b5   :  { %2895 = vmatmul.bf16.gmra.mxu2 %v6350_v35  ;;  %v7205_v35 = vld [vmem:[#allocation13_spill] sm:$0xff] }
 0x1b6   :  { %2919 = vmatmul.bf16.gmra.mxu3 %v6361_v14 }
 0x1b8   :  { %v2613_v36 = vpop.f32.mrf.mxu2  ;;  %v2567_v1 = vpop.f32.mrf.mxu0 }
 0x1b9   :  { %v2614_v4 = vadd.f32 %v2613_v36, %v2590_v41  ;;  %v2637_v17 = vpop.f32.mrf.mxu3  ;;  %v2568_v6 = vadd.f32 %v2567_v1, %v2544_v11  ;;  %v2591_v7 = vpop.f32.mrf.mxu1 }
 0x1bb   :  { %v2638_v61 = vadd.f32 %v2637_v17, %v2614_v4  ;;  %v2592_v16 = vadd.f32 %v2591_v7, %v2568_v6 }
 0x1c0   :  { %v2615_v28 = vpop.f32.mrf.mxu2  ;;  %v2651_v38 = vpop.f32.mrf.mxu0 }
 0x1c1   :  { %v2616_v18 = vadd.f32 %v2615_v28, %v2592_v16  ;;  %v2639_v23 = vpop.f32.mrf.mxu3  ;;  %v2652_v59 = vadd.f32 %v2651_v38, %v2628_v33  ;;  %v2675_v60 = vpop.f32.mrf.mxu1 }
 0x1c3   :  { %v2640_v39 = vadd.f32 %v2639_v23, %v2616_v18  ;;  %v2676_v30 = vadd.f32 %v2675_v60, %v2652_v59  ;;  %2852 = vmatmul.bf16.gmra.mxu0 %v7204_v51 }
 0x1c4   :  { %2876 = vmatmul.bf16.gmra.mxu1 %v7205_v35 }
 0x1c5   :  { %2900 = vmatmul.bf16.gmra.mxu2 %v6442_v8 }
 0x1c6   :  { %2924 = vmatmul.bf16.gmra.mxu3 %v6444_v27 }
 0x1c8   :  { %v2699_v14 = vpop.f32.mrf.mxu2  ;;  %v2653_v13 = vpop.f32.mrf.mxu0 }
 0x1c9   :  { %v2700_v11 = vadd.f32 %v2699_v14, %v2676_v30  ;;  %v2723_v46 = vpop.f32.mrf.mxu3  ;;  %v2654_v25 = vadd.f32 %v2653_v13, %v2630_v29  ;;  %v2677_v53 = vpop.f32.mrf.mxu1 }
 0x1cb   :  { %v2724_v56 = vadd.f32 %v2723_v46, %v2700_v11  ;;  %v2678_v52 = vadd.f32 %v2677_v53, %v2654_v25 }
 0x1d0   :  { %v2701_v33 = vpop.f32.mrf.mxu2  ;;  %v2656_v21 = vpop.f32.mrf.mxu0 }
 0x1d1   :  { %v2702_v45 = vadd.f32 %v2701_v33, %v2678_v52  ;;  %v2725_v62 = vpop.f32.mrf.mxu3  ;;  %v2657_v44 = vadd.f32 %v2656_v21, %v2633_v15  ;;  %v2680_v22 = vpop.f32.mrf.mxu1 }
 0x1d3   :  { %v2726_v54 = vadd.f32 %v2725_v62, %v2702_v45  ;;  %v2681_v50 = vadd.f32 %v2680_v22, %v2657_v44 }
 0x1d8   :  { %v2704_v9 = vpop.f32.mrf.mxu2  ;;  %v2658_v27 = vpop.f32.mrf.mxu0 }
 0x1d9   :  { %v2705_v8 = vadd.f32 %v2704_v9, %v2681_v50  ;;  %v2728_v57 = vpop.f32.mrf.mxu3  ;;  %v2659_v19 = vadd.f32 %v2658_v27, %v2635_v40  ;;  %v2682_v0 = vpop.f32.mrf.mxu1 }
 0x1db   :  { %v2729_v2 = vadd.f32 %v2728_v57, %v2705_v8  ;;  %v2683_v12 = vadd.f32 %v2682_v0, %v2659_v19  ;;  %v2942_v0 = vld [vmem:[%s7168_s2] sm:$0xff] }
 0x1e0   :  { %v2706_v29 = vpop.f32.mrf.mxu2  ;;  %v2661_v37 = vpop.f32.mrf.mxu0 }
 0x1e1   :  { %v2707_v47 = vadd.f32 %v2706_v29, %v2683_v12  ;;  %v2730_v31 = vpop.f32.mrf.mxu3  ;;  %v2662_v58 = vadd.f32 %v2661_v37, %v2638_v61  ;;  %v2685_v3 = vpop.f32.mrf.mxu1 }
 0x1e3   :  { %v7091_v26 = vadd.f32 %v2730_v31, %v2707_v47  ;;  %v2686_v15 = vadd.f32 %v2685_v3, %v2662_v58  ;;  %v2930_v31 = vmax.f32 %v6887_v48, 0.0 }
 0x1e8   :  { %v2709_v63 = vpop.f32.mrf.mxu2  ;;  %v2663_v49 = vpop.f32.mrf.mxu0 }
 0x1e9   :  { %v2710_v5 = vadd.f32 %v2709_v63, %v2686_v15  ;;  %v2733_v24 = vpop.f32.mrf.mxu3  ;;  %v2664_v41 = vadd.f32 %v2663_v49, %v2640_v39  ;;  %v2687_v43 = vpop.f32.mrf.mxu1  ;;  %v2949_v49 = vunpack.c.h.bf16 %v2942_v0 }
 0x1eb   :  { %v7093_v34 = vadd.f32 %v2733_v24, %v2710_v5  ;;  %v2688_v40 = vadd.f32 %v2687_v43, %v2664_v41 }
 0x1f0   :  { %v2711_v36 = vpop.f32.mrf.mxu2  ;;  %v2747_v1 = vpop.f32.mrf.mxu0 }
 0x1f1   :  { %v2712_v4 = vadd.f32 %v2711_v36, %v2688_v40  ;;  %v2735_v17 = vpop.f32.mrf.mxu3  ;;  %v2771_v6 = vpop.f32.mrf.mxu1  ;;  %v2748_v25 = vadd.f32 %v2747_v1, %v2724_v56  ;;  %v2943_v40 = vld [vmem:[%s7168_s2 + $0x8] sm:$0xff]  ;;  %v2932_v1 = vmax.f32 %v6923_v20, 0.0 }
 0x1f3   :  { %v7095_v7 = vadd.f32 %v2735_v17, %v2712_v4  ;;  %v2772_v62 = vadd.f32 %v2771_v6, %v2748_v25  ;;  %v2950_v6 = vunpack.c.l.bf16 %v2943_v40 }
 0x1f8   :  { %v2795_v61 = vpop.f32.mrf.mxu2  ;;  %v2749_v28 = vpop.f32.mrf.mxu0 }
 0x1f9   :  { %v2819_v16 = vpop.f32.mrf.mxu3  ;;  %v2773_v18 = vpop.f32.mrf.mxu1  ;;  %v2796_v21 = vadd.f32 %v2795_v61, %v2772_v62  ;;  %v2750_v44 = vadd.f32 %v2749_v28, %v2726_v54  ;;  %v2948_v54 = vunpack.c.l.bf16 %v2942_v0 }
 0x1fb   :  { %v2820_v50 = vadd.f32 %v2819_v16, %v2796_v21  ;;  %v2774_v27 = vadd.f32 %v2773_v18, %v2750_v44  ;;  %v2960_v43 = vadd.f32 %v2948_v54, %v2930_v31 }
 0x1fd   :  { %v2972_v16 = vmax.f32 %v2960_v43, 0.0 }
 0x200   :  { %v2797_v23 = vpop.f32.mrf.mxu2  ;;  %v2752_v59 = vpop.f32.mrf.mxu0 }
 0x201   :  { %v2821_v38 = vpop.f32.mrf.mxu3  ;;  %v2776_v60 = vpop.f32.mrf.mxu1  ;;  %v2798_v19 = vadd.f32 %v2797_v23, %v2774_v27  ;;  %v2753_v12 = vadd.f32 %v2752_v59, %v2729_v2 }
 0x203   :  { %v2822_v37 = vadd.f32 %v2821_v38, %v2798_v19  ;;  %v2777_v5 = vadd.f32 %v2776_v60, %v2753_v12  ;;  %v2934_v19 = vmax.f32 %v6970_v10, 0.0 }
 0x208   :  { %v2800_v39 = vpop.f32.mrf.mxu2  ;;  %v2754_v51 = vpop.f32.mrf.mxu0 }
 0x209   :  { %v2824_v30 = vpop.f32.mrf.mxu3  ;;  %v2778_v35 = vpop.f32.mrf.mxu1  ;;  %v2801_v2 = vadd.f32 %v2800_v39, %v2777_v5  ;;  %v2755_v4 = vadd.f32 %v2754_v51, %v7091_v26  ;;  %v2951_v39 = vunpack.c.h.bf16 %v2943_v40  ;;  %v2944_v26 = vld [vmem:[%s7168_s2 + $0x10] sm:$0xff] }
 0x20a   :  { %v2952_v27 = vunpack.c.l.bf16 %v2944_v26 }
 0x20b   :  { %v2825_v28 = vadd.f32 %v2824_v30, %v2801_v2  ;;  %v2779_v60 = vadd.f32 %v2778_v35, %v2755_v4 }
 0x210   :  { %v2802_v14 = vpop.f32.mrf.mxu2  ;;  %v2757_v46 = vpop.f32.mrf.mxu0 }
 0x211   :  { %v7097_v11 = vpop.f32.mrf.mxu3  ;;  %v7099_v13 = vpop.f32.mrf.mxu1  ;;  %v2803_v20 = vadd.f32 %v2802_v14, %v2779_v60  ;;  %v2758_v51 = vadd.f32 %v2757_v46, %v7093_v34  ;;  %v2964_v46 = vadd.f32 %v2952_v27, %v2934_v19 }
 0x213   :  { %v2827_v0 = vadd.f32 %v7097_v11, %v2803_v20  ;;  %v2782_v31 = vadd.f32 %v7099_v13, %v2758_v51  ;;  %v2976_v43 = vmax.f32 %v2964_v46, 0.0 }
 0x218   :  { %v7101_v53 = vpop.f32.mrf.mxu2  ;;  %v7105_v33 = vpop.f32.mrf.mxu0 }
 0x219   :  { %v7103_v52 = vpop.f32.mrf.mxu3  ;;  %v7107_v45 = vpop.f32.mrf.mxu1  ;;  %v2806_v10 = vadd.f32 %v7101_v53, %v2782_v31  ;;  %v2760_v13 = vadd.f32 %v7105_v33, %v7095_v7 }
 0x21b   :  { %v2830_v40 = vadd.f32 %v7103_v52, %v2806_v10 }
 0x220   :  { %v7109_v22 = vpop.f32.mrf.mxu2  ;;  %v2843_v8 = vpop.f32.mrf.mxu0 }
 0x221   :  { %v7111_v9 = vpop.f32.mrf.mxu3  ;;  %v2867_v57 = vpop.f32.mrf.mxu1  ;;  %v2844_v56 = vadd.f32 %v2843_v8, %v2820_v50  ;;  %v2962_v50 = vadd.f32 %v2950_v6, %v2932_v1 }
 0x223   :  { %v2868_v29 = vadd.f32 %v2867_v57, %v2844_v56  ;;  %v2974_v57 = vmax.f32 %v2962_v50, 0.0 }
 0x228   :  { %v2891_v47 = vpop.f32.mrf.mxu2  ;;  %v2845_v15 = vpop.f32.mrf.mxu0 }
 0x229   :  { %v2892_v58 = vadd.f32 %v2891_v47, %v2868_v29  ;;  %v2915_v3 = vpop.f32.mrf.mxu3  ;;  %v2869_v63 = vpop.f32.mrf.mxu1  ;;  %v2846_v41 = vadd.f32 %v2845_v15, %v2822_v37  ;;  %v2945_v15 = vld [vmem:[%s7168_s2 + $0x18] sm:$0xff] }
 0x22a   :  { %v2955_v6 = vunpack.c.h.bf16 %v2945_v15 }
 0x22b   :  { %v2916_v24 = vadd.f32 %v2915_v3, %v2892_v58  ;;  %v2870_v17 = vadd.f32 %v2869_v63, %v2846_v41  ;;  %v2953_v3 = vunpack.c.h.bf16 %v2944_v26 }
 0x22d   :  { %v2931_v36 = vmax.f32 %v2916_v24, 0.0  ;;  %v2936_v24 = vmax.f32 %v7018_v55, 0.0  ;;  %v2946_v55 = vld [vmem:[%s7168_s2 + $0x20] sm:$0xff] }
 0x22e   :  { %v2957_v50 = vunpack.c.h.bf16 %v2946_v55 }
 0x22f   :  { %v2961_v48 = vadd.f32 %v2949_v49, %v2931_v36  ;;  %v2954_v49 = vunpack.c.l.bf16 %v2945_v15 }
 0x230   :  { %v2893_v61 = vpop.f32.mrf.mxu2  ;;  %v2848_v59 = vpop.f32.mrf.mxu0 }
 0x231   :  { %v2973_v18 = vmax.f32 %v2961_v48, 0.0  ;;  %v2894_v23 = vadd.f32 %v2893_v61, %v2870_v17  ;;  %v2917_v38 = vpop.f32.mrf.mxu3  ;;  %v2872_v25 = vpop.f32.mrf.mxu1  ;;  %v2849_v44 = vadd.f32 %v2848_v59, %v2825_v28  ;;  %v2784_v48 = vadd.f32 %v7107_v45, %v2760_v13 }
 0x232   :  { %v2966_v7 = vadd.f32 %v2954_v49, %v2936_v24  ;;  %v2938_v59 = vmax.f32 %v7063_v42, 0.0 }
 0x233   :  { %v2984_v62 = vpack.c.bf16 %v2973_v18, %v2972_v16  ;;  %v2918_v21 = vadd.f32 %v2917_v38, %v2894_v23  ;;  %v2873_v35 = vadd.f32 %v2872_v25, %v2849_v44  ;;  %v2808_v16 = vadd.f32 %v7109_v22, %v2784_v48 }
 0x234   :  { %v2978_v45 = vmax.f32 %v2966_v7, 0.0  ;;  %v2956_v23 = vunpack.c.l.bf16 %v2946_v55 }
 0x235   :  { %2990 = vst [vmem:[%s7169_s3] sm:$0xff] %v2984_v62  ;;  %v2933_v30 = vmax.f32 %v2918_v21, 0.0  ;;  %v2832_v60 = vadd.f32 %v7111_v9, %v2808_v16 }
 0x236   :  { %v2968_v20 = vadd.f32 %v2956_v23, %v2938_v59 }
 0x237   :  { %v2963_v8 = vadd.f32 %v2951_v39, %v2933_v30  ;;  %v2947_v30 = vld [vmem:[%s7168_s2 + $0x28] sm:$0xff] }
 0x238   :  { %v2896_v56 = vpop.f32.mrf.mxu2  ;;  %v2850_v14 = vpop.f32.mrf.mxu0  ;;  %v2980_v27 = vmax.f32 %v2968_v20, 0.0 }
 0x239   :  { %v2975_v12 = vmax.f32 %v2963_v8, 0.0  ;;  %v2897_v29 = vadd.f32 %v2896_v56, %v2873_v35  ;;  %v2920_v47 = vpop.f32.mrf.mxu3  ;;  %v2874_v54 = vpop.f32.mrf.mxu1  ;;  %v2851_v34 = vadd.f32 %v2850_v14, %v2827_v0  ;;  %v2958_v35 = vunpack.c.l.bf16 %v2947_v30 }
 0x23a   :  { %v2940_v56 = vmax.f32 %v7070_v32, 0.0  ;;  %v2959_v14 = vunpack.c.h.bf16 %v2947_v30 }
 0x23b   :  { %v2985_v37 = vpack.c.bf16 %v2975_v12, %v2974_v57  ;;  %v2921_v58 = vadd.f32 %v2920_v47, %v2897_v29  ;;  %v2875_v5 = vadd.f32 %v2874_v54, %v2851_v34 }
 0x23c   :  { %v2970_v31 = vadd.f32 %v2958_v35, %v2940_v56 }
 0x23d   :  { %2991 = vst [vmem:[%s7169_s3 + $0x8] sm:$0xff] %v2985_v37  ;;  %v2935_v11 = vmax.f32 %v2921_v58, 0.0 }
 0x23e   :  { %v2982_v58 = vmax.f32 %v2970_v31, 0.0 }
 0x23f   :  { %v2965_v63 = vadd.f32 %v2953_v3, %v2935_v11 }
 0x240   :  { %v2898_v41 = vpop.f32.mrf.mxu2  ;;  %v2853_v4 = vpop.f32.mrf.mxu0 }
 0x241   :  { %v2977_v2 = vmax.f32 %v2965_v63, 0.0  ;;  %v2899_v36 = vadd.f32 %v2898_v41, %v2875_v5  ;;  %v2922_v53 = vpop.f32.mrf.mxu3  ;;  %v2854_v61 = vadd.f32 %v2853_v4, %v2830_v40  ;;  %v2877_v33 = vpop.f32.mrf.mxu1 }
 0x243   :  { %v2986_v17 = vpack.c.bf16 %v2977_v2, %v2976_v43  ;;  %v2923_v1 = vadd.f32 %v2922_v53, %v2899_v36  ;;  %v2878_v18 = vadd.f32 %v2877_v33, %v2854_v61 }
 0x245   :  { %2992 = vst [vmem:[%s7169_s3 + $0x10] sm:$0xff] %v2986_v17  ;;  %v2937_v52 = vmax.f32 %v2923_v1, 0.0 }
 0x247   :  { %v2967_v28 = vadd.f32 %v2955_v6, %v2937_v52 }
 0x248   :  { %v2901_v38 = vpop.f32.mrf.mxu2  ;;  %v2855_v39 = vpop.f32.mrf.mxu0 }
 0x249   :  { %v2979_v25 = vmax.f32 %v2967_v28, 0.0  ;;  %v2902_v62 = vadd.f32 %v2901_v38, %v2878_v18  ;;  %v2925_v21 = vpop.f32.mrf.mxu3  ;;  %v2856_v26 = vadd.f32 %v2855_v39, %v2832_v60  ;;  %v2879_v51 = vpop.f32.mrf.mxu1 }
 0x24b   :  { %v2987_v44 = vpack.c.bf16 %v2979_v25, %v2978_v45  ;;  %v2926_v22 = vadd.f32 %v2925_v21, %v2902_v62  ;;  %v2880_v8 = vadd.f32 %v2879_v51, %v2856_v26 }
 0x24d   :  { %2993 = vst [vmem:[%s7169_s3 + $0x18] sm:$0xff] %v2987_v44  ;;  %v2939_v42 = vmax.f32 %v2926_v22, 0.0 }
 0x24f   :  { %v2969_v9 = vadd.f32 %v2957_v50, %v2939_v42 }
 0x250   :  { %v2903_v57 = vpop.f32.mrf.mxu2 }
 0x251   :  { %v2981_v19 = vmax.f32 %v2969_v9, 0.0  ;;  %v2904_v0 = vadd.f32 %v2903_v57, %v2880_v8  ;;  %v2927_v12 = vpop.f32.mrf.mxu3 }
 0x253   :  { %v2988_v29 = vpack.c.bf16 %v2981_v19, %v2980_v27  ;;  %v2928_v47 = vadd.f32 %v2927_v12, %v2904_v0 }
 0x255   :  { %2994 = vst [vmem:[%s7169_s3 + $0x20] sm:$0xff] %v2988_v29  ;;  %v2941_v54 = vmax.f32 %v2928_v47, 0.0 }
 0x257   :  { %v2971_v37 = vadd.f32 %v2959_v14, %v2941_v54 }
 0x259   :  { %v2983_v3 = vmax.f32 %v2971_v37, 0.0 }
 0x25b   :  { %v2989_v34 = vpack.c.bf16 %v2983_v3, %v2982_v58 }
 0x25d   :  { %2995 = vst [vmem:[%s7169_s3 + $0x28] sm:$0xff] %v2989_v34 }

</bundles_post_ra>
